<compile_context>
chip_gen: v6e
topology: v6e:2x2x1
jax: 0.10.0
libtpu: 0.0.40
codegen_flags: <defaults>
</compile_context>

<pallas_src>
import functools

import jax
import jax.numpy as jnp
from jax.experimental import pallas as pl
from jax.experimental.pallas import tpu as pltpu

EPS = 1e-5


# ----------------------------- Pallas kernels ------------------------------

def _fc_kernel(m_true, z_ref, w1_ref, b1_ref, g1_ref, be1_ref,
               w2_ref, b2_ref, g2_ref, be2_ref, o_ref):
    """Fused fc1 -> BN1 -> ReLU -> fc2(tile) -> BN2(tile) -> ReLU.

    Batch rows >= m_true are padding; they are excluded from BN statistics
    (static row slice) and discarded by the caller.
    """
    inv_m = 1.0 / float(m_true)

    # fc1 (+BN1+ReLU) is tiny and recomputed per fc2 tile (keeps one launch).
    h1 = jnp.dot(z_ref[...], w1_ref[...], preferred_element_type=jnp.float32)
    h1 = h1 + b1_ref[...]
    h1v = h1[:m_true]                                   # true batch rows only
    mean1 = jnp.sum(h1v, axis=0, keepdims=True) * inv_m
    var1 = jnp.maximum(
        jnp.sum(h1v * h1v, axis=0, keepdims=True) * inv_m - mean1 * mean1, 0.0)
    scale1 = jax.lax.rsqrt(var1 + EPS) * g1_ref[...]
    a1 = jnp.maximum(h1 * scale1 + (be1_ref[...] - mean1 * scale1), 0.0)

    h2 = jnp.dot(a1.astype(jnp.bfloat16), w2_ref[...],
                 preferred_element_type=jnp.float32)
    h2 = h2 + b2_ref[...]
    h2v = h2[:m_true]
    mean2 = jnp.sum(h2v, axis=0, keepdims=True) * inv_m
    var2 = jnp.maximum(
        jnp.sum(h2v * h2v, axis=0, keepdims=True) * inv_m - mean2 * mean2, 0.0)
    scale2 = jax.lax.rsqrt(var2 + EPS) * g2_ref[...]
    a2 = jnp.maximum(h2 * scale2 + (be2_ref[...] - mean2 * scale2), 0.0)
    o_ref[...] = a2.astype(o_ref.dtype)


def _deconv1_kernel(cols_ref, w_ref, b_ref, g_ref, be_ref, o_ref):
    """4 stride-phase 2x2 convs (matmuls) + bias + BN2d(batch stats) + ReLU.

    cols_ref: (4, R, 4*Cin) bf16, w_ref: (4, 4*Cin, Cout) bf16, R = N*7*7.
    BN statistics are taken over all 4 phases x R rows (= N*14*14 positions).
    """
    r = cols_ref.shape[1]
    inv_cnt = 1.0 / float(4 * r)

    accs = []
    for ph in range(4):
        acc = jnp.dot(cols_ref[ph], w_ref[ph],
                      preferred_element_type=jnp.float32)
        accs.append(acc + b_ref[...])

    tot = accs[0] + accs[1] + accs[2] + accs[3]
    tot2 = (accs[0] * accs[0] + accs[1] * accs[1]
            + accs[2] * accs[2] + accs[3] * accs[3])
    mean = jnp.sum(tot, axis=0, keepdims=True) * inv_cnt
    var = jnp.maximum(
        jnp.sum(tot2, axis=0, keepdims=True) * inv_cnt - mean * mean, 0.0)
    scale = jax.lax.rsqrt(var + EPS) * g_ref[...]
    shift = be_ref[...] - mean * scale
    for ph in range(4):
        o_ref[ph] = jnp.maximum(accs[ph] * scale + shift, 0.0).astype(o_ref.dtype)


def _deconv2_kernel(w_ref, p_ref, b_ref, o_ref):
    """Final deconv as one transposed matmul + bias + sigmoid.

    w_ref: (4, 16*Cin) bf16 block-diagonal phase weights,
    p_ref: (16*Cin, N*14*14) bf16 transposed patches -> lane-dense (4, N*196).
    """
    out = jnp.dot(w_ref[...], p_ref[...], preferred_element_type=jnp.float32)
    o_ref[...] = jax.nn.sigmoid(out + b_ref[...])


# --------------------------- pallas_call wrappers ---------------------------

def fc_block(z_p, params, m_true, tile_n=896):
    mp = z_p.shape[0]
    n_out = params["fc2_w"].shape[1]
    assert n_out % tile_n == 0
    kernel = functools.partial(_fc_kernel, m_true)
    return pl.pallas_call(
        kernel,
        out_shape=jax.ShapeDtypeStruct((mp, n_out), jnp.bfloat16),
        grid=(n_out // tile_n,),
        in_specs=[
            pl.BlockSpec((mp, 64), lambda j: (0, 0)),
            pl.BlockSpec((64, 1024), lambda j: (0, 0)),
            pl.BlockSpec((1, 1024), lambda j: (0, 0)),
            pl.BlockSpec((1, 1024), lambda j: (0, 0)),
            pl.BlockSpec((1, 1024), lambda j: (0, 0)),
            pl.BlockSpec((1024, tile_n), lambda j: (0, j)),
            pl.BlockSpec((1, tile_n), lambda j: (0, j)),
            pl.BlockSpec((1, tile_n), lambda j: (0, j)),
            pl.BlockSpec((1, tile_n), lambda j: (0, j)),
        ],
        out_specs=pl.BlockSpec((mp, tile_n), lambda j: (0, j)),
        compiler_params=pltpu.CompilerParams(
            dimension_semantics=("parallel",)),   # independent column tiles
    )(z_p, params["fc1_w"], params["fc1_b"], params["bn1_g"], params["bn1_b"],
      params["fc2_w"], params["fc2_b"], params["bn2_g"], params["bn2_b"])


def deconv1_block(cols, w, b, g, be):
    p, r, k = cols.shape
    cout = w.shape[-1]
    return pl.pallas_call(
        _deconv1_kernel,
        out_shape=jax.ShapeDtypeStruct((p, r, cout), jnp.bfloat16),
        grid=(1,),
        in_specs=[
            pl.BlockSpec((p, r, k), lambda i: (0, 0, 0)),
            pl.BlockSpec((p, k, cout), lambda i: (0, 0, 0)),
            pl.BlockSpec((1, cout), lambda i: (0, 0)),
            pl.BlockSpec((1, cout), lambda i: (0, 0)),
            pl.BlockSpec((1, cout), lambda i: (0, 0)),
        ],
        out_specs=pl.BlockSpec((p, r, cout), lambda i: (0, 0, 0)),
        compiler_params=pltpu.CompilerParams(
            dimension_semantics=("arbitrary",)),
    )(cols, w, b, g, be)


def deconv2_block(w, patches, b):
    k, r2 = patches.shape
    return pl.pallas_call(
        _deconv2_kernel,
        out_shape=jax.ShapeDtypeStruct((4, r2), jnp.float32),
        grid=(1,),
        in_specs=[
            pl.BlockSpec((4, k), lambda i: (0, 0)),
            pl.BlockSpec((k, r2), lambda i: (0, 0)),
            pl.BlockSpec((1, 1), lambda i: (0, 0)),
        ],
        out_specs=pl.BlockSpec((4, r2), lambda i: (0, 0)),
        compiler_params=pltpu.CompilerParams(
            dimension_semantics=("arbitrary",)),
    )(w, patches, b)


# ------------------------ layout / parameter helpers ------------------------
# ConvTranspose2d(k=4, s=2, p=1): output (2p+rh, 2q+rw) uses input (p+a-1, q+b-1)
# with a in {rh, rh+1}, b in {rw, rw+1}, and kernel tap
# (kh, kw) = (3-rh-2*da, 3-rw-2*db) where da=a-rh, db=b-rw (zero padding of 1).

def _phase_patches(xp, hw):
    """xp: (n, hw+2, hw+2, c) padded NHWC -> (4, n*hw*hw, 4*c) per-phase patches."""
    n, _, _, c = xp.shape
    phases = []
    for rh in (0, 1):
        for rw in (0, 1):
            taps = []
            for da in (0, 1):
                for db in (0, 1):
                    a, b = rh + da, rw + db
                    v = xp[:, a:a + hw, b:b + hw, :]
                    taps.append(v.reshape(n * hw * hw, c))
            phases.append(jnp.concatenate(taps, axis=-1))
    return jnp.stack(phases, axis=0)


def _phase_patches_t(xp, hw):
    """xp: (n, hw+2, hw+2, c) -> (16*c, n*hw*hw) transposed stacked patches."""
    n, _, _, c = xp.shape
    rows = []
    for rh in (0, 1):
        for rw in (0, 1):
            for da in (0, 1):
                for db in (0, 1):
                    a, b = rh + da, rw + db
                    v = xp[:, a:a + hw, b:b + hw, :]
                    rows.append(jnp.transpose(v, (3, 0, 1, 2)).reshape(c, n * hw * hw))
    return jnp.concatenate(rows, axis=0)


def _dc1_phase_weight(wt):
    """PyTorch ConvT weight (Cin, Cout, 4, 4) -> (4, 4*Cin, Cout) phase weights."""
    blocks = []
    for rh in (0, 1):
        for rw in (0, 1):
            taps = []
            for da in (0, 1):
                for db in (0, 1):
                    kh = 3 - rh - 2 * da
                    kw = 3 - rw - 2 * db
                    taps.append(wt[:, :, kh, kw])
            blocks.append(jnp.concatenate(taps, axis=0))
    return jnp.stack(blocks, axis=0)


def _dc2_phase_weight(wt):
    """PyTorch ConvT weight (Cin, 1, 4, 4) -> (4, 16*Cin) block-diagonal weights."""
    cin = wt.shape[0]
    w = jnp.zeros((4, 16 * cin), wt.dtype)
    for rh in (0, 1):
        for rw in (0, 1):
            ph = rh * 2 + rw
            segs = []
            for da in (0, 1):
                for db in (0, 1):
                    kh = 3 - rh - 2 * da
                    kw = 3 - rw - 2 * db
                    segs.append(wt[:, 0, kh, kw])
            w = w.at[ph, ph * 4 * cin:(ph + 1) * 4 * cin].set(
                jnp.concatenate(segs, axis=0))
    return w


def init_params(key):
    """Synthetic init matching pt_gan.utils.initialize_weights
    (weights ~ N(0, 0.02), biases = 0, BN gamma ~ N(1, 0.02), BN beta = 0)."""
    ks = jax.random.split(key, 7)
    std = 0.02
    f32, bf16 = jnp.float32, jnp.bfloat16
    p = {}
    # fc1: Linear(62, 1024); latent padded 62 -> 64 with zero weight rows.
    p["fc1_w"] = jnp.pad(std * jax.random.normal(ks[0], (62, 1024), f32),
                         ((0, 2), (0, 0))).astype(bf16)
    p["fc1_b"] = jnp.zeros((1, 1024), f32)
    p["bn1_g"] = 1.0 + std * jax.random.normal(ks[1], (1, 1024), f32)
    p["bn1_b"] = jnp.zeros((1, 1024), f32)
    # fc2: Linear(1024, 6272); columns permuted from PyTorch (c,h,w) to (h,w,c)
    # so the later view(-1,128,7,7)->NHWC reshape is layout-free.
    perm = lambda t: t.reshape(t.shape[0], 128, 7, 7).transpose(0, 2, 3, 1)\
                      .reshape(t.shape[0], 6272)
    p["fc2_w"] = perm(std * jax.random.normal(ks[2], (1024, 6272), f32)).astype(bf16)
    p["fc2_b"] = jnp.zeros((1, 6272), f32)
    p["bn2_g"] = perm(1.0 + std * jax.random.normal(ks[3], (1, 6272), f32))
    p["bn2_b"] = jnp.zeros((1, 6272), f32)
    # deconv1: ConvTranspose2d(128, 64, 4, 2, 1)
    wt1 = std * jax.random.normal(ks[4], (128, 64, 4, 4), f32)
    p["dc1_w"] = _dc1_phase_weight(wt1).astype(bf16)          # (4, 512, 64)
    p["dc1_b"] = jnp.zeros((1, 64), f32)
    p["bn3_g"] = 1.0 + std * jax.random.normal(ks[5], (1, 64), f32)
    p["bn3_b"] = jnp.zeros((1, 64), f32)
    # deconv2: ConvTranspose2d(64, 1, 4, 2, 1)
    wt2 = std * jax.random.normal(ks[6], (64, 1, 4, 4), f32)
    p["dc2_w"] = _dc2_phase_weight(wt2).astype(bf16)          # (4, 1024)
    p["dc2_b"] = jnp.zeros((1, 1), f32)
    return p


# --------------------------------- forward ----------------------------------

@jax.jit
def generator_forward(z, params):
    n = z.shape[0]
    mp = ((n + 7) // 8) * 8                              # sublane-pad the batch
    z_p = jnp.pad(z.astype(jnp.bfloat16),
                  ((0, mp - n), (0, 64 - z.shape[1])))   # 62 -> 64 lanes
    # fc1 -> BN1 -> ReLU -> fc2 -> BN2 -> ReLU (single fused, tiled kernel)
    h2 = fc_block(z_p, params, m_true=n)                 # (mp, 6272) bf16
    # view(-1,128,7,7) in NHWC (columns already permuted to (h,w,c))
    x = h2[:n].reshape(n, 7, 7, 128)
    xp = jnp.pad(x, ((0, 0), (1, 1), (1, 1), (0, 0)))    # (n, 9, 9, 128)
    # ConvTranspose2d(128,64,4,2,1) + BN2d + ReLU  (4 stride phases)
    cols1 = _phase_patches(xp, 7)                        # (4, n*49, 512) bf16
    y1 = deconv1_block(cols1, params["dc1_w"], params["dc1_b"],
                       params["bn3_g"], params["bn3_b"])  # (4, n*49, 64) bf16
    y1n = y1.reshape(2, 2, n, 7, 7, 64).transpose(2, 3, 0, 4, 1, 5)\
            .reshape(n, 14, 14, 64)
    y1p = jnp.pad(y1n, ((0, 0), (1, 1), (1, 1), (0, 0)))  # (n, 16, 16, 64)
    # ConvTranspose2d(64,1,4,2,1) + Sigmoid  (transposed, lane-dense output)
    p2 = _phase_patches_t(y1p, 14)                       # (1024, n*196) bf16
    o2 = deconv2_block(params["dc2_w"], p2, params["dc2_b"])  # (4, n*196) f32
    img = o2.reshape(2, 2, n, 14, 14).transpose(2, 3, 0, 4, 1).reshape(n, 28, 28)
    return img[:, None, :, :]                            # NCHW (n, 1, 28, 28)


if __name__ == "__main__":
    key = jax.random.PRNGKey(0)
    pkey, zkey = jax.random.split(key)
    params = init_params(pkey)
    z = jax.random.normal(zkey, (2, 62), jnp.float32)    # batch=2, latent=62
    out = generator_forward(z, params)
    out = jax.block_until_ready(out)
    assert out.shape == (2, 1, 28, 28), out.shape
    assert bool(jnp.all(jnp.isfinite(out)))
    assert bool(jnp.all((out >= 0.0) & (out <= 1.0)))    # sigmoid range
    print("KERNEL_OK")
</pallas_src>

<mosaic_0001>
module attributes {stable_mosaic.version = 11 : i64} {
  func.func @_fc_kernel(%arg0: i32, %arg1: memref<8x64xbf16, #tpu.memory_space<vmem>>, %arg2: memref<64x1024xbf16, #tpu.memory_space<vmem>>, %arg3: memref<1x1024xf32, #tpu.memory_space<vmem>>, %arg4: memref<1x1024xf32, #tpu.memory_space<vmem>>, %arg5: memref<1x1024xf32, #tpu.memory_space<vmem>>, %arg6: memref<1024x896xbf16, #tpu.memory_space<vmem>>, %arg7: memref<1x896xf32, #tpu.memory_space<vmem>>, %arg8: memref<1x896xf32, #tpu.memory_space<vmem>>, %arg9: memref<1x896xf32, #tpu.memory_space<vmem>>, %arg10: memref<8x896xbf16, #tpu.memory_space<vmem>>) attributes {dimension_semantics = [#tpu.dimension_semantics<parallel>], iteration_bounds = array<i64: 7>, scalar_prefetch = 0 : i64, scratch_operands = 0 : i64, tpu.core_type = #tpu.core_type<tc>, window_params = [{pipeline_mode = #tpu.pipeline_mode<synchronous>, transform_indices = @transform_0, window_bounds = array<i64: 8, 64>}, {pipeline_mode = #tpu.pipeline_mode<synchronous>, transform_indices = @transform_1, window_bounds = array<i64: 64, 1024>}, {pipeline_mode = #tpu.pipeline_mode<synchronous>, transform_indices = @transform_2, window_bounds = array<i64: 1, 1024>}, {pipeline_mode = #tpu.pipeline_mode<synchronous>, transform_indices = @transform_3, window_bounds = array<i64: 1, 1024>}, {pipeline_mode = #tpu.pipeline_mode<synchronous>, transform_indices = @transform_4, window_bounds = array<i64: 1, 1024>}, {transform_indices = @transform_5, window_bounds = array<i64: 1024, 896>}, {transform_indices = @transform_6, window_bounds = array<i64: 1, 896>}, {transform_indices = @transform_7, window_bounds = array<i64: 1, 896>}, {transform_indices = @transform_8, window_bounds = array<i64: 1, 896>}, {transform_indices = @transform_9, window_bounds = array<i64: 8, 896>}]} {
    %c0 = arith.constant 0 : index
    %c0_0 = arith.constant 0 : index
    %0 = vector.load %arg1[%c0, %c0_0] : memref<8x64xbf16, #tpu.memory_space<vmem>>, vector<8x64xbf16>
    %c0_1 = arith.constant 0 : index
    %c0_2 = arith.constant 0 : index
    %1 = vector.load %arg2[%c0_1, %c0_2] : memref<64x1024xbf16, #tpu.memory_space<vmem>>, vector<64x1024xbf16>
    %cst = arith.constant dense<0.000000e+00> : vector<8x1024xf32>
    %2 = tpu.matmul %0, %1, %cst {dimension_numbers = #tpu.dot_dimension_numbers<[1], [0], [0], [1], [0, 0, 1, 1], [], []>} : vector<8x64xbf16>, vector<64x1024xbf16>, vector<8x1024xf32> -> vector<8x1024xf32>
    %c0_3 = arith.constant 0 : index
    %c0_4 = arith.constant 0 : index
    %3 = vector.load %arg3[%c0_3, %c0_4] : memref<1x1024xf32, #tpu.memory_space<vmem>>, vector<1x1024xf32>
    %4 = vector.broadcast %3 : vector<1x1024xf32> to vector<8x1024xf32>
    %5 = arith.addf %2, %4 : vector<8x1024xf32>
    %6 = vector.extract_strided_slice %5 {offsets = [0, 0], sizes = [2, 1024], strides = [1, 1]} : vector<8x1024xf32> to vector<2x1024xf32>
    %cst_5 = arith.constant dense<0.000000e+00> : vector<1024xf32>
    %7 = vector.multi_reduction <add>, %6, %cst_5 [0] : vector<2x1024xf32> to vector<1024xf32>
    %8 = vector.shape_cast %7 : vector<1024xf32> to vector<1x1024xf32>
    %cst_6 = arith.constant 5.000000e-01 : f32
    %9 = vector.broadcast %cst_6 : f32 to vector<1x1024xf32>
    %10 = arith.mulf %8, %9 : vector<1x1024xf32>
    %11 = arith.mulf %6, %6 : vector<2x1024xf32>
    %cst_7 = arith.constant dense<0.000000e+00> : vector<1024xf32>
    %12 = vector.multi_reduction <add>, %11, %cst_7 [0] : vector<2x1024xf32> to vector<1024xf32>
    %13 = vector.shape_cast %12 : vector<1024xf32> to vector<1x1024xf32>
    %cst_8 = arith.constant 5.000000e-01 : f32
    %14 = vector.broadcast %cst_8 : f32 to vector<1x1024xf32>
    %15 = arith.mulf %13, %14 : vector<1x1024xf32>
    %16 = arith.mulf %10, %10 : vector<1x1024xf32>
    %17 = arith.subf %15, %16 : vector<1x1024xf32>
    %cst_9 = arith.constant 0.000000e+00 : f32
    %18 = vector.broadcast %cst_9 : f32 to vector<1x1024xf32>
    %19 = arith.maximumf %17, %18 : vector<1x1024xf32>
    %cst_10 = arith.constant 9.99999974E-6 : f32
    %20 = vector.broadcast %cst_10 : f32 to vector<1x1024xf32>
    %21 = arith.addf %19, %20 : vector<1x1024xf32>
    %22 = math.rsqrt %21 : vector<1x1024xf32>
    %c0_11 = arith.constant 0 : index
    %c0_12 = arith.constant 0 : index
    %23 = vector.load %arg4[%c0_11, %c0_12] : memref<1x1024xf32, #tpu.memory_space<vmem>>, vector<1x1024xf32>
    %24 = arith.mulf %22, %23 : vector<1x1024xf32>
    %25 = vector.broadcast %24 : vector<1x1024xf32> to vector<8x1024xf32>
    %26 = arith.mulf %5, %25 : vector<8x1024xf32>
    %c0_13 = arith.constant 0 : index
    %c0_14 = arith.constant 0 : index
    %27 = vector.load %arg5[%c0_13, %c0_14] : memref<1x1024xf32, #tpu.memory_space<vmem>>, vector<1x1024xf32>
    %28 = arith.mulf %10, %24 : vector<1x1024xf32>
    %29 = arith.subf %27, %28 : vector<1x1024xf32>
    %30 = vector.broadcast %29 : vector<1x1024xf32> to vector<8x1024xf32>
    %31 = arith.addf %26, %30 : vector<8x1024xf32>
    %cst_15 = arith.constant 0.000000e+00 : f32
    %32 = vector.broadcast %cst_15 : f32 to vector<8x1024xf32>
    %33 = arith.maximumf %31, %32 : vector<8x1024xf32>
    %34 = arith.truncf %33 : vector<8x1024xf32> to vector<8x1024xbf16>
    %c0_16 = arith.constant 0 : index
    %c0_17 = arith.constant 0 : index
    %35 = vector.load %arg6[%c0_16, %c0_17] : memref<1024x896xbf16, #tpu.memory_space<vmem>>, vector<1024x896xbf16>
    %cst_18 = arith.constant dense<0.000000e+00> : vector<8x896xf32>
    %36 = tpu.matmul %34, %35, %cst_18 {dimension_numbers = #tpu.dot_dimension_numbers<[1], [0], [0], [1], [0, 0, 1, 1], [], []>} : vector<8x1024xbf16>, vector<1024x896xbf16>, vector<8x896xf32> -> vector<8x896xf32>
    %c0_19 = arith.constant 0 : index
    %c0_20 = arith.constant 0 : index
    %37 = vector.load %arg7[%c0_19, %c0_20] : memref<1x896xf32, #tpu.memory_space<vmem>>, vector<1x896xf32>
    %38 = vector.broadcast %37 : vector<1x896xf32> to vector<8x896xf32>
    %39 = arith.addf %36, %38 : vector<8x896xf32>
    %40 = vector.extract_strided_slice %39 {offsets = [0, 0], sizes = [2, 896], strides = [1, 1]} : vector<8x896xf32> to vector<2x896xf32>
    %cst_21 = arith.constant dense<0.000000e+00> : vector<896xf32>
    %41 = vector.multi_reduction <add>, %40, %cst_21 [0] : vector<2x896xf32> to vector<896xf32>
    %42 = vector.shape_cast %41 : vector<896xf32> to vector<1x896xf32>
    %cst_22 = arith.constant 5.000000e-01 : f32
    %43 = vector.broadcast %cst_22 : f32 to vector<1x896xf32>
    %44 = arith.mulf %42, %43 : vector<1x896xf32>
    %45 = arith.mulf %40, %40 : vector<2x896xf32>
    %cst_23 = arith.constant dense<0.000000e+00> : vector<896xf32>
    %46 = vector.multi_reduction <add>, %45, %cst_23 [0] : vector<2x896xf32> to vector<896xf32>
    %47 = vector.shape_cast %46 : vector<896xf32> to vector<1x896xf32>
    %cst_24 = arith.constant 5.000000e-01 : f32
    %48 = vector.broadcast %cst_24 : f32 to vector<1x896xf32>
    %49 = arith.mulf %47, %48 : vector<1x896xf32>
    %50 = arith.mulf %44, %44 : vector<1x896xf32>
    %51 = arith.subf %49, %50 : vector<1x896xf32>
    %cst_25 = arith.constant 0.000000e+00 : f32
    %52 = vector.broadcast %cst_25 : f32 to vector<1x896xf32>
    %53 = arith.maximumf %51, %52 : vector<1x896xf32>
    %cst_26 = arith.constant 9.99999974E-6 : f32
    %54 = vector.broadcast %cst_26 : f32 to vector<1x896xf32>
    %55 = arith.addf %53, %54 : vector<1x896xf32>
    %56 = math.rsqrt %55 : vector<1x896xf32>
    %c0_27 = arith.constant 0 : index
    %c0_28 = arith.constant 0 : index
    %57 = vector.load %arg8[%c0_27, %c0_28] : memref<1x896xf32, #tpu.memory_space<vmem>>, vector<1x896xf32>
    %58 = arith.mulf %56, %57 : vector<1x896xf32>
    %59 = vector.broadcast %58 : vector<1x896xf32> to vector<8x896xf32>
    %60 = arith.mulf %39, %59 : vector<8x896xf32>
    %c0_29 = arith.constant 0 : index
    %c0_30 = arith.constant 0 : index
    %61 = vector.load %arg9[%c0_29, %c0_30] : memref<1x896xf32, #tpu.memory_space<vmem>>, vector<1x896xf32>
    %62 = arith.mulf %44, %58 : vector<1x896xf32>
    %63 = arith.subf %61, %62 : vector<1x896xf32>
    %64 = vector.broadcast %63 : vector<1x896xf32> to vector<8x896xf32>
    %65 = arith.addf %60, %64 : vector<8x896xf32>
    %cst_31 = arith.constant 0.000000e+00 : f32
    %66 = vector.broadcast %cst_31 : f32 to vector<8x896xf32>
    %67 = arith.maximumf %65, %66 : vector<8x896xf32>
    %68 = arith.truncf %67 : vector<8x896xf32> to vector<8x896xbf16>
    %c0_32 = arith.constant 0 : index
    %c0_33 = arith.constant 0 : index
    %69 = vector.load %arg10[%c0_32, %c0_33] : memref<8x896xbf16, #tpu.memory_space<vmem>>, vector<8x896xbf16>
    tpu.vector_store %arg10[%c0_32, %c0_33], %68 {strides = array<i32>} : memref<8x896xbf16, #tpu.memory_space<vmem>>, vector<8x896xbf16>,
    return
  }
  func.func @transform_0(%arg0: i32) -> (i32, i32) {
    %c0_i32 = arith.constant 0 : i32
    %c0_i32_0 = arith.constant 0 : i32
    %c0_i32_1 = arith.constant 0 : i32
    return %c0_i32, %c0_i32_0 : i32, i32
  }
  func.func @transform_1(%arg0: i32) -> (i32, i32) {
    %c0_i32 = arith.constant 0 : i32
    %c0_i32_0 = arith.constant 0 : i32
    %c0_i32_1 = arith.constant 0 : i32
    return %c0_i32, %c0_i32_0 : i32, i32
  }
  func.func @transform_2(%arg0: i32) -> (i32, i32) {
    %c0_i32 = arith.constant 0 : i32
    %c0_i32_0 = arith.constant 0 : i32
    %c0_i32_1 = arith.constant 0 : i32
    return %c0_i32, %c0_i32_0 : i32, i32
  }
  func.func @transform_3(%arg0: i32) -> (i32, i32) {
    %c0_i32 = arith.constant 0 : i32
    %c0_i32_0 = arith.constant 0 : i32
    %c0_i32_1 = arith.constant 0 : i32
    return %c0_i32, %c0_i32_0 : i32, i32
  }
  func.func @transform_4(%arg0: i32) -> (i32, i32) {
    %c0_i32 = arith.constant 0 : i32
    %c0_i32_0 = arith.constant 0 : i32
    %c0_i32_1 = arith.constant 0 : i32
    return %c0_i32, %c0_i32_0 : i32, i32
  }
  func.func @transform_5(%arg0: i32) -> (i32, i32) {
    %c0_i32 = arith.constant 0 : i32
    %c0_i32_0 = arith.constant 0 : i32
    return %c0_i32, %arg0 : i32, i32
  }
  func.func @transform_6(%arg0: i32) -> (i32, i32) {
    %c0_i32 = arith.constant 0 : i32
    %c0_i32_0 = arith.constant 0 : i32
    return %c0_i32, %arg0 : i32, i32
  }
  func.func @transform_7(%arg0: i32) -> (i32, i32) {
    %c0_i32 = arith.constant 0 : i32
    %c0_i32_0 = arith.constant 0 : i32
    return %c0_i32, %arg0 : i32, i32
  }
  func.func @transform_8(%arg0: i32) -> (i32, i32) {
    %c0_i32 = arith.constant 0 : i32
    %c0_i32_0 = arith.constant 0 : i32
    return %c0_i32, %arg0 : i32, i32
  }
  func.func @transform_9(%arg0: i32) -> (i32, i32) {
    %c0_i32 = arith.constant 0 : i32
    %c0_i32_0 = arith.constant 0 : i32
    return %c0_i32, %arg0 : i32, i32
  }
}

module attributes {stable_mosaic.version = 11 : i64} {
  func.func @_deconv1_kernel(%arg0: i32, %arg1: memref<4x98x512xbf16, #tpu.memory_space<vmem>>, %arg2: memref<4x512x64xbf16, #tpu.memory_space<vmem>>, %arg3: memref<1x64xf32, #tpu.memory_space<vmem>>, %arg4: memref<1x64xf32, #tpu.memory_space<vmem>>, %arg5: memref<1x64xf32, #tpu.memory_space<vmem>>, %arg6: memref<4x98x64xbf16, #tpu.memory_space<vmem>>) attributes {dimension_semantics = [#tpu.dimension_semantics<arbitrary>], iteration_bounds = array<i64: 1>, scalar_prefetch = 0 : i64, scratch_operands = 0 : i64, tpu.core_type = #tpu.core_type<tc>, window_params = [{pipeline_mode = #tpu.pipeline_mode<synchronous>, transform_indices = @transform_0, window_bounds = array<i64: 4, 98, 512>}, {pipeline_mode = #tpu.pipeline_mode<synchronous>, transform_indices = @transform_1, window_bounds = array<i64: 4, 512, 64>}, {pipeline_mode = #tpu.pipeline_mode<synchronous>, transform_indices = @transform_2, window_bounds = array<i64: 1, 64>}, {pipeline_mode = #tpu.pipeline_mode<synchronous>, transform_indices = @transform_3, window_bounds = array<i64: 1, 64>}, {pipeline_mode = #tpu.pipeline_mode<synchronous>, transform_indices = @transform_4, window_bounds = array<i64: 1, 64>}, {pipeline_mode = #tpu.pipeline_mode<synchronous>, transform_indices = @transform_5, window_bounds = array<i64: 4, 98, 64>}]} {
    %c0 = arith.constant 0 : index
    %c0_0 = arith.constant 0 : index
    %c0_1 = arith.constant 0 : index
    %0 = vector.load %arg1[%c0, %c0_0, %c0_1] : memref<4x98x512xbf16, #tpu.memory_space<vmem>>, vector<1x98x512xbf16>
    %1 = vector.shape_cast %0 : vector<1x98x512xbf16> to vector<98x512xbf16>
    %c0_2 = arith.constant 0 : index
    %c0_3 = arith.constant 0 : index
    %c0_4 = arith.constant 0 : index
    %2 = vector.load %arg2[%c0_2, %c0_3, %c0_4] : memref<4x512x64xbf16, #tpu.memory_space<vmem>>, vector<1x512x64xbf16>
    %3 = vector.shape_cast %2 : vector<1x512x64xbf16> to vector<512x64xbf16>
    %cst = arith.constant dense<0.000000e+00> : vector<98x64xf32>
    %4 = tpu.matmul %1, %3, %cst {dimension_numbers = #tpu.dot_dimension_numbers<[1], [0], [0], [1], [0, 0, 1, 1], [], []>} : vector<98x512xbf16>, vector<512x64xbf16>, vector<98x64xf32> -> vector<98x64xf32>
    %c0_5 = arith.constant 0 : index
    %c0_6 = arith.constant 0 : index
    %5 = vector.load %arg3[%c0_5, %c0_6] : memref<1x64xf32, #tpu.memory_space<vmem>>, vector<1x64xf32>
    %6 = vector.broadcast %5 : vector<1x64xf32> to vector<98x64xf32>
    %7 = arith.addf %4, %6 : vector<98x64xf32>
    %c1 = arith.constant 1 : index
    %c0_7 = arith.constant 0 : index
    %c0_8 = arith.constant 0 : index
    %8 = vector.load %arg1[%c1, %c0_7, %c0_8] : memref<4x98x512xbf16, #tpu.memory_space<vmem>>, vector<1x98x512xbf16>
    %9 = vector.shape_cast %8 : vector<1x98x512xbf16> to vector<98x512xbf16>
    %c1_9 = arith.constant 1 : index
    %c0_10 = arith.constant 0 : index
    %c0_11 = arith.constant 0 : index
    %10 = vector.load %arg2[%c1_9, %c0_10, %c0_11] : memref<4x512x64xbf16, #tpu.memory_space<vmem>>, vector<1x512x64xbf16>
    %11 = vector.shape_cast %10 : vector<1x512x64xbf16> to vector<512x64xbf16>
    %cst_12 = arith.constant dense<0.000000e+00> : vector<98x64xf32>
    %12 = tpu.matmul %9, %11, %cst_12 {dimension_numbers = #tpu.dot_dimension_numbers<[1], [0], [0], [1], [0, 0, 1, 1], [], []>} : vector<98x512xbf16>, vector<512x64xbf16>, vector<98x64xf32> -> vector<98x64xf32>
    %c0_13 = arith.constant 0 : index
    %c0_14 = arith.constant 0 : index
    %13 = vector.load %arg3[%c0_13, %c0_14] : memref<1x64xf32, #tpu.memory_space<vmem>>, vector<1x64xf32>
    %14 = vector.broadcast %13 : vector<1x64xf32> to vector<98x64xf32>
    %15 = arith.addf %12, %14 : vector<98x64xf32>
    %c2 = arith.constant 2 : index
    %c0_15 = arith.constant 0 : index
    %c0_16 = arith.constant 0 : index
    %16 = vector.load %arg1[%c2, %c0_15, %c0_16] : memref<4x98x512xbf16, #tpu.memory_space<vmem>>, vector<1x98x512xbf16>
    %17 = vector.shape_cast %16 : vector<1x98x512xbf16> to vector<98x512xbf16>
    %c2_17 = arith.constant 2 : index
    %c0_18 = arith.constant 0 : index
    %c0_19 = arith.constant 0 : index
    %18 = vector.load %arg2[%c2_17, %c0_18, %c0_19] : memref<4x512x64xbf16, #tpu.memory_space<vmem>>, vector<1x512x64xbf16>
    %19 = vector.shape_cast %18 : vector<1x512x64xbf16> to vector<512x64xbf16>
    %cst_20 = arith.constant dense<0.000000e+00> : vector<98x64xf32>
    %20 = tpu.matmul %17, %19, %cst_20 {dimension_numbers = #tpu.dot_dimension_numbers<[1], [0], [0], [1], [0, 0, 1, 1], [], []>} : vector<98x512xbf16>, vector<512x64xbf16>, vector<98x64xf32> -> vector<98x64xf32>
    %c0_21 = arith.constant 0 : index
    %c0_22 = arith.constant 0 : index
    %21 = vector.load %arg3[%c0_21, %c0_22] : memref<1x64xf32, #tpu.memory_space<vmem>>, vector<1x64xf32>
    %22 = vector.broadcast %21 : vector<1x64xf32> to vector<98x64xf32>
    %23 = arith.addf %20, %22 : vector<98x64xf32>
    %c3 = arith.constant 3 : index
    %c0_23 = arith.constant 0 : index
    %c0_24 = arith.constant 0 : index
    %24 = vector.load %arg1[%c3, %c0_23, %c0_24] : memref<4x98x512xbf16, #tpu.memory_space<vmem>>, vector<1x98x512xbf16>
    %25 = vector.shape_cast %24 : vector<1x98x512xbf16> to vector<98x512xbf16>
    %c3_25 = arith.constant 3 : index
    %c0_26 = arith.constant 0 : index
    %c0_27 = arith.constant 0 : index
    %26 = vector.load %arg2[%c3_25, %c0_26, %c0_27] : memref<4x512x64xbf16, #tpu.memory_space<vmem>>, vector<1x512x64xbf16>
    %27 = vector.shape_cast %26 : vector<1x512x64xbf16> to vector<512x64xbf16>
    %cst_28 = arith.constant dense<0.000000e+00> : vector<98x64xf32>
    %28 = tpu.matmul %25, %27, %cst_28 {dimension_numbers = #tpu.dot_dimension_numbers<[1], [0], [0], [1], [0, 0, 1, 1], [], []>} : vector<98x512xbf16>, vector<512x64xbf16>, vector<98x64xf32> -> vector<98x64xf32>
    %c0_29 = arith.constant 0 : index
    %c0_30 = arith.constant 0 : index
    %29 = vector.load %arg3[%c0_29, %c0_30] : memref<1x64xf32, #tpu.memory_space<vmem>>, vector<1x64xf32>
    %30 = vector.broadcast %29 : vector<1x64xf32> to vector<98x64xf32>
    %31 = arith.addf %28, %30 : vector<98x64xf32>
    %32 = arith.addf %7, %15 : vector<98x64xf32>
    %33 = arith.addf %32, %23 : vector<98x64xf32>
    %34 = arith.addf %33, %31 : vector<98x64xf32>
    %35 = arith.mulf %7, %7 : vector<98x64xf32>
    %36 = arith.mulf %15, %15 : vector<98x64xf32>
    %37 = arith.addf %35, %36 : vector<98x64xf32>
    %38 = arith.mulf %23, %23 : vector<98x64xf32>
    %39 = arith.addf %37, %38 : vector<98x64xf32>
    %40 = arith.mulf %31, %31 : vector<98x64xf32>
    %41 = arith.addf %39, %40 : vector<98x64xf32>
    %cst_31 = arith.constant dense<0.000000e+00> : vector<64xf32>
    %42 = vector.multi_reduction <add>, %34, %cst_31 [0] : vector<98x64xf32> to vector<64xf32>
    %43 = vector.shape_cast %42 : vector<64xf32> to vector<1x64xf32>
    %cst_32 = arith.constant 0.00255102036 : f32
    %44 = vector.broadcast %cst_32 : f32 to vector<1x64xf32>
    %45 = arith.mulf %43, %44 : vector<1x64xf32>
    %cst_33 = arith.constant dense<0.000000e+00> : vector<64xf32>
    %46 = vector.multi_reduction <add>, %41, %cst_33 [0] : vector<98x64xf32> to vector<64xf32>
    %47 = vector.shape_cast %46 : vector<64xf32> to vector<1x64xf32>
    %cst_34 = arith.constant 0.00255102036 : f32
    %48 = vector.broadcast %cst_34 : f32 to vector<1x64xf32>
    %49 = arith.mulf %47, %48 : vector<1x64xf32>
    %50 = arith.mulf %45, %45 : vector<1x64xf32>
    %51 = arith.subf %49, %50 : vector<1x64xf32>
    %cst_35 = arith.constant 0.000000e+00 : f32
    %52 = vector.broadcast %cst_35 : f32 to vector<1x64xf32>
    %53 = arith.maximumf %51, %52 : vector<1x64xf32>
    %cst_36 = arith.constant 9.99999974E-6 : f32
    %54 = vector.broadcast %cst_36 : f32 to vector<1x64xf32>
    %55 = arith.addf %53, %54 : vector<1x64xf32>
    %56 = math.rsqrt %55 : vector<1x64xf32>
    %c0_37 = arith.constant 0 : index
    %c0_38 = arith.constant 0 : index
    %57 = vector.load %arg4[%c0_37, %c0_38] : memref<1x64xf32, #tpu.memory_space<vmem>>, vector<1x64xf32>
    %58 = arith.mulf %56, %57 : vector<1x64xf32>
    %c0_39 = arith.constant 0 : index
    %c0_40 = arith.constant 0 : index
    %59 = vector.load %arg5[%c0_39, %c0_40] : memref<1x64xf32, #tpu.memory_space<vmem>>, vector<1x64xf32>
    %60 = arith.mulf %45, %58 : vector<1x64xf32>
    %61 = arith.subf %59, %60 : vector<1x64xf32>
    %62 = vector.broadcast %58 : vector<1x64xf32> to vector<98x64xf32>
    %63 = arith.mulf %7, %62 : vector<98x64xf32>
    %64 = vector.broadcast %61 : vector<1x64xf32> to vector<98x64xf32>
    %65 = arith.addf %63, %64 : vector<98x64xf32>
    %cst_41 = arith.constant 0.000000e+00 : f32
    %66 = vector.broadcast %cst_41 : f32 to vector<98x64xf32>
    %67 = arith.maximumf %65, %66 : vector<98x64xf32>
    %68 = arith.truncf %67 : vector<98x64xf32> to vector<98x64xbf16>
    %c0_42 = arith.constant 0 : index
    %c0_43 = arith.constant 0 : index
    %c0_44 = arith.constant 0 : index
    %69 = vector.load %arg6[%c0_42, %c0_43, %c0_44] : memref<4x98x64xbf16, #tpu.memory_space<vmem>>, vector<1x98x64xbf16>
    %70 = vector.shape_cast %69 : vector<1x98x64xbf16> to vector<98x64xbf16>
    %71 = vector.shape_cast %68 : vector<98x64xbf16> to vector<1x98x64xbf16>
    tpu.vector_store %arg6[%c0_42, %c0_43, %c0_44], %71 {strides = array<i32>} : memref<4x98x64xbf16, #tpu.memory_space<vmem>>, vector<1x98x64xbf16>,
    %72 = vector.broadcast %58 : vector<1x64xf32> to vector<98x64xf32>
    %73 = arith.mulf %15, %72 : vector<98x64xf32>
    %74 = vector.broadcast %61 : vector<1x64xf32> to vector<98x64xf32>
    %75 = arith.addf %73, %74 : vector<98x64xf32>
    %cst_45 = arith.constant 0.000000e+00 : f32
    %76 = vector.broadcast %cst_45 : f32 to vector<98x64xf32>
    %77 = arith.maximumf %75, %76 : vector<98x64xf32>
    %78 = arith.truncf %77 : vector<98x64xf32> to vector<98x64xbf16>
    %c1_46 = arith.constant 1 : index
    %c0_47 = arith.constant 0 : index
    %c0_48 = arith.constant 0 : index
    %79 = vector.load %arg6[%c1_46, %c0_47, %c0_48] : memref<4x98x64xbf16, #tpu.memory_space<vmem>>, vector<1x98x64xbf16>
    %80 = vector.shape_cast %79 : vector<1x98x64xbf16> to vector<98x64xbf16>
    %81 = vector.shape_cast %78 : vector<98x64xbf16> to vector<1x98x64xbf16>
    tpu.vector_store %arg6[%c1_46, %c0_47, %c0_48], %81 {strides = array<i32>} : memref<4x98x64xbf16, #tpu.memory_space<vmem>>, vector<1x98x64xbf16>,
    %82 = vector.broadcast %58 : vector<1x64xf32> to vector<98x64xf32>
    %83 = arith.mulf %23, %82 : vector<98x64xf32>
    %84 = vector.broadcast %61 : vector<1x64xf32> to vector<98x64xf32>
    %85 = arith.addf %83, %84 : vector<98x64xf32>
    %cst_49 = arith.constant 0.000000e+00 : f32
    %86 = vector.broadcast %cst_49 : f32 to vector<98x64xf32>
    %87 = arith.maximumf %85, %86 : vector<98x64xf32>
    %88 = arith.truncf %87 : vector<98x64xf32> to vector<98x64xbf16>
    %c2_50 = arith.constant 2 : index
    %c0_51 = arith.constant 0 : index
    %c0_52 = arith.constant 0 : index
    %89 = vector.load %arg6[%c2_50, %c0_51, %c0_52] : memref<4x98x64xbf16, #tpu.memory_space<vmem>>, vector<1x98x64xbf16>
    %90 = vector.shape_cast %89 : vector<1x98x64xbf16> to vector<98x64xbf16>
    %91 = vector.shape_cast %88 : vector<98x64xbf16> to vector<1x98x64xbf16>
    tpu.vector_store %arg6[%c2_50, %c0_51, %c0_52], %91 {strides = array<i32>} : memref<4x98x64xbf16, #tpu.memory_space<vmem>>, vector<1x98x64xbf16>,
    %92 = vector.broadcast %58 : vector<1x64xf32> to vector<98x64xf32>
    %93 = arith.mulf %31, %92 : vector<98x64xf32>
    %94 = vector.broadcast %61 : vector<1x64xf32> to vector<98x64xf32>
    %95 = arith.addf %93, %94 : vector<98x64xf32>
    %cst_53 = arith.constant 0.000000e+00 : f32
    %96 = vector.broadcast %cst_53 : f32 to vector<98x64xf32>
    %97 = arith.maximumf %95, %96 : vector<98x64xf32>
    %98 = arith.truncf %97 : vector<98x64xf32> to vector<98x64xbf16>
    %c3_54 = arith.constant 3 : index
    %c0_55 = arith.constant 0 : index
    %c0_56 = arith.constant 0 : index
    %99 = vector.load %arg6[%c3_54, %c0_55, %c0_56] : memref<4x98x64xbf16, #tpu.memory_space<vmem>>, vector<1x98x64xbf16>
    %100 = vector.shape_cast %99 : vector<1x98x64xbf16> to vector<98x64xbf16>
    %101 = vector.shape_cast %98 : vector<98x64xbf16> to vector<1x98x64xbf16>
    tpu.vector_store %arg6[%c3_54, %c0_55, %c0_56], %101 {strides = array<i32>} : memref<4x98x64xbf16, #tpu.memory_space<vmem>>, vector<1x98x64xbf16>,
    return
  }
  func.func @transform_0(%arg0: i32) -> (i32, i32, i32) {
    %c0_i32 = arith.constant 0 : i32
    %c0_i32_0 = arith.constant 0 : i32
    %c0_i32_1 = arith.constant 0 : i32
    %c0_i32_2 = arith.constant 0 : i32
    return %c0_i32, %c0_i32_0, %c0_i32_1 : i32, i32, i32
  }
  func.func @transform_1(%arg0: i32) -> (i32, i32, i32) {
    %c0_i32 = arith.constant 0 : i32
    %c0_i32_0 = arith.constant 0 : i32
    %c0_i32_1 = arith.constant 0 : i32
    %c0_i32_2 = arith.constant 0 : i32
    return %c0_i32, %c0_i32_0, %c0_i32_1 : i32, i32, i32
  }
  func.func @transform_2(%arg0: i32) -> (i32, i32) {
    %c0_i32 = arith.constant 0 : i32
    %c0_i32_0 = arith.constant 0 : i32
    %c0_i32_1 = arith.constant 0 : i32
    return %c0_i32, %c0_i32_0 : i32, i32
  }
  func.func @transform_3(%arg0: i32) -> (i32, i32) {
    %c0_i32 = arith.constant 0 : i32
    %c0_i32_0 = arith.constant 0 : i32
    %c0_i32_1 = arith.constant 0 : i32
    return %c0_i32, %c0_i32_0 : i32, i32
  }
  func.func @transform_4(%arg0: i32) -> (i32, i32) {
    %c0_i32 = arith.constant 0 : i32
    %c0_i32_0 = arith.constant 0 : i32
    %c0_i32_1 = arith.constant 0 : i32
    return %c0_i32, %c0_i32_0 : i32, i32
  }
  func.func @transform_5(%arg0: i32) -> (i32, i32, i32) {
    %c0_i32 = arith.constant 0 : i32
    %c0_i32_0 = arith.constant 0 : i32
    %c0_i32_1 = arith.constant 0 : i32
    %c0_i32_2 = arith.constant 0 : i32
    return %c0_i32, %c0_i32_0, %c0_i32_1 : i32, i32, i32
  }
}

module attributes {stable_mosaic.version = 11 : i64} {
  func.func @_deconv2_kernel(%arg0: i32, %arg1: memref<4x1024xbf16, #tpu.memory_space<vmem>>, %arg2: memref<1024x392xbf16, #tpu.memory_space<vmem>>, %arg3: memref<1x1xf32, #tpu.memory_space<vmem>>, %arg4: memref<4x392xf32, #tpu.memory_space<vmem>>) attributes {dimension_semantics = [#tpu.dimension_semantics<arbitrary>], iteration_bounds = array<i64: 1>, scalar_prefetch = 0 : i64, scratch_operands = 0 : i64, tpu.core_type = #tpu.core_type<tc>, window_params = [{pipeline_mode = #tpu.pipeline_mode<synchronous>, transform_indices = @transform_0, window_bounds = array<i64: 4, 1024>}, {pipeline_mode = #tpu.pipeline_mode<synchronous>, transform_indices = @transform_1, window_bounds = array<i64: 1024, 392>}, {pipeline_mode = #tpu.pipeline_mode<synchronous>, transform_indices = @transform_2, window_bounds = array<i64: 1, 1>}, {pipeline_mode = #tpu.pipeline_mode<synchronous>, transform_indices = @transform_3, window_bounds = array<i64: 4, 392>}]} {
    %c0 = arith.constant 0 : index
    %c0_0 = arith.constant 0 : index
    %0 = vector.load %arg1[%c0, %c0_0] : memref<4x1024xbf16, #tpu.memory_space<vmem>>, vector<4x1024xbf16>
    %c0_1 = arith.constant 0 : index
    %c0_2 = arith.constant 0 : index
    %1 = vector.load %arg2[%c0_1, %c0_2] : memref<1024x392xbf16, #tpu.memory_space<vmem>>, vector<1024x392xbf16>
    %cst = arith.constant dense<0.000000e+00> : vector<4x392xf32>
    %2 = tpu.matmul %0, %1, %cst {dimension_numbers = #tpu.dot_dimension_numbers<[1], [0], [0], [1], [0, 0, 1, 1], [], []>} : vector<4x1024xbf16>, vector<1024x392xbf16>, vector<4x392xf32> -> vector<4x392xf32>
    %c0_3 = arith.constant 0 : index
    %c0_4 = arith.constant 0 : index
    %3 = vector.load %arg3[%c0_3, %c0_4] : memref<1x1xf32, #tpu.memory_space<vmem>>, vector<1x1xf32>
    %4 = vector.broadcast %3 : vector<1x1xf32> to vector<4x392xf32>
    %5 = arith.addf %2, %4 : vector<4x392xf32>
    %6 = arith.negf %5 : vector<4x392xf32>
    %7 = math.exp %6 : vector<4x392xf32>
    %cst_5 = arith.constant 1.000000e+00 : f32
    %8 = vector.broadcast %cst_5 : f32 to vector<4x392xf32>
    %9 = arith.addf %8, %7 : vector<4x392xf32>
    %10 = arith.divf %8, %9 : vector<4x392xf32>
    %c0_6 = arith.constant 0 : index
    %c0_7 = arith.constant 0 : index
    %11 = vector.load %arg4[%c0_6, %c0_7] : memref<4x392xf32, #tpu.memory_space<vmem>>, vector<4x392xf32>
    tpu.vector_store %arg4[%c0_6, %c0_7], %10 {strides = array<i32>} : memref<4x392xf32, #tpu.memory_space<vmem>>, vector<4x392xf32>,
    return
  }
  func.func @transform_0(%arg0: i32) -> (i32, i32) {
    %c0_i32 = arith.constant 0 : i32
    %c0_i32_0 = arith.constant 0 : i32
    %c0_i32_1 = arith.constant 0 : i32
    return %c0_i32, %c0_i32_0 : i32, i32
  }
  func.func @transform_1(%arg0: i32) -> (i32, i32) {
    %c0_i32 = arith.constant 0 : i32
    %c0_i32_0 = arith.constant 0 : i32
    %c0_i32_1 = arith.constant 0 : i32
    return %c0_i32, %c0_i32_0 : i32, i32
  }
  func.func @transform_2(%arg0: i32) -> (i32, i32) {
    %c0_i32 = arith.constant 0 : i32
    %c0_i32_0 = arith.constant 0 : i32
    %c0_i32_1 = arith.constant 0 : i32
    return %c0_i32, %c0_i32_0 : i32, i32
  }
  func.func @transform_3(%arg0: i32) -> (i32, i32) {
    %c0_i32 = arith.constant 0 : i32
    %c0_i32_0 = arith.constant 0 : i32
    %c0_i32_1 = arith.constant 0 : i32
    return %c0_i32, %c0_i32_0 : i32, i32
  }
}

</mosaic_0001>

<bundles_post_ra>
// kernel: generator_forward.3
= control target key start
LH: loop header
LB: loop body
LE: loop exit
PB: predicated region body
PF: predicated region fallthrough
CT: control target
= control target key end

     0   :  { %s8217_s0 = inlined_call_operand.vmem [shape: bf16[8,64], index: 0, kind: input, shape index: {}]   ;;  %s8218_s1 = inlined_call_operand.hbm [shape: bf16[64,1024], index: 1, kind: input, shape index: {}]   ;;  %s8219_s2 = inlined_call_operand.hbm [shape: f32[1,1024], index: 2, kind: input, shape index: {}]   ;;  %s8220_s3 = inlined_call_operand.hbm [shape: f32[1,1024], index: 3, kind: input, shape index: {}]   ;;  %s8221_s4 = inlined_call_operand.hbm [shape: f32[1,1024], index: 4, kind: input, shape index: {}]   ;;  %s8222_s5 = inlined_call_operand.hbm [shape: bf16[1024,6272], index: 5, kind: input, shape index: {}]   ;;  %s8223_s6 = inlined_call_operand.hbm [shape: f32[1,6272], index: 6, kind: input, shape index: {}]   ;;  %s8224_s7 = inlined_call_operand.hbm [shape: f32[1,6272], index: 7, kind: input, shape index: {}]   ;;  %s8225_s8 = inlined_call_operand.hbm [shape: f32[1,6272], index: 8, kind: input, shape index: {}]   ;;  %s8226_s9 = inlined_call_operand.vmem [shape: bf16[8,6272], index: 9, kind: output, shape index: {}]  }
   0x1   :  { %8239 = sst [smem:[#allocation20_spill]] %s8217_s0 }
   0x2   :  { %8240 = sst [smem:[#allocation21_spill]] %s8218_s1 }
   0x3   :  { %8241 = sst [smem:[#allocation22_spill]] %s8222_s5 }
   0x4   :  { %8242 = sst [smem:[#allocation23_spill]] %s8226_s9 }
   0x5   :  { %14 = vsyncpa [#allocation3], 0 }
   0x6   :  { %15 = vsyncpa [#allocation5], 0 }
   0x7   :  { %16 = vsyncpa [#allocation8], 0  ;;  %s7080_s30 = smov 0   ;;  %s7082_s10 = smov 0  }
   0x8   :  { %s7084_s11 = smov 0   ;;  %s7086_s12 = smov 0  }
   0x9 LB: > { %8243 = sst [smem:[#allocation17_spill]] %s7009_s11  ;;  %s7099_s13 = sadd.s32 4294967295, %s7013_s12   ;;  %s7013_s12 = sphi %s7086_s12, %s8270_s12   ;;  %s7009_s11 = sphi %s7084_s11, %s8272_s11   ;;  %s7005_s10 = sphi %s7082_s10, %s8274_s10   ;;  %s7001_s30 = sphi %s7080_s30, %s8273_s30  }
   0xa   : > { %s7102_s14 = sadd.s32 1, %s7013_s12   ;;  %s134_s16 = sadd.s32 1, %s7009_s11 }
   0xb   : > { %8244 = sst [smem:[#allocation18_spill]] %s7102_s14  ;;  %s131_s15 = ssub.s32 %s7013_s12, %s7102_s14 }
   0xc   : > { %p132_p0 = scmp.eq.s32.totalorder %s131_s15, 0  ;;  %p141_p1 = scmp.ne.s32.totalorder %s7009_s11, %s7005_s10 }
   0xd   : > { %p142_p2 = scmp.eq.s32.totalorder %s7013_s12, 0  ;;  %p147_p3 = scmp.ne.s32.totalorder %s7005_s10, %s7001_s30 }
   0xe   : > { %s7112_s17 = scalar_select %p132_p0, %s7009_s11, %s134_s16  }
   0xf   : > { %p7114_p4 = por %p142_p2, %p141_p1  ;;  %p8227_p5 = scmp.eq.s32.totalorder %s7099_s13, 0 }
  0x10   : > { %8245 = sst [smem:[#allocation19_spill]] %s7112_s17  ;;  %p5370_p6 = scmp.ge.s32.totalorder %s7013_s12, 1 }
  0x11   : > { %p262_p7 = scmp.lt.s32.totalorder %s7013_s12, 8  ;;  %p7123_p8 = por %p8227_p5, %p147_p3 }
  0x12   : > { %s7015_s21 = smov [#allocation2]   ;;  %p6032_p12 = scmp.lt.s32.totalorder %s7013_s12, 7 }
  0x13   : > { %s8247_s19 = scalar_select %p7123_p8, 1, 0 }
  0x14   : > { %p7127_p9 = pnand %p5370_p6, %p262_p7  ;;  %s277_s22 = sshll.u32 %s7015_s21, 4  ;;  %s278_s22 = int_to_ptr.vmem [resolvable:$true] %s277_s22 }
  0x15   : > { %s324_s24 = sand.u32 1, %s7013_s12   ;;  %s326_s25 = sand.u32 1, %s7009_s11  }
  0x16   : > { %s8248_s20 = scalar_select %p7127_p9, 1, 0 }
  0x17   : > { %p6002_p10 = pneg %p7127_p9  ;;  %p7144_p13 = pnand %p6032_p12, %p7114_p4 }
  0x18   : > { %s6762_s27 = scalar_lea.vmem %s278_s22, 4096  ;;  %p6770_p6 = scmp.lt.s32.totalorder %s278_s22, %s278_s22 }
  0x19   : > { %p7135_p11 = pnand %p6002_p10, %p8227_p5  ;;  %p6763_p1 = scmp.ne.s32.totalorder %s278_s22, %s6762_s27 }
  0x1a   : > { %p6771_p7 = scmp.lt.s32.totalorder %s6762_s27, %s6762_s27 }
  0x1b   : > { %s8249_s23 = scalar_select %p7135_p11, 1, 0 }
  0x1c   : > { %p8231_p0 = pneg %p7135_p11  ;;  %p6772_p10 = por %p6771_p7, %p6770_p6 }
  0x1e   : > { %p6765_p2 = pnand %p6763_p1, %p8231_p0 }
  0x20   : > { %p6766_p3 = pneg %p6765_p2 }
  0x22   : > { %p6773_p5 = pnand %p6772_p10, %p6766_p3 }
  0x24   : > { %6776 = shalt.err (!%p6773_p5)
}
  0x25   : > { %s7016_s28 = smov 512   ;;  %s7017_s29 = smov 32  }
  0x26   : > { %s8251_s1 = sld [smem:[#allocation21_spill]]  ;;  %s5972_s16 = smul.u32 3584, %s326_s25 }
  0x27   : > { %s5876_s18 = smul.u32 448, %s7013_s12  ;;  %s8252_s5 = sld [smem:[#allocation22_spill]] }
  0x28   : > { %s328_s27 = scalar_lea.vmem [#allocation9], %s5972_s16  ;;  %s7166_s9 = smul.u32 7, %s326_s25 }
  0x29   : > { %s335_s14 = sshll.u32 %s328_s27, 4  ;;  %s7168_s0 = scalar_lea.sflag [#allocation3], %s324_s24  ;;  %s7164_s14 = int_to_ptr.vmem [resolvable:$true] %s335_s14 }
  0x2a   : > { %p7174_p5 = pneg %p7144_p13 }
  0x2c   : > { %6005 = dma.hbm_to_vmem [thread:$0]  (!%p7135_p11), %s8251_s1, 4096, %s278_s22, [#allocation3], %s7016_s28, %s7016_s28, %s7017_s29  }
  0x2d   : > { %s7162_s11 = scalar_lea.hbm %s8252_s5, %s5876_s18  ;;  %s6782_s29 = scalar_lea.hbm %s8252_s5, 401408 }
  0x2e   : > { %s6777_s30 = scalar_lea.hbm %s7162_s11, 57344  ;;  %p6783_p2 = scmp.lt.s32.totalorder %s7162_s11, %s8252_s5 }
  0x2f   : > { %p6778_p4 = scmp.ne.s32.totalorder %s7162_s11, %s6777_s30  ;;  %p6784_p3 = scmp.lt.s32.totalorder %s6782_s29, %s6777_s30 }
  0x30   : > { %s8253_s22 = scalar_select %p7174_p5, 1, 0 }
  0x31   : > { %p6780_p12 = pnand %p7174_p5, %p6778_p4  ;;  %p6785_p6 = por %p6784_p3, %p6783_p2 }
  0x33   : > { %p6781_p1 = pneg %p6780_p12 }
  0x35   : > { %p6786_p7 = pnand %p6785_p6, %p6781_p1 }
  0x37   : > { %6789 = shalt.err (!%p6786_p7)
}
  0x38   : > { %s6790_s24 = scalar_lea.vmem %s7164_s14, 57344  ;;  %s7018_s16 = smov [#allocation9]  }
  0x39   : > { %p6791_p10 = scmp.ne.s32.totalorder %s7164_s14, %s6790_s24  ;;  %s6795_s18 = sshll.u32 %s7018_s16, 4  ;;  %s6796_s18 = int_to_ptr.vmem [resolvable:$false] %s6795_s18 }
  0x3a   : > { %s6797_s21 = scalar_lea.vmem %s6796_s18, 114688  ;;  %p6798_p0 = scmp.lt.s32.totalorder %s7164_s14, %s6796_s18 }
  0x3b   : > { %p6793_p4 = pnand %p6791_p10, %p7174_p5  ;;  %p6799_p8 = scmp.lt.s32.totalorder %s6797_s21, %s6790_s24 }
  0x3d   : > { %p6794_p12 = pneg %p6793_p4  ;;  %p6800_p9 = por %p6799_p8, %p6798_p0 }
  0x3f   : > { %p6801_p11 = pnand %p6800_p9, %p6794_p12 }
  0x41   : > { %6804 = shalt.err (!%p6801_p11)
}
  0x42   : > { %s7019_s27 = smov 3136   ;;  %s7020_s30 = smov 448  }
  0x43   : > { %s7021_s17 = smov 28   ;;  %s7198_s28 = smul.u32 112, %s7013_s12 }
  0x44   : > { %6018 = dma.hbm_to_vmem [thread:$0]  (!%p7144_p13), %s7162_s11, 57344, %s7164_s14, %s7168_s0, %s7019_s27, %s7020_s30, %s7021_s17  }
  0x45   : > { %s349_s29 = scalar_lea.vmem [#allocation10], %s7166_s9  ;;  %s355_s16 = scalar_lea.hbm %s8223_s6, %s7198_s28 }
  0x46   : > { %s357_s15 = sshll.u32 %s349_s29, 4  ;;  %s6805_s18 = scalar_lea.hbm %s355_s16, 112  ;;  %s358_s15 = int_to_ptr.vmem [resolvable:$true] %s357_s15 }
  0x47   : > { %p6806_p8 = scmp.ne.s32.totalorder %s355_s16, %s6805_s18  ;;  %s6810_s5 = scalar_lea.hbm %s8223_s6, 784 }
  0x48   : > { %p6811_p0 = scmp.lt.s32.totalorder %s355_s16, %s8223_s6  ;;  %p6812_p1 = scmp.lt.s32.totalorder %s6810_s5, %s6805_s18 }
  0x49   : > { %p6808_p9 = pnand %p6806_p8, %p7174_p5 }
  0x4a   : > { %p6813_p2 = por %p6812_p1, %p6811_p0 }
  0x4b   : > { %p6809_p11 = pneg %p6808_p9 }
  0x4d   : > { %p6814_p3 = pnand %p6813_p2, %p6809_p11 }
  0x4f   : > { %6817 = shalt.err (!%p6814_p3)
}
  0x50   : > { %s6818_s14 = scalar_lea.vmem %s358_s15, 112  ;;  %s7022_s27 = smov [#allocation10]  }
  0x51   : > { %p6819_p6 = scmp.ne.s32.totalorder %s358_s15, %s6818_s14  ;;  %s6823_s30 = sshll.u32 %s7022_s27, 4  ;;  %s6824_s30 = int_to_ptr.vmem [resolvable:$false] %s6823_s30 }
  0x52   : > { %s6825_s17 = scalar_lea.vmem %s6824_s30, 224  ;;  %p6826_p4 = scmp.lt.s32.totalorder %s358_s15, %s6824_s30 }
  0x53   : > { %p6821_p7 = pnand %p6819_p6, %p7174_p5  ;;  %p6827_p12 = scmp.lt.s32.totalorder %s6825_s17, %s6818_s14 }
  0x55   : > { %p6822_p10 = pneg %p6821_p7  ;;  %p6828_p8 = por %p6827_p12, %p6826_p4 }
  0x57   : > { %p6829_p9 = pnand %p6828_p8, %p6822_p10 }
  0x59   : > { %6832 = shalt.err (!%p6829_p9)
}
  0x5a   : > { %6021 = dma.hbm_to_vmem [thread:$0]  (!%p7144_p13), %s355_s16, 112, %s358_s15, %s7168_s0  }
  0x5b   : > { %s7023_s1 = smov [#allocation4]   ;;  %s7222_s24 = scalar_lea.hbm %s8224_s7, %s7198_s28 }
  0x5c   : > { %s291_s5 = sshll.u32 %s7023_s1, 4  ;;  %p8254_p0 = scmp.ne.s32.totalorder %s8249_s23, 0  ;;  %s292_s5 = int_to_ptr.vmem [resolvable:$true] %s291_s5 }
  0x5d   : > { %s6844_s18 = scalar_lea.vmem %s292_s5, 128  ;;  %p6852_p6 = scmp.lt.s32.totalorder %s292_s5, %s292_s5 }
  0x5e   : > { %p6845_p11 = scmp.ne.s32.totalorder %s292_s5, %s6844_s18  ;;  %p8255_p1 = pneg %p8254_p0 }
  0x5f   : > { %p6853_p7 = scmp.lt.s32.totalorder %s6844_s18, %s6844_s18 }
  0x60   : > { %p6847_p2 = pnand %p6845_p11, %p8255_p1 }
  0x61   : > { %p6854_p10 = por %p6853_p7, %p6852_p6 }
  0x62   : > { %p6848_p3 = pneg %p6847_p2 }
  0x64   : > { %p6855_p4 = pnand %p6854_p10, %p6848_p3 }
  0x66   : > { %6858 = shalt.err (!%p6855_p4)
}
  0x67   : > { %6008 = dma.hbm_to_vmem [thread:$0]  (!%p8254_p0), %s8219_s2, 128, %s292_s5, [#allocation5]  }
  0x68   : > { %s368_s21 = scalar_lea.vmem [#allocation11], %s7166_s9  ;;  %s7024_s12 = smov [#allocation6]  }
  0x69   : > { %s376_s11 = sshll.u32 %s368_s21, 4  ;;  %s302_s14 = sshll.u32 %s7024_s12, 4  ;;  %s377_s11 = int_to_ptr.vmem [resolvable:$true] %s376_s11  ;;  %s303_s14 = int_to_ptr.vmem [resolvable:$true] %s302_s14 }
  0x6a   : > { %s6859_s27 = scalar_lea.hbm %s7222_s24, 112  ;;  %s6864_s1 = scalar_lea.hbm %s8224_s7, 784 }
  0x6b   : > { %p6860_p12 = scmp.ne.s32.totalorder %s7222_s24, %s6859_s27  ;;  %p6865_p11 = scmp.lt.s32.totalorder %s7222_s24, %s8224_s7 }
  0x6c   : > { %p6866_p1 = scmp.lt.s32.totalorder %s6864_s1, %s6859_s27 }
  0x6d   : > { %p6862_p8 = pnand %p6860_p12, %p7174_p5 }
  0x6e   : > { %p6867_p2 = por %p6866_p1, %p6865_p11 }
  0x6f   : > { %p6863_p9 = pneg %p6862_p8 }
  0x71   : > { %p6868_p3 = pnand %p6867_p2, %p6863_p9 }
  0x73   : > { %6871 = shalt.err (!%p6868_p3)
}
  0x74   : > { %s6872_s5 = scalar_lea.vmem %s377_s11, 112  ;;  %s7025_s18 = smov [#allocation11]  }
  0x75   : > { %p6873_p6 = scmp.ne.s32.totalorder %s377_s11, %s6872_s5  ;;  %s6877_s15 = sshll.u32 %s7025_s18, 4  ;;  %s6878_s15 = int_to_ptr.vmem [resolvable:$false] %s6877_s15 }
  0x76   : > { %s6879_s16 = scalar_lea.vmem %s6878_s15, 224  ;;  %p6880_p4 = scmp.lt.s32.totalorder %s377_s11, %s6878_s15 }
  0x77   : > { %p6875_p7 = pnand %p6873_p6, %p7174_p5  ;;  %p6881_p12 = scmp.lt.s32.totalorder %s6879_s16, %s6872_s5 }
  0x79   : > { %p6876_p10 = pneg %p6875_p7  ;;  %p6882_p8 = por %p6881_p12, %p6880_p4 }
  0x7b   : > { %p6883_p0 = pnand %p6882_p8, %p6876_p10 }
  0x7d   : > { %6886 = shalt.err (!%p6883_p0)
}
  0x7e   : > { %6024 = dma.hbm_to_vmem [thread:$0]  (!%p7144_p13), %s7222_s24, 112, %s377_s11, %s7168_s0  }
  0x7f   : > { %s6898_s21 = scalar_lea.vmem %s303_s14, 128  ;;  %p8256_p11 = scmp.ne.s32.totalorder %s8249_s23, 0 }
  0x80   : > { %p6899_p9 = scmp.ne.s32.totalorder %s303_s14, %s6898_s21  ;;  %p6906_p6 = scmp.lt.s32.totalorder %s303_s14, %s303_s14 }
  0x81   : > { %p8257_p1 = pneg %p8256_p11  ;;  %p6907_p7 = scmp.lt.s32.totalorder %s6898_s21, %s6898_s21 }
  0x83   : > { %p6901_p2 = pnand %p6899_p9, %p8257_p1  ;;  %p6908_p5 = por %p6907_p7, %p6906_p6 }
  0x85   : > { %p6902_p3 = pneg %p6901_p2 }
  0x87   : > { %p6909_p4 = pnand %p6908_p5, %p6902_p3 }
  0x89   : > { %6912 = shalt.err (!%p6909_p4)
}
  0x8a   : > { %6011 = dma.hbm_to_vmem [thread:$0]  (!%p8256_p11), %s8220_s3, 128, %s303_s14, [#allocation5]  }
  0x8b   : > { %s7026_s24 = smov [#allocation7]   ;;  %s7262_s1 = scalar_lea.hbm %s8225_s8, %s7198_s28 }
  0x8c   : > { %s313_s11 = sshll.u32 %s7026_s24, 4  ;;  %p8258_p5 = pmov %p8257_p1  ;;  %s314_s11 = int_to_ptr.vmem [resolvable:$true] %s313_s11 }
  0x8d   : > { %s6924_s29 = scalar_lea.vmem %s314_s11, 128  ;;  %p6932_p8 = scmp.lt.s32.totalorder %s314_s11, %s314_s11 }
  0x8e   : > { %p6925_p0 = scmp.ne.s32.totalorder %s314_s11, %s6924_s29  ;;  %p6933_p9 = scmp.lt.s32.totalorder %s6924_s29, %s6924_s29 }
  0x90   : > { %p6927_p10 = pnand %p6925_p0, %p8258_p5  ;;  %p6934_p1 = por %p6933_p9, %p6932_p8 }
  0x92   : > { %p6928_p12 = pneg %p6927_p10 }
  0x94   : > { %p6935_p2 = pnand %p6934_p1, %p6928_p12 }
  0x96   : > { %6938 = shalt.err (!%p6935_p2)
}
  0x97   : > { %6014 = dma.hbm_to_vmem [thread:$0]  (!%p8256_p11), %s8221_s4, 128, %s314_s11, [#allocation8]  }
  0x98   : > { %s387_s28 = scalar_lea.vmem [#allocation12], %s7166_s9  ;;  %s6939_s18 = scalar_lea.hbm %s7262_s1, 112 }
  0x99   : > { %s395_s5 = sshll.u32 %s387_s28, 4  ;;  %p6940_p3 = scmp.ne.s32.totalorder %s7262_s1, %s6939_s18  ;;  %s396_s5 = int_to_ptr.vmem [resolvable:$true] %s395_s5 }
  0x9a   : > { %p8259_p6 = scmp.ne.s32.totalorder %s8253_s22, 0  ;;  %s6944_s23 = scalar_lea.hbm %s8225_s8, 784 }
  0x9b   : > { %p6945_p0 = scmp.lt.s32.totalorder %s7262_s1, %s8225_s8  ;;  %p6946_p5 = scmp.lt.s32.totalorder %s6944_s23, %s6939_s18 }
  0x9c   : > { %p6942_p7 = pnand %p6940_p3, %p8259_p6 }
  0x9d   : > { %p6947_p10 = por %p6946_p5, %p6945_p0 }
  0x9e   : > { %p6943_p4 = pneg %p6942_p7 }
  0xa0   : > { %p6948_p12 = pnand %p6947_p10, %p6943_p4 }
  0xa2   : > { %6951 = shalt.err (!%p6948_p12)
}
  0xa3   : > { %s6952_s9 = scalar_lea.vmem %s396_s5, 112  ;;  %s7027_s27 = smov [#allocation12]  }
  0xa4   : > { %p6953_p11 = scmp.ne.s32.totalorder %s396_s5, %s6952_s9  ;;  %s6957_s24 = sshll.u32 %s7027_s27, 4  ;;  %s6958_s24 = int_to_ptr.vmem [resolvable:$false] %s6957_s24 }
  0xa5   : > { %s6959_s11 = scalar_lea.vmem %s6958_s24, 224  ;;  %p6960_p1 = scmp.lt.s32.totalorder %s396_s5, %s6958_s24 }
  0xa6   : > { %p6955_p8 = pnand %p6953_p11, %p8259_p6  ;;  %p6961_p2 = scmp.lt.s32.totalorder %s6959_s11, %s6952_s9 }
  0xa8   : > { %p6956_p9 = pneg %p6955_p8  ;;  %p6962_p3 = por %p6961_p2, %p6960_p1 }
  0xaa   : > { %p6963_p7 = pnand %p6962_p3, %p6956_p9 }
  0xac   : > { %6966 = shalt.err (!%p6963_p7)
}
  0xad   : > { %6027 = dma.hbm_to_vmem [thread:$0]  (!%p7144_p13), %s7262_s1, 112, %s396_s5, %s7168_s0  }
  0xae   : > { %p8260_p4 = scmp.ne.s32.totalorder %s8248_s20, 0 }
  0xaf   : > { %p8261_p6 = scmp.eq.s32.totalorder (!%p8260_p4), %s7099_s13, 0 }
  0xb0   : > { %404 = sbr.rel (%p8260_p4) target bundleno = 1151 (0x47f), region = 56 }
  0xb5   : > { %6984 = dma.done.wait (%p8261_p6), [#allocation3], 4096   ;;  %p8262_p0 = pmov %p8261_p6 }
  0xb7   : > { %6986 = vsyncadd (%p8262_p0), [#allocation3], 4294963200  ;;  %p8263_p5 = pmov %p8262_p0 }
  0xb8   : > { %p8264_p10 = pmov %p8262_p0 }
  0xb9   : > { %6988 = dma.done.wait (%p8263_p5), [#allocation5], 256  }
  0xba   : > { %6990 = vsyncadd (%p8264_p10), [#allocation5], 4294967040  ;;  %p8265_p12 = pmov %p8262_p0 }
  0xbb   : > { %p8266_p13 = pmov %p8262_p0 }
  0xbc   : > { %6992 = dma.done.wait (%p8265_p12), [#allocation8], 128  }
  0xbd   : > { %6994 = vsyncadd (%p8266_p13), [#allocation8], 4294967168  ;;  %s422_s0 = sand.u32 1, %s7099_s13   ;;  %s424_s20 = sand.u32 1, %s7005_s10  }
  0xbe   : > { %s5976_s26 = smul.u32 3584, %s424_s20  ;;  %s423_s22 = scalar_lea.sflag [#allocation3], %s422_s0 }
  0xbf   : > { %p8267_p11 = scmp.ne.s32.totalorder %s8247_s19, 0 }
  0xc0   : > { %s7308_s30 = scalar_lea.vmem [#allocation9], %s5976_s26 }
  0xc1   : > { %6996 = dma.done.wait (%p8267_p11), %s423_s22, 57680  }
  0xc2   : > { %6998 = vsyncadd (%p8267_p11), %s423_s22, 4294909616  ;;  %v7028_v0 = vmov 0   ;;  %v539_v1 = vld [vmem:[#allocation2 + $0xc0] sm:$0xff]  ;;  %v540_v3 = vld [vmem:[#allocation2 + $0xc8] sm:$0xff]  ;;  %s8268_s1 = sld [smem:[#allocation20_spill]]  ;;  %vm749_vm0 = vcmask 523264  }
  0xc3   : > { %785 = vmatprep.mubr.bf16.mxu0 %v7028_v0  ;;  %826 = vmatprep.mubr.bf16.mxu1 %v7028_v0  ;;  %v543_v2 = vld [vmem:[#allocation2 + $0xe0] sm:$0xff]  ;;  %v544_v5 = vld [vmem:[#allocation2 + $0xe8] sm:$0xff]  ;;  %v541_v31 = vld [vmem:[#allocation2 + $0xd0] sm:$0xff]  ;;  %vm917_vm1 = vcmask 1041408   ;;  %s7807_s29 = smul.u32 7, %s424_s20  ;;  %s8269_s16 = sld [smem:[#allocation23_spill]] }
  0xc4   : > { %v5411_v4 = vcombine.high %v539_v1, %v543_v2  ;;  %v5410_v6 = vcombine.low %v539_v1, %v543_v2  ;;  %v531_v7 = vld [vmem:[#allocation2 + $0x80] sm:$0xff]  ;;  %v5413_v9 = vcombine.high %v540_v3, %v544_v5  ;;  %v5412_v10 = vcombine.low %v540_v3, %v544_v5  ;;  %v532_v12 = vld [vmem:[#allocation2 + $0x88] sm:$0xff]  ;;  %v545_v32 = vld [vmem:[#allocation2 + $0xf0] sm:$0xff]  ;;  %s507_s28 = smul.u32 7, %s7099_s13 }
  0xc5   : > { %v535_v8 = vld [vmem:[#allocation2 + $0xa0] sm:$0xff]  ;;  %v536_v13 = vld [vmem:[#allocation2 + $0xa8] sm:$0xff]  ;;  %v542_v33 = vld [vmem:[#allocation2 + $0xd8] sm:$0xff]  ;;  %v5415_v39 = vcombine.high %v541_v31, %v545_v32  ;;  %v5414_v44 = vcombine.low %v541_v31, %v545_v32  ;;  %s435_s14 = scalar_lea.vmem [#allocation10], %s7807_s29  ;;  %s444_s25 = scalar_lea.vmem [#allocation11], %s7807_s29 }
  0xc6   : > { %v5403_v11 = vcombine.high %v531_v7, %v535_v8  ;;  %v523_v14 = vld [vmem:[#allocation2 + $0x40] sm:$0xff]  ;;  %761 = vmatprep.subr.bf16.mxu0 %v5411_v4  ;;  %v5405_v15 = vcombine.high %v532_v12, %v536_v13  ;;  %v524_v17 = vld [vmem:[#allocation2 + $0x48] sm:$0xff]  ;;  %802 = vmatprep.subr.bf16.mxu1 %v5413_v9  ;;  %v5402_v19 = vcombine.low %v531_v7, %v535_v8  ;;  %v546_v34 = vld [vmem:[#allocation2 + $0xf8] sm:$0xff]  ;;  %p508_p8 = scmp.lt.s32.totalorder %s507_s28, 48  ;;  %s453_s13 = scalar_lea.vmem [#allocation12], %s7807_s29 }
  0xc7   : > { %v527_v16 = vld [vmem:[#allocation2 + $0x60] sm:$0xff]  ;;  %v528_v18 = vld [vmem:[#allocation2 + $0x68] sm:$0xff]  ;;  %762 = vmatpush1.bf16.msra.mxu0 %v5410_v6  ;;  %803 = vmatpush1.bf16.msra.mxu1 %v5412_v10  ;;  %v5404_v20 = vcombine.low %v532_v12, %v536_v13  ;;  %v533_v36 = vld [vmem:[#allocation2 + $0x90] sm:$0xff]  ;;  %v5417_v43 = vcombine.high %v542_v33, %v546_v34  ;;  %v5416_v47 = vcombine.low %v542_v33, %v546_v34 }
  0xc8   : > { %763 = vmatprep.subr.bf16.mxu0 %v5403_v11  ;;  %v5395_v21 = vcombine.high %v523_v14, %v527_v16  ;;  %804 = vmatprep.subr.bf16.mxu1 %v5405_v15  ;;  %v5397_v22 = vcombine.high %v524_v17, %v528_v18  ;;  %v515_v23 = vld [vmem:[#allocation2] sm:$0xff]  ;;  %v516_v25 = vld [vmem:[#allocation2 + $0x8] sm:$0xff]  ;;  %v5394_v27 = vcombine.low %v523_v14, %v527_v16  ;;  %v537_v37 = vld [vmem:[#allocation2 + $0xb0] sm:$0xff]  ;;  %s8276_s28 = smov (!%p508_p8, %s507_s28), 48 }
  0xc9   : > { %v519_v24 = vld [vmem:[#allocation2 + $0x20] sm:$0xff]  ;;  %v520_v26 = vld [vmem:[#allocation2 + $0x28] sm:$0xff]  ;;  %v5396_v28 = vcombine.low %v524_v17, %v528_v18  ;;  %v534_v40 = vld [vmem:[#allocation2 + $0x98] sm:$0xff]  ;;  %v5407_v48 = vcombine.high %v533_v36, %v537_v37  ;;  %v5406_v52 = vcombine.low %v533_v36, %v537_v37  ;;  %s5385_s5 = sshll.u32 %s8276_s28, 2 }
  0xca   : > { %v5387_v29 = vcombine.high %v515_v23, %v519_v24  ;;  %v5389_v30 = vcombine.high %v516_v25, %v520_v26  ;;  %v5386_v35 = vcombine.low %v515_v23, %v519_v24  ;;  %v5388_v38 = vcombine.low %v516_v25, %v520_v26  ;;  %v538_v41 = vld [vmem:[#allocation2 + $0xb8] sm:$0xff]  ;;  %v514_v42 = vld [vmem:[%s8268_s1] sm:$0xf]  ;;  %v525_v45 = vld [vmem:[#allocation2 + $0x50] sm:$0xff]  ;;  %s511_s23 = scalar_lea.vmem %s8269_s16, %s5385_s5 }
  0xcb   : > { %764 = vmatpush1.bf16.msra.mxu0 %v5402_v19  ;;  %805 = vmatpush1.bf16.msra.mxu1 %v5404_v20  ;;  %v529_v46 = vld [vmem:[#allocation2 + $0x70] sm:$0xff]  ;;  %v526_v49 = vld [vmem:[#allocation2 + $0x58] sm:$0xff]  ;;  %v5409_v51 = vcombine.high %v534_v40, %v538_v41  ;;  %v5408_v55 = vcombine.low %v534_v40, %v538_v41  ;;  %v6085_v3 = vld [vmem:[%s7308_s30 + $0x50c] ss:$28 sps:$4 sm:$0xff]  }
  0xcc   : > { %765 = vmatprep.subr.bf16.mxu0 %v5395_v21  ;;  %806 = vmatprep.subr.bf16.mxu1 %v5397_v22  ;;  %v530_v50 = vld [vmem:[#allocation2 + $0x78] sm:$0xff]  ;;  %v517_v53 = vld [vmem:[#allocation2 + $0x10] sm:$0xff]  ;;  %v5399_v56 = vcombine.high %v525_v45, %v529_v46  ;;  %v5398_v60 = vcombine.low %v525_v45, %v529_v46  ;;  %v6088_v6 = vld [vmem:[%s7308_s30 + $0x154] ss:$28 sps:$4 sm:$0xff]  }
  0xcd   : > { %v521_v54 = vld [vmem:[#allocation2 + $0x30] sm:$0xff]  ;;  %v518_v57 = vld [vmem:[#allocation2 + $0x18] sm:$0xff]  ;;  %v5401_v59 = vcombine.high %v526_v49, %v530_v50  ;;  %v5400_v61 = vcombine.low %v526_v49, %v530_v50  ;;  %v6091_v7 = vld [vmem:[%s7308_s30 + $0x4d4] ss:$28 sps:$4 sm:$0xff]  }
  0xce   : > { %v522_v58 = vld [vmem:[#allocation2 + $0x38] sm:$0xff]  ;;  %v5391_v62 = vcombine.high %v517_v53, %v521_v54  ;;  %v5390_v1 = vcombine.low %v517_v53, %v521_v54  ;;  %v6086_v8 = vld [vmem:[%s7308_s30 + $0x150] ss:$28 sps:$4 sm:$0xff]   ;;  %v6094_v10 = vld [vmem:[%s7308_s30 + $0x11c] ss:$28 sps:$4 sm:$0xff]  }
  0xcf   : > { %766 = vmatpush1.bf16.msra.mxu0 %v5394_v27  ;;  %807 = vmatpush1.bf16.msra.mxu1 %v5396_v28  ;;  %v5393_v63 = vcombine.high %v518_v57, %v522_v58  ;;  %v5392_v2 = vcombine.low %v518_v57, %v522_v58  ;;  %v6080_v4 = vld [vmem:[%s7308_s30 + $0x188] ss:$28 sps:$4 sm:$0xff]   ;;  %v6089_v9 = vld [vmem:[%s7308_s30 + $0x4d0] ss:$28 sps:$4 sm:$0xff]   ;;  %v6097_v11 = vld [vmem:[%s7308_s30 + $0x49c] ss:$28 sps:$4 sm:$0xff]  }
  0xd0   : > { %767 = vmatprep.subr.bf16.mxu0 %v5387_v29  ;;  %808 = vmatprep.subr.bf16.mxu1 %v5389_v30  ;;  %v6083_v5 = vld [vmem:[%s7308_s30 + $0x508] ss:$28 sps:$4 sm:$0xff]   ;;  %v6092_v12 = vld [vmem:[%s7308_s30 + $0x118] ss:$28 sps:$4 sm:$0xff]   ;;  %v6098_v16 = vld [vmem:[%s7308_s30 + $0xe0] ss:$28 sps:$4 sm:$0xff]  }
  0xd1   : > { %v6095_v13 = vld [vmem:[%s7308_s30 + $0x498] ss:$28 sps:$4 sm:$0xff]   ;;  %v6100_v14 = vld [vmem:[%s7308_s30 + $0xe4] ss:$28 sps:$4 sm:$0xff]   ;;  %v6106_v18 = vld [vmem:[%s7308_s30 + $0xac] ss:$28 sps:$4 sm:$0xff]  }
  0xd2   : > { %v6103_v15 = vld [vmem:[%s7308_s30 + $0x464] ss:$28 sps:$4 sm:$0xff]   ;;  %v6109_v19 = vld [vmem:[%s7308_s30 + $0x42c] ss:$28 sps:$4 sm:$0xff]   ;;  %v6112_v22 = vld [vmem:[%s7308_s30 + $0x74] ss:$28 sps:$4 sm:$0xff]  }
  0xd3   : > { %768 = vmatpush1.bf16.msra.mxu0 %v5386_v35  ;;  %809 = vmatpush1.bf16.msra.mxu1 %v5388_v38  ;;  %v6101_v17 = vld [vmem:[%s7308_s30 + $0x460] ss:$28 sps:$4 sm:$0xff]   ;;  %v6104_v20 = vld [vmem:[%s7308_s30 + $0xa8] ss:$28 sps:$4 sm:$0xff]   ;;  %v6115_v23 = vld [vmem:[%s7308_s30 + $0x3f4] ss:$28 sps:$4 sm:$0xff]  }
  0xd4   : > { %843 = vmatprep.subr.bf16.mxu0 %v5415_v39  ;;  %884 = vmatprep.subr.bf16.mxu1 %v5417_v43  ;;  %v6107_v21 = vld [vmem:[%s7308_s30 + $0x428] ss:$28 sps:$4 sm:$0xff]   ;;  %v6110_v24 = vld [vmem:[%s7308_s30 + $0x70] ss:$28 sps:$4 sm:$0xff]   ;;  %v6118_v26 = vld [vmem:[%s7308_s30 + $0x3c] ss:$28 sps:$4 sm:$0xff]  }
  0xd5   : > { %v6113_v25 = vld [vmem:[%s7308_s30 + $0x3f0] ss:$28 sps:$4 sm:$0xff]   ;;  %v6121_v27 = vld [vmem:[%s7308_s30 + $0x3bc] ss:$28 sps:$4 sm:$0xff]   ;;  %v6124_v30 = vld [vmem:[%s7308_s30 + $0x4] ss:$28 sps:$4 sm:$0xff]  }
  0xd6   : > { %5418 = vmatmul.mubr.msk.bf16.vlgmr.msra.gmra.mxu0 %vm749_vm0, %v514_v42  ;;  %5419 = vmatmul.mubr.msk.bf16.vlgmr.msra.gmra.mxu1 %vm749_vm0, %v514_v42  ;;  %v6116_v28 = vld [vmem:[%s7308_s30 + $0x38] ss:$28 sps:$4 sm:$0xff]   ;;  %v6127_v31 = vld [vmem:[%s7308_s30 + $0x384] ss:$28 sps:$4 sm:$0xff]   ;;  %v6130_v34 = vld [vmem:[%s7308_s30 + $0x34c] ss:$28 sps:$4 sm:$0xff]  }
  0xd7   : > { %844 = vmatpush1.bf16.msra.mxu0 %v5414_v44  ;;  %885 = vmatpush1.bf16.msra.mxu1 %v5416_v47  ;;  %v6119_v29 = vld [vmem:[%s7308_s30 + $0x3b8] ss:$28 sps:$4 sm:$0xff]   ;;  %v6122_v32 = vld [vmem:[%s7308_s30] ss:$28 sps:$4 sm:$0xff]   ;;  %v6133_v35 = vld [vmem:[%s7308_s30 + $0x6cc] ss:$28 sps:$4 sm:$0xff]  }
  0xd8   : > { %845 = vmatprep.subr.bf16.mxu0 %v5407_v48  ;;  %886 = vmatprep.subr.bf16.mxu1 %v5409_v51  ;;  %v6125_v33 = vld [vmem:[%s7308_s30 + $0x380] ss:$28 sps:$4 sm:$0xff]   ;;  %v6128_v36 = vld [vmem:[%s7308_s30 + $0x348] ss:$28 sps:$4 sm:$0xff]   ;;  %v6136_v38 = vld [vmem:[%s7308_s30 + $0x314] ss:$28 sps:$4 sm:$0xff]  }
  0xd9   : > { %867 = vmatprep.mubr.bf16.mxu0 %v7028_v0  ;;  %908 = vmatprep.mubr.bf16.mxu1 %v7028_v0  ;;  %v6082_v0 = vld [vmem:[%s7308_s30 + $0x18c] ss:$28 sps:$4 sm:$0xff]   ;;  %v6139_v39 = vld [vmem:[%s7308_s30 + $0x694] ss:$28 sps:$4 sm:$0xff]   ;;  %v6145_v43 = vld [vmem:[%s7308_s30 + $0x65c] ss:$28 sps:$4 sm:$0xff]  }
  0xda   : > { %v6131_v37 = vld [vmem:[%s7308_s30 + $0x6c8] ss:$28 sps:$4 sm:$0xff]   ;;  %v6134_v40 = vld [vmem:[%s7308_s30 + $0x310] ss:$28 sps:$4 sm:$0xff]   ;;  %v6140_v44 = vld [vmem:[%s7308_s30 + $0x2d8] ss:$28 sps:$4 sm:$0xff]  }
  0xdb   : > { %846 = vmatpush1.bf16.msra.mxu0 %v5406_v52  ;;  %887 = vmatpush1.bf16.msra.mxu1 %v5408_v55  ;;  %v6137_v41 = vld [vmem:[%s7308_s30 + $0x690] ss:$28 sps:$4 sm:$0xff]   ;;  %v6143_v45 = vld [vmem:[%s7308_s30 + $0x658] ss:$28 sps:$4 sm:$0xff]   ;;  %v6148_v46 = vld [vmem:[%s7308_s30 + $0x2a4] ss:$28 sps:$4 sm:$0xff]  }
  0xdc   : > { %847 = vmatprep.subr.bf16.mxu0 %v5399_v56  ;;  %888 = vmatprep.subr.bf16.mxu1 %v5401_v59  ;;  %v6151_v47 = vld [vmem:[%s7308_s30 + $0x624] ss:$28 sps:$4 sm:$0xff]   ;;  %v6154_v50 = vld [vmem:[%s7308_s30 + $0x26c] ss:$28 sps:$4 sm:$0xff]   ;;  %v6160_v54 = vld [vmem:[%s7308_s30 + $0x234] ss:$28 sps:$4 sm:$0xff]  }
  0xdd   : > { %v6146_v48 = vld [vmem:[%s7308_s30 + $0x2a0] ss:$28 sps:$4 sm:$0xff]   ;;  %v6157_v51 = vld [vmem:[%s7308_s30 + $0x5ec] ss:$28 sps:$4 sm:$0xff]   ;;  %v6163_v55 = vld [vmem:[%s7308_s30 + $0x5b4] ss:$28 sps:$4 sm:$0xff]  }
  0xde   : > { %v6149_v49 = vld [vmem:[%s7308_s30 + $0x620] ss:$28 sps:$4 sm:$0xff]   ;;  %v6152_v52 = vld [vmem:[%s7308_s30 + $0x268] ss:$28 sps:$4 sm:$0xff]   ;;  %v6158_v56 = vld [vmem:[%s7308_s30 + $0x230] ss:$28 sps:$4 sm:$0xff]  }
  0xdf   : > { %848 = vmatpush1.bf16.msra.mxu0 %v5398_v60  ;;  %889 = vmatpush1.bf16.msra.mxu1 %v5400_v61  ;;  %v6155_v53 = vld [vmem:[%s7308_s30 + $0x5e8] ss:$28 sps:$4 sm:$0xff]   ;;  %v6161_v57 = vld [vmem:[%s7308_s30 + $0x5b0] ss:$28 sps:$4 sm:$0xff]   ;;  %v6166_v58 = vld [vmem:[%s7308_s30 + $0x1fc] ss:$28 sps:$4 sm:$0xff]  }
  0xe0   : > { %849 = vmatprep.subr.bf16.mxu0 %v5391_v62  ;;  %890 = vmatprep.subr.bf16.mxu1 %v5393_v63  ;;  %v6169_v59 = vld [vmem:[%s7308_s30 + $0x57c] ss:$28 sps:$4 sm:$0xff]   ;;  %v6172_v62 = vld [vmem:[%s7308_s30 + $0x1c4] ss:$28 sps:$4 sm:$0xff]  }
  0xe1   : > { %v6164_v60 = vld [vmem:[%s7308_s30 + $0x1f8] ss:$28 sps:$4 sm:$0xff]   ;;  %v6175_v63 = vld [vmem:[%s7308_s30 + $0x544] ss:$28 sps:$4 sm:$0xff]  }
  0xe2   : > { %v6167_v61 = vld [vmem:[%s7308_s30 + $0x578] ss:$28 sps:$4 sm:$0xff]  }
  0xe3   : > { %850 = vmatpush1.bf16.msra.mxu0 %v5390_v1  ;;  %891 = vmatpush1.bf16.msra.mxu1 %v5392_v2  ;;  %v6170_v1 = vld [vmem:[%s7308_s30 + $0x1c0] ss:$28 sps:$4 sm:$0xff]  }
  0xe4   : > { %4170 = vmatprep.subr.bf16.mxu0 %v6082_v0  ;;  %4211 = vmatprep.subr.bf16.mxu1 %v6085_v3  ;;  %v6173_v2 = vld [vmem:[%s7308_s30 + $0x540] ss:$28 sps:$4 sm:$0xff]   ;;  %v6178_v0 = vld [vmem:[%s7308_s30 + $0x88c] ss:$28 sps:$4 sm:$0xff]  }
  0xe5   : > { %v6181_v3 = vld [vmem:[%s7308_s30 + $0xc0c] ss:$28 sps:$4 sm:$0xff]  }
  0xe6   : > { %5420 = vmatmul.mubr.msk.bf16.vlgmr.msra.gmra.mxu0 %vm749_vm0, %v514_v42  ;;  %5421 = vmatmul.mubr.msk.bf16.vlgmr.msra.gmra.mxu1 %vm749_vm0, %v514_v42  ;;  %v6142_v42 = vld [vmem:[%s7308_s30 + $0x2dc] ss:$28 sps:$4 sm:$0xff]  }
  0xe7   : > { %4171 = vmatpush1.bf16.msra.mxu0 %v6080_v4  ;;  %4212 = vmatpush1.bf16.msra.mxu1 %v6083_v5  ;;  %v549_v4 = vlaneseq }
  0xe8   : > { %4172 = vmatprep.subr.bf16.mxu0 %v6088_v6  ;;  %4213 = vmatprep.subr.bf16.mxu1 %v6091_v7  ;;  %v7396_v7 = vld [vmem:[#allocation4] sm:$0xff] }
  0xe9   : > { %v7391_v5 = vshrl.u32 %v549_v4, 7 }
  0xeb   : > { %4173 = vmatpush1.bf16.msra.mxu0 %v6086_v8  ;;  %4214 = vmatpush1.bf16.msra.mxu1 %v6089_v9  ;;  %v7394_v6 = vsub.s32 0, %v7391_v5  ;;  %v7399_v8 = vsub.s32 2, %v7391_v5  ;;  %v7402_v9 = vsub.s32 1, %v7391_v5 }
  0xec   : > { %4174 = vmatprep.subr.bf16.mxu0 %v6094_v10  ;;  %4215 = vmatprep.subr.bf16.mxu1 %v6097_v11  ;;  %v7405_v10 = vsub.s32 3, %v7391_v5 }
  0xed   : > { %v552_v11 = vrot.slane %v7396_v7, %v7394_v6 }
  0xef   : > { %4175 = vmatpush1.bf16.msra.mxu0 %v6092_v12  ;;  %4216 = vmatpush1.bf16.msra.mxu1 %v6095_v13  ;;  %v560_v12 = vrot.slane %v7396_v7, %v7399_v8  ;;  %v556_v13 = vrot.slane %v7396_v7, %v7402_v9 }
  0xf0   : > { %4176 = vmatprep.subr.bf16.mxu0 %v6100_v14  ;;  %4217 = vmatprep.subr.bf16.mxu1 %v6103_v15  ;;  %v564_v15 = vrot.slane %v7396_v7, %v7405_v10 }
  0xf3   : > { %4177 = vmatpush1.bf16.msra.mxu0 %v6098_v16  ;;  %4218 = vmatpush1.bf16.msra.mxu1 %v6101_v17 }
  0xf4   : > { %4178 = vmatprep.subr.bf16.mxu0 %v6106_v18  ;;  %4219 = vmatprep.subr.bf16.mxu1 %v6109_v19 }
  0xf7   : > { %4179 = vmatpush1.bf16.msra.mxu0 %v6104_v20  ;;  %4220 = vmatpush1.bf16.msra.mxu1 %v6107_v21 }
  0xf8   : > { %4180 = vmatprep.subr.bf16.mxu0 %v6112_v22  ;;  %4221 = vmatprep.subr.bf16.mxu1 %v6115_v23 }
  0xfb   : > { %4181 = vmatpush1.bf16.msra.mxu0 %v6110_v24  ;;  %4222 = vmatpush1.bf16.msra.mxu1 %v6113_v25 }
  0xfc   : > { %4182 = vmatprep.subr.bf16.mxu0 %v6118_v26  ;;  %4223 = vmatprep.subr.bf16.mxu1 %v6121_v27 }
  0xff   : > { %4183 = vmatpush1.bf16.msra.mxu0 %v6116_v28  ;;  %4224 = vmatpush1.bf16.msra.mxu1 %v6119_v29 }
 0x100   : > { %4184 = vmatprep.subr.bf16.mxu0 %v6124_v30  ;;  %4225 = vmatprep.subr.bf16.mxu1 %v6127_v31 }
 0x103   : > { %4185 = vmatpush1.bf16.msra.mxu0 %v6122_v32  ;;  %4226 = vmatpush1.bf16.msra.mxu1 %v6125_v33 }
 0x104   : > { %4186 = vmatprep.subr.bf16.mxu0 %v6130_v34  ;;  %4227 = vmatprep.subr.bf16.mxu1 %v6133_v35 }
 0x107   : > { %4187 = vmatpush2.bf16.msra.mxu0 %v6128_v36  ;;  %4228 = vmatpush2.bf16.msra.mxu1 %v6131_v37 }
 0x108   : > { %4188 = vmatprep.subr.bf16.mxu0 %v6136_v38  ;;  %4229 = vmatprep.subr.bf16.mxu1 %v6139_v39 }
 0x10b   : > { %4189 = vmatpush2.bf16.msra.mxu0 %v6134_v40  ;;  %4230 = vmatpush2.bf16.msra.mxu1 %v6137_v41 }
 0x10c   : > { %4190 = vmatprep.subr.bf16.mxu0 %v6142_v42  ;;  %4231 = vmatprep.subr.bf16.mxu1 %v6145_v43 }
 0x10f   : > { %4191 = vmatpush2.bf16.msra.mxu0 %v6140_v44  ;;  %4232 = vmatpush2.bf16.msra.mxu1 %v6143_v45 }
 0x110   : > { %4192 = vmatprep.subr.bf16.mxu0 %v6148_v46  ;;  %4233 = vmatprep.subr.bf16.mxu1 %v6151_v47 }
 0x113   : > { %4193 = vmatpush2.bf16.msra.mxu0 %v6146_v48  ;;  %4234 = vmatpush2.bf16.msra.mxu1 %v6149_v49 }
 0x114   : > { %4194 = vmatprep.subr.bf16.mxu0 %v6154_v50  ;;  %4235 = vmatprep.subr.bf16.mxu1 %v6157_v51 }
 0x117   : > { %4195 = vmatpush2.bf16.msra.mxu0 %v6152_v52  ;;  %4236 = vmatpush2.bf16.msra.mxu1 %v6155_v53 }
 0x118   : > { %4196 = vmatprep.subr.bf16.mxu0 %v6160_v54  ;;  %4237 = vmatprep.subr.bf16.mxu1 %v6163_v55 }
 0x11b   : > { %4197 = vmatpush2.bf16.msra.mxu0 %v6158_v56  ;;  %4238 = vmatpush2.bf16.msra.mxu1 %v6161_v57 }
 0x11c   : > { %4198 = vmatprep.subr.bf16.mxu0 %v6166_v58  ;;  %4239 = vmatprep.subr.bf16.mxu1 %v6169_v59 }
 0x11f   : > { %4199 = vmatpush2.bf16.msra.mxu0 %v6164_v60  ;;  %4240 = vmatpush2.bf16.msra.mxu1 %v6167_v61  ;;  %v7444_v61 = vsub.s32 4, %v7391_v5 }
 0x120   : > { %4200 = vmatprep.subr.bf16.mxu0 %v6172_v62  ;;  %4241 = vmatprep.subr.bf16.mxu1 %v6175_v63 }
 0x123   : > { %4201 = vmatpush2.bf16.msra.mxu0 %v6170_v1  ;;  %4242 = vmatpush2.bf16.msra.mxu1 %v6173_v2  ;;  %v7447_v2 = vsub.s32 6, %v7391_v5 }
 0x124   : > { %4252 = vmatprep.subr.bf16.mxu0 %v6178_v0  ;;  %4293 = vmatprep.subr.bf16.mxu1 %v6181_v3 }
 0x196   : > { %v787_v14 = vpop.f32.mrf.mxu0  ;;  %v828_v17 = vpop.f32.mrf.mxu1 }
 0x197   : > { %v7415_v16 = vadd.f32 %v787_v14, %v552_v11  ;;  %v7417_v18 = vadd.f32 %v828_v17, %v560_v12  ;;  %v568_v14 = vrot.slane %v7396_v7, %v7444_v61 }
 0x198   : > { %v789_v19 = vpop.f32.mrf.mxu0  ;;  %v830_v23 = vpop.f32.mrf.mxu1 }
 0x199   : > { %v918_v20 = vsel %vm917_vm1, %v7415_v16, 0.0  ;;  %v982_v21 = vmul.f32 %v7415_v16, %v7415_v16  ;;  %v7423_v22 = vadd.f32 %v789_v19, %v556_v13  ;;  %v932_v25 = vsel %vm917_vm1, %v7417_v18, 0.0 }
 0x19a   : > { %v919_v24 = vrot.slane %v918_v20, 4  ;;  %v984_v26 = vmul.f32 %v7417_v18, %v7417_v18  ;;  %v7429_v27 = vadd.f32 %v830_v23, %v564_v15  ;;  %v791_v28 = vpop.f32.mrf.mxu0  ;;  %v933_v30 = vrot.slane %v932_v25, 4  ;;  %v832_v33 = vpop.f32.mrf.mxu1 }
 0x19b   : > { %v990_v29 = vsel %vm917_vm1, %v982_v21, 0.0  ;;  %v925_v31 = vsel %vm917_vm1, %v7423_v22, 0.0  ;;  %v983_v32 = vmul.f32 %v7423_v22, %v7423_v22  ;;  %v7454_v23 = vsub.s32 5, %v7391_v5 }
 0x19c   : > { %v920_v34 = vadd.f32 %v919_v24, %v918_v20  ;;  %v991_v35 = vrot.slane %v990_v29, 4  ;;  %v1004_v36 = vsel %vm917_vm1, %v984_v26, 0.0  ;;  %v926_v37 = vrot.slane %v925_v31, 4  ;;  %v792_v38 = vpop.f32.mrf.mxu0  ;;  %v833_v43 = vpop.f32.mrf.mxu1 }
 0x19d   : > { %v934_v39 = vadd.f32 %v933_v30, %v932_v25  ;;  %v1005_v40 = vrot.slane %v1004_v36, 4  ;;  %v997_v41 = vsel %vm917_vm1, %v983_v32, 0.0  ;;  %v939_v42 = vsel %vm917_vm1, %v7429_v27, 0.0 }
 0x19e   : > { %v921_v44 = vrot.slane %v920_v34, 2  ;;  %v992_v45 = vadd.f32 %v991_v35, %v990_v29  ;;  %v927_v46 = vadd.f32 %v926_v37, %v925_v31  ;;  %v998_v47 = vrot.slane %v997_v41, 4 }
 0x19f   : > { %v935_v48 = vrot.slane %v934_v39, 2  ;;  %v1006_v49 = vadd.f32 %v1005_v40, %v1004_v36  ;;  %v940_v50 = vrot.slane %v939_v42, 4  ;;  %v985_v51 = vmul.f32 %v7429_v27, %v7429_v27 }
 0x1a0   : > { %v922_v52 = vadd.f32 %v921_v44, %v920_v34  ;;  %v993_v53 = vrot.slane %v992_v45, 2  ;;  %v928_v54 = vrot.slane %v927_v46, 2  ;;  %v999_v55 = vadd.f32 %v998_v47, %v997_v41 }
 0x1a1   : > { %v941_v56 = vadd.f32 %v940_v50, %v939_v42  ;;  %v1011_v57 = vsel %vm917_vm1, %v985_v51, 0.0  ;;  %v936_v58 = vadd.f32 %v935_v48, %v934_v39  ;;  %v1007_v62 = vrot.slane %v1006_v49, 2 }
 0x1a2   : > { %v929_v59 = vadd.f32 %v928_v54, %v927_v46  ;;  %v1000_v60 = vrot.slane %v999_v55, 2  ;;  %v1012_v1 = vrot.slane %v1011_v57, 4  ;;  %v923_v0 = vrot.slane %v922_v52, 1 }
 0x1a3   : > { %v942_v63 = vrot.slane %v941_v56, 2  ;;  %v994_v3 = vadd.f32 %v993_v53, %v992_v45  ;;  %v937_v12 = vrot.slane %v936_v58, 1  ;;  %v1008_v17 = vadd.f32 %v1007_v62, %v1006_v49 }
 0x1a4   : > { %v1001_v4 = vadd.f32 %v1000_v60, %v999_v55  ;;  %v1013_v11 = vadd.f32 %v1012_v1, %v1011_v57  ;;  %v930_v13 = vrot.slane %v929_v59, 1  ;;  %v576_v20 = vrot.slane %v7396_v7, %v7447_v2 }
 0x1a5   : > { %v943_v19 = vadd.f32 %v942_v63, %v941_v56  ;;  %v924_v24 = vadd.f32 %v923_v0, %v922_v52  ;;  %v995_v25 = vrot.slane %v994_v3, 1  ;;  %v7457_v30 = vsub.s32 7, %v7391_v5 }
 0x1a6   : > { %v869_v15 = vpop.f32.mrf.mxu0  ;;  %v910_v21 = vpop.f32.mrf.mxu1  ;;  %v1002_v28 = vrot.slane %v1001_v4, 1  ;;  %v1014_v29 = vrot.slane %v1013_v11, 2  ;;  %v938_v32 = vadd.f32 %v937_v12, %v936_v58  ;;  %v931_v33 = vadd.f32 %v930_v13, %v929_v59 }
 0x1a7   : > { %v7459_v34 = vadd.f32 %v869_v15, %v568_v14  ;;  %v1009_v36 = vrot.slane %v1008_v17, 1  ;;  %v944_v37 = vrot.slane %v943_v19, 1  ;;  %v7461_v38 = vadd.f32 %v910_v21, %v576_v20 }
 0x1a8   : > { %v871_v26 = vpop.f32.mrf.mxu0  ;;  %v912_v31 = vpop.f32.mrf.mxu1  ;;  %v572_v39 = vrot.slane %v7396_v7, %v7454_v23  ;;  %v7465_v41 = vmul.f32 0.5, %v924_v24  ;;  %v996_v42 = vadd.f32 %v995_v25, %v994_v3  ;;  %v1003_v46 = vadd.f32 %v1002_v28, %v1001_v4 }
 0x1a9   : > { %v946_v43 = vsel %vm917_vm1, %v7459_v34, 0.0  ;;  %v986_v44 = vmul.f32 %v7459_v34, %v7459_v34  ;;  %v1015_v47 = vadd.f32 %v1014_v29, %v1013_v11  ;;  %v580_v49 = vrot.slane %v7396_v7, %v7457_v30 }
 0x1aa   : > { %v873_v35 = vpop.f32.mrf.mxu0  ;;  %v914_v40 = vpop.f32.mrf.mxu1  ;;  %v947_v48 = vrot.slane %v946_v43, 4  ;;  %v7473_v51 = vmul.f32 0.5, %v938_v32  ;;  %v7475_v52 = vmul.f32 0.5, %v931_v33  ;;  %v960_v54 = vsel %vm917_vm1, %v7461_v38, 0.0 }
 0x1ab   : > { %v1018_v53 = vsel %vm917_vm1, %v986_v44, 0.0  ;;  %v1010_v55 = vadd.f32 %v1009_v36, %v1008_v17  ;;  %v945_v56 = vadd.f32 %v944_v37, %v943_v19  ;;  %v7480_v59 = vmul.f32 0.5, %v996_v42 }
 0x1ac   : > { %v874_v45 = vpop.f32.mrf.mxu0  ;;  %v915_v50 = vpop.f32.mrf.mxu1  ;;  %v948_v57 = vadd.f32 %v947_v48, %v946_v43  ;;  %v1019_v58 = vrot.slane %v1018_v53, 4  ;;  %v7484_v60 = vmul.f32 %v7465_v41, %v7465_v41  ;;  %v961_v7 = vrot.slane %v960_v54, 4 }
 0x1ad   : > { %v988_v62 = vmul.f32 %v7461_v38, %v7461_v38  ;;  %v7488_v63 = vmul.f32 0.5, %v1003_v46  ;;  %v1016_v1 = vrot.slane %v1015_v47, 1  ;;  %v7492_v4 = vmul.f32 %v7475_v52, %v7475_v52 }
 0x1ae   : > { %v949_v0 = vrot.slane %v948_v57, 2  ;;  %v1020_v3 = vadd.f32 %v1019_v58, %v1018_v53  ;;  %v962_v11 = vadd.f32 %v961_v7, %v960_v54  ;;  %v7495_v13 = vadd.f32 %v871_v26, %v572_v39 }
 0x1af   : > { %v1032_v12 = vsel %vm917_vm1, %v988_v62, 0.0  ;;  %v7497_v14 = vmul.f32 0.5, %v945_v56  ;;  %v7503_v25 = vadd.f32 %v912_v31, %v580_v49  ;;  %v1017_v28 = vadd.f32 %v1016_v1, %v1015_v47 }
 0x1b0   : > { %v950_v15 = vadd.f32 %v949_v0, %v948_v57  ;;  %v1021_v17 = vrot.slane %v1020_v3, 2  ;;  %v1033_v19 = vrot.slane %v1032_v12, 4  ;;  %v963_v20 = vrot.slane %v962_v11, 2 }
 0x1b1   : > { %v953_v21 = vsel %vm917_vm1, %v7495_v13, 0.0  ;;  %v987_v24 = vmul.f32 %v7495_v13, %v7495_v13  ;;  %v967_v37 = vsel %vm917_vm1, %v7503_v25, 0.0  ;;  %v1057_v39 = vmul.f32 %v7497_v14, %v7497_v14 }
 0x1b2   : > { %v951_v29 = vrot.slane %v950_v15, 1  ;;  %v1022_v32 = vadd.f32 %v1021_v17, %v1020_v3  ;;  %v1034_v33 = vadd.f32 %v1033_v19, %v1032_v12  ;;  %v964_v26 = vadd.f32 %v963_v20, %v962_v11 }
 0x1b3   : > { %v954_v35 = vrot.slane %v953_v21, 4  ;;  %v1025_v36 = vsel %vm917_vm1, %v987_v24, 0.0  ;;  %v968_v46 = vrot.slane %v967_v37, 4  ;;  %v989_v50 = vmul.f32 %v7503_v25, %v7503_v25 }
 0x1b4   : > { %v952_v40 = vadd.f32 %v951_v29, %v950_v15  ;;  %v1023_v42 = vrot.slane %v1022_v32, 1  ;;  %v1035_v43 = vrot.slane %v1034_v33, 2  ;;  %v965_v44 = vrot.slane %v964_v26, 1 }
 0x1b5   : > { %v955_v31 = vadd.f32 %v954_v35, %v953_v21  ;;  %v1026_v45 = vrot.slane %v1025_v36, 4  ;;  %v969_v57 = vadd.f32 %v968_v46, %v967_v37  ;;  %v1049_v58 = vmul.f32 0.5, %v1017_v28 }
 0x1b6   : > { %v7510_v47 = vmul.f32 0.5, %v952_v40  ;;  %v1024_v48 = vadd.f32 %v1023_v42, %v1022_v32  ;;  %v1036_v49 = vadd.f32 %v1035_v43, %v1034_v33  ;;  %v966_v53 = vadd.f32 %v965_v44, %v964_v26 }
 0x1b7   : > { %v956_v54 = vrot.slane %v955_v31, 2  ;;  %v1027_v56 = vadd.f32 %v1026_v45, %v1025_v36  ;;  %v970_v12 = vrot.slane %v969_v57, 2  ;;  %v1048_v15 = vmul.f32 0.5, %v1010_v55 }
 0x1b8   : > { %v1050_v7 = vmul.f32 0.5, %v1024_v48  ;;  %v1058_v62 = vmul.f32 %v7510_v47, %v7510_v47  ;;  %v1037_v1 = vrot.slane %v1036_v49, 1  ;;  %v7516_v0 = vmul.f32 0.5, %v966_v53 }
 0x1b9   : > { %v957_v3 = vadd.f32 %v956_v54, %v955_v31  ;;  %v1028_v11 = vrot.slane %v1027_v56, 2  ;;  %v1056_v20 = vmul.f32 %v7473_v51, %v7473_v51  ;;  %v1039_v28 = vsel %vm917_vm1, %v989_v50, 0.0 }
 0x1ba   : > { %v1066_v17 = vsub.f32 %v1050_v7, %v1058_v62  ;;  %v1038_v19 = vadd.f32 %v1037_v1, %v1036_v49  ;;  %v1060_v21 = vmul.f32 %v7516_v0, %v7516_v0  ;;  %v1063_v29 = vsub.f32 %v7488_v63, %v7492_v4 }
 0x1bb   : > { %v958_v24 = vrot.slane %v957_v3, 1  ;;  %v1029_v26 = vadd.f32 %v1028_v11, %v1027_v56  ;;  %v1062_v55 = vsub.f32 %v7480_v59, %v7484_v60  ;;  %v1065_v35 = vsub.f32 %v1049_v58, %v1057_v39 }
 0x1bc   : > { %v1074_v32 = vmax.f32 %v1066_v17, 0.0  ;;  %v1052_v33 = vmul.f32 0.5, %v1038_v19  ;;  %v971_v37 = vadd.f32 %v970_v12, %v969_v57  ;;  %v1040_v43 = vrot.slane %v1039_v28, 4  ;;  %v1094_v17 = vld [vmem:[#allocation6] sm:$0xff] }
 0x1bd   : > { %v959_v36 = vadd.f32 %v958_v24, %v957_v3  ;;  %v1064_v44 = vsub.f32 %v1048_v15, %v1056_v20  ;;  %v1071_v45 = vmax.f32 %v1063_v29, 0.0  ;;  %v1030_v48 = vrot.slane %v1029_v26, 1 }
 0x1be   : > { %v1082_v40 = vadd.f32 1e-05, %v1074_v32  ;;  %v1068_v42 = vsub.f32 %v1052_v33, %v1060_v21  ;;  %v1070_v63 = vmax.f32 %v1062_v55, 0.0  ;;  %v1073_v4 = vmax.f32 %v1065_v35, 0.0 }
 0x1bf   : > { %v7527_v31 = vmul.f32 0.5, %v959_v36  ;;  %v972_v49 = vrot.slane %v971_v37, 1  ;;  %v1031_v53 = vadd.f32 %v1030_v48, %v1029_v26  ;;  %v1041_v60 = vadd.f32 %v1040_v43, %v1039_v28 }
 0x1c0   : > { %6720 = vrsqrt.f32 %v1082_v40  ;;  %v1076_v46 = vmax.f32 %v1068_v42, 0.0  ;;  %v1072_v39 = vmax.f32 %v1064_v44, 0.0  ;;  %v1079_v56 = vadd.f32 1e-05, %v1071_v45 }
 0x1c1   : > { %v1059_v59 = vmul.f32 %v7527_v31, %v7527_v31  ;;  %v973_v54 = vadd.f32 %v972_v49, %v971_v37  ;;  %v1051_v57 = vmul.f32 0.5, %v1031_v53  ;;  %v1081_v58 = vadd.f32 1e-05, %v1073_v4 }
 0x1c2   : > { %v1084_v50 = vadd.f32 1e-05, %v1076_v46  ;;  %v1042_v7 = vrot.slane %v1041_v60, 2  ;;  %v1078_v62 = vadd.f32 1e-05, %v1070_v63  ;;  %v1115_v20 = vrot.slane %v1094_v17, %v7444_v61 }
 0x1c3   : > { %v1067_v1 = vsub.f32 %v1051_v57, %v1059_v59  ;;  %v1080_v3 = vadd.f32 1e-05, %v1072_v39  ;;  %v981_v11 = vmul.f32 0.5, %v973_v54  ;;  %v1123_v26 = vrot.slane %v1094_v17, %v7447_v2 }
 0x1c4   : > { %6722 = vrsqrt.f32 %v1084_v50  ;;  %v1043_v12 = vadd.f32 %v1042_v7, %v1041_v60  ;;  %v1103_v46 = vrot.slane %v1094_v17, %v7402_v9  ;;  %v1111_v48 = vrot.slane %v1094_v17, %v7405_v10 }
 0x1c5   : > { %6724 = vrsqrt.f32 %v1079_v56  ;;  %v1075_v15 = vmax.f32 %v1067_v1, 0.0  ;;  %v1061_v28 = vmul.f32 %v981_v11, %v981_v11  ;;  %v1099_v50 = vrot.slane %v1094_v17, %v7394_v6 }
 0x1c6   : > { %6726 = vrsqrt.f32 %v1081_v58  ;;  %v1044_v19 = vrot.slane %v1043_v12, 1  ;;  %v1119_v53 = vrot.slane %v1094_v17, %v7454_v23  ;;  %v7029_v54 = vmov 1966171168  }
 0x1c7   : > { %6728 = vrsqrt.f32 %v1078_v62  ;;  %v1083_v21 = vadd.f32 1e-05, %v1075_v15  ;;  %v1206_v56 = vunpack.c.l.s4 %v7029_v54 }
 0x1c8   : > { %6730 = vrsqrt.f32 %v1080_v3  ;;  %v1045_v24 = vadd.f32 %v1044_v19, %v1043_v12 }
 0x1c9   : > { %6732 = vrsqrt.f32 %v1083_v21 }
 0x1ca   : > { %v1053_v32 = vmul.f32 0.5, %v1045_v24 }
 0x1cc   : > { %v1069_v55 = vsub.f32 %v1053_v32, %v1061_v28 }
 0x1cd   : > { %v6721_v29 = vpop.eup %6720 }
 0x1ce   : > { %v1140_v33 = vmul.f32 %v6721_v29, %v1115_v20  ;;  %v1077_v37 = vmax.f32 %v1069_v55, 0.0  ;;  %v1127_v20 = vrot.slane %v1094_v17, %v7457_v30 }
 0x1d0   : > { %v1163_v35 = vrot.slane %v1140_v33, %v7394_v6  ;;  %v1085_v43 = vadd.f32 1e-05, %v1077_v37  ;;  %v1189_v29 = vmul.f32 %v1140_v33, %v7510_v47 }
 0x1d1   : > { %v6723_v36 = vpop.eup %6722 }
 0x1d2   : > { %v7535_v40 = vmul.f32 %v1163_v35, %v7459_v34  ;;  %v1142_v42 = vmul.f32 %v6723_v36, %v1123_v26  ;;  %v6725_v45 = vpop.eup %6724  ;;  %6734 = vrsqrt.f32 %v1085_v43  ;;  %v1107_v34 = vrot.slane %v1094_v17, %v7399_v8 }
 0x1d3   : > { %v6727_v63 = vpop.eup %6726  ;;  %v1137_v39 = vmul.f32 %v6725_v45, %v1103_v46  ;;  %v1184_v45 = vld [vmem:[#allocation7] sm:$0xff] }
 0x1d4   : > { %v1171_v44 = vrot.slane %v1142_v42, %v7394_v6  ;;  %v6729_v49 = vpop.eup %6728  ;;  %v1139_v57 = vmul.f32 %v6727_v63, %v1111_v48 }
 0x1d5   : > { %v6731_v59 = vpop.eup %6730  ;;  %v1136_v58 = vmul.f32 %v6729_v49, %v1099_v50  ;;  %v1186_v1 = vmul.f32 %v1137_v39, %v7475_v52 }
 0x1d6   : > { %v7541_v4 = vmul.f32 %v1171_v44, %v7461_v38  ;;  %v6733_v60 = vpop.eup %6732  ;;  %v1138_v7 = vmul.f32 %v6731_v59, %v1107_v34  ;;  %v1207_v38 = vunpack.c.0.s8 %v1206_v56  ;;  %v1188_v3 = vmul.f32 %v1139_v57, %v7497_v14 }
 0x1d7   : > { %v1141_v62 = vmul.f32 %v6733_v60, %v1119_v53  ;;  %v1185_v12 = vmul.f32 %v1136_v58, %v7465_v41  ;;  %v1147_v37 = vrot.slane %v1136_v58, %v7394_v6  ;;  %v1151_v44 = vrot.slane %v1137_v39, %v7394_v6 }
 0x1d8   : > { %v1187_v15 = vmul.f32 %v1138_v7, %v7473_v51  ;;  %v7553_v24 = vsub.s32 %v1207_v38, %v7391_v5  ;;  %v1191_v51 = vmul.f32 %v1142_v42, %v7516_v0  ;;  %v1155_v47 = vrot.slane %v1138_v7, %v7394_v6 }
 0x1d9   : > { %v1190_v19 = vmul.f32 %v1141_v62, %v7527_v31  ;;  %v1201_v21 = vcombine.low %v1185_v12, %v1186_v1  ;;  %v1159_v0 = vrot.slane %v1139_v57, %v7394_v6  ;;  %v1176_v48 = vmul.f32 %v1147_v37, %v7415_v16  ;;  %v6199_v37 = vld [vmem:[%s7308_s30 + $0xb64] ss:$28 sps:$4 sm:$0xff]  }
 0x1da   : > { %v1202_v28 = vcombine.low %v1187_v15, %v1188_v3  ;;  %v1178_v63 = vmul.f32 %v1155_v47, %v7417_v18  ;;  %v1177_v50 = vmul.f32 %v1151_v44, %v7423_v22  ;;  %v6194_v47 = vld [vmem:[%s7308_s30 + $0x7e0] ss:$28 sps:$4 sm:$0xff]   ;;  %v6205_v44 = vld [vmem:[%s7308_s30 + $0xb2c] ss:$28 sps:$4 sm:$0xff]  }
 0x1db   : > { %v1203_v52 = vcombine.low %v1189_v29, %v1190_v19  ;;  %v1211_v14 = vrot.slane %v1201_v21, %v7553_v24  ;;  %v1179_v34 = vmul.f32 %v1159_v0, %v7429_v27  ;;  %v6176_v29 = vld [vmem:[%s7308_s30 + $0x888] ss:$28 sps:$4 sm:$0xff]  }
 0x1dc   : > { %v1218_v41 = vrot.slane %v1202_v28, %v7553_v24  ;;  %v6200_v0 = vld [vmem:[%s7308_s30 + $0x7a8] ss:$28 sps:$4 sm:$0xff]  }
 0x1dd   : > { %v1225_v31 = vrot.slane %v1203_v52, %v7553_v24  ;;  %v6184_v52 = vld [vmem:[%s7308_s30 + $0x854] ss:$28 sps:$4 sm:$0xff]  }
 0x1de   : > { %v1233_v35 = vcombine.low %v1211_v14, %v1218_v41 }
 0x1df   : > { %v6735_v32 = vpop.eup %6734 }
 0x1e0   : > { %v1143_v26 = vmul.f32 %v6735_v32, %v1127_v20  ;;  %v1241_v33 = vrot.slane %v1233_v35, %v7553_v24  ;;  %v6188_v35 = vld [vmem:[%s7308_s30 + $0x818] ss:$28 sps:$4 sm:$0xff]  }
 0x1e2   : > { %v1192_v55 = vmul.f32 %v1143_v26, %v981_v11  ;;  %v1167_v11 = vrot.slane %v1141_v62, %v7394_v6  ;;  %v1175_v42 = vrot.slane %v1143_v26, %v7394_v6  ;;  %v6187_v26 = vld [vmem:[%s7308_s30 + $0xbd4] ss:$28 sps:$4 sm:$0xff]  }
 0x1e4   : > { %v1204_v17 = vcombine.low %v1191_v51, %v1192_v55  ;;  %v1181_v53 = vmul.f32 %v1167_v11, %v7495_v13  ;;  %v1183_v59 = vmul.f32 %v1175_v42, %v7503_v25  ;;  %v6182_v51 = vld [vmem:[%s7308_s30 + $0x850] ss:$28 sps:$4 sm:$0xff]   ;;  %v6203_v11 = vld [vmem:[%s7308_s30 + $0xb28] ss:$28 sps:$4 sm:$0xff]  }
 0x1e5   : > { %v6185_v55 = vld [vmem:[%s7308_s30 + $0xbd0] ss:$28 sps:$4 sm:$0xff]  }
 0x1e6   : > { %v1232_v5 = vrot.slane %v1204_v17, %v7553_v24  ;;  %v6193_v17 = vld [vmem:[%s7308_s30 + $0xb9c] ss:$28 sps:$4 sm:$0xff]   ;;  %v6208_v42 = vld [vmem:[%s7308_s30 + $0x774] ss:$28 sps:$4 sm:$0xff]  }
 0x1e8   : > { %v1234_v36 = vcombine.low %v1225_v31, %v1232_v5  ;;  %v6190_v31 = vld [vmem:[%s7308_s30 + $0x81c] ss:$28 sps:$4 sm:$0xff]  }
 0x1e9   : > { %v6191_v5 = vld [vmem:[%s7308_s30 + $0xb98] ss:$28 sps:$4 sm:$0xff]  }
 0x1ea   : > { %v1248_v43 = vrot.slane %v1234_v36, %v7553_v24  ;;  %v6196_v36 = vld [vmem:[%s7308_s30 + $0x7e4] ss:$28 sps:$4 sm:$0xff]  }
 0x1ec   : > { %v1249_v46 = vcombine.low %v1241_v33, %v1248_v43  ;;  %v6197_v33 = vld [vmem:[%s7308_s30 + $0xb60] ss:$28 sps:$4 sm:$0xff]   ;;  %v6202_v43 = vld [vmem:[%s7308_s30 + $0x7ac] ss:$28 sps:$4 sm:$0xff]  }
 0x1ee   : > { %v1251_v49 = vsub.f32 %v1184_v45, %v1249_v46  ;;  %v6211_v45 = vld [vmem:[%s7308_s30 + $0xaf4] ss:$28 sps:$4 sm:$0xff]  }
 0x1ef   : > { %v6206_v46 = vld [vmem:[%s7308_s30 + $0x770] ss:$28 sps:$4 sm:$0xff]  }
 0x1f0   : > { %v1284_v60 = vrot.slane %v1251_v49, %v7457_v30  ;;  %v1260_v39 = vrot.slane %v1251_v49, %v7402_v9  ;;  %v1268_v54 = vrot.slane %v1251_v49, %v7405_v10  ;;  %v1256_v56 = vrot.slane %v1251_v49, %v7394_v6 }
 0x1f1   : > { %v1264_v16 = vrot.slane %v1251_v49, %v7399_v8  ;;  %v1276_v18 = vrot.slane %v1251_v49, %v7454_v23  ;;  %v1272_v22 = vrot.slane %v1251_v49, %v7444_v61  ;;  %v1280_v27 = vrot.slane %v1251_v49, %v7447_v2  ;;  %v6217_v49 = vld [vmem:[%s7308_s30 + $0xabc] ss:$28 sps:$4 sm:$0xff]  }
 0x1f2   : > { %v1300_v57 = vadd.f32 %v1284_v60, %v1183_v59  ;;  %v1294_v13 = vadd.f32 %v1260_v39, %v1177_v50  ;;  %v1296_v25 = vadd.f32 %v1268_v54, %v1179_v34  ;;  %v1293_v30 = vadd.f32 %v1256_v56, %v1176_v48  ;;  %v6209_v48 = vld [vmem:[%s7308_s30 + $0xaf0] ss:$28 sps:$4 sm:$0xff]   ;;  %v6212_v50 = vld [vmem:[%s7308_s30 + $0x738] ss:$28 sps:$4 sm:$0xff]   ;;  %v6223_v59 = vld [vmem:[%s7308_s30 + $0xa84] ss:$28 sps:$4 sm:$0xff]  }
 0x1f3   : > { %v1295_v58 = vadd.f32 %v1264_v16, %v1178_v63  ;;  %v1298_v7 = vadd.f32 %v1276_v18, %v1181_v53  ;;  %v7584_v62 = vadd.f32 %v1272_v22, %v7535_v40  ;;  %v7587_v1 = vadd.f32 %v1280_v27, %v7541_v4  ;;  %v6179_v40 = vld [vmem:[%s7308_s30 + $0xc08] ss:$28 sps:$4 sm:$0xff]   ;;  %v6214_v63 = vld [vmem:[%s7308_s30 + $0x73c] ss:$28 sps:$4 sm:$0xff]   ;;  %v6232_v22 = vld [vmem:[%s7308_s30 + $0xa14] ss:$28 sps:$4 sm:$0xff]  }
 0x1f4   : > { %v1302_v38 = vmax.f32 %v1294_v13, 0.0  ;;  %v1304_v3 = vmax.f32 %v1296_v25, 0.0  ;;  %v1301_v12 = vmax.f32 %v1293_v30, 0.0  ;;  %v1308_v15 = vmax.f32 %v1300_v57, 0.0  ;;  %v6215_v34 = vld [vmem:[%s7308_s30 + $0xab8] ss:$28 sps:$4 sm:$0xff]  }
 0x1f5   : > { %v1303_v19 = vmax.f32 %v1295_v58, 0.0  ;;  %v1306_v20 = vmax.f32 %v1298_v7, 0.0  ;;  %v6220_v53 = vld [vmem:[%s7308_s30 + $0x704] ss:$28 sps:$4 sm:$0xff]   ;;  %v6226_v54 = vld [vmem:[%s7308_s30 + $0xa4c] ss:$28 sps:$4 sm:$0xff]  }
 0x1f6   : > { %v7589_v21 = vpack.c.bf16 %v1302_v38, %v1302_v38  ;;  %v7591_v28 = vpack.c.bf16 %v1304_v3, %v1304_v3  ;;  %v7595_v32 = vpack.c.bf16 %v1301_v12, %v1301_v12  ;;  %v7607_v41 = vpack.c.bf16 %v1308_v15, %v1308_v15  ;;  %v6218_v60 = vld [vmem:[%s7308_s30 + $0x700] ss:$28 sps:$4 sm:$0xff]   ;;  %v6229_v56 = vld [vmem:[%s7308_s30 + $0xdcc] ss:$28 sps:$4 sm:$0xff]   ;;  %v6235_v27 = vld [vmem:[%s7308_s30 + $0xd94] ss:$28 sps:$4 sm:$0xff]  }
 0x1f7   : > { %v7597_v4 = vpack.c.bf16 %v1303_v19, %v1303_v19  ;;  %v7605_v14 = vpack.c.bf16 %v1306_v20, %v1306_v20  ;;  %v6221_v39 = vld [vmem:[%s7308_s30 + $0xa80] ss:$28 sps:$4 sm:$0xff]   ;;  %v6224_v16 = vld [vmem:[%s7308_s30 + $0xa48] ss:$28 sps:$4 sm:$0xff]   ;;  %v6230_v57 = vld [vmem:[%s7308_s30 + $0xa10] ss:$28 sps:$4 sm:$0xff]  }
 0x1f8   : > { %4202 = vmatprep.mubr.bf16.mxu0 %v7589_v21  ;;  %4243 = vmatprep.mubr.bf16.mxu1 %v7591_v28  ;;  %v6227_v18 = vld [vmem:[%s7308_s30 + $0xdc8] ss:$28 sps:$4 sm:$0xff]   ;;  %v6233_v13 = vld [vmem:[%s7308_s30 + $0xd90] ss:$28 sps:$4 sm:$0xff]   ;;  %v6238_v25 = vld [vmem:[%s7308_s30 + $0x9dc] ss:$28 sps:$4 sm:$0xff]  }
 0x1f9   : > { %4203 = vmatmul.mubr.bf16.vlgmr.msra.gmra.mxu0 %v7595_v32  ;;  %4244 = vmatmul.mubr.bf16.vlgmr.msra.gmra.mxu1 %v7597_v4  ;;  %v6241_v30 = vld [vmem:[%s7308_s30 + $0xd5c] ss:$28 sps:$4 sm:$0xff]   ;;  %v6244_v38 = vld [vmem:[%s7308_s30 + $0x9a4] ss:$28 sps:$4 sm:$0xff]   ;;  %v6250_v19 = vld [vmem:[%s7308_s30 + $0x96c] ss:$28 sps:$4 sm:$0xff]  }
 0x1fa   : > { %4253 = vmatpush1.bf16.msra.mxu0 %v6176_v29  ;;  %4294 = vmatpush1.bf16.msra.mxu1 %v6179_v40  ;;  %v6236_v58 = vld [vmem:[%s7308_s30 + $0x9d8] ss:$28 sps:$4 sm:$0xff]   ;;  %v6247_v3 = vld [vmem:[%s7308_s30 + $0xd24] ss:$28 sps:$4 sm:$0xff]   ;;  %v6253_v20 = vld [vmem:[%s7308_s30 + $0xcec] ss:$28 sps:$4 sm:$0xff]  }
 0x1fb   : > { %4284 = vmatprep.mubr.bf16.mxu0 %v7605_v14  ;;  %4325 = vmatprep.mubr.bf16.mxu1 %v7607_v41  ;;  %v6239_v7 = vld [vmem:[%s7308_s30 + $0xd58] ss:$28 sps:$4 sm:$0xff]   ;;  %v6242_v12 = vld [vmem:[%s7308_s30 + $0x9a0] ss:$28 sps:$4 sm:$0xff]   ;;  %v6248_v29 = vld [vmem:[%s7308_s30 + $0x968] ss:$28 sps:$4 sm:$0xff]  }
 0x1fc   : > { %4254 = vmatprep.subr.bf16.mxu0 %v6184_v52  ;;  %4295 = vmatprep.subr.bf16.mxu1 %v6187_v26  ;;  %v6245_v15 = vld [vmem:[%s7308_s30 + $0xd20] ss:$28 sps:$4 sm:$0xff]   ;;  %v6251_v40 = vld [vmem:[%s7308_s30 + $0xce8] ss:$28 sps:$4 sm:$0xff]   ;;  %v6256_v52 = vld [vmem:[%s7308_s30 + $0x934] ss:$28 sps:$4 sm:$0xff]  }
 0x1fd   : > { %v6259_v26 = vld [vmem:[%s7308_s30 + $0xcb4] ss:$28 sps:$4 sm:$0xff]  }
 0x1fe   : > { %4255 = vmatpush1.bf16.msra.mxu0 %v6182_v51  ;;  %4296 = vmatpush1.bf16.msra.mxu1 %v6185_v55  ;;  %v6254_v51 = vld [vmem:[%s7308_s30 + $0x930] ss:$28 sps:$4 sm:$0xff]  }
 0x1ff   : > { %4256 = vmatprep.subr.bf16.mxu0 %v6190_v31  ;;  %4297 = vmatprep.subr.bf16.mxu1 %v6193_v17  ;;  %v6257_v55 = vld [vmem:[%s7308_s30 + $0xcb0] ss:$28 sps:$4 sm:$0xff]   ;;  %v6262_v31 = vld [vmem:[%s7308_s30 + $0x8fc] ss:$28 sps:$4 sm:$0xff]  }
 0x200   : > { %v6265_v17 = vld [vmem:[%s7308_s30 + $0xc7c] ss:$28 sps:$4 sm:$0xff]  }
 0x202   : > { %4257 = vmatpush1.bf16.msra.mxu0 %v6188_v35  ;;  %4298 = vmatpush1.bf16.msra.mxu1 %v6191_v5  ;;  %v6260_v35 = vld [vmem:[%s7308_s30 + $0x8f8] ss:$28 sps:$4 sm:$0xff]  }
 0x203   : > { %4258 = vmatprep.subr.bf16.mxu0 %v6196_v36  ;;  %4299 = vmatprep.subr.bf16.mxu1 %v6199_v37  ;;  %v6263_v5 = vld [vmem:[%s7308_s30 + $0xc78] ss:$28 sps:$4 sm:$0xff]   ;;  %v6268_v36 = vld [vmem:[%s7308_s30 + $0x8c4] ss:$28 sps:$4 sm:$0xff]  }
 0x204   : > { %v6271_v37 = vld [vmem:[%s7308_s30 + $0xc44] ss:$28 sps:$4 sm:$0xff]  }
 0x206   : > { %4259 = vmatpush1.bf16.msra.mxu0 %v6194_v47  ;;  %4300 = vmatpush1.bf16.msra.mxu1 %v6197_v33  ;;  %v6266_v47 = vld [vmem:[%s7308_s30 + $0x8c0] ss:$28 sps:$4 sm:$0xff]  }
 0x207   : > { %4260 = vmatprep.subr.bf16.mxu0 %v6202_v43  ;;  %4301 = vmatprep.subr.bf16.mxu1 %v6205_v44  ;;  %v6269_v33 = vld [vmem:[%s7308_s30 + $0xc40] ss:$28 sps:$4 sm:$0xff]   ;;  %v1305_v43 = vmax.f32 %v7584_v62, 0.0  ;;  %v1307_v44 = vmax.f32 %v7587_v1, 0.0  ;;  %v6278_v1 = vld [vmem:[%s7308_s30 + $0x158] ss:$28 sps:$4 sm:$0xff]  }
 0x208   : > { %v6280_v62 = vld [vmem:[%s7308_s30 + $0x15c] ss:$28 sps:$4 sm:$0xff]  }
 0x20a   : > { %4261 = vmatpush1.bf16.msra.mxu0 %v6200_v0  ;;  %4302 = vmatpush1.bf16.msra.mxu1 %v6203_v11  ;;  %v6274_v0 = vld [vmem:[%s7308_s30 + $0x194] ss:$28 sps:$4 sm:$0xff]  }
 0x20b   : > { %4262 = vmatprep.subr.bf16.mxu0 %v6208_v42  ;;  %4303 = vmatprep.subr.bf16.mxu1 %v6211_v45  ;;  %v6277_v11 = vld [vmem:[%s7308_s30 + $0x514] ss:$28 sps:$4 sm:$0xff]   ;;  %v7674_v45 = vpack.c.bf16 %v1305_v43, %v1305_v43  ;;  %v6338_v43 = vld [vmem:[%s7308_s30 + $0x2a8] ss:$28 sps:$4 sm:$0xff]  }
 0x20c   : > { %v6272_v42 = vld [vmem:[%s7308_s30 + $0x190] ss:$28 sps:$4 sm:$0xff]  }
 0x20e   : > { %4263 = vmatpush1.bf16.msra.mxu0 %v6206_v46  ;;  %4304 = vmatpush1.bf16.msra.mxu1 %v6209_v48  ;;  %v7676_v46 = vpack.c.bf16 %v1307_v44, %v1307_v44  ;;  %v6275_v48 = vld [vmem:[%s7308_s30 + $0x510] ss:$28 sps:$4 sm:$0xff]   ;;  %v6341_v44 = vld [vmem:[%s7308_s30 + $0x628] ss:$28 sps:$4 sm:$0xff]  }
 0x20f   : > { %4264 = vmatprep.subr.bf16.mxu0 %v6214_v63  ;;  %4305 = vmatprep.subr.bf16.mxu1 %v6217_v49  ;;  %v6283_v63 = vld [vmem:[%s7308_s30 + $0x4dc] ss:$28 sps:$4 sm:$0xff]  }
 0x210   : > { %v6281_v49 = vld [vmem:[%s7308_s30 + $0x4d8] ss:$28 sps:$4 sm:$0xff]  }
 0x212   : > { %4265 = vmatpush1.bf16.msra.mxu0 %v6212_v50  ;;  %4306 = vmatpush1.bf16.msra.mxu1 %v6215_v34  ;;  %v6286_v50 = vld [vmem:[%s7308_s30 + $0x124] ss:$28 sps:$4 sm:$0xff]  }
 0x213   : > { %4266 = vmatprep.subr.bf16.mxu0 %v6220_v53  ;;  %4307 = vmatprep.subr.bf16.mxu1 %v6223_v59  ;;  %v6289_v34 = vld [vmem:[%s7308_s30 + $0x4a4] ss:$28 sps:$4 sm:$0xff]  }
 0x214   : > { %v6284_v53 = vld [vmem:[%s7308_s30 + $0x120] ss:$28 sps:$4 sm:$0xff]  }
 0x215   : > { %v6287_v59 = vld [vmem:[%s7308_s30 + $0x4a0] ss:$28 sps:$4 sm:$0xff]  }
 0x216   : > { %4267 = vmatpush1.bf16.msra.mxu0 %v6218_v60  ;;  %4308 = vmatpush1.bf16.msra.mxu1 %v6221_v39  ;;  %v6292_v60 = vld [vmem:[%s7308_s30 + $0xec] ss:$28 sps:$4 sm:$0xff]  }
 0x217   : > { %4268 = vmatprep.subr.bf16.mxu0 %v6226_v54  ;;  %4309 = vmatprep.subr.bf16.mxu1 %v6229_v56  ;;  %v6295_v39 = vld [vmem:[%s7308_s30 + $0x46c] ss:$28 sps:$4 sm:$0xff]  }
 0x218   : > { %v6290_v54 = vld [vmem:[%s7308_s30 + $0xe8] ss:$28 sps:$4 sm:$0xff]  }
 0x219   : > { %v6293_v56 = vld [vmem:[%s7308_s30 + $0x468] ss:$28 sps:$4 sm:$0xff]  }
 0x21a   : > { %4269 = vmatpush2.bf16.msra.mxu0 %v6224_v16  ;;  %4310 = vmatpush2.bf16.msra.mxu1 %v6227_v18  ;;  %v6298_v16 = vld [vmem:[%s7308_s30 + $0xb4] ss:$28 sps:$4 sm:$0xff]  }
 0x21b   : > { %4270 = vmatprep.subr.bf16.mxu0 %v6232_v22  ;;  %4311 = vmatprep.subr.bf16.mxu1 %v6235_v27  ;;  %v6301_v18 = vld [vmem:[%s7308_s30 + $0x434] ss:$28 sps:$4 sm:$0xff]  }
 0x21c   : > { %v6296_v22 = vld [vmem:[%s7308_s30 + $0xb0] ss:$28 sps:$4 sm:$0xff]  }
 0x21d   : > { %v6299_v27 = vld [vmem:[%s7308_s30 + $0x430] ss:$28 sps:$4 sm:$0xff]  }
 0x21e   : > { %4271 = vmatpush2.bf16.msra.mxu0 %v6230_v57  ;;  %4312 = vmatpush2.bf16.msra.mxu1 %v6233_v13  ;;  %v6304_v57 = vld [vmem:[%s7308_s30 + $0x7c] ss:$28 sps:$4 sm:$0xff]  }
 0x21f   : > { %4272 = vmatprep.subr.bf16.mxu0 %v6238_v25  ;;  %4313 = vmatprep.subr.bf16.mxu1 %v6241_v30  ;;  %v6307_v13 = vld [vmem:[%s7308_s30 + $0x3fc] ss:$28 sps:$4 sm:$0xff]  }
 0x220   : > { %v6302_v25 = vld [vmem:[%s7308_s30 + $0x78] ss:$28 sps:$4 sm:$0xff]  }
 0x221   : > { %v6305_v30 = vld [vmem:[%s7308_s30 + $0x3f8] ss:$28 sps:$4 sm:$0xff]  }
 0x222   : > { %4273 = vmatpush2.bf16.msra.mxu0 %v6236_v58  ;;  %4314 = vmatpush2.bf16.msra.mxu1 %v6239_v7  ;;  %v6310_v58 = vld [vmem:[%s7308_s30 + $0x44] ss:$28 sps:$4 sm:$0xff]  }
 0x223   : > { %4274 = vmatprep.subr.bf16.mxu0 %v6244_v38  ;;  %4315 = vmatprep.subr.bf16.mxu1 %v6247_v3  ;;  %v6313_v7 = vld [vmem:[%s7308_s30 + $0x3c4] ss:$28 sps:$4 sm:$0xff]  }
 0x224   : > { %v6308_v38 = vld [vmem:[%s7308_s30 + $0x40] ss:$28 sps:$4 sm:$0xff]  }
 0x225   : > { %v6311_v3 = vld [vmem:[%s7308_s30 + $0x3c0] ss:$28 sps:$4 sm:$0xff]  }
 0x226   : > { %4275 = vmatpush2.bf16.msra.mxu0 %v6242_v12  ;;  %4316 = vmatpush2.bf16.msra.mxu1 %v6245_v15  ;;  %v6316_v12 = vld [vmem:[%s7308_s30 + $0xc] ss:$28 sps:$4 sm:$0xff]  }
 0x227   : > { %4276 = vmatprep.subr.bf16.mxu0 %v6250_v19  ;;  %4317 = vmatprep.subr.bf16.mxu1 %v6253_v20  ;;  %v6319_v15 = vld [vmem:[%s7308_s30 + $0x38c] ss:$28 sps:$4 sm:$0xff]  }
 0x228   : > { %v6314_v19 = vld [vmem:[%s7308_s30 + $0x8] ss:$28 sps:$4 sm:$0xff]  }
 0x229   : > { %v6317_v20 = vld [vmem:[%s7308_s30 + $0x388] ss:$28 sps:$4 sm:$0xff]  }
 0x22a   : > { %4277 = vmatpush2.bf16.msra.mxu0 %v6248_v29  ;;  %4318 = vmatpush2.bf16.msra.mxu1 %v6251_v40  ;;  %v6322_v29 = vld [vmem:[%s7308_s30 + $0x354] ss:$28 sps:$4 sm:$0xff]  }
 0x22b   : > { %4278 = vmatprep.subr.bf16.mxu0 %v6256_v52  ;;  %4319 = vmatprep.subr.bf16.mxu1 %v6259_v26  ;;  %v6325_v40 = vld [vmem:[%s7308_s30 + $0x6d4] ss:$28 sps:$4 sm:$0xff]  }
 0x22c   : > { %v6320_v52 = vld [vmem:[%s7308_s30 + $0x350] ss:$28 sps:$4 sm:$0xff]  }
 0x22d   : > { %v6323_v26 = vld [vmem:[%s7308_s30 + $0x6d0] ss:$28 sps:$4 sm:$0xff]  }
 0x22e   : > { %4279 = vmatpush2.bf16.msra.mxu0 %v6254_v51  ;;  %4320 = vmatpush2.bf16.msra.mxu1 %v6257_v55  ;;  %v6328_v51 = vld [vmem:[%s7308_s30 + $0x31c] ss:$28 sps:$4 sm:$0xff]  }
 0x22f   : > { %4280 = vmatprep.subr.bf16.mxu0 %v6262_v31  ;;  %4321 = vmatprep.subr.bf16.mxu1 %v6265_v17  ;;  %v6331_v55 = vld [vmem:[%s7308_s30 + $0x69c] ss:$28 sps:$4 sm:$0xff]  }
 0x230   : > { %v6326_v31 = vld [vmem:[%s7308_s30 + $0x318] ss:$28 sps:$4 sm:$0xff]  }
 0x231   : > { %v6329_v17 = vld [vmem:[%s7308_s30 + $0x698] ss:$28 sps:$4 sm:$0xff]  }
 0x232   : > { %4281 = vmatpush2.bf16.msra.mxu0 %v6260_v35  ;;  %4322 = vmatpush2.bf16.msra.mxu1 %v6263_v5  ;;  %v6334_v35 = vld [vmem:[%s7308_s30 + $0x2e4] ss:$28 sps:$4 sm:$0xff]  }
 0x233   : > { %4282 = vmatprep.subr.bf16.mxu0 %v6268_v36  ;;  %4323 = vmatprep.subr.bf16.mxu1 %v6271_v37  ;;  %v6337_v5 = vld [vmem:[%s7308_s30 + $0x664] ss:$28 sps:$4 sm:$0xff]  }
 0x234   : > { %v6332_v36 = vld [vmem:[%s7308_s30 + $0x2e0] ss:$28 sps:$4 sm:$0xff]  }
 0x235   : > { %v6335_v37 = vld [vmem:[%s7308_s30 + $0x660] ss:$28 sps:$4 sm:$0xff]  }
 0x236   : > { %4283 = vmatpush2.bf16.msra.mxu0 %v6266_v47  ;;  %4324 = vmatpush2.bf16.msra.mxu1 %v6269_v33  ;;  %v6340_v47 = vld [vmem:[%s7308_s30 + $0x2ac] ss:$28 sps:$4 sm:$0xff]  }
 0x237   : > { %4334 = vmatprep.subr.bf16.mxu0 %v6274_v0  ;;  %4375 = vmatprep.subr.bf16.mxu1 %v6277_v11  ;;  %v6343_v33 = vld [vmem:[%s7308_s30 + $0x62c] ss:$28 sps:$4 sm:$0xff]   ;;  %v6346_v0 = vld [vmem:[%s7308_s30 + $0x274] ss:$28 sps:$4 sm:$0xff]  }
 0x238   : > { %v6349_v11 = vld [vmem:[%s7308_s30 + $0x5f4] ss:$28 sps:$4 sm:$0xff]  }
 0x239   : > { %4285 = vmatmul.mubr.bf16.vlgmr.msra.gmra.mxu0 %v7674_v45  ;;  %4326 = vmatmul.mubr.bf16.vlgmr.msra.gmra.mxu1 %v7676_v46 }
 0x23a   : > { %4335 = vmatpush1.bf16.msra.mxu0 %v6272_v42  ;;  %4366 = vmatprep.mubr.bf16.mxu0 %v7589_v21  ;;  %v6344_v42 = vld [vmem:[%s7308_s30 + $0x270] ss:$28 sps:$4 sm:$0xff]  }
 0x23b   : > { %4376 = vmatpush1.bf16.msra.mxu1 %v6275_v48  ;;  %4407 = vmatprep.mubr.bf16.mxu1 %v7591_v28  ;;  %v6347_v48 = vld [vmem:[%s7308_s30 + $0x5f0] ss:$28 sps:$4 sm:$0xff]  }
 0x23c   : > { %4336 = vmatprep.subr.bf16.mxu0 %v6280_v62  ;;  %4377 = vmatprep.subr.bf16.mxu1 %v6283_v63  ;;  %v6352_v62 = vld [vmem:[%s7308_s30 + $0x23c] ss:$28 sps:$4 sm:$0xff]  }
 0x23d   : > { %v6355_v63 = vld [vmem:[%s7308_s30 + $0x5bc] ss:$28 sps:$4 sm:$0xff]  }
 0x23e   : > { %4337 = vmatpush1.bf16.msra.mxu0 %v6278_v1  ;;  %v6350_v1 = vld [vmem:[%s7308_s30 + $0x238] ss:$28 sps:$4 sm:$0xff]  }
 0x23f   : > { %4378 = vmatpush1.bf16.msra.mxu1 %v6281_v49  ;;  %4338 = vmatprep.subr.bf16.mxu0 %v6286_v50  ;;  %v6353_v49 = vld [vmem:[%s7308_s30 + $0x5b8] ss:$28 sps:$4 sm:$0xff]   ;;  %v6358_v50 = vld [vmem:[%s7308_s30 + $0x204] ss:$28 sps:$4 sm:$0xff]  }
 0x240   : > { %4379 = vmatprep.subr.bf16.mxu1 %v6289_v34  ;;  %v6361_v34 = vld [vmem:[%s7308_s30 + $0x584] ss:$28 sps:$4 sm:$0xff]  }
 0x242   : > { %4339 = vmatpush1.bf16.msra.mxu0 %v6284_v53  ;;  %v6356_v53 = vld [vmem:[%s7308_s30 + $0x200] ss:$28 sps:$4 sm:$0xff]  }
 0x243   : > { %4380 = vmatpush1.bf16.msra.mxu1 %v6287_v59  ;;  %4340 = vmatprep.subr.bf16.mxu0 %v6292_v60  ;;  %v6359_v59 = vld [vmem:[%s7308_s30 + $0x580] ss:$28 sps:$4 sm:$0xff]   ;;  %v6364_v60 = vld [vmem:[%s7308_s30 + $0x1cc] ss:$28 sps:$4 sm:$0xff]  }
 0x244   : > { %4381 = vmatprep.subr.bf16.mxu1 %v6295_v39  ;;  %v6367_v39 = vld [vmem:[%s7308_s30 + $0x54c] ss:$28 sps:$4 sm:$0xff]  }
 0x246   : > { %4341 = vmatpush1.bf16.msra.mxu0 %v6290_v54  ;;  %v6362_v54 = vld [vmem:[%s7308_s30 + $0x1c8] ss:$28 sps:$4 sm:$0xff]  }
 0x247   : > { %4382 = vmatpush1.bf16.msra.mxu1 %v6293_v56  ;;  %4342 = vmatprep.subr.bf16.mxu0 %v6298_v16  ;;  %v6365_v56 = vld [vmem:[%s7308_s30 + $0x548] ss:$28 sps:$4 sm:$0xff]   ;;  %v6370_v16 = vld [vmem:[%s7308_s30 + $0x894] ss:$28 sps:$4 sm:$0xff]  }
 0x248   : > { %4383 = vmatprep.subr.bf16.mxu1 %v6301_v18  ;;  %v6373_v18 = vld [vmem:[%s7308_s30 + $0xc14] ss:$28 sps:$4 sm:$0xff]  }
 0x24a   : > { %4343 = vmatpush1.bf16.msra.mxu0 %v6296_v22  ;;  %v6368_v22 = vld [vmem:[%s7308_s30 + $0x890] ss:$28 sps:$4 sm:$0xff]  }
 0x24b   : > { %4384 = vmatpush1.bf16.msra.mxu1 %v6299_v27  ;;  %4344 = vmatprep.subr.bf16.mxu0 %v6304_v57  ;;  %v6371_v27 = vld [vmem:[%s7308_s30 + $0xc10] ss:$28 sps:$4 sm:$0xff]   ;;  %v6376_v57 = vld [vmem:[%s7308_s30 + $0x85c] ss:$28 sps:$4 sm:$0xff]  }
 0x24c   : > { %4385 = vmatprep.subr.bf16.mxu1 %v6307_v13  ;;  %v6379_v13 = vld [vmem:[%s7308_s30 + $0xbdc] ss:$28 sps:$4 sm:$0xff]  }
 0x24e   : > { %4345 = vmatpush1.bf16.msra.mxu0 %v6302_v25  ;;  %v6374_v25 = vld [vmem:[%s7308_s30 + $0x858] ss:$28 sps:$4 sm:$0xff]  }
 0x24f   : > { %4386 = vmatpush1.bf16.msra.mxu1 %v6305_v30  ;;  %4346 = vmatprep.subr.bf16.mxu0 %v6310_v58  ;;  %v6377_v30 = vld [vmem:[%s7308_s30 + $0xbd8] ss:$28 sps:$4 sm:$0xff]   ;;  %v6382_v58 = vld [vmem:[%s7308_s30 + $0x824] ss:$28 sps:$4 sm:$0xff]  }
 0x250   : > { %4387 = vmatprep.subr.bf16.mxu1 %v6313_v7  ;;  %v6385_v7 = vld [vmem:[%s7308_s30 + $0xba4] ss:$28 sps:$4 sm:$0xff]  }
 0x252   : > { %4347 = vmatpush1.bf16.msra.mxu0 %v6308_v38  ;;  %v6380_v38 = vld [vmem:[%s7308_s30 + $0x820] ss:$28 sps:$4 sm:$0xff]  }
 0x253   : > { %4388 = vmatpush1.bf16.msra.mxu1 %v6311_v3  ;;  %4348 = vmatprep.subr.bf16.mxu0 %v6316_v12  ;;  %v6383_v3 = vld [vmem:[%s7308_s30 + $0xba0] ss:$28 sps:$4 sm:$0xff]   ;;  %v6388_v12 = vld [vmem:[%s7308_s30 + $0x7ec] ss:$28 sps:$4 sm:$0xff]  }
 0x254   : > { %4389 = vmatprep.subr.bf16.mxu1 %v6319_v15  ;;  %v6391_v15 = vld [vmem:[%s7308_s30 + $0xb6c] ss:$28 sps:$4 sm:$0xff]  }
 0x256   : > { %4349 = vmatpush1.bf16.msra.mxu0 %v6314_v19  ;;  %v6386_v19 = vld [vmem:[%s7308_s30 + $0x7e8] ss:$28 sps:$4 sm:$0xff]  }
 0x257   : > { %4390 = vmatpush1.bf16.msra.mxu1 %v6317_v20  ;;  %4350 = vmatprep.subr.bf16.mxu0 %v6322_v29  ;;  %v6389_v20 = vld [vmem:[%s7308_s30 + $0xb68] ss:$28 sps:$4 sm:$0xff]   ;;  %v6394_v29 = vld [vmem:[%s7308_s30 + $0x7b4] ss:$28 sps:$4 sm:$0xff]  }
 0x258   : > { %4391 = vmatprep.subr.bf16.mxu1 %v6325_v40  ;;  %v6397_v40 = vld [vmem:[%s7308_s30 + $0xb34] ss:$28 sps:$4 sm:$0xff]  }
 0x25a   : > { %4351 = vmatpush2.bf16.msra.mxu0 %v6320_v52  ;;  %v6392_v52 = vld [vmem:[%s7308_s30 + $0x7b0] ss:$28 sps:$4 sm:$0xff]  }
 0x25b   : > { %4392 = vmatpush2.bf16.msra.mxu1 %v6323_v26  ;;  %4352 = vmatprep.subr.bf16.mxu0 %v6328_v51  ;;  %v6395_v26 = vld [vmem:[%s7308_s30 + $0xb30] ss:$28 sps:$4 sm:$0xff]   ;;  %v6400_v51 = vld [vmem:[%s7308_s30 + $0x77c] ss:$28 sps:$4 sm:$0xff]  }
 0x25c   : > { %4393 = vmatprep.subr.bf16.mxu1 %v6331_v55  ;;  %v6403_v55 = vld [vmem:[%s7308_s30 + $0xafc] ss:$28 sps:$4 sm:$0xff]  }
 0x25e   : > { %4353 = vmatpush2.bf16.msra.mxu0 %v6326_v31  ;;  %v6398_v31 = vld [vmem:[%s7308_s30 + $0x778] ss:$28 sps:$4 sm:$0xff]  }
 0x25f   : > { %4394 = vmatpush2.bf16.msra.mxu1 %v6329_v17  ;;  %4354 = vmatprep.subr.bf16.mxu0 %v6334_v35  ;;  %v6401_v17 = vld [vmem:[%s7308_s30 + $0xaf8] ss:$28 sps:$4 sm:$0xff]   ;;  %v6406_v35 = vld [vmem:[%s7308_s30 + $0x744] ss:$28 sps:$4 sm:$0xff]  }
 0x260   : > { %4395 = vmatprep.subr.bf16.mxu1 %v6337_v5  ;;  %v6409_v5 = vld [vmem:[%s7308_s30 + $0xac4] ss:$28 sps:$4 sm:$0xff]  }
 0x262   : > { %4355 = vmatpush2.bf16.msra.mxu0 %v6332_v36  ;;  %v6404_v36 = vld [vmem:[%s7308_s30 + $0x740] ss:$28 sps:$4 sm:$0xff]  }
 0x263   : > { %4396 = vmatpush2.bf16.msra.mxu1 %v6335_v37  ;;  %4356 = vmatprep.subr.bf16.mxu0 %v6340_v47  ;;  %v6407_v37 = vld [vmem:[%s7308_s30 + $0xac0] ss:$28 sps:$4 sm:$0xff]   ;;  %v6412_v47 = vld [vmem:[%s7308_s30 + $0x70c] ss:$28 sps:$4 sm:$0xff]  }
 0x264   : > { %4397 = vmatprep.subr.bf16.mxu1 %v6343_v33  ;;  %v6415_v33 = vld [vmem:[%s7308_s30 + $0xa8c] ss:$28 sps:$4 sm:$0xff]  }
 0x266   : > { %4357 = vmatpush2.bf16.msra.mxu0 %v6338_v43  ;;  %v6410_v43 = vld [vmem:[%s7308_s30 + $0x708] ss:$28 sps:$4 sm:$0xff]  }
 0x267   : > { %4398 = vmatpush2.bf16.msra.mxu1 %v6341_v44  ;;  %4358 = vmatprep.subr.bf16.mxu0 %v6346_v0  ;;  %v6413_v44 = vld [vmem:[%s7308_s30 + $0xa88] ss:$28 sps:$4 sm:$0xff]   ;;  %v6418_v0 = vld [vmem:[%s7308_s30 + $0xa54] ss:$28 sps:$4 sm:$0xff]  }
 0x268   : > { %4399 = vmatprep.subr.bf16.mxu1 %v6349_v11  ;;  %v6421_v11 = vld [vmem:[%s7308_s30 + $0xdd4] ss:$28 sps:$4 sm:$0xff]  }
 0x26a   : > { %4359 = vmatpush2.bf16.msra.mxu0 %v6344_v42  ;;  %v6416_v42 = vld [vmem:[%s7308_s30 + $0xa50] ss:$28 sps:$4 sm:$0xff]  }
 0x26b   : > { %4400 = vmatpush2.bf16.msra.mxu1 %v6347_v48  ;;  %4360 = vmatprep.subr.bf16.mxu0 %v6352_v62  ;;  %v6419_v48 = vld [vmem:[%s7308_s30 + $0xdd0] ss:$28 sps:$4 sm:$0xff]   ;;  %v6424_v62 = vld [vmem:[%s7308_s30 + $0xa1c] ss:$28 sps:$4 sm:$0xff]  }
 0x26c   : > { %4401 = vmatprep.subr.bf16.mxu1 %v6355_v63  ;;  %v6427_v63 = vld [vmem:[%s7308_s30 + $0xd9c] ss:$28 sps:$4 sm:$0xff]  }
 0x26e   : > { %4361 = vmatpush2.bf16.msra.mxu0 %v6350_v1  ;;  %v6422_v1 = vld [vmem:[%s7308_s30 + $0xa18] ss:$28 sps:$4 sm:$0xff]  }
 0x26f   : > { %4402 = vmatpush2.bf16.msra.mxu1 %v6353_v49  ;;  %4362 = vmatprep.subr.bf16.mxu0 %v6358_v50  ;;  %v6425_v49 = vld [vmem:[%s7308_s30 + $0xd98] ss:$28 sps:$4 sm:$0xff]   ;;  %v6430_v50 = vld [vmem:[%s7308_s30 + $0x9e4] ss:$28 sps:$4 sm:$0xff]  }
 0x270   : > { %4403 = vmatprep.subr.bf16.mxu1 %v6361_v34  ;;  %v6433_v34 = vld [vmem:[%s7308_s30 + $0xd64] ss:$28 sps:$4 sm:$0xff]  }
 0x272   : > { %4363 = vmatpush2.bf16.msra.mxu0 %v6356_v53  ;;  %v6428_v53 = vld [vmem:[%s7308_s30 + $0x9e0] ss:$28 sps:$4 sm:$0xff]  }
 0x273   : > { %4404 = vmatpush2.bf16.msra.mxu1 %v6359_v59  ;;  %4364 = vmatprep.subr.bf16.mxu0 %v6364_v60  ;;  %v6431_v59 = vld [vmem:[%s7308_s30 + $0xd60] ss:$28 sps:$4 sm:$0xff]   ;;  %v6436_v60 = vld [vmem:[%s7308_s30 + $0x9ac] ss:$28 sps:$4 sm:$0xff]  }
 0x274   : > { %4405 = vmatprep.subr.bf16.mxu1 %v6367_v39  ;;  %v6439_v39 = vld [vmem:[%s7308_s30 + $0xd2c] ss:$28 sps:$4 sm:$0xff]  }
 0x276   : > { %4365 = vmatpush2.bf16.msra.mxu0 %v6362_v54  ;;  %v6434_v54 = vld [vmem:[%s7308_s30 + $0x9a8] ss:$28 sps:$4 sm:$0xff]  }
 0x277   : > { %4406 = vmatpush2.bf16.msra.mxu1 %v6365_v56  ;;  %4416 = vmatprep.subr.bf16.mxu0 %v6370_v16  ;;  %v6437_v56 = vld [vmem:[%s7308_s30 + $0xd28] ss:$28 sps:$4 sm:$0xff]   ;;  %v6442_v16 = vld [vmem:[%s7308_s30 + $0x974] ss:$28 sps:$4 sm:$0xff]  }
 0x278   : > { %4457 = vmatprep.subr.bf16.mxu1 %v6373_v18  ;;  %v6445_v18 = vld [vmem:[%s7308_s30 + $0xcf4] ss:$28 sps:$4 sm:$0xff]  }
 0x279   : > { %4367 = vmatmul.mubr.bf16.vlgmr.msra.gmra.mxu0 %v7595_v32 }
 0x27a   : > { %4408 = vmatmul.mubr.bf16.vlgmr.msra.gmra.mxu1 %v7597_v4  ;;  %4417 = vmatpush1.bf16.msra.mxu0 %v6368_v22  ;;  %v6440_v22 = vld [vmem:[%s7308_s30 + $0x970] ss:$28 sps:$4 sm:$0xff]  }
 0x27b   : > { %4448 = vmatprep.mubr.bf16.mxu0 %v7605_v14  ;;  %4458 = vmatpush1.bf16.msra.mxu1 %v6371_v27  ;;  %v6443_v27 = vld [vmem:[%s7308_s30 + $0xcf0] ss:$28 sps:$4 sm:$0xff]  }
 0x27c   : > { %4489 = vmatprep.mubr.bf16.mxu1 %v7607_v41  ;;  %4418 = vmatprep.subr.bf16.mxu0 %v6376_v57  ;;  %v6448_v57 = vld [vmem:[%s7308_s30 + $0x93c] ss:$28 sps:$4 sm:$0xff]  }
 0x27d   : > { %4459 = vmatprep.subr.bf16.mxu1 %v6379_v13  ;;  %v6451_v13 = vld [vmem:[%s7308_s30 + $0xcbc] ss:$28 sps:$4 sm:$0xff]  }
 0x27e   : > { %4419 = vmatpush1.bf16.msra.mxu0 %v6374_v25  ;;  %v6446_v25 = vld [vmem:[%s7308_s30 + $0x938] ss:$28 sps:$4 sm:$0xff]  }
 0x27f   : > { %4460 = vmatpush1.bf16.msra.mxu1 %v6377_v30  ;;  %4420 = vmatprep.subr.bf16.mxu0 %v6382_v58  ;;  %v6449_v30 = vld [vmem:[%s7308_s30 + $0xcb8] ss:$28 sps:$4 sm:$0xff]   ;;  %v6454_v58 = vld [vmem:[%s7308_s30 + $0x904] ss:$28 sps:$4 sm:$0xff]  }
 0x280   : > { %4461 = vmatprep.subr.bf16.mxu1 %v6385_v7  ;;  %v6457_v7 = vld [vmem:[%s7308_s30 + $0xc84] ss:$28 sps:$4 sm:$0xff]  }
 0x282   : > { %4421 = vmatpush1.bf16.msra.mxu0 %v6380_v38  ;;  %v6452_v38 = vld [vmem:[%s7308_s30 + $0x900] ss:$28 sps:$4 sm:$0xff]  }
 0x283   : > { %4462 = vmatpush1.bf16.msra.mxu1 %v6383_v3  ;;  %4422 = vmatprep.subr.bf16.mxu0 %v6388_v12  ;;  %v6455_v3 = vld [vmem:[%s7308_s30 + $0xc80] ss:$28 sps:$4 sm:$0xff]   ;;  %v6460_v12 = vld [vmem:[%s7308_s30 + $0x8cc] ss:$28 sps:$4 sm:$0xff]  }
 0x284   : > { %4463 = vmatprep.subr.bf16.mxu1 %v6391_v15  ;;  %v6463_v15 = vld [vmem:[%s7308_s30 + $0xc4c] ss:$28 sps:$4 sm:$0xff]  }
 0x286   : > { %4423 = vmatpush1.bf16.msra.mxu0 %v6386_v19  ;;  %v6458_v19 = vld [vmem:[%s7308_s30 + $0x8c8] ss:$28 sps:$4 sm:$0xff]  }
 0x287   : > { %4464 = vmatpush1.bf16.msra.mxu1 %v6389_v20  ;;  %4424 = vmatprep.subr.bf16.mxu0 %v6394_v29  ;;  %v6461_v20 = vld [vmem:[%s7308_s30 + $0xc48] ss:$28 sps:$4 sm:$0xff]   ;;  %v6466_v29 = vld [vmem:[%s7308_s30 + $0x19c] ss:$28 sps:$4 sm:$0xff]  }
 0x288   : > { %4465 = vmatprep.subr.bf16.mxu1 %v6397_v40  ;;  %v7819_v40 = vld [vmem:[%s435_s14] sm:$0xff] }
 0x28a   : > { %4425 = vmatpush1.bf16.msra.mxu0 %v6392_v52  ;;  %v6469_v52 = vld [vmem:[%s7308_s30 + $0x51c] ss:$28 sps:$4 sm:$0xff]  }
 0x28b   : > { %4466 = vmatpush1.bf16.msra.mxu1 %v6395_v26  ;;  %4426 = vmatprep.subr.bf16.mxu0 %v6400_v51  ;;  %v6464_v26 = vld [vmem:[%s7308_s30 + $0x198] ss:$28 sps:$4 sm:$0xff]   ;;  %v1834_v51 = vrot.slane %v7819_v40, %v7394_v6 }
 0x28c   : > { %4467 = vmatprep.subr.bf16.mxu1 %v6403_v55  ;;  %v6467_v55 = vld [vmem:[%s7308_s30 + $0x518] ss:$28 sps:$4 sm:$0xff]  }
 0x28e   : > { %4427 = vmatpush1.bf16.msra.mxu0 %v6398_v31  ;;  %v1838_v31 = vrot.slane %v7819_v40, %v7402_v9 }
 0x28f   : > { %4468 = vmatpush1.bf16.msra.mxu1 %v6401_v17  ;;  %4428 = vmatprep.subr.bf16.mxu0 %v6406_v35  ;;  %v6472_v17 = vld [vmem:[%s7308_s30 + $0x164] ss:$28 sps:$4 sm:$0xff]  }
 0x290   : > { %4469 = vmatprep.subr.bf16.mxu1 %v6409_v5 }
 0x292   : > { %4429 = vmatpush1.bf16.msra.mxu0 %v6404_v36  ;;  %v6475_v36 = vld [vmem:[%s7308_s30 + $0x4e4] ss:$28 sps:$4 sm:$0xff]  }
 0x293   : > { %4470 = vmatpush1.bf16.msra.mxu1 %v6407_v37  ;;  %4430 = vmatprep.subr.bf16.mxu0 %v6412_v47  ;;  %v6470_v47 = vld [vmem:[%s7308_s30 + $0x160] ss:$28 sps:$4 sm:$0xff]  }
 0x294   : > { %4471 = vmatprep.subr.bf16.mxu1 %v6415_v33 }
 0x296   : > { %4431 = vmatpush1.bf16.msra.mxu0 %v6410_v43 }
 0x297   : > { %4472 = vmatpush1.bf16.msra.mxu1 %v6413_v44  ;;  %4432 = vmatprep.subr.bf16.mxu0 %v6418_v0  ;;  %v6473_v44 = vld [vmem:[%s7308_s30 + $0x4e0] ss:$28 sps:$4 sm:$0xff]   ;;  %v6478_v0 = vld [vmem:[%s7308_s30 + $0x12c] ss:$28 sps:$4 sm:$0xff]  }
 0x298   : > { %4473 = vmatprep.subr.bf16.mxu1 %v6421_v11 }
 0x29a   : > { %4433 = vmatpush2.bf16.msra.mxu0 %v6416_v42 }
 0x29b   : > { %4474 = vmatpush2.bf16.msra.mxu1 %v6419_v48  ;;  %4434 = vmatprep.subr.bf16.mxu0 %v6424_v62  ;;  %v6481_v48 = vld [vmem:[%s7308_s30 + $0x4ac] ss:$28 sps:$4 sm:$0xff]  }
 0x29c   : > { %4475 = vmatprep.subr.bf16.mxu1 %v6427_v63 }
 0x29e   : > { %4435 = vmatpush2.bf16.msra.mxu0 %v6422_v1 }
 0x29f   : > { %4476 = vmatpush2.bf16.msra.mxu1 %v6425_v49  ;;  %4436 = vmatprep.subr.bf16.mxu0 %v6430_v50  ;;  %v6476_v49 = vld [vmem:[%s7308_s30 + $0x128] ss:$28 sps:$4 sm:$0xff]  }
 0x2a0   : > { %4477 = vmatprep.subr.bf16.mxu1 %v6433_v34 }
 0x2a2   : > { %4437 = vmatpush2.bf16.msra.mxu0 %v6428_v53  ;;  %v6479_v53 = vld [vmem:[%s7308_s30 + $0x4a8] ss:$28 sps:$4 sm:$0xff]  }
 0x2a3   : > { %4478 = vmatpush2.bf16.msra.mxu1 %v6431_v59  ;;  %4438 = vmatprep.subr.bf16.mxu0 %v6436_v60  ;;  %v6484_v59 = vld [vmem:[%s7308_s30 + $0xf4] ss:$28 sps:$4 sm:$0xff]  }
 0x2a4   : > { %4479 = vmatprep.subr.bf16.mxu1 %v6439_v39  ;;  %v6487_v60 = vld [vmem:[%s7308_s30 + $0x474] ss:$28 sps:$4 sm:$0xff]  }
 0x2a5   : > { %v6482_v39 = vld [vmem:[%s7308_s30 + $0xf0] ss:$28 sps:$4 sm:$0xff]  }
 0x2a6   : > { %4439 = vmatpush2.bf16.msra.mxu0 %v6434_v54  ;;  %v6485_v54 = vld [vmem:[%s7308_s30 + $0x470] ss:$28 sps:$4 sm:$0xff]  }
 0x2a7   : > { %4480 = vmatpush2.bf16.msra.mxu1 %v6437_v56  ;;  %4440 = vmatprep.subr.bf16.mxu0 %v6442_v16  ;;  %v6490_v56 = vld [vmem:[%s7308_s30 + $0xbc] ss:$28 sps:$4 sm:$0xff]  }
 0x2a8   : > { %4481 = vmatprep.subr.bf16.mxu1 %v6445_v18  ;;  %v6493_v16 = vld [vmem:[%s7308_s30 + $0x43c] ss:$28 sps:$4 sm:$0xff]  }
 0x2a9   : > { %v6488_v18 = vld [vmem:[%s7308_s30 + $0xb8] ss:$28 sps:$4 sm:$0xff]  }
 0x2aa   : > { %4441 = vmatpush2.bf16.msra.mxu0 %v6440_v22  ;;  %v6491_v22 = vld [vmem:[%s7308_s30 + $0x438] ss:$28 sps:$4 sm:$0xff]  }
 0x2ab   : > { %4482 = vmatpush2.bf16.msra.mxu1 %v6443_v27  ;;  %4442 = vmatprep.subr.bf16.mxu0 %v6448_v57  ;;  %v6496_v27 = vld [vmem:[%s7308_s30 + $0x84] ss:$28 sps:$4 sm:$0xff]  }
 0x2ac   : > { %4483 = vmatprep.subr.bf16.mxu1 %v6451_v13  ;;  %v6499_v57 = vld [vmem:[%s7308_s30 + $0x404] ss:$28 sps:$4 sm:$0xff]  }
 0x2ad   : > { %v6494_v13 = vld [vmem:[%s7308_s30 + $0x80] ss:$28 sps:$4 sm:$0xff]  }
 0x2ae   : > { %4443 = vmatpush2.bf16.msra.mxu0 %v6446_v25  ;;  %v6497_v25 = vld [vmem:[%s7308_s30 + $0x400] ss:$28 sps:$4 sm:$0xff]  }
 0x2af   : > { %4484 = vmatpush2.bf16.msra.mxu1 %v6449_v30  ;;  %4444 = vmatprep.subr.bf16.mxu0 %v6454_v58  ;;  %v6502_v30 = vld [vmem:[%s7308_s30 + $0x4c] ss:$28 sps:$4 sm:$0xff]  }
 0x2b0   : > { %4485 = vmatprep.subr.bf16.mxu1 %v6457_v7  ;;  %v6505_v58 = vld [vmem:[%s7308_s30 + $0x3cc] ss:$28 sps:$4 sm:$0xff]  }
 0x2b1   : > { %v6500_v7 = vld [vmem:[%s7308_s30 + $0x48] ss:$28 sps:$4 sm:$0xff]  }
 0x2b2   : > { %4445 = vmatpush2.bf16.msra.mxu0 %v6452_v38  ;;  %v6503_v38 = vld [vmem:[%s7308_s30 + $0x3c8] ss:$28 sps:$4 sm:$0xff]  }
 0x2b3   : > { %4486 = vmatpush2.bf16.msra.mxu1 %v6455_v3  ;;  %4446 = vmatprep.subr.bf16.mxu0 %v6460_v12  ;;  %v6508_v3 = vld [vmem:[%s7308_s30 + $0x14] ss:$28 sps:$4 sm:$0xff]  }
 0x2b4   : > { %4487 = vmatprep.subr.bf16.mxu1 %v6463_v15  ;;  %v6511_v12 = vld [vmem:[%s7308_s30 + $0x394] ss:$28 sps:$4 sm:$0xff]  }
 0x2b5   : > { %v6506_v15 = vld [vmem:[%s7308_s30 + $0x10] ss:$28 sps:$4 sm:$0xff]  }
 0x2b6   : > { %4447 = vmatpush2.bf16.msra.mxu0 %v6458_v19  ;;  %v6509_v19 = vld [vmem:[%s7308_s30 + $0x390] ss:$28 sps:$4 sm:$0xff]  }
 0x2b7   : > { %4488 = vmatpush2.bf16.msra.mxu1 %v6461_v20  ;;  %4498 = vmatprep.subr.bf16.mxu0 %v6466_v29  ;;  %v6514_v20 = vld [vmem:[%s7308_s30 + $0x35c] ss:$28 sps:$4 sm:$0xff]  }
 0x2b8   : > { %4539 = vmatprep.subr.bf16.mxu1 %v6469_v52  ;;  %v6517_v29 = vld [vmem:[%s7308_s30 + $0x6dc] ss:$28 sps:$4 sm:$0xff]  }
 0x2b9   : > { %4449 = vmatmul.mubr.bf16.vlgmr.msra.gmra.mxu0 %v7674_v45  ;;  %v4204_v35 = vpop.f32.mrf.mxu0  ;;  %v4245_v5 = vpop.f32.mrf.mxu1  ;;  %v6512_v52 = vld [vmem:[%s7308_s30 + $0x358] ss:$28 sps:$4 sm:$0xff]  }
 0x2ba   : > { %4490 = vmatmul.mubr.bf16.vlgmr.msra.gmra.mxu1 %v7676_v46  ;;  %v4205_v37 = vadd.f32 %v4204_v35, %v1834_v51  ;;  %4499 = vmatpush1.bf16.msra.mxu0 %v6464_v26  ;;  %v6515_v26 = vld [vmem:[%s7308_s30 + $0x6d8] ss:$28 sps:$4 sm:$0xff]   ;;  %v6520_v51 = vld [vmem:[%s7308_s30 + $0x324] ss:$28 sps:$4 sm:$0xff]   ;;  %v6526_v35 = vld [vmem:[%s7308_s30 + $0x2ec] ss:$28 sps:$4 sm:$0xff]  }
 0x2bb   : > { %4530 = vmatprep.mubr.bf16.mxu0 %v7589_v21  ;;  %4540 = vmatpush1.bf16.msra.mxu1 %v6467_v55  ;;  %v4206_v33 = vpop.f32.mrf.mxu0  ;;  %v4247_v43 = vpop.f32.mrf.mxu1  ;;  %v6523_v55 = vld [vmem:[%s7308_s30 + $0x6a4] ss:$28 sps:$4 sm:$0xff]  }
 0x2bc   : > { %v7836_v11 = vadd.f32 %v4245_v5, %v4205_v37  ;;  %4571 = vmatprep.mubr.bf16.mxu1 %v7591_v28  ;;  %v4207_v42 = vadd.f32 %v4206_v33, %v1838_v31  ;;  %4500 = vmatprep.subr.bf16.mxu0 %v6472_v17  ;;  %v6518_v31 = vld [vmem:[%s7308_s30 + $0x320] ss:$28 sps:$4 sm:$0xff]   ;;  %v6529_v5 = vld [vmem:[%s7308_s30 + $0x66c] ss:$28 sps:$4 sm:$0xff]   ;;  %v6535_v33 = vld [vmem:[%s7308_s30 + $0x634] ss:$28 sps:$4 sm:$0xff]  }
 0x2bd   : > { %4541 = vmatprep.subr.bf16.mxu1 %v6475_v36  ;;  %v4208_v62 = vpop.f32.mrf.mxu0  ;;  %v4249_v63 = vpop.f32.mrf.mxu1  ;;  %v6521_v17 = vld [vmem:[%s7308_s30 + $0x6a0] ss:$28 sps:$4 sm:$0xff]   ;;  %v6524_v36 = vld [vmem:[%s7308_s30 + $0x2e8] ss:$28 sps:$4 sm:$0xff]  }
 0x2be   : > { %v7840_v1 = vadd.f32 %v4247_v43, %v4207_v42  ;;  %4501 = vmatpush1.bf16.msra.mxu0 %v6470_v47  ;;  %v6527_v37 = vld [vmem:[%s7308_s30 + $0x668] ss:$28 sps:$4 sm:$0xff]   ;;  %v6532_v47 = vld [vmem:[%s7308_s30 + $0x2b4] ss:$28 sps:$4 sm:$0xff]   ;;  %v6541_v42 = vld [vmem:[%s7308_s30 + $0x5fc] ss:$28 sps:$4 sm:$0xff]  }
 0x2bf   : > { %4542 = vmatpush1.bf16.msra.mxu1 %v6473_v44  ;;  %v4209_v50 = vpop.f32.mrf.mxu0  ;;  %v4250_v34 = vpop.f32.mrf.mxu1  ;;  %4502 = vmatprep.subr.bf16.mxu0 %v6478_v0  ;;  %v6530_v43 = vld [vmem:[%s7308_s30 + $0x2b0] ss:$28 sps:$4 sm:$0xff]   ;;  %v6538_v0 = vld [vmem:[%s7308_s30 + $0x27c] ss:$28 sps:$4 sm:$0xff]   ;;  %v6544_v63 = vld [vmem:[%s7308_s30 + $0x244] ss:$28 sps:$4 sm:$0xff]  }
 0x2c0   : > { %4543 = vmatprep.subr.bf16.mxu1 %v6481_v48  ;;  %v6533_v44 = vld [vmem:[%s7308_s30 + $0x630] ss:$28 sps:$4 sm:$0xff]   ;;  %v6536_v48 = vld [vmem:[%s7308_s30 + $0x278] ss:$28 sps:$4 sm:$0xff]   ;;  %v6542_v50 = vld [vmem:[%s7308_s30 + $0x240] ss:$28 sps:$4 sm:$0xff]  }
 0x2c1   : > { %v6539_v62 = vld [vmem:[%s7308_s30 + $0x5f8] ss:$28 sps:$4 sm:$0xff]   ;;  %v6545_v34 = vld [vmem:[%s7308_s30 + $0x5c0] ss:$28 sps:$4 sm:$0xff]  }
 0x2c2   : > { %4503 = vmatpush1.bf16.msra.mxu0 %v6476_v49  ;;  %v6547_v49 = vld [vmem:[%s7308_s30 + $0x5c4] ss:$28 sps:$4 sm:$0xff]  }
 0x2c3   : > { %4544 = vmatpush1.bf16.msra.mxu1 %v6479_v53  ;;  %4504 = vmatprep.subr.bf16.mxu0 %v6484_v59  ;;  %v6550_v53 = vld [vmem:[%s7308_s30 + $0x20c] ss:$28 sps:$4 sm:$0xff]  }
 0x2c4   : > { %4545 = vmatprep.subr.bf16.mxu1 %v6487_v60  ;;  %v6553_v59 = vld [vmem:[%s7308_s30 + $0x58c] ss:$28 sps:$4 sm:$0xff]  }
 0x2c5   : > { %v6548_v60 = vld [vmem:[%s7308_s30 + $0x208] ss:$28 sps:$4 sm:$0xff]  }
 0x2c6   : > { %4505 = vmatpush1.bf16.msra.mxu0 %v6482_v39  ;;  %v6551_v39 = vld [vmem:[%s7308_s30 + $0x588] ss:$28 sps:$4 sm:$0xff]  }
 0x2c7   : > { %4546 = vmatpush1.bf16.msra.mxu1 %v6485_v54  ;;  %4506 = vmatprep.subr.bf16.mxu0 %v6490_v56  ;;  %v6556_v54 = vld [vmem:[%s7308_s30 + $0x1d4] ss:$28 sps:$4 sm:$0xff]  }
 0x2c8   : > { %4547 = vmatprep.subr.bf16.mxu1 %v6493_v16  ;;  %v6559_v56 = vld [vmem:[%s7308_s30 + $0x554] ss:$28 sps:$4 sm:$0xff]  }
 0x2c9   : > { %v6554_v16 = vld [vmem:[%s7308_s30 + $0x1d0] ss:$28 sps:$4 sm:$0xff]  }
 0x2ca   : > { %4507 = vmatpush1.bf16.msra.mxu0 %v6488_v18  ;;  %v6557_v18 = vld [vmem:[%s7308_s30 + $0x550] ss:$28 sps:$4 sm:$0xff]  }
 0x2cb   : > { %4548 = vmatpush1.bf16.msra.mxu1 %v6491_v22  ;;  %4508 = vmatprep.subr.bf16.mxu0 %v6496_v27  ;;  %v6562_v22 = vld [vmem:[%s7308_s30 + $0x89c] ss:$28 sps:$4 sm:$0xff]  }
 0x2cc   : > { %4549 = vmatprep.subr.bf16.mxu1 %v6499_v57  ;;  %v6565_v27 = vld [vmem:[%s7308_s30 + $0xc1c] ss:$28 sps:$4 sm:$0xff]  }
 0x2cd   : > { %v6560_v57 = vld [vmem:[%s7308_s30 + $0x898] ss:$28 sps:$4 sm:$0xff]  }
 0x2ce   : > { %4509 = vmatpush1.bf16.msra.mxu0 %v6494_v13  ;;  %v6563_v13 = vld [vmem:[%s7308_s30 + $0xc18] ss:$28 sps:$4 sm:$0xff]  }
 0x2cf   : > { %4550 = vmatpush1.bf16.msra.mxu1 %v6497_v25  ;;  %4510 = vmatprep.subr.bf16.mxu0 %v6502_v30  ;;  %v6568_v25 = vld [vmem:[%s7308_s30 + $0x864] ss:$28 sps:$4 sm:$0xff]  }
 0x2d0   : > { %4551 = vmatprep.subr.bf16.mxu1 %v6505_v58 }
 0x2d2   : > { %4511 = vmatpush1.bf16.msra.mxu0 %v6500_v7  ;;  %v6571_v7 = vld [vmem:[%s7308_s30 + $0xbe4] ss:$28 sps:$4 sm:$0xff]  }
 0x2d3   : > { %4552 = vmatpush1.bf16.msra.mxu1 %v6503_v38  ;;  %4512 = vmatprep.subr.bf16.mxu0 %v6508_v3  ;;  %v6566_v3 = vld [vmem:[%s7308_s30 + $0x860] ss:$28 sps:$4 sm:$0xff]  }
 0x2d4   : > { %4553 = vmatprep.subr.bf16.mxu1 %v6511_v12 }
 0x2d6   : > { %4513 = vmatpush1.bf16.msra.mxu0 %v6506_v15 }
 0x2d7   : > { %4554 = vmatpush1.bf16.msra.mxu1 %v6509_v19  ;;  %4514 = vmatprep.subr.bf16.mxu0 %v6514_v20  ;;  %v6569_v19 = vld [vmem:[%s7308_s30 + $0xbe0] ss:$28 sps:$4 sm:$0xff]   ;;  %v6574_v20 = vld [vmem:[%s7308_s30 + $0x82c] ss:$28 sps:$4 sm:$0xff]  }
 0x2d8   : > { %4555 = vmatprep.subr.bf16.mxu1 %v6517_v29 }
 0x2da   : > { %4515 = vmatpush2.bf16.msra.mxu0 %v6512_v52 }
 0x2db   : > { %4556 = vmatpush2.bf16.msra.mxu1 %v6515_v26  ;;  %4516 = vmatprep.subr.bf16.mxu0 %v6520_v51 }
 0x2dc   : > { %4557 = vmatprep.subr.bf16.mxu1 %v6523_v55 }
 0x2de   : > { %4517 = vmatpush2.bf16.msra.mxu0 %v6518_v31 }
 0x2df   : > { %4558 = vmatpush2.bf16.msra.mxu1 %v6521_v17  ;;  %4518 = vmatprep.subr.bf16.mxu0 %v6526_v35  ;;  %v6572_v35 = vld [vmem:[%s7308_s30 + $0x828] ss:$28 sps:$4 sm:$0xff]  }
 0x2e0   : > { %4559 = vmatprep.subr.bf16.mxu1 %v6529_v5 }
 0x2e2   : > { %4519 = vmatpush2.bf16.msra.mxu0 %v6524_v36 }
 0x2e3   : > { %4560 = vmatpush2.bf16.msra.mxu1 %v6527_v37  ;;  %4520 = vmatprep.subr.bf16.mxu0 %v6532_v47  ;;  %v6575_v37 = vld [vmem:[%s7308_s30 + $0xba8] ss:$28 sps:$4 sm:$0xff]   ;;  %v6580_v47 = vld [vmem:[%s7308_s30 + $0x7f4] ss:$28 sps:$4 sm:$0xff]  }
 0x2e4   : > { %4561 = vmatprep.subr.bf16.mxu1 %v6535_v33 }
 0x2e6   : > { %4521 = vmatpush2.bf16.msra.mxu0 %v6530_v43 }
 0x2e7   : > { %4562 = vmatpush2.bf16.msra.mxu1 %v6533_v44  ;;  %4522 = vmatprep.subr.bf16.mxu0 %v6538_v0  ;;  %v6583_v0 = vld [vmem:[%s7308_s30 + $0xb74] ss:$28 sps:$4 sm:$0xff]  }
 0x2e8   : > { %4563 = vmatprep.subr.bf16.mxu1 %v6541_v42 }
 0x2ea   : > { %4523 = vmatpush2.bf16.msra.mxu0 %v6536_v48 }
 0x2eb   : > { %4564 = vmatpush2.bf16.msra.mxu1 %v6539_v62  ;;  %4524 = vmatprep.subr.bf16.mxu0 %v6544_v63 }
 0x2ec   : > { %4565 = vmatprep.subr.bf16.mxu1 %v6547_v49  ;;  %v6578_v49 = vld [vmem:[%s7308_s30 + $0x7f0] ss:$28 sps:$4 sm:$0xff]  }
 0x2ee   : > { %4525 = vmatpush2.bf16.msra.mxu0 %v6542_v50 }
 0x2ef   : > { %4566 = vmatpush2.bf16.msra.mxu1 %v6545_v34  ;;  %4526 = vmatprep.subr.bf16.mxu0 %v6550_v53 }
 0x2f0   : > { %4567 = vmatprep.subr.bf16.mxu1 %v6553_v59 }
 0x2f2   : > { %4527 = vmatpush2.bf16.msra.mxu0 %v6548_v60  ;;  %v6581_v60 = vld [vmem:[%s7308_s30 + $0xb70] ss:$28 sps:$4 sm:$0xff]  }
 0x2f3   : > { %4568 = vmatpush2.bf16.msra.mxu1 %v6551_v39  ;;  %4528 = vmatprep.subr.bf16.mxu0 %v6556_v54  ;;  %v6586_v39 = vld [vmem:[%s7308_s30 + $0x7bc] ss:$28 sps:$4 sm:$0xff]  }
 0x2f4   : > { %4569 = vmatprep.subr.bf16.mxu1 %v6559_v56  ;;  %v6589_v54 = vld [vmem:[%s7308_s30 + $0xb3c] ss:$28 sps:$4 sm:$0xff]  }
 0x2f6   : > { %4529 = vmatpush2.bf16.msra.mxu0 %v6554_v16 }
 0x2f7   : > { %4570 = vmatpush2.bf16.msra.mxu1 %v6557_v18  ;;  %4580 = vmatprep.subr.bf16.mxu0 %v6562_v22 }
 0x2f8   : > { %4621 = vmatprep.subr.bf16.mxu1 %v6565_v27  ;;  %v6584_v27 = vld [vmem:[%s7308_s30 + $0x7b8] ss:$28 sps:$4 sm:$0xff]  }
 0x2f9   : > { %v4286_v30 = vpop.f32.mrf.mxu0  ;;  %v4327_v58 = vpop.f32.mrf.mxu1  ;;  %4531 = vmatmul.mubr.bf16.vlgmr.msra.gmra.mxu0 %v7595_v32 }
 0x2fa   : > { %v4287_v38 = vadd.f32 %v4286_v30, %v7836_v11  ;;  %4572 = vmatmul.mubr.bf16.vlgmr.msra.gmra.mxu1 %v7597_v4  ;;  %4581 = vmatpush1.bf16.msra.mxu0 %v6560_v57  ;;  %v6577_v11 = vld [vmem:[%s7308_s30 + $0xbac] ss:$28 sps:$4 sm:$0xff]  }
 0x2fb   : > { %4612 = vmatprep.mubr.bf16.mxu0 %v7605_v14  ;;  %4622 = vmatpush1.bf16.msra.mxu1 %v6563_v13  ;;  %v4288_v12 = vpop.f32.mrf.mxu0  ;;  %v4329_v15 = vpop.f32.mrf.mxu1 }
 0x2fc   : > { %v7909_v29 = vadd.f32 %v4327_v58, %v4287_v38  ;;  %4653 = vmatprep.mubr.bf16.mxu1 %v7607_v41  ;;  %v4289_v52 = vadd.f32 %v4288_v12, %v7840_v1  ;;  %4582 = vmatprep.subr.bf16.mxu0 %v6568_v25  ;;  %v6587_v58 = vld [vmem:[%s7308_s30 + $0xb38] ss:$28 sps:$4 sm:$0xff]   ;;  %v6595_v38 = vld [vmem:[%s7308_s30 + $0xb04] ss:$28 sps:$4 sm:$0xff]  }
 0x2fd   : > { %v4290_v26 = vpop.f32.mrf.mxu0  ;;  %v4331_v51 = vpop.f32.mrf.mxu1  ;;  %4623 = vmatprep.subr.bf16.mxu1 %v6571_v7  ;;  %v6592_v7 = vld [vmem:[%s7308_s30 + $0x784] ss:$28 sps:$4 sm:$0xff]  }
 0x2fe   : > { %v4822_v55 = vsel %vm917_vm1, %v7909_v29, 0.0  ;;  %v4878_v31 = vmul.f32 %v7909_v29, %v7909_v29  ;;  %v7918_v17 = vadd.f32 %v4329_v15, %v4289_v52  ;;  %4583 = vmatpush1.bf16.msra.mxu0 %v6566_v3 }
 0x2ff   : > { %v4823_v5 = vrot.slane %v4822_v55, 4  ;;  %4624 = vmatpush1.bf16.msra.mxu1 %v6569_v19  ;;  %v4291_v1 = vpop.f32.mrf.mxu0  ;;  %v4332_v36 = vpop.f32.mrf.mxu1  ;;  %4584 = vmatprep.subr.bf16.mxu0 %v6574_v20  ;;  %v6590_v20 = vld [vmem:[%s7308_s30 + $0x780] ss:$28 sps:$4 sm:$0xff]  }
 0x300   : > { %v4885_v33 = vsel %vm917_vm1, %v4878_v31, 0.0  ;;  %v4829_v43 = vsel %vm917_vm1, %v7918_v17, 0.0  ;;  %v4879_v44 = vmul.f32 %v7918_v17, %v7918_v17  ;;  %4625 = vmatprep.subr.bf16.mxu1 %v6577_v11  ;;  %v6598_v31 = vld [vmem:[%s7308_s30 + $0x74c] ss:$28 sps:$4 sm:$0xff]  }
 0x301   : > { %v4824_v42 = vadd.f32 %v4823_v5, %v4822_v55  ;;  %v4886_v48 = vrot.slane %v4885_v33, 4  ;;  %v4830_v62 = vrot.slane %v4829_v43, 4  ;;  %v6593_v55 = vld [vmem:[%s7308_s30 + $0xb00] ss:$28 sps:$4 sm:$0xff]  }
 0x302   : > { %v4892_v63 = vsel %vm917_vm1, %v4879_v44, 0.0  ;;  %4585 = vmatpush1.bf16.msra.mxu0 %v6572_v35  ;;  %v6601_v35 = vld [vmem:[%s7308_s30 + $0xacc] ss:$28 sps:$4 sm:$0xff]  }
 0x303   : > { %v4825_v50 = vrot.slane %v4824_v42, 2  ;;  %v4887_v34 = vadd.f32 %v4886_v48, %v4885_v33  ;;  %v4831_v53 = vadd.f32 %v4830_v62, %v4829_v43  ;;  %v4893_v59 = vrot.slane %v4892_v63, 4  ;;  %4626 = vmatpush1.bf16.msra.mxu1 %v6575_v37  ;;  %4586 = vmatprep.subr.bf16.mxu0 %v6580_v47  ;;  %v6596_v47 = vld [vmem:[%s7308_s30 + $0x748] ss:$28 sps:$4 sm:$0xff]   ;;  %v6607_v48 = vld [vmem:[%s7308_s30 + $0xa94] ss:$28 sps:$4 sm:$0xff]  }
 0x304   : > { %4627 = vmatprep.subr.bf16.mxu1 %v6583_v0  ;;  %v6599_v0 = vld [vmem:[%s7308_s30 + $0xac8] ss:$28 sps:$4 sm:$0xff]  }
 0x305   : > { %v4826_v56 = vadd.f32 %v4825_v50, %v4824_v42  ;;  %v4888_v16 = vrot.slane %v4887_v34, 2  ;;  %v4832_v18 = vrot.slane %v4831_v53, 2  ;;  %v4894_v22 = vadd.f32 %v4893_v59, %v4892_v63  ;;  %v6604_v42 = vld [vmem:[%s7308_s30 + $0x714] ss:$28 sps:$4 sm:$0xff]   ;;  %v6610_v59 = vld [vmem:[%s7308_s30 + $0xa5c] ss:$28 sps:$4 sm:$0xff]  }
 0x306   : > { %4587 = vmatpush1.bf16.msra.mxu0 %v6578_v49  ;;  %v6602_v49 = vld [vmem:[%s7308_s30 + $0x710] ss:$28 sps:$4 sm:$0xff]  }
 0x307   : > { %v4827_v57 = vrot.slane %v4826_v56, 1  ;;  %v4889_v13 = vadd.f32 %v4888_v16, %v4887_v34  ;;  %v4833_v25 = vadd.f32 %v4832_v18, %v4831_v53  ;;  %v4895_v30 = vrot.slane %v4894_v22, 2  ;;  %4628 = vmatpush1.bf16.msra.mxu1 %v6581_v60  ;;  %4588 = vmatprep.subr.bf16.mxu0 %v6586_v39  ;;  %v6605_v50 = vld [vmem:[%s7308_s30 + $0xa90] ss:$28 sps:$4 sm:$0xff]   ;;  %v6613_v60 = vld [vmem:[%s7308_s30 + $0xddc] ss:$28 sps:$4 sm:$0xff]  }
 0x308   : > { %4629 = vmatprep.subr.bf16.mxu1 %v6589_v54  ;;  %v6608_v54 = vld [vmem:[%s7308_s30 + $0xa58] ss:$28 sps:$4 sm:$0xff]   ;;  %v6616_v16 = vld [vmem:[%s7308_s30 + $0xa24] ss:$28 sps:$4 sm:$0xff]  }
 0x309   : > { %v4828_v3 = vadd.f32 %v4827_v57, %v4826_v56  ;;  %v4890_v12 = vrot.slane %v4889_v13, 1  ;;  %v4834_v15 = vrot.slane %v4833_v25, 1  ;;  %v4896_v19 = vadd.f32 %v4895_v30, %v4894_v22  ;;  %v6611_v56 = vld [vmem:[%s7308_s30 + $0xdd8] ss:$28 sps:$4 sm:$0xff]   ;;  %v6619_v18 = vld [vmem:[%s7308_s30 + $0xda4] ss:$28 sps:$4 sm:$0xff]  }
 0x30a   : > { %4589 = vmatpush1.bf16.msra.mxu0 %v6584_v27  ;;  %v6614_v22 = vld [vmem:[%s7308_s30 + $0xa20] ss:$28 sps:$4 sm:$0xff]   ;;  %v6622_v57 = vld [vmem:[%s7308_s30 + $0x9ec] ss:$28 sps:$4 sm:$0xff]  }
 0x30b   : > { %v7939_v52 = vmul.f32 0.5, %v4828_v3  ;;  %v4891_v11 = vadd.f32 %v4890_v12, %v4889_v13  ;;  %v4835_v26 = vadd.f32 %v4834_v15, %v4833_v25  ;;  %v4897_v51 = vrot.slane %v4896_v19, 1  ;;  %4630 = vmatpush1.bf16.msra.mxu1 %v6587_v58  ;;  %4590 = vmatprep.subr.bf16.mxu0 %v6592_v7  ;;  %v6617_v27 = vld [vmem:[%s7308_s30 + $0xda0] ss:$28 sps:$4 sm:$0xff]   ;;  %v6625_v25 = vld [vmem:[%s7308_s30 + $0xd6c] ss:$28 sps:$4 sm:$0xff]  }
 0x30c   : > { %4631 = vmatprep.subr.bf16.mxu1 %v6595_v38  ;;  %v7966_v13 = vld [vmem:[%s444_s25] sm:$0xff]  ;;  %v6620_v30 = vld [vmem:[%s7308_s30 + $0x9e8] ss:$28 sps:$4 sm:$0xff]  }
 0x30d   : > { %v4934_v5 = vmul.f32 0.5, %v4891_v11  ;;  %v4941_v1 = vmul.f32 %v7939_v52, %v7939_v52  ;;  %v7946_v36 = vmul.f32 0.5, %v4835_v26  ;;  %v4898_v37 = vadd.f32 %v4897_v51, %v4896_v19  ;;  %v6623_v7 = vld [vmem:[%s7308_s30 + $0xd68] ss:$28 sps:$4 sm:$0xff]   ;;  %v6628_v38 = vld [vmem:[%s7308_s30 + $0x9b4] ss:$28 sps:$4 sm:$0xff]  }
 0x30e   : > { %4591 = vmatpush1.bf16.msra.mxu0 %v6590_v20  ;;  %v4981_v58 = vrot.slane %v7966_v13, %v7394_v6  ;;  %v6631_v3 = vld [vmem:[%s7308_s30 + $0xd34] ss:$28 sps:$4 sm:$0xff]   ;;  %v4985_v12 = vrot.slane %v7966_v13, %v7402_v9  ;;  %v6634_v26 = vld [vmem:[%s7308_s30 + $0x97c] ss:$28 sps:$4 sm:$0xff]  }
 0x30f   : > { %v4948_v33 = vsub.f32 %v4934_v5, %v4941_v1  ;;  %v4935_v43 = vmul.f32 0.5, %v4898_v37  ;;  %v4942_v44 = vmul.f32 %v7946_v36, %v7946_v36  ;;  %4632 = vmatpush1.bf16.msra.mxu1 %v6593_v55  ;;  %4592 = vmatprep.subr.bf16.mxu0 %v6598_v31  ;;  %v6626_v19 = vld [vmem:[%s7308_s30 + $0x9b0] ss:$28 sps:$4 sm:$0xff]   ;;  %v6637_v55 = vld [vmem:[%s7308_s30 + $0xcfc] ss:$28 sps:$4 sm:$0xff]  }
 0x310   : > { %4633 = vmatprep.subr.bf16.mxu1 %v6601_v35  ;;  %v6629_v11 = vld [vmem:[%s7308_s30 + $0xd30] ss:$28 sps:$4 sm:$0xff]   ;;  %v6632_v35 = vld [vmem:[%s7308_s30 + $0x978] ss:$28 sps:$4 sm:$0xff]  }
 0x311   : > { %v4955_v62 = vmax.f32 %v4948_v33, 0.0  ;;  %v4949_v63 = vsub.f32 %v4935_v43, %v4942_v44  ;;  %v6635_v37 = vld [vmem:[%s7308_s30 + $0xcf8] ss:$28 sps:$4 sm:$0xff]   ;;  %v6643_v33 = vld [vmem:[%s7308_s30 + $0xcc4] ss:$28 sps:$4 sm:$0xff]  }
 0x312   : > { %4593 = vmatpush1.bf16.msra.mxu0 %v6596_v47  ;;  %v6640_v47 = vld [vmem:[%s7308_s30 + $0x944] ss:$28 sps:$4 sm:$0xff]   ;;  %v6646_v44 = vld [vmem:[%s7308_s30 + $0x90c] ss:$28 sps:$4 sm:$0xff]  }
 0x313   : > { %v4962_v34 = vadd.f32 1e-05, %v4955_v62  ;;  %v4956_v53 = vmax.f32 %v4949_v63, 0.0  ;;  %4634 = vmatpush1.bf16.msra.mxu1 %v6599_v0  ;;  %4594 = vmatprep.subr.bf16.mxu0 %v6604_v42  ;;  %v6649_v0 = vld [vmem:[%s7308_s30 + $0xc8c] ss:$28 sps:$4 sm:$0xff]  }
 0x314   : > { %4635 = vmatprep.subr.bf16.mxu1 %v6607_v48  ;;  %v6644_v42 = vld [vmem:[%s7308_s30 + $0x908] ss:$28 sps:$4 sm:$0xff]   ;;  %v6652_v62 = vld [vmem:[%s7308_s30 + $0x8d4] ss:$28 sps:$4 sm:$0xff]  }
 0x315   : > { %6736 = vrsqrt.f32 %v4962_v34  ;;  %v4963_v39 = vadd.f32 1e-05, %v4956_v53  ;;  %v6647_v48 = vld [vmem:[%s7308_s30 + $0xc88] ss:$28 sps:$4 sm:$0xff]   ;;  %v6655_v63 = vld [vmem:[%s7308_s30 + $0xc54] ss:$28 sps:$4 sm:$0xff]  }
 0x316   : > { %4595 = vmatpush1.bf16.msra.mxu0 %v6602_v49  ;;  %v6650_v49 = vld [vmem:[%s7308_s30 + $0x8d0] ss:$28 sps:$4 sm:$0xff]   ;;  %v6656_v34 = vld [vmem:[%s7308_s30 + $0x360] ss:$28 sps:$4 sm:$0xff]  }
 0x317   : > { %6738 = vrsqrt.f32 %v4963_v39  ;;  %4636 = vmatpush1.bf16.msra.mxu1 %v6605_v50  ;;  %4596 = vmatprep.subr.bf16.mxu0 %v6610_v59  ;;  %v6653_v50 = vld [vmem:[%s7308_s30 + $0xc50] ss:$28 sps:$4 sm:$0xff]   ;;  %v6657_v53 = vld [vmem:[%s7308_s30 + $0x6e0] ss:$28 sps:$4 sm:$0xff]   ;;  %v1842_v59 = vrot.slane %v7819_v40, %v7399_v8 }
 0x318   : > { %4637 = vmatprep.subr.bf16.mxu1 %v6613_v60  ;;  %v6658_v60 = vld [vmem:[%s7308_s30 + $0x1a0] ss:$28 sps:$4 sm:$0xff]  }
 0x319   : > { %v6659_v39 = vld [vmem:[%s7308_s30 + $0x520] ss:$28 sps:$4 sm:$0xff]  }
 0x31a   : > { %4597 = vmatpush2.bf16.msra.mxu0 %v6608_v54  ;;  %v1846_v54 = vrot.slane %v7819_v40, %v7405_v10 }
 0x31b   : > { %4638 = vmatpush2.bf16.msra.mxu1 %v6611_v56  ;;  %4598 = vmatprep.subr.bf16.mxu0 %v6616_v16  ;;  %v6660_v56 = vld [vmem:[%s7308_s30 + $0x328] ss:$28 sps:$4 sm:$0xff]  }
 0x31c   : > { %4639 = vmatprep.subr.bf16.mxu1 %v6619_v18  ;;  %v6661_v18 = vld [vmem:[%s7308_s30 + $0x6a8] ss:$28 sps:$4 sm:$0xff]  }
 0x31e   : > { %4599 = vmatpush2.bf16.msra.mxu0 %v6614_v22 }
 0x31f   : > { %4640 = vmatpush2.bf16.msra.mxu1 %v6617_v27  ;;  %4600 = vmatprep.subr.bf16.mxu0 %v6622_v57  ;;  %v6662_v57 = vld [vmem:[%s7308_s30 + $0x168] ss:$28 sps:$4 sm:$0xff]  }
 0x320   : > { %4641 = vmatprep.subr.bf16.mxu1 %v6625_v25 }
 0x322   : > { %v6737_v15 = vpop.eup %6736  ;;  %4601 = vmatpush2.bf16.msra.mxu0 %v6620_v30  ;;  %v6663_v30 = vld [vmem:[%s7308_s30 + $0x4e8] ss:$28 sps:$4 sm:$0xff]  }
 0x323   : > { %v7978_v20 = vmul.f32 %v6737_v15, %v4981_v58  ;;  %4642 = vmatpush2.bf16.msra.mxu1 %v6623_v7  ;;  %4602 = vmatprep.subr.bf16.mxu0 %v6628_v38  ;;  %v6664_v58 = vld [vmem:[%s7308_s30 + $0x2f0] ss:$28 sps:$4 sm:$0xff]  }
 0x324   : > { %v6739_v51 = vpop.eup %6738  ;;  %4643 = vmatprep.subr.bf16.mxu1 %v6631_v3  ;;  %v6665_v3 = vld [vmem:[%s7308_s30 + $0x670] ss:$28 sps:$4 sm:$0xff]  }
 0x325   : > { %v7983_v31 = vmul.f32 %v6739_v51, %v4985_v12  ;;  %v7988_v5 = vmul.f32 %v7978_v20, %v7939_v52  ;;  %v6638_v52 = vld [vmem:[%s7308_s30 + $0x940] ss:$28 sps:$4 sm:$0xff]  }
 0x326   : > { %4603 = vmatpush2.bf16.msra.mxu0 %v6626_v19  ;;  %v6666_v19 = vld [vmem:[%s7308_s30 + $0x130] ss:$28 sps:$4 sm:$0xff]  }
 0x327   : > { %v7992_v1 = vmul.f32 %v7983_v31, %v7946_v36  ;;  %4644 = vmatpush2.bf16.msra.mxu1 %v6629_v11  ;;  %4604 = vmatprep.subr.bf16.mxu0 %v6634_v26  ;;  %v6641_v36 = vld [vmem:[%s7308_s30 + $0xcc0] ss:$28 sps:$4 sm:$0xff]   ;;  %v6668_v26 = vld [vmem:[%s7308_s30 + $0x2b8] ss:$28 sps:$4 sm:$0xff]  }
 0x328   : > { %4645 = vmatprep.subr.bf16.mxu1 %v6637_v55  ;;  %v6669_v55 = vld [vmem:[%s7308_s30 + $0x638] ss:$28 sps:$4 sm:$0xff]  }
 0x329   : > { %v5070_v43 = vcombine.low %v7988_v5, %v7992_v1 }
 0x32a   : > { %4605 = vmatpush2.bf16.msra.mxu0 %v6632_v35  ;;  %v6670_v35 = vld [vmem:[%s7308_s30 + $0xf8] ss:$28 sps:$4 sm:$0xff]  }
 0x32b   : > { %4646 = vmatpush2.bf16.msra.mxu1 %v6635_v37  ;;  %4606 = vmatprep.subr.bf16.mxu0 %v6640_v47  ;;  %v6671_v37 = vld [vmem:[%s7308_s30 + $0x478] ss:$28 sps:$4 sm:$0xff]   ;;  %v6672_v47 = vld [vmem:[%s7308_s30 + $0x280] ss:$28 sps:$4 sm:$0xff]  }
 0x32c   : > { %4647 = vmatprep.subr.bf16.mxu1 %v6643_v33  ;;  %v6673_v33 = vld [vmem:[%s7308_s30 + $0x600] ss:$28 sps:$4 sm:$0xff]  }
 0x32e   : > { %4607 = vmatpush2.bf16.msra.mxu0 %v6638_v52  ;;  %v6674_v52 = vld [vmem:[%s7308_s30 + $0xc0] ss:$28 sps:$4 sm:$0xff]  }
 0x32f   : > { %4648 = vmatpush2.bf16.msra.mxu1 %v6641_v36  ;;  %4608 = vmatprep.subr.bf16.mxu0 %v6646_v44  ;;  %v6675_v36 = vld [vmem:[%s7308_s30 + $0x440] ss:$28 sps:$4 sm:$0xff]   ;;  %v6676_v44 = vld [vmem:[%s7308_s30 + $0x248] ss:$28 sps:$4 sm:$0xff]  }
 0x330   : > { %4649 = vmatprep.subr.bf16.mxu1 %v6649_v0  ;;  %v6677_v0 = vld [vmem:[%s7308_s30 + $0x5c8] ss:$28 sps:$4 sm:$0xff]  }
 0x332   : > { %4609 = vmatpush2.bf16.msra.mxu0 %v6644_v42  ;;  %v6678_v42 = vld [vmem:[%s7308_s30 + $0x88] ss:$28 sps:$4 sm:$0xff]  }
 0x333   : > { %4650 = vmatpush2.bf16.msra.mxu1 %v6647_v48  ;;  %4610 = vmatprep.subr.bf16.mxu0 %v6652_v62  ;;  %v6679_v48 = vld [vmem:[%s7308_s30 + $0x408] ss:$28 sps:$4 sm:$0xff]   ;;  %v6680_v62 = vld [vmem:[%s7308_s30 + $0x210] ss:$28 sps:$4 sm:$0xff]  }
 0x334   : > { %4651 = vmatprep.subr.bf16.mxu1 %v6655_v63  ;;  %v6681_v63 = vld [vmem:[%s7308_s30 + $0x590] ss:$28 sps:$4 sm:$0xff]  }
 0x336   : > { %4611 = vmatpush2.bf16.msra.mxu0 %v6650_v49  ;;  %v6682_v49 = vld [vmem:[%s7308_s30 + $0x50] ss:$28 sps:$4 sm:$0xff]  }
 0x337   : > { %4652 = vmatpush2.bf16.msra.mxu1 %v6653_v50  ;;  %5884 = vmatprep.subr.bf16.mxu0 %v6656_v34  ;;  %v6683_v50 = vld [vmem:[%s7308_s30 + $0x3d0] ss:$28 sps:$4 sm:$0xff]   ;;  %v6684_v34 = vld [vmem:[%s7308_s30 + $0x1d8] ss:$28 sps:$4 sm:$0xff]  }
 0x338   : > { %5906 = vmatprep.subr.bf16.mxu1 %v6657_v53  ;;  %v6685_v53 = vld [vmem:[%s7308_s30 + $0x558] ss:$28 sps:$4 sm:$0xff]  }
 0x339   : > { %v4368_v16 = vpop.f32.mrf.mxu0  ;;  %4613 = vmatmul.mubr.bf16.vlgmr.msra.gmra.mxu0 %v7674_v45 }
 0x33a   : > { %v4369_v22 = vadd.f32 %v4368_v16, %v1842_v59  ;;  %v4409_v27 = vpop.f32.mrf.mxu1  ;;  %4654 = vmatmul.mubr.bf16.vlgmr.msra.gmra.mxu1 %v7676_v46  ;;  %5885 = vmatpush3.bf16.msra.mxu0 %v6658_v60  ;;  %v6686_v59 = vld [vmem:[%s7308_s30 + $0x18] ss:$28 sps:$4 sm:$0xff]   ;;  %v6691_v16 = vld [vmem:[%s7308_s30 + $0xc20] ss:$28 sps:$4 sm:$0xff]  }
 0x33b   : > { %4694 = vmatprep.mubr.bf16.mxu0 %v7589_v21  ;;  %5907 = vmatpush3.bf16.msra.mxu1 %v6659_v39  ;;  %v4370_v25 = vpop.f32.mrf.mxu0  ;;  %v6687_v60 = vld [vmem:[%s7308_s30 + $0x398] ss:$28 sps:$4 sm:$0xff]   ;;  %v6688_v39 = vld [vmem:[%s7308_s30 + $0xa60] ss:$28 sps:$4 sm:$0xff]  }
 0x33c   : > { %v8025_v40 = vadd.f32 %v4409_v27, %v4369_v22  ;;  %4734 = vmatprep.mubr.bf16.mxu1 %v7591_v28  ;;  %v4371_v7 = vadd.f32 %v4370_v25, %v1846_v54  ;;  %v4411_v38 = vpop.f32.mrf.mxu1  ;;  %5886 = vmatprep.subr.bf16.mxu0 %v6660_v56  ;;  %v6667_v28 = vld [vmem:[%s7308_s30 + $0x4b0] ss:$28 sps:$4 sm:$0xff]   ;;  %v6689_v54 = vld [vmem:[%s7308_s30 + $0xde0] ss:$28 sps:$4 sm:$0xff]   ;;  %v6693_v22 = vld [vmem:[%s7308_s30 + $0xda8] ss:$28 sps:$4 sm:$0xff]  }
 0x33d   : > { %v4372_v12 = vpop.f32.mrf.mxu0  ;;  %5908 = vmatprep.subr.bf16.mxu1 %v6661_v18  ;;  %v6690_v56 = vld [vmem:[%s7308_s30 + $0x8a0] ss:$28 sps:$4 sm:$0xff]   ;;  %v6692_v18 = vld [vmem:[%s7308_s30 + $0xa28] ss:$28 sps:$4 sm:$0xff]   ;;  %v6696_v25 = vld [vmem:[%s7308_s30 + $0x9f0] ss:$28 sps:$4 sm:$0xff]  }
 0x33e   : > { %v8029_v21 = vadd.f32 %v4411_v38, %v4371_v7  ;;  %v4413_v15 = vpop.f32.mrf.mxu1  ;;  %5887 = vmatpush3.bf16.msra.mxu0 %v6662_v57  ;;  %v6694_v27 = vld [vmem:[%s7308_s30 + $0x868] ss:$28 sps:$4 sm:$0xff]   ;;  %v6703_v7 = vld [vmem:[%s7308_s30 + $0xb78] ss:$28 sps:$4 sm:$0xff]   ;;  %v6704_v38 = vld [vmem:[%s7308_s30 + $0x980] ss:$28 sps:$4 sm:$0xff]  }
 0x33f   : > { %5909 = vmatpush3.bf16.msra.mxu1 %v6663_v30  ;;  %v4373_v11 = vpop.f32.mrf.mxu0  ;;  %5888 = vmatprep.subr.bf16.mxu0 %v6664_v58  ;;  %v6695_v57 = vld [vmem:[%s7308_s30 + $0xbe8] ss:$28 sps:$4 sm:$0xff]   ;;  %v6699_v30 = vld [vmem:[%s7308_s30 + $0xbb0] ss:$28 sps:$4 sm:$0xff]   ;;  %v6701_v58 = vld [vmem:[%s7308_s30 + $0xd38] ss:$28 sps:$4 sm:$0xff]  }
 0x340   : > { %v4414_v51 = vpop.f32.mrf.mxu1  ;;  %5910 = vmatprep.subr.bf16.mxu1 %v6665_v3  ;;  %v6705_v3 = vld [vmem:[%s7308_s30 + $0xd00] ss:$28 sps:$4 sm:$0xff]   ;;  %v6709_v11 = vld [vmem:[%s7308_s30 + $0xcc8] ss:$28 sps:$4 sm:$0xff]  }
 0x341   : > { %v6706_v12 = vld [vmem:[%s7308_s30 + $0x7c0] ss:$28 sps:$4 sm:$0xff]   ;;  %v6712_v51 = vld [vmem:[%s7308_s30 + $0x910] ss:$28 sps:$4 sm:$0xff]  }
 0x342   : > { %5889 = vmatpush3.bf16.msra.mxu0 %v6666_v19  ;;  %v6707_v15 = vld [vmem:[%s7308_s30 + $0xb40] ss:$28 sps:$4 sm:$0xff]   ;;  %v6708_v19 = vld [vmem:[%s7308_s30 + $0x948] ss:$28 sps:$4 sm:$0xff]  }
 0x343   : > { %5911 = vmatpush3.bf16.msra.mxu1 %v6667_v28  ;;  %5890 = vmatprep.subr.bf16.mxu0 %v6668_v26  ;;  %v6710_v28 = vld [vmem:[%s7308_s30 + $0x788] ss:$28 sps:$4 sm:$0xff]  }
 0x344   : > { %5912 = vmatprep.subr.bf16.mxu1 %v6669_v55  ;;  %v6711_v26 = vld [vmem:[%s7308_s30 + $0xb08] ss:$28 sps:$4 sm:$0xff]   ;;  %v6713_v55 = vld [vmem:[%s7308_s30 + $0xc90] ss:$28 sps:$4 sm:$0xff]  }
 0x346   : > { %5891 = vmatpush3.bf16.msra.mxu0 %v6670_v35  ;;  %v6714_v35 = vld [vmem:[%s7308_s30 + $0x750] ss:$28 sps:$4 sm:$0xff]  }
 0x347   : > { %5913 = vmatpush3.bf16.msra.mxu1 %v6671_v37  ;;  %5892 = vmatprep.subr.bf16.mxu0 %v6672_v47  ;;  %v6715_v37 = vld [vmem:[%s7308_s30 + $0xad0] ss:$28 sps:$4 sm:$0xff]   ;;  %v6716_v47 = vld [vmem:[%s7308_s30 + $0x8d8] ss:$28 sps:$4 sm:$0xff]  }
 0x348   : > { %5914 = vmatprep.subr.bf16.mxu1 %v6673_v33  ;;  %v6717_v33 = vld [vmem:[%s7308_s30 + $0xc58] ss:$28 sps:$4 sm:$0xff]  }
 0x34a   : > { %5893 = vmatpush3.bf16.msra.mxu0 %v6674_v52  ;;  %v6718_v52 = vld [vmem:[%s7308_s30 + $0x718] ss:$28 sps:$4 sm:$0xff]  }
 0x34b   : > { %5915 = vmatpush3.bf16.msra.mxu1 %v6675_v36  ;;  %5894 = vmatprep.subr.bf16.mxu0 %v6676_v44  ;;  %v6719_v36 = vld [vmem:[%s7308_s30 + $0xa98] ss:$28 sps:$4 sm:$0xff]  }
 0x34c   : > { %5916 = vmatprep.subr.bf16.mxu1 %v6677_v0 }
 0x34e   : > { %5895 = vmatpush3.bf16.msra.mxu0 %v6678_v42 }
 0x34f   : > { %5917 = vmatpush3.bf16.msra.mxu1 %v6679_v48  ;;  %5896 = vmatprep.subr.bf16.mxu0 %v6680_v62 }
 0x350   : > { %5918 = vmatprep.subr.bf16.mxu1 %v6681_v63 }
 0x352   : > { %5897 = vmatpush3.bf16.msra.mxu0 %v6682_v49 }
 0x353   : > { %5919 = vmatpush3.bf16.msra.mxu1 %v6683_v50  ;;  %5898 = vmatprep.subr.bf16.mxu0 %v6684_v34 }
 0x354   : > { %5920 = vmatprep.subr.bf16.mxu1 %v6685_v53 }
 0x356   : > { %5899 = vmatpush3.bf16.msra.mxu0 %v6686_v59 }
 0x357   : > { %5921 = vmatpush3.bf16.msra.mxu1 %v6687_v60  ;;  %5928 = vmatprep.subr.bf16.mxu0 %v6688_v39 }
 0x358   : > { %5950 = vmatprep.subr.bf16.mxu1 %v6689_v54 }
 0x359   : > { %4695 = vmatmul.mubr.bf16.vlgmr.msra.gmra.mxu0 %v7595_v32  ;;  %v6697_v32 = vld [vmem:[%s7308_s30 + $0xd70] ss:$28 sps:$4 sm:$0xff]  }
 0x35a   : > { %4735 = vmatmul.mubr.bf16.vlgmr.msra.gmra.mxu1 %v7597_v4  ;;  %5929 = vmatpush3.bf16.msra.mxu0 %v6690_v56  ;;  %v6698_v4 = vld [vmem:[%s7308_s30 + $0x830] ss:$28 sps:$4 sm:$0xff]  }
 0x35b   : > { %4774 = vmatprep.mubr.bf16.mxu0 %v7605_v14  ;;  %5951 = vmatpush3.bf16.msra.mxu1 %v6691_v16  ;;  %v6700_v14 = vld [vmem:[%s7308_s30 + $0x9b8] ss:$28 sps:$4 sm:$0xff]  }
 0x35c   : > { %4814 = vmatprep.mubr.bf16.mxu1 %v7607_v41  ;;  %5930 = vmatprep.subr.bf16.mxu0 %v6692_v18  ;;  %v6702_v41 = vld [vmem:[%s7308_s30 + $0x7f8] ss:$28 sps:$4 sm:$0xff]  }
 0x35d   : > { %5952 = vmatprep.subr.bf16.mxu1 %v6693_v22 }
 0x35e   : > { %5931 = vmatpush3.bf16.msra.mxu0 %v6694_v27 }
 0x35f   : > { %5953 = vmatpush3.bf16.msra.mxu1 %v6695_v57  ;;  %5932 = vmatprep.subr.bf16.mxu0 %v6696_v25 }
 0x360   : > { %5954 = vmatprep.subr.bf16.mxu1 %v6697_v32 }
 0x362   : > { %5933 = vmatpush3.bf16.msra.mxu0 %v6698_v4 }
 0x363   : > { %5955 = vmatpush3.bf16.msra.mxu1 %v6699_v30  ;;  %5934 = vmatprep.subr.bf16.mxu0 %v6700_v14 }
 0x364   : > { %5956 = vmatprep.subr.bf16.mxu1 %v6701_v58 }
 0x366   : > { %5935 = vmatpush3.bf16.msra.mxu0 %v6702_v41 }
 0x367   : > { %5957 = vmatpush3.bf16.msra.mxu1 %v6703_v7  ;;  %5936 = vmatprep.subr.bf16.mxu0 %v6704_v38 }
 0x368   : > { %5958 = vmatprep.subr.bf16.mxu1 %v6705_v3 }
 0x36a   : > { %5937 = vmatpush3.bf16.msra.mxu0 %v6706_v12 }
 0x36b   : > { %5959 = vmatpush3.bf16.msra.mxu1 %v6707_v15  ;;  %5938 = vmatprep.subr.bf16.mxu0 %v6708_v19 }
 0x36c   : > { %5960 = vmatprep.subr.bf16.mxu1 %v6709_v11 }
 0x36e   : > { %5939 = vmatpush3.bf16.msra.mxu0 %v6710_v28 }
 0x36f   : > { %5961 = vmatpush3.bf16.msra.mxu1 %v6711_v26  ;;  %5940 = vmatprep.subr.bf16.mxu0 %v6712_v51 }
 0x370   : > { %5962 = vmatprep.subr.bf16.mxu1 %v6713_v55 }
 0x372   : > { %5941 = vmatpush3.bf16.msra.mxu0 %v6714_v35 }
 0x373   : > { %5963 = vmatpush3.bf16.msra.mxu1 %v6715_v37  ;;  %5942 = vmatprep.subr.bf16.mxu0 %v6716_v47 }
 0x374   : > { %5964 = vmatprep.subr.bf16.mxu1 %v6717_v33 }
 0x376   : > { %5943 = vmatpush3.bf16.msra.mxu0 %v6718_v52 }
 0x377   : > { %5965 = vmatpush3.bf16.msra.mxu1 %v6719_v36 }
 0x379   : > { %v4450_v44 = vpop.f32.mrf.mxu0  ;;  %4775 = vmatmul.mubr.bf16.vlgmr.msra.gmra.mxu0 %v7674_v45 }
 0x37a   : > { %v4451_v0 = vadd.f32 %v4450_v44, %v8025_v40  ;;  %v4491_v42 = vpop.f32.mrf.mxu1  ;;  %4815 = vmatmul.mubr.bf16.vlgmr.msra.gmra.mxu1 %v7676_v46 }
 0x37b   : > { %v4452_v48 = vpop.f32.mrf.mxu0 }
 0x37c   : > { %v8092_v62 = vadd.f32 %v4491_v42, %v4451_v0  ;;  %v4453_v63 = vadd.f32 %v4452_v48, %v8029_v21  ;;  %v4493_v49 = vpop.f32.mrf.mxu1 }
 0x37d   : > { %v4454_v50 = vpop.f32.mrf.mxu0 }
 0x37e   : > { %v4836_v34 = vsel %vm917_vm1, %v8092_v62, 0.0  ;;  %v4880_v53 = vmul.f32 %v8092_v62, %v8092_v62  ;;  %v8099_v59 = vadd.f32 %v4493_v49, %v4453_v63  ;;  %v4495_v45 = vpop.f32.mrf.mxu1  ;;  %v4989_v50 = vrot.slane %v7966_v13, %v7399_v8 }
 0x37f   : > { %v4837_v40 = vrot.slane %v4836_v34, 4  ;;  %v4455_v60 = vpop.f32.mrf.mxu0 }
 0x380   : > { %v4899_v46 = vsel %vm917_vm1, %v4880_v53, 0.0  ;;  %v4843_v39 = vsel %vm917_vm1, %v8099_v59, 0.0  ;;  %v4881_v21 = vmul.f32 %v8099_v59, %v8099_v59  ;;  %v4496_v54 = vpop.f32.mrf.mxu1 }
 0x381   : > { %v4838_v56 = vadd.f32 %v4837_v40, %v4836_v34  ;;  %v4900_v16 = vrot.slane %v4899_v46, 4  ;;  %v4844_v18 = vrot.slane %v4843_v39, 4  ;;  %v4993_v34 = vrot.slane %v7966_v13, %v7405_v10 }
 0x382   : > { %v4906_v22 = vsel %vm917_vm1, %v4881_v21, 0.0  ;;  %v8121_v54 = vrot.slane %v5070_v43, %v7553_v24 }
 0x383   : > { %v4839_v27 = vrot.slane %v4838_v56, 2  ;;  %v4901_v57 = vadd.f32 %v4900_v16, %v4899_v46  ;;  %v4845_v25 = vadd.f32 %v4844_v18, %v4843_v39  ;;  %v4907_v32 = vrot.slane %v4906_v22, 4  ;;  %v8130_v18 = vld [vmem:[%s435_s14] sm:$0xff] }
 0x385   : > { %v4840_v4 = vadd.f32 %v4839_v27, %v4838_v56  ;;  %v4902_v30 = vrot.slane %v4901_v57, 2  ;;  %v4846_v14 = vrot.slane %v4845_v25, 2  ;;  %v4908_v58 = vadd.f32 %v4907_v32, %v4906_v22 }
 0x386   : > { %v1850_v22 = vrot.slane %v8130_v18, %v7444_v61  ;;  %v1854_v27 = vrot.slane %v8130_v18, %v7454_v23 }
 0x387   : > { %v4841_v41 = vrot.slane %v4840_v4, 1  ;;  %v4903_v7 = vadd.f32 %v4902_v30, %v4901_v57  ;;  %v4847_v38 = vadd.f32 %v4846_v14, %v4845_v25  ;;  %v4909_v3 = vrot.slane %v4908_v58, 2 }
 0x389   : > { %v4842_v12 = vadd.f32 %v4841_v41, %v4840_v4  ;;  %v4904_v15 = vrot.slane %v4903_v7, 1  ;;  %v4848_v19 = vrot.slane %v4847_v38, 1  ;;  %v4910_v11 = vadd.f32 %v4909_v3, %v4908_v58 }
 0x38b   : > { %v4873_v28 = vmul.f32 0.5, %v4842_v12  ;;  %v4905_v26 = vadd.f32 %v4904_v15, %v4903_v7  ;;  %v4849_v51 = vadd.f32 %v4848_v19, %v4847_v38  ;;  %v4911_v55 = vrot.slane %v4910_v11, 1 }
 0x38d   : > { %v4936_v35 = vmul.f32 0.5, %v4905_v26  ;;  %v4943_v37 = vmul.f32 %v4873_v28, %v4873_v28  ;;  %v4874_v47 = vmul.f32 0.5, %v4849_v51  ;;  %v4912_v33 = vadd.f32 %v4911_v55, %v4910_v11 }
 0x38f   : > { %v4950_v52 = vsub.f32 %v4936_v35, %v4943_v37  ;;  %v4937_v36 = vmul.f32 0.5, %v4912_v33  ;;  %v4944_v44 = vmul.f32 %v4874_v47, %v4874_v47 }
 0x391   : > { %v4957_v0 = vmax.f32 %v4950_v52, 0.0  ;;  %v4951_v42 = vsub.f32 %v4937_v36, %v4944_v44 }
 0x393   : > { %v4964_v48 = vadd.f32 1e-05, %v4957_v0  ;;  %v4958_v63 = vmax.f32 %v4951_v42, 0.0 }
 0x395   : > { %6740 = vrsqrt.f32 %v4964_v48  ;;  %v4965_v49 = vadd.f32 1e-05, %v4958_v63 }
 0x397   : > { %6742 = vrsqrt.f32 %v4965_v49 }
 0x3a2   : > { %v6741_v53 = vpop.eup %6740 }
 0x3a3   : > { %v8111_v45 = vmul.f32 %v6741_v53, %v4989_v50 }
 0x3a4   : > { %v6743_v40 = vpop.eup %6742 }
 0x3a5   : > { %v8113_v60 = vmul.f32 %v6743_v40, %v4993_v34  ;;  %v5058_v46 = vmul.f32 %v8111_v45, %v4873_v28 }
 0x3a7   : > { %v5059_v39 = vmul.f32 %v8113_v60, %v4874_v47 }
 0x3a9   : > { %v5071_v21 = vcombine.low %v5058_v46, %v5059_v39 }
 0x3ab   : > { %v8124_v56 = vrot.slane %v5071_v21, %v7553_v24 }
 0x3ad   : > { %v5101_v16 = vcombine.low %v8121_v54, %v8124_v56 }
 0x3b9   : > { %v4532_v57 = vpop.f32.mrf.mxu0 }
 0x3ba   : > { %v4533_v25 = vadd.f32 %v4532_v57, %v1850_v22  ;;  %v4573_v5 = vpop.f32.mrf.mxu1 }
 0x3bb   : > { %v4534_v1 = vpop.f32.mrf.mxu0 }
 0x3bc   : > { %v4574_v43 = vadd.f32 %v4573_v5, %v4533_v25  ;;  %v4535_v32 = vadd.f32 %v4534_v1, %v1854_v27  ;;  %v4575_v4 = vpop.f32.mrf.mxu1 }
 0x3bd   : > { %v4536_v30 = vpop.f32.mrf.mxu0 }
 0x3be   : > { %v4576_v14 = vadd.f32 %v4575_v4, %v4535_v32  ;;  %v4577_v58 = vpop.f32.mrf.mxu1 }
 0x3bf   : > { %v4537_v41 = vpop.f32.mrf.mxu0 }
 0x3c0   : > { %v4578_v7 = vpop.f32.mrf.mxu1 }
 0x3f9   : > { %v4614_v38 = vpop.f32.mrf.mxu0 }
 0x3fa   : > { %v4615_v3 = vadd.f32 %v4614_v38, %v4574_v43  ;;  %v4655_v12 = vpop.f32.mrf.mxu1 }
 0x3fb   : > { %v4616_v15 = vpop.f32.mrf.mxu0 }
 0x3fc   : > { %v8136_v19 = vadd.f32 %v4655_v12, %v4615_v3  ;;  %v4617_v11 = vadd.f32 %v4616_v15, %v4576_v14  ;;  %v4657_v28 = vpop.f32.mrf.mxu1 }
 0x3fd   : > { %v4618_v26 = vpop.f32.mrf.mxu0 }
 0x3fe   : > { %v4850_v51 = vsel %vm917_vm1, %v8136_v19, 0.0  ;;  %v4882_v55 = vmul.f32 %v8136_v19, %v8136_v19  ;;  %v8142_v35 = vadd.f32 %v4657_v28, %v4617_v11  ;;  %v4659_v37 = vpop.f32.mrf.mxu1 }
 0x3ff   : > { %v4851_v47 = vrot.slane %v4850_v51, 4  ;;  %v4619_v33 = vpop.f32.mrf.mxu0 }
 0x400   : > { %v4913_v52 = vsel %vm917_vm1, %v4882_v55, 0.0  ;;  %v4857_v36 = vsel %vm917_vm1, %v8142_v35, 0.0  ;;  %v4883_v44 = vmul.f32 %v8142_v35, %v8142_v35  ;;  %v4660_v0 = vpop.f32.mrf.mxu1 }
 0x401   : > { %v4852_v42 = vadd.f32 %v4851_v47, %v4850_v51  ;;  %v4914_v48 = vrot.slane %v4913_v52, 4  ;;  %v4858_v63 = vrot.slane %v4857_v36, 4 }
 0x402   : > { %v4920_v49 = vsel %vm917_vm1, %v4883_v44, 0.0 }
 0x403   : > { %v4853_v50 = vrot.slane %v4852_v42, 2  ;;  %v4915_v34 = vadd.f32 %v4914_v48, %v4913_v52  ;;  %v4859_v53 = vadd.f32 %v4858_v63, %v4857_v36  ;;  %v4921_v40 = vrot.slane %v4920_v49, 4 }
 0x404   : > { %v4997_v48 = vrot.slane %v7966_v13, %v7444_v61 }
 0x405   : > { %v4854_v46 = vadd.f32 %v4853_v50, %v4852_v42  ;;  %v4916_v39 = vrot.slane %v4915_v34, 2  ;;  %v4860_v21 = vrot.slane %v4859_v53, 2  ;;  %v4922_v22 = vadd.f32 %v4921_v40, %v4920_v49 }
 0x406   : > { %v5001_v50 = vrot.slane %v7966_v13, %v7454_v23 }
 0x407   : > { %v4855_v27 = vrot.slane %v4854_v46, 1  ;;  %v4917_v57 = vadd.f32 %v4916_v39, %v4915_v34  ;;  %v4861_v25 = vadd.f32 %v4860_v21, %v4859_v53  ;;  %v4923_v5 = vrot.slane %v4922_v22, 2 }
 0x409   : > { %v4856_v1 = vadd.f32 %v4855_v27, %v4854_v46  ;;  %v4918_v43 = vrot.slane %v4917_v57, 1  ;;  %v4862_v32 = vrot.slane %v4861_v25, 1  ;;  %v4924_v4 = vadd.f32 %v4923_v5, %v4922_v22 }
 0x40a   : > { %v1858_v27 = vrot.slane %v8130_v18, %v7447_v2 }
 0x40b   : > { %v4875_v30 = vmul.f32 0.5, %v4856_v1  ;;  %v4919_v14 = vadd.f32 %v4918_v43, %v4917_v57  ;;  %v4863_v58 = vadd.f32 %v4862_v32, %v4861_v25  ;;  %v4925_v41 = vrot.slane %v4924_v4, 1 }
 0x40d   : > { %v4938_v7 = vmul.f32 0.5, %v4919_v14  ;;  %v4945_v38 = vmul.f32 %v4875_v30, %v4875_v30  ;;  %v4876_v3 = vmul.f32 0.5, %v4863_v58  ;;  %v4926_v12 = vadd.f32 %v4925_v41, %v4924_v4 }
 0x40f   : > { %v4952_v15 = vsub.f32 %v4938_v7, %v4945_v38  ;;  %v4939_v11 = vmul.f32 0.5, %v4926_v12  ;;  %v4946_v28 = vmul.f32 %v4876_v3, %v4876_v3 }
 0x411   : > { %v4959_v26 = vmax.f32 %v4952_v15, 0.0  ;;  %v4953_v51 = vsub.f32 %v4939_v11, %v4946_v28 }
 0x413   : > { %v4966_v55 = vadd.f32 1e-05, %v4959_v26  ;;  %v4960_v37 = vmax.f32 %v4953_v51, 0.0 }
 0x415   : > { %6744 = vrsqrt.f32 %v4966_v55  ;;  %v4967_v47 = vadd.f32 1e-05, %v4960_v37 }
 0x417   : > { %6746 = vrsqrt.f32 %v4967_v47 }
 0x419   : > { %v5900_v33 = vpop.f32.mrf.mxu0 }
 0x41a   : > { %v5922_v52 = vpop.f32.mrf.mxu1 }
 0x41b   : > { %v5901_v36 = vpop.f32.mrf.mxu0 }
 0x41c   : > { %v5923_v44 = vpop.f32.mrf.mxu1  ;;  %v5902_v57 = vadd.f32 %v5901_v36, %v5900_v33 }
 0x41d   : > { %v5903_v0 = vpop.f32.mrf.mxu0  ;;  %v5924_v1 = vadd.f32 %v5923_v44, %v5922_v52 }
 0x41e   : > { %v5925_v42 = vpop.f32.mrf.mxu1  ;;  %v4697_v25 = vadd.f32 %v5902_v57, %v1858_v27 }
 0x41f   : > { %v5904_v63 = vpop.f32.mrf.mxu0 }
 0x420   : > { %v5926_v49 = vpop.f32.mrf.mxu1  ;;  %v4737_v4 = vadd.f32 %v5924_v1, %v4697_v25 }
 0x422   : > { %v6745_v34 = vpop.eup %6744 }
 0x423   : > { %v8154_v53 = vmul.f32 %v6745_v34, %v4997_v48 }
 0x424   : > { %v6747_v40 = vpop.eup %6746 }
 0x425   : > { %v8156_v46 = vmul.f32 %v6747_v40, %v5001_v50  ;;  %v5060_v39 = vmul.f32 %v8154_v53, %v4875_v30 }
 0x427   : > { %v5061_v21 = vmul.f32 %v8156_v46, %v4876_v3 }
 0x429   : > { %v5072_v22 = vcombine.low %v5060_v39, %v5061_v21  ;;  %v5005_v21 = vrot.slane %v7966_v13, %v7447_v2  ;;  %v5109_v13 = vrot.slane %v5101_v16, %v7553_v24 }
 0x439   : > { %v5944_v5 = vpop.f32.mrf.mxu0 }
 0x43a   : > { %v5966_v43 = vpop.f32.mrf.mxu1 }
 0x43b   : > { %v5945_v32 = vpop.f32.mrf.mxu0 }
 0x43c   : > { %v5946_v14 = vadd.f32 %v5945_v32, %v5944_v5  ;;  %v5967_v58 = vpop.f32.mrf.mxu1  ;;  %v5093_v5 = vrot.slane %v5072_v22, %v7553_v24  ;;  %v5023_v32 = vrot.slane %v7978_v20, %v7394_v6  ;;  %v5031_v22 = vrot.slane %v8111_v45, %v7394_v6 }
 0x43d   : > { %v5947_v41 = vpop.f32.mrf.mxu0  ;;  %v5968_v38 = vadd.f32 %v5967_v58, %v5966_v43  ;;  %v5035_v58 = vrot.slane %v8113_v60, %v7394_v6  ;;  %v5039_v20 = vrot.slane %v8154_v53, %v7394_v6 }
 0x43e   : > { %v4777_v7 = vadd.f32 %v5946_v14, %v4737_v4  ;;  %v5969_v12 = vpop.f32.mrf.mxu1  ;;  %v5027_v4 = vrot.slane %v7983_v31, %v7394_v6  ;;  %v5043_v31 = vrot.slane %v8156_v46, %v7394_v6  ;;  %v5055_v41 = vld [vmem:[%s453_s13] sm:$0xff]  ;;  %v5048_v56 = vmul.f32 %v5023_v32, %v7909_v29 }
 0x43f   : > { %v5948_v30 = vpop.f32.mrf.mxu0  ;;  %v5050_v16 = vmul.f32 %v5031_v22, %v8092_v62  ;;  %v5051_v60 = vmul.f32 %v5035_v58, %v8099_v59  ;;  %v5052_v53 = vmul.f32 %v5039_v20, %v8136_v19 }
 0x440   : > { %v4817_v15 = vadd.f32 %v5968_v38, %v4777_v7  ;;  %v5970_v3 = vpop.f32.mrf.mxu1  ;;  %v5053_v38 = vmul.f32 %v5043_v31, %v8142_v35 }
 0x442   : > { %v4864_v11 = vsel %vm917_vm1, %v4817_v15, 0.0  ;;  %v4884_v28 = vmul.f32 %v4817_v15, %v4817_v15 }
 0x443   : > { %v4865_v18 = vrot.slane %v4864_v11, 4 }
 0x444   : > { %v4927_v26 = vsel %vm917_vm1, %v4884_v28, 0.0 }
 0x445   : > { %v4866_v51 = vadd.f32 %v4865_v18, %v4864_v11  ;;  %v4928_v55 = vrot.slane %v4927_v26, 4 }
 0x447   : > { %v4867_v37 = vrot.slane %v4866_v51, 2  ;;  %v4929_v47 = vadd.f32 %v4928_v55, %v4927_v26 }
 0x449   : > { %v4868_v33 = vadd.f32 %v4867_v37, %v4866_v51  ;;  %v4930_v52 = vrot.slane %v4929_v47, 2 }
 0x44b   : > { %v4869_v36 = vrot.slane %v4868_v33, 1  ;;  %v4931_v44 = vadd.f32 %v4930_v52, %v4929_v47 }
 0x44d   : > { %v4870_v0 = vadd.f32 %v4869_v36, %v4868_v33  ;;  %v4932_v42 = vrot.slane %v4931_v44, 1 }
 0x44f   : > { %v4877_v48 = vmul.f32 0.5, %v4870_v0  ;;  %v4933_v63 = vadd.f32 %v4932_v42, %v4931_v44 }
 0x451   : > { %v4940_v49 = vmul.f32 0.5, %v4933_v63  ;;  %v4947_v50 = vmul.f32 %v4877_v48, %v4877_v48 }
 0x453   : > { %v4954_v34 = vsub.f32 %v4940_v49, %v4947_v50 }
 0x455   : > { %v4961_v40 = vmax.f32 %v4954_v34, 0.0 }
 0x457   : > { %v4968_v39 = vadd.f32 1e-05, %v4961_v40 }
 0x459   : > { %6748 = vrsqrt.f32 %v4968_v39 }
 0x466   : > { %v6749_v27 = vpop.eup %6748 }
 0x467   : > { %v5019_v57 = vmul.f32 %v6749_v27, %v5005_v21 }
 0x469   : > { %v5062_v25 = vmul.f32 %v5019_v57, %v4877_v48  ;;  %v5047_v54 = vrot.slane %v5019_v57, %v7394_v6 }
 0x46b   : > { %v5100_v1 = vrot.slane %v5062_v25, %v7553_v24  ;;  %v5054_v3 = vmul.f32 %v5047_v54, %v4817_v15 }
 0x46d   : > { %v5102_v43 = vcombine.low %v5093_v5, %v5100_v1 }
 0x46f   : > { %v5116_v14 = vrot.slane %v5102_v43, %v7553_v24  ;;  %v5049_v24 = vmul.f32 %v5027_v4, %v7918_v17 }
 0x471   : > { %v5117_v7 = vcombine.low %v5109_v13, %v5116_v14 }
 0x473   : > { %v5119_v45 = vsub.f32 %v5055_v41, %v5117_v7 }
 0x475   : > { %v5124_v46 = vrot.slane %v5119_v45, %v7394_v6  ;;  %v5128_v12 = vrot.slane %v5119_v45, %v7402_v9  ;;  %v5132_v30 = vrot.slane %v5119_v45, %v7399_v8  ;;  %v5136_v29 = vrot.slane %v5119_v45, %v7405_v10 }
 0x476   : > { %v5140_v17 = vrot.slane %v5119_v45, %v7444_v61  ;;  %v5144_v11 = vrot.slane %v5119_v45, %v7454_v23  ;;  %v5148_v62 = vrot.slane %v5119_v45, %v7447_v2 }
 0x477   : > { %v5156_v59 = vadd.f32 %v5124_v46, %v5048_v56  ;;  %v5157_v19 = vadd.f32 %v5128_v12, %v5049_v24  ;;  %v5158_v28 = vadd.f32 %v5132_v30, %v5050_v16  ;;  %v5159_v35 = vadd.f32 %v5136_v29, %v5051_v60 }
 0x478   : > { %v5160_v18 = vadd.f32 %v5140_v17, %v5052_v53  ;;  %v5161_v6 = vadd.f32 %v5144_v11, %v5053_v38  ;;  %v5162_v26 = vadd.f32 %v5148_v62, %v5054_v3 }
 0x479   : > { %v5163_v9 = vmax.f32 %v5156_v59, 0.0  ;;  %v5164_v51 = vmax.f32 %v5157_v19, 0.0  ;;  %v5165_v8 = vmax.f32 %v5158_v28, 0.0  ;;  %v5166_v55 = vmax.f32 %v5159_v35, 0.0 }
 0x47a   : > { %v5167_v10 = vmax.f32 %v5160_v18, 0.0  ;;  %v5168_v61 = vmax.f32 %v5161_v6, 0.0  ;;  %v5169_v23 = vmax.f32 %v5162_v26, 0.0 }
 0x47b   : > { %v5880_v2 = vpack.c.bf16 %v5164_v51, %v5163_v9  ;;  %v5881_v15 = vpack.c.bf16 %v5166_v55, %v5165_v8 }
 0x47c   : > { %v5882_v37 = vpack.c.bf16 %v5168_v61, %v5167_v10  ;;  %v5883_v47 = vpack.c.bf16 %v5169_v23, %v5169_v23 }
 0x47d   : > { %5199 = vst [vmem:[%s511_s23] sm:$0xff] %v5880_v2  ;;  %5200 = vst [vmem:[%s511_s23 + $0x8] sm:$0xff] %v5881_v15 }
 0x47e   : > { %5201 = vst [vmem:[%s511_s23 + $0x10] sm:$0xff] %v5882_v37  ;;  %5202 = vst [vmem:[%s511_s23 + $0x18] sm:$0xf] %v5883_v47 }
 0x47f PF: > { %s8270_s12 = sld [smem:[#allocation18_spill]]  ;;  %s8273_s30 = smov %s7005_s10 }
 0x480   : > { %s8271_s21 = sld [smem:[#allocation17_spill]] }
 0x481   : > { %s8272_s11 = sld [smem:[#allocation19_spill]] }
 0x485   : > { %p19_p9 = scmp.ge.s32.totalorder %s8270_s12, 9  }
 0x486   : > { %s8274_s10 = smov %s8271_s21 }
 0x487   :  { %21 = sbr.rel (!%p19_p9) target bundleno = 9 (0x9), region = 144 }
 0x48c   :  { %5225 = vsyncpa [#allocation3], 1 }
 0x48d   :  { %5227 = vsyncpa [#allocation3 + $0x1], 1 }
 0x48e   :  { %5228 = vsyncpa [#allocation5], 1 }
 0x48f   :  { %5229 = vsyncpa [#allocation8], 1 }

// kernel: generator_forward.4
= control target key start
LH: loop header
LB: loop body
LE: loop exit
PB: predicated region body
PF: predicated region fallthrough
CT: control target
= control target key end

     0   :  { %vm2532_vm0 = vcmask 523264   ;;  %vm2556_vm1 = vcmask 517120   ;;  %vm2710_vm2 = vcmask 519168   ;;  %vm2723_vm3 = vcmask 516096   ;;  %s6040_s1 = inlined_call_operand.vmem [shape: bf16[4,512,64], index: 1, kind: input, shape index: {}]   ;;  %s6041_s0 = inlined_call_operand.vmem [shape: bf16[4,98,512], index: 0, kind: input, shape index: {}]   ;;  %s6042_s2 = inlined_call_operand.vmem [shape: f32[1,64], index: 2, kind: input, shape index: {}]   ;;  %s6043_s3 = inlined_call_operand.vmem [shape: f32[1,64], index: 3, kind: input, shape index: {}]   ;;  %s6044_s4 = inlined_call_operand.vmem [shape: f32[1,64], index: 4, kind: input, shape index: {}]   ;;  %s6045_s5 = inlined_call_operand.vmem [shape: bf16[4,98,64], index: 5, kind: output, shape index: {}]  }
   0x1   :  { %v4165_v0 = vld [vmem:[%s6040_s1 + $0x78] sm:$0xff]   ;;  %v4169_v4 = vld [vmem:[%s6040_s1 + $0x70] sm:$0xff]   ;;  %v4173_v8 = vld [vmem:[%s6040_s1 + $0x68] sm:$0xff]  }
   0x2   :  { %v4166_v1 = vld [vmem:[%s6040_s1 + $0xf8] sm:$0xff]   ;;  %3701 = vmatprep.subr.bf16.mxu0 %v4165_v0  ;;  %v4170_v5 = vld [vmem:[%s6040_s1 + $0xf0] sm:$0xff]   ;;  %v4174_v9 = vld [vmem:[%s6040_s1 + $0xe8] sm:$0xff]  }
   0x3   :  { %v4167_v2 = vld [vmem:[%s6040_s1 + $0x38] sm:$0xff]   ;;  %3759 = vmatprep.subr.bf16.mxu1 %v4166_v1  ;;  %v4171_v6 = vld [vmem:[%s6040_s1 + $0x30] sm:$0xff]   ;;  %v4175_v10 = vld [vmem:[%s6040_s1 + $0x28] sm:$0xff]  }
   0x4   :  { %v4168_v3 = vld [vmem:[%s6040_s1 + $0xb8] sm:$0xff]   ;;  %3702 = vmatpush3.bf16.msra.mxu0 %v4167_v2  ;;  %v4172_v7 = vld [vmem:[%s6040_s1 + $0xb0] sm:$0xff]   ;;  %v4176_v11 = vld [vmem:[%s6040_s1 + $0xa8] sm:$0xff]  }
   0x5   :  { %3760 = vmatpush3.bf16.msra.mxu1 %v4168_v3  ;;  %3703 = vmatprep.subr.bf16.mxu0 %v4169_v4  ;;  %v4177_v12 = vld [vmem:[%s6040_s1 + $0x60] sm:$0xff]   ;;  %v4181_v16 = vld [vmem:[%s6040_s1 + $0x58] sm:$0xff]   ;;  %v4185_v20 = vld [vmem:[%s6040_s1 + $0x50] sm:$0xff]  }
   0x6   :  { %3761 = vmatprep.subr.bf16.mxu1 %v4170_v5  ;;  %v4178_v13 = vld [vmem:[%s6040_s1 + $0xe0] sm:$0xff]   ;;  %v4182_v17 = vld [vmem:[%s6040_s1 + $0xd8] sm:$0xff]   ;;  %v4186_v21 = vld [vmem:[%s6040_s1 + $0xd0] sm:$0xff]  }
   0x7   :  { %v4179_v14 = vld [vmem:[%s6040_s1 + $0x20] sm:$0xff]   ;;  %v4183_v18 = vld [vmem:[%s6040_s1 + $0x18] sm:$0xff]   ;;  %v4187_v22 = vld [vmem:[%s6040_s1 + $0x10] sm:$0xff]  }
   0x8   :  { %3704 = vmatpush3.bf16.msra.mxu0 %v4171_v6  ;;  %v4180_v15 = vld [vmem:[%s6040_s1 + $0xa0] sm:$0xff]   ;;  %v4184_v19 = vld [vmem:[%s6040_s1 + $0x98] sm:$0xff]   ;;  %v4188_v23 = vld [vmem:[%s6040_s1 + $0x90] sm:$0xff]  }
   0x9   :  { %3762 = vmatpush3.bf16.msra.mxu1 %v4172_v7  ;;  %3705 = vmatprep.subr.bf16.mxu0 %v4173_v8  ;;  %v4189_v24 = vld [vmem:[%s6040_s1 + $0x48] sm:$0xff]   ;;  %v4193_v28 = vld [vmem:[%s6040_s1 + $0x40] sm:$0xff]   ;;  %v4203_v36 = vld [vmem:[%s6040_s1 + $0x178] sm:$0xff]  }
   0xa   :  { %3763 = vmatprep.subr.bf16.mxu1 %v4174_v9  ;;  %v4190_v25 = vld [vmem:[%s6040_s1 + $0xc8] sm:$0xff]   ;;  %v4194_v29 = vld [vmem:[%s6040_s1 + $0xc0] sm:$0xff]   ;;  %v4204_v37 = vld [vmem:[%s6040_s1 + $0x138] sm:$0xff]  }
   0xb   :  { %v4191_v26 = vld [vmem:[%s6040_s1 + $0x8] sm:$0xff]   ;;  %v4195_v30 = vld [vmem:[%s6040_s1] sm:$0xff]   ;;  %v4205_v38 = vld [vmem:[%s6040_s1 + $0x1f8] sm:$0xff]  }
   0xc   :  { %3706 = vmatpush3.bf16.msra.mxu0 %v4175_v10  ;;  %v4192_v27 = vld [vmem:[%s6040_s1 + $0x88] sm:$0xff]   ;;  %v4196_v31 = vld [vmem:[%s6040_s1 + $0x80] sm:$0xff]   ;;  %v4206_v39 = vld [vmem:[%s6040_s1 + $0x1b8] sm:$0xff]  }
   0xd   :  { %3764 = vmatpush3.bf16.msra.mxu1 %v4176_v11  ;;  %3707 = vmatprep.subr.bf16.mxu0 %v4177_v12  ;;  %v4197_v32 = vld [vmem:[%s6041_s0] ss:$16 sps:$4 sm:$0xff]   ;;  %v4199_v33 = vld [vmem:[%s6041_s0 + $0x4] ss:$16 sps:$4 sm:$0xff]   ;;  %v4200_v34 = vld [vmem:[%s6041_s0 + $0x8] ss:$16 sps:$4 sm:$0xff]  }
   0xe   :  { %3765 = vmatprep.subr.bf16.mxu1 %v4178_v13  ;;  %v4202_v35 = vld [vmem:[%s6041_s0 + $0xc] ss:$16 sps:$4 sm:$0xff]   ;;  %476 = vmatprep.mubr.bf16.mxu0 %v4199_v33  ;;  %v4207_v40 = vld [vmem:[%s6041_s0 + $0x24] ss:$16 sps:$4 sm:$0xff]   ;;  %v4212_v43 = vld [vmem:[%s6041_s0 + $0x20] ss:$16 sps:$4 sm:$0xff]  }
   0xf   :  { %564 = vmatprep.mubr.bf16.mxu1 %v4202_v35  ;;  %v4209_v41 = vld [vmem:[%s6041_s0 + $0x2c] ss:$16 sps:$4 sm:$0xff]   ;;  %v4211_v42 = vld [vmem:[%s6040_s1 + $0x170] sm:$0xff]   ;;  %v4213_v44 = vld [vmem:[%s6041_s0 + $0x28] ss:$16 sps:$4 sm:$0xff]  }
  0x10   :  { %3708 = vmatpush3.bf16.msra.mxu0 %v4179_v14  ;;  %v4214_v45 = vld [vmem:[%s6040_s1 + $0x130] sm:$0xff]   ;;  %v4217_v48 = vld [vmem:[%s6040_s1 + $0x168] sm:$0xff]   ;;  %v4227_v56 = vld [vmem:[%s6040_s1 + $0x160] sm:$0xff]  }
  0x11   :  { %3766 = vmatpush3.bf16.msra.mxu1 %v4180_v15  ;;  %3709 = vmatprep.subr.bf16.mxu0 %v4181_v16  ;;  %v4215_v46 = vld [vmem:[%s6040_s1 + $0x1f0] sm:$0xff]   ;;  %v4220_v50 = vld [vmem:[%s6041_s0 + $0x4c] ss:$16 sps:$4 sm:$0xff]   ;;  %v4224_v53 = vld [vmem:[%s6041_s0 + $0x48] ss:$16 sps:$4 sm:$0xff]  }
  0x12   :  { %3767 = vmatprep.subr.bf16.mxu1 %v4182_v17  ;;  %v4216_v47 = vld [vmem:[%s6040_s1 + $0x1b0] sm:$0xff]   ;;  %v4222_v51 = vld [vmem:[%s6040_s1 + $0x128] sm:$0xff]   ;;  %v4228_v57 = vld [vmem:[%s6040_s1 + $0x120] sm:$0xff]  }
  0x13   :  { %v4218_v49 = vld [vmem:[%s6041_s0 + $0x44] ss:$16 sps:$4 sm:$0xff]   ;;  %v4223_v52 = vld [vmem:[%s6041_s0 + $0x40] ss:$16 sps:$4 sm:$0xff]   ;;  %v4225_v54 = vld [vmem:[%s6040_s1 + $0x1e8] sm:$0xff]  }
  0x14   :  { %3710 = vmatpush3.bf16.msra.mxu0 %v4183_v18  ;;  %v4226_v55 = vld [vmem:[%s6040_s1 + $0x1a8] sm:$0xff]   ;;  %v4229_v58 = vld [vmem:[%s6041_s0 + $0x64] ss:$16 sps:$4 sm:$0xff]   ;;  %v4234_v61 = vld [vmem:[%s6041_s0 + $0x60] ss:$16 sps:$4 sm:$0xff]  }
  0x15   :  { %3768 = vmatpush3.bf16.msra.mxu1 %v4184_v19  ;;  %3711 = vmatprep.subr.bf16.mxu0 %v4185_v20  ;;  %v4231_v59 = vld [vmem:[%s6041_s0 + $0x6c] ss:$16 sps:$4 sm:$0xff]   ;;  %v4233_v60 = vld [vmem:[%s6040_s1 + $0x1e0] sm:$0xff]   ;;  %v4235_v62 = vld [vmem:[%s6041_s0 + $0x68] ss:$16 sps:$4 sm:$0xff]  }
  0x16   :  { %3769 = vmatprep.subr.bf16.mxu1 %v4186_v21  ;;  %v4236_v63 = vld [vmem:[%s6040_s1 + $0x1a0] sm:$0xff]   ;;  %v4237_v0 = vld [vmem:[%s6040_s1 + $0x158] sm:$0xff]   ;;  %v4247_v8 = vld [vmem:[%s6040_s1 + $0x150] sm:$0xff]  }
  0x17   :  { %v4238_v1 = vld [vmem:[%s6040_s1 + $0x118] sm:$0xff]   ;;  %v4240_v3 = vld [vmem:[%s6041_s0 + $0x84] ss:$16 sps:$4 sm:$0xff]   ;;  %v4245_v6 = vld [vmem:[%s6041_s0 + $0x80] ss:$16 sps:$4 sm:$0xff]  }
  0x18   :  { %3712 = vmatpush3.bf16.msra.mxu0 %v4187_v22  ;;  %v4239_v2 = vld [vmem:[%s6040_s1 + $0x1d8] sm:$0xff]   ;;  %v4248_v9 = vld [vmem:[%s6040_s1 + $0x110] sm:$0xff]   ;;  %v4257_v16 = vld [vmem:[%s6040_s1 + $0x148] sm:$0xff]  }
  0x19   :  { %3770 = vmatpush3.bf16.msra.mxu1 %v4188_v23  ;;  %3713 = vmatprep.subr.bf16.mxu0 %v4189_v24  ;;  %v4242_v4 = vld [vmem:[%s6041_s0 + $0x8c] ss:$16 sps:$4 sm:$0xff]   ;;  %v4246_v7 = vld [vmem:[%s6041_s0 + $0x88] ss:$16 sps:$4 sm:$0xff]   ;;  %v4249_v10 = vld [vmem:[%s6040_s1 + $0x1d0] sm:$0xff]  }
  0x1a   :  { %3771 = vmatprep.subr.bf16.mxu1 %v4190_v25  ;;  %v4244_v5 = vld [vmem:[%s6040_s1 + $0x198] sm:$0xff]   ;;  %v4250_v11 = vld [vmem:[%s6040_s1 + $0x190] sm:$0xff]   ;;  %v4258_v17 = vld [vmem:[%s6040_s1 + $0x108] sm:$0xff]  }
  0x1b   :  { %v4251_v12 = vld [vmem:[%s6041_s0 + $0xa4] ss:$16 sps:$4 sm:$0xff]   ;;  %v4253_v13 = vld [vmem:[%s6041_s0 + $0xac] ss:$16 sps:$4 sm:$0xff]   ;;  %v4255_v14 = vld [vmem:[%s6041_s0 + $0xa0] ss:$16 sps:$4 sm:$0xff]  }
  0x1c   :  { %3714 = vmatpush3.bf16.msra.mxu0 %v4191_v26  ;;  %v4256_v15 = vld [vmem:[%s6041_s0 + $0xa8] ss:$16 sps:$4 sm:$0xff]   ;;  %v45_v20 = vld [vmem:[%s6041_s0 + $0xc0] sm:$0x11] }
  0x1d   :  { %3772 = vmatpush3.bf16.msra.mxu1 %v4192_v27  ;;  %3715 = vmatprep.subr.bf16.mxu0 %v4193_v28  ;;  %v4259_v18 = vld [vmem:[%s6040_s1 + $0x1c8] sm:$0xff]   ;;  %v3073_v22 = vcombine.high %v45_v20, %v45_v20  ;;  %v4265_v24 = vld [vmem:[%s6040_s1 + $0x140] sm:$0xff]   ;;  %v3072_v27 = vcombine.low %v45_v20, %v45_v20 }
  0x1e   :  { %3773 = vmatprep.subr.bf16.mxu1 %v4194_v29  ;;  %v4260_v19 = vld [vmem:[%s6040_s1 + $0x188] sm:$0xff]   ;;  %v4266_v25 = vld [vmem:[%s6040_s1 + $0x100] sm:$0xff]  }
  0x1f   :  { %v46_v21 = vld [vmem:[%s6041_s0 + $0xc8] sm:$0x11]  ;;  %v4267_v26 = vld [vmem:[%s6040_s1 + $0x1c0] sm:$0xff]  }
  0x20   :  { %3716 = vmatpush3.bf16.msra.mxu0 %v4195_v30  ;;  %v3075_v23 = vcombine.high %v46_v21, %v46_v21  ;;  %v4268_v28 = vld [vmem:[%s6040_s1 + $0x180] sm:$0xff]   ;;  %v3074_v29 = vcombine.low %v46_v21, %v46_v21  ;;  %v4272_v35 = vld [vmem:[%s6041_s0 + $0xd8] ss:$16 sps:$4 sm:$0xff]  }
  0x21   :  { %3774 = vmatpush3.bf16.msra.mxu1 %v4196_v31  ;;  %3817 = vmatprep.subr.bf16.mxu0 %v4203_v36  ;;  %v4271_v30 = vld [vmem:[%s6041_s0 + $0xd4] ss:$16 sps:$4 sm:$0xff]   ;;  %v4274_v31 = vld [vmem:[%s6041_s0 + $0xdc] ss:$16 sps:$4 sm:$0xff]   ;;  %v4269_v33 = vld [vmem:[%s6041_s0 + $0xd0] ss:$16 sps:$4 sm:$0xff]  }
  0x22   :  { %3875 = vmatprep.subr.bf16.mxu1 %v4205_v38  ;;  %v4276_v36 = vld [vmem:[%s6040_s1 + $0x238] sm:$0xff]   ;;  %v4279_v38 = vld [vmem:[%s6041_s0 + $0xf4] ss:$16 sps:$4 sm:$0xff]  }
  0x23   :  { %477 = vmatmul.mubr.bf16.vlgmr.msra.gmra.mxu0 %v4197_v32  ;;  %v4275_v32 = vld [vmem:[%s6040_s1 + $0x278] sm:$0xff]   ;;  %v4338_v21 = vld [vmem:[%s6040_s1 + $0x200] sm:$0xff]  }
  0x24   :  { %565 = vmatmul.mubr.bf16.vlgmr.msra.gmra.mxu1 %v4200_v34  ;;  %3818 = vmatpush3.bf16.msra.mxu0 %v4204_v37  ;;  %v4277_v34 = vld [vmem:[%s6040_s1 + $0x2f8] sm:$0xff]  }
  0x25   :  { %3876 = vmatpush3.bf16.msra.mxu1 %v4206_v39  ;;  %484 = vmatprep.mubr.bf16.mxu0 %v4207_v40  ;;  %v4278_v37 = vld [vmem:[%s6040_s1 + $0x2b8] sm:$0xff]   ;;  %v4283_v40 = vld [vmem:[%s6040_s1 + $0x270] sm:$0xff]  }
  0x26   :  { %572 = vmatprep.mubr.bf16.mxu1 %v4209_v41  ;;  %3819 = vmatprep.subr.bf16.mxu0 %v4211_v42  ;;  %v4281_v39 = vld [vmem:[%s6041_s0 + $0xfc] ss:$16 sps:$4 sm:$0xff]   ;;  %v4286_v41 = vld [vmem:[%s6040_s1 + $0x230] sm:$0xff]   ;;  %v4328_v20 = vld [vmem:[%s6041_s0 + $0x178] ss:$16 sps:$4 sm:$0xff]  }
  0x27   :  { %3877 = vmatprep.subr.bf16.mxu1 %v4215_v46  ;;  %v4287_v42 = vld [vmem:[%s6040_s1 + $0x2f0] sm:$0xff]   ;;  %v4285_v46 = vld [vmem:[%s6041_s0 + $0xf8] ss:$16 sps:$4 sm:$0xff]  }
  0x28   :  { %3820 = vmatpush3.bf16.msra.mxu0 %v4214_v45  ;;  %v4284_v45 = vld [vmem:[%s6041_s0 + $0xf0] ss:$16 sps:$4 sm:$0xff]  }
  0x29   :  { %3878 = vmatpush3.bf16.msra.mxu1 %v4216_v47  ;;  %3821 = vmatprep.subr.bf16.mxu0 %v4217_v48  ;;  %v4290_v47 = vld [vmem:[%s6041_s0 + $0x114] ss:$16 sps:$4 sm:$0xff]   ;;  %v4292_v48 = vld [vmem:[%s6041_s0 + $0x11c] ss:$16 sps:$4 sm:$0xff]  }
  0x2a   :  { %3879 = vmatprep.subr.bf16.mxu1 %v4225_v54  ;;  %v4295_v54 = vld [vmem:[%s6041_s0 + $0x110] ss:$16 sps:$4 sm:$0xff]  }
  0x2b   :  { %485 = vmatmul.mubr.bf16.gmra.mxu0 %v4212_v43  ;;  %v4288_v43 = vld [vmem:[%s6040_s1 + $0x2b0] sm:$0xff]  }
  0x2c   :  { %573 = vmatmul.mubr.bf16.gmra.mxu1 %v4213_v44  ;;  %492 = vmatprep.mubr.bf16.mxu0 %v4218_v49  ;;  %v4289_v44 = vld [vmem:[%s6040_s1 + $0x268] sm:$0xff]  }
  0x2d   :  { %580 = vmatprep.mubr.bf16.mxu1 %v4220_v50  ;;  %3822 = vmatpush3.bf16.msra.mxu0 %v4222_v51  ;;  %v4294_v49 = vld [vmem:[%s6040_s1 + $0x228] sm:$0xff]  }
  0x2e   :  { %3880 = vmatpush3.bf16.msra.mxu1 %v4226_v55  ;;  %3823 = vmatprep.subr.bf16.mxu0 %v4227_v56  ;;  %v4297_v50 = vld [vmem:[%s6040_s1 + $0x2e8] sm:$0xff]   ;;  %v4301_v56 = vld [vmem:[%s6041_s0 + $0x134] ss:$16 sps:$4 sm:$0xff]  }
  0x2f   :  { %3881 = vmatprep.subr.bf16.mxu1 %v4233_v60  ;;  %v4298_v51 = vld [vmem:[%s6040_s1 + $0x2a8] sm:$0xff]   ;;  %v4309_v60 = vld [vmem:[%s6040_s1 + $0x258] sm:$0xff]  }
  0x30   :  { %v4296_v55 = vld [vmem:[%s6041_s0 + $0x118] ss:$16 sps:$4 sm:$0xff]  }
  0x31   :  { %3824 = vmatpush3.bf16.msra.mxu0 %v4228_v57  ;;  %v4305_v57 = vld [vmem:[%s6040_s1 + $0x2e0] sm:$0xff]  }
  0x32   :  { %3882 = vmatpush3.bf16.msra.mxu1 %v4236_v63  ;;  %3825 = vmatprep.subr.bf16.mxu0 %v4237_v0  ;;  %v4306_v63 = vld [vmem:[%s6041_s0 + $0x130] ss:$16 sps:$4 sm:$0xff]   ;;  %v4307_v0 = vld [vmem:[%s6041_s0 + $0x138] ss:$16 sps:$4 sm:$0xff]  }
  0x33   :  { %493 = vmatmul.mubr.bf16.gmra.mxu0 %v4223_v52  ;;  %3883 = vmatprep.subr.bf16.mxu1 %v4239_v2  ;;  %v4299_v52 = vld [vmem:[%s6040_s1 + $0x260] sm:$0xff]   ;;  %v4314_v2 = vld [vmem:[%s6041_s0 + $0x15c] ss:$16 sps:$4 sm:$0xff]  }
  0x34   :  { %581 = vmatmul.mubr.bf16.gmra.mxu1 %v4224_v53  ;;  %500 = vmatprep.mubr.bf16.mxu0 %v4229_v58  ;;  %v4300_v53 = vld [vmem:[%s6040_s1 + $0x220] sm:$0xff]   ;;  %v4303_v58 = vld [vmem:[%s6041_s0 + $0x13c] ss:$16 sps:$4 sm:$0xff]  }
  0x35   :  { %588 = vmatprep.mubr.bf16.mxu1 %v4231_v59  ;;  %3826 = vmatpush3.bf16.msra.mxu0 %v4238_v1  ;;  %v4308_v59 = vld [vmem:[%s6040_s1 + $0x2a0] sm:$0xff]  }
  0x36   :  { %3884 = vmatpush3.bf16.msra.mxu1 %v4244_v5  ;;  %3827 = vmatprep.subr.bf16.mxu0 %v4247_v8  ;;  %v4312_v1 = vld [vmem:[%s6041_s0 + $0x154] ss:$16 sps:$4 sm:$0xff]   ;;  %v4317_v8 = vld [vmem:[%s6041_s0 + $0x150] ss:$16 sps:$4 sm:$0xff]  }
  0x37   :  { %3885 = vmatprep.subr.bf16.mxu1 %v4249_v10  ;;  %v4320_v5 = vld [vmem:[%s6040_s1 + $0x210] sm:$0xff]  }
  0x38   :  { %v4323_v10 = vld [vmem:[%s6041_s0 + $0x174] ss:$16 sps:$4 sm:$0xff]  }
  0x39   :  { %3828 = vmatpush3.bf16.msra.mxu0 %v4248_v9  ;;  %v4318_v9 = vld [vmem:[%s6041_s0 + $0x158] ss:$16 sps:$4 sm:$0xff]  }
  0x3a   :  { %3886 = vmatpush3.bf16.msra.mxu1 %v4250_v11  ;;  %3829 = vmatprep.subr.bf16.mxu0 %v4257_v16  ;;  %v4325_v11 = vld [vmem:[%s6041_s0 + $0x17c] ss:$16 sps:$4 sm:$0xff]   ;;  %v3132_v16 = vld [vmem:[%s6041_s0 + $0x190] sm:$0x11] }
  0x3b   :  { %501 = vmatmul.mubr.bf16.gmra.mxu0 %v4234_v61  ;;  %3887 = vmatprep.subr.bf16.mxu1 %v4259_v18  ;;  %v4310_v61 = vld [vmem:[%s6040_s1 + $0x218] sm:$0xff]   ;;  %v4327_v18 = vld [vmem:[%s6041_s0 + $0x170] ss:$16 sps:$4 sm:$0xff]  }
  0x3c   :  { %589 = vmatmul.mubr.bf16.gmra.mxu1 %v4235_v62  ;;  %508 = vmatprep.mubr.bf16.mxu0 %v4240_v3  ;;  %v4311_v62 = vld [vmem:[%s6040_s1 + $0x2d8] sm:$0xff]  }
  0x3d   :  { %596 = vmatprep.mubr.bf16.mxu1 %v4242_v4  ;;  %3830 = vmatpush3.bf16.msra.mxu0 %v4258_v17  ;;  %v4316_v3 = vld [vmem:[%s6040_s1 + $0x298] sm:$0xff]   ;;  %v4319_v4 = vld [vmem:[%s6040_s1 + $0x250] sm:$0xff]  }
  0x3e   :  { %3888 = vmatpush3.bf16.msra.mxu1 %v4260_v19  ;;  %3831 = vmatprep.subr.bf16.mxu0 %v4265_v24  ;;  %v3133_v17 = vld [vmem:[%s6041_s0 + $0x198] sm:$0x11]  ;;  %v4337_v19 = vld [vmem:[%s6040_s1 + $0x240] sm:$0xff]  }
  0x3f   :  { %3889 = vmatprep.subr.bf16.mxu1 %v4267_v26  ;;  %v4340_v24 = vld [vmem:[%s6040_s1 + $0x280] sm:$0xff]   ;;  %v4347_v26 = vld [vmem:[%s6040_s1 + $0x378] sm:$0xff]  }
  0x41   :  { %3832 = vmatpush3.bf16.msra.mxu0 %v4266_v25  ;;  %v3225_v25 = vcombine.high %v3133_v17, %v3133_v17 }
  0x42   :  { %3890 = vmatpush3.bf16.msra.mxu1 %v4268_v28  ;;  %3933 = vmatprep.subr.bf16.mxu0 %v4275_v32  ;;  %v3222_v28 = vcombine.low %v3132_v16, %v3132_v16  ;;  %v4341_v32 = vld [vmem:[%s6041_s0 + $0x1a0] ss:$16 sps:$4 sm:$0xff]  }
  0x43   :  { %509 = vmatmul.mubr.bf16.gmra.mxu0 %v4245_v6  ;;  %3991 = vmatprep.subr.bf16.mxu1 %v4277_v34  ;;  %v4321_v6 = vld [vmem:[%s6040_s1 + $0x2d0] sm:$0xff]   ;;  %v4348_v34 = vld [vmem:[%s6040_s1 + $0x338] sm:$0xff]  }
  0x44   :  { %597 = vmatmul.mubr.bf16.gmra.mxu1 %v4246_v7  ;;  %516 = vmatprep.mubr.bf16.mxu0 %v4251_v12  ;;  %v4322_v7 = vld [vmem:[%s6040_s1 + $0x290] sm:$0xff]   ;;  %v4329_v12 = vld [vmem:[%s6040_s1 + $0x248] sm:$0xff]  }
  0x45   :  { %604 = vmatprep.mubr.bf16.mxu1 %v4253_v13  ;;  %v4330_v13 = vld [vmem:[%s6040_s1 + $0x208] sm:$0xff]  }
  0x4b   :  { %517 = vmatmul.mubr.bf16.gmra.mxu0 %v4255_v14  ;;  %v4331_v14 = vld [vmem:[%s6040_s1 + $0x2c8] sm:$0xff]  }
  0x4c   :  { %605 = vmatmul.mubr.bf16.gmra.mxu1 %v4256_v15  ;;  %524 = vmatprep.mubr.bf16.mxu0 %v3073_v22  ;;  %v4332_v15 = vld [vmem:[%s6040_s1 + $0x288] sm:$0xff]   ;;  %v4339_v22 = vld [vmem:[%s6040_s1 + $0x2c0] sm:$0xff]  }
  0x4d   :  { %612 = vmatprep.mubr.bf16.mxu1 %v3075_v23  ;;  %v3223_v23 = vcombine.high %v3132_v16, %v3132_v16  ;;  %v4412_v16 = vld [vmem:[%s6040_s1 + $0x380] sm:$0xff]  }
  0x53   :  { %525 = vmatmul.mubr.bf16.gmra.mxu0 %v3072_v27  ;;  %v4349_v27 = vld [vmem:[%s6040_s1 + $0x3f8] sm:$0xff]  }
  0x54   :  { %613 = vmatmul.mubr.bf16.gmra.mxu1 %v3074_v29  ;;  %1070 = vmatprep.mubr.bf16.mxu0 %v4271_v30  ;;  %v3224_v29 = vcombine.low %v3133_v17, %v3133_v17  ;;  %v4343_v30 = vld [vmem:[%s6041_s0 + $0x1a4] ss:$16 sps:$4 sm:$0xff]   ;;  %v4397_v17 = vld [vmem:[%s6041_s0 + $0x24c] ss:$16 sps:$4 sm:$0xff]  }
  0x55   :  { %1158 = vmatprep.mubr.bf16.mxu1 %v4274_v31  ;;  %v4346_v31 = vld [vmem:[%s6041_s0 + $0x1ac] ss:$16 sps:$4 sm:$0xff]  }
  0x5b   :  { %1071 = vmatmul.mubr.bf16.vlgmr.msra.gmra.mxu0 %v4269_v33  ;;  %v4344_v33 = vld [vmem:[%s6041_s0 + $0x1a8] ss:$16 sps:$4 sm:$0xff]  }
  0x5c   :  { %1159 = vmatmul.mubr.bf16.vlgmr.msra.gmra.mxu1 %v4272_v35  ;;  %3934 = vmatpush3.bf16.msra.mxu0 %v4276_v36  ;;  %v4350_v35 = vld [vmem:[%s6040_s1 + $0x3b8] sm:$0xff]   ;;  %v4351_v36 = vld [vmem:[%s6041_s0 + $0x1c4] ss:$16 sps:$4 sm:$0xff]  }
  0x5d   :  { %3992 = vmatpush3.bf16.msra.mxu1 %v4278_v37  ;;  %1078 = vmatprep.mubr.bf16.mxu0 %v4279_v38  ;;  %v4353_v37 = vld [vmem:[%s6041_s0 + $0x1cc] ss:$16 sps:$4 sm:$0xff]   ;;  %v4355_v38 = vld [vmem:[%s6040_s1 + $0x370] sm:$0xff]  }
  0x5e   :  { %1166 = vmatprep.mubr.bf16.mxu1 %v4281_v39  ;;  %3935 = vmatprep.subr.bf16.mxu0 %v4283_v40  ;;  %v4358_v39 = vld [vmem:[%s6040_s1 + $0x330] sm:$0xff]  }
  0x5f   :  { %3993 = vmatprep.subr.bf16.mxu1 %v4287_v42  ;;  %v4359_v40 = vld [vmem:[%s6040_s1 + $0x3f0] sm:$0xff]  }
  0x60   :  { %3936 = vmatpush3.bf16.msra.mxu0 %v4286_v41  ;;  %v4360_v41 = vld [vmem:[%s6040_s1 + $0x3b0] sm:$0xff]  }
  0x61   :  { %3994 = vmatpush3.bf16.msra.mxu1 %v4288_v43  ;;  %3937 = vmatprep.subr.bf16.mxu0 %v4289_v44  ;;  %v4356_v42 = vld [vmem:[%s6041_s0 + $0x1c0] ss:$16 sps:$4 sm:$0xff]   ;;  %v4361_v43 = vld [vmem:[%s6040_s1 + $0x368] sm:$0xff]  }
  0x62   :  { %3995 = vmatprep.subr.bf16.mxu1 %v4297_v50  ;;  %v4369_v44 = vld [vmem:[%s6040_s1 + $0x3e8] sm:$0xff]   ;;  %v4371_v50 = vld [vmem:[%s6040_s1 + $0x360] sm:$0xff]  }
  0x63   :  { %1079 = vmatmul.mubr.bf16.gmra.mxu0 %v4284_v45  ;;  %v4357_v45 = vld [vmem:[%s6041_s0 + $0x1c8] ss:$16 sps:$4 sm:$0xff]  }
  0x64   :  { %1167 = vmatmul.mubr.bf16.gmra.mxu1 %v4285_v46  ;;  %1086 = vmatprep.mubr.bf16.mxu0 %v4290_v47  ;;  %v4362_v46 = vld [vmem:[%s6041_s0 + $0x1e4] ss:$16 sps:$4 sm:$0xff]   ;;  %v4364_v47 = vld [vmem:[%s6041_s0 + $0x1ec] ss:$16 sps:$4 sm:$0xff]  }
  0x65   :  { %1174 = vmatprep.mubr.bf16.mxu1 %v4292_v48  ;;  %3938 = vmatpush3.bf16.msra.mxu0 %v4294_v49  ;;  %v4366_v48 = vld [vmem:[%s6040_s1 + $0x328] sm:$0xff]  }
  0x66   :  { %3939 = vmatprep.subr.bf16.mxu0 %v4299_v52  ;;  %3996 = vmatpush3.bf16.msra.mxu1 %v4298_v51  ;;  %v4370_v49 = vld [vmem:[%s6040_s1 + $0x3a8] sm:$0xff]   ;;  %v4377_v51 = vld [vmem:[%s6040_s1 + $0x3e0] sm:$0xff]  }
  0x67   :  { %3997 = vmatprep.subr.bf16.mxu1 %v4305_v57  ;;  %v4372_v52 = vld [vmem:[%s6040_s1 + $0x320] sm:$0xff]   ;;  %v4381_v57 = vld [vmem:[%s6040_s1 + $0x358] sm:$0xff]  }
  0x69   :  { %3940 = vmatpush3.bf16.msra.mxu0 %v4300_v53  ;;  %v4367_v53 = vld [vmem:[%s6041_s0 + $0x1e0] ss:$16 sps:$4 sm:$0xff]  }
  0x6a   :  { %3998 = vmatpush3.bf16.msra.mxu1 %v4308_v59  ;;  %3941 = vmatprep.subr.bf16.mxu0 %v4309_v60  ;;  %v4375_v59 = vld [vmem:[%s6041_s0 + $0x20c] ss:$16 sps:$4 sm:$0xff]  }
  0x6b   :  { %1087 = vmatmul.mubr.bf16.gmra.mxu0 %v4295_v54  ;;  %3999 = vmatprep.subr.bf16.mxu1 %v4311_v62  ;;  %v4380_v54 = vld [vmem:[%s6040_s1 + $0x3a0] sm:$0xff]   ;;  %v4382_v60 = vld [vmem:[%s6040_s1 + $0x318] sm:$0xff]   ;;  %v4391_v62 = vld [vmem:[%s6040_s1 + $0x350] sm:$0xff]  }
  0x6c   :  { %1175 = vmatmul.mubr.bf16.gmra.mxu1 %v4296_v55  ;;  %1094 = vmatprep.mubr.bf16.mxu0 %v4301_v56  ;;  %v4368_v55 = vld [vmem:[%s6041_s0 + $0x1e8] ss:$16 sps:$4 sm:$0xff]   ;;  %v4373_v56 = vld [vmem:[%s6041_s0 + $0x204] ss:$16 sps:$4 sm:$0xff]  }
  0x6d   :  { %1182 = vmatprep.mubr.bf16.mxu1 %v4303_v58  ;;  %3942 = vmatpush3.bf16.msra.mxu0 %v4310_v61  ;;  %v4383_v58 = vld [vmem:[%s6040_s1 + $0x3d8] sm:$0xff]  }
  0x6e   :  { %4000 = vmatpush3.bf16.msra.mxu1 %v4316_v3  ;;  %3943 = vmatprep.subr.bf16.mxu0 %v4319_v4  ;;  %v4388_v61 = vld [vmem:[%s6040_s1 + $0x398] sm:$0xff]   ;;  %v4384_v4 = vld [vmem:[%s6041_s0 + $0x224] ss:$16 sps:$4 sm:$0xff]  }
  0x6f   :  { %4001 = vmatprep.subr.bf16.mxu1 %v4321_v6  ;;  %v4379_v3 = vld [vmem:[%s6041_s0 + $0x208] ss:$16 sps:$4 sm:$0xff]  }
  0x70   :  { %v4401_v6 = vld [vmem:[%s6040_s1 + $0x348] sm:$0xff]  }
  0x71   :  { %3944 = vmatpush3.bf16.msra.mxu0 %v4320_v5  ;;  %v4386_v5 = vld [vmem:[%s6041_s0 + $0x22c] ss:$16 sps:$4 sm:$0xff]  }
  0x72   :  { %4002 = vmatpush3.bf16.msra.mxu1 %v4322_v7  ;;  %3945 = vmatprep.subr.bf16.mxu0 %v4329_v12  ;;  %v4402_v7 = vld [vmem:[%s6040_s1 + $0x308] sm:$0xff]  }
  0x73   :  { %1095 = vmatmul.mubr.bf16.gmra.mxu0 %v4306_v63  ;;  %4003 = vmatprep.subr.bf16.mxu1 %v4331_v14  ;;  %v4393_v63 = vld [vmem:[%s6040_s1 + $0x3d0] sm:$0xff]   ;;  %v4390_v12 = vld [vmem:[%s6041_s0 + $0x228] ss:$16 sps:$4 sm:$0xff]   ;;  %v4410_v14 = vld [vmem:[%s6040_s1 + $0x300] sm:$0xff]  }
  0x74   :  { %1183 = vmatmul.mubr.bf16.gmra.mxu1 %v4307_v0  ;;  %1102 = vmatprep.mubr.bf16.mxu0 %v4312_v1  ;;  %v4378_v0 = vld [vmem:[%s6041_s0 + $0x200] ss:$16 sps:$4 sm:$0xff]  }
  0x75   :  { %1190 = vmatprep.mubr.bf16.mxu1 %v4314_v2  ;;  %3946 = vmatpush3.bf16.msra.mxu0 %v4330_v13  ;;  %v4392_v1 = vld [vmem:[%s6040_s1 + $0x310] sm:$0xff]  }
  0x76   :  { %4004 = vmatpush3.bf16.msra.mxu1 %v4332_v15  ;;  %3947 = vmatprep.subr.bf16.mxu0 %v4337_v19  ;;  %v4394_v2 = vld [vmem:[%s6040_s1 + $0x390] sm:$0xff]   ;;  %v4411_v15 = vld [vmem:[%s6040_s1 + $0x3c0] sm:$0xff]   ;;  %v3283_v19 = vld [vmem:[%s6041_s0 + $0x268] sm:$0x11] }
  0x77   :  { %4005 = vmatprep.subr.bf16.mxu1 %v4339_v22  ;;  %v4395_v13 = vld [vmem:[%s6041_s0 + $0x244] ss:$16 sps:$4 sm:$0xff]  }
  0x79   :  { %3948 = vmatpush3.bf16.msra.mxu0 %v4338_v21  ;;  %v4400_v21 = vld [vmem:[%s6041_s0 + $0x248] ss:$16 sps:$4 sm:$0xff]  }
  0x7a   :  { %4006 = vmatpush3.bf16.msra.mxu1 %v4340_v24  ;;  %4049 = vmatprep.subr.bf16.mxu0 %v4347_v26  ;;  %v4415_v26 = vld [vmem:[%s6041_s0 + $0x274] ss:$16 sps:$4 sm:$0xff]  }
  0x7b   :  { %1103 = vmatmul.mubr.bf16.gmra.mxu0 %v4317_v8  ;;  %4107 = vmatprep.subr.bf16.mxu1 %v4349_v27  ;;  %v4403_v8 = vld [vmem:[%s6040_s1 + $0x3c8] sm:$0xff]  }
  0x7c   :  { %1191 = vmatmul.mubr.bf16.gmra.mxu1 %v4318_v9  ;;  %1110 = vmatprep.mubr.bf16.mxu0 %v4323_v10  ;;  %v4404_v9 = vld [vmem:[%s6040_s1 + $0x388] sm:$0xff]   ;;  %v4389_v10 = vld [vmem:[%s6041_s0 + $0x220] ss:$16 sps:$4 sm:$0xff]  }
  0x7d   :  { %1198 = vmatprep.mubr.bf16.mxu1 %v4325_v11  ;;  %v4409_v11 = vld [vmem:[%s6040_s1 + $0x340] sm:$0xff]   ;;  %v4418_v27 = vld [vmem:[%s6041_s0 + $0x27c] ss:$16 sps:$4 sm:$0xff]  }
  0x83   :  { %1111 = vmatmul.mubr.bf16.gmra.mxu0 %v4327_v18  ;;  %v3282_v18 = vld [vmem:[%s6041_s0 + $0x260] sm:$0x11] }
  0x84   :  { %1199 = vmatmul.mubr.bf16.gmra.mxu1 %v4328_v20  ;;  %1118 = vmatprep.mubr.bf16.mxu0 %v3223_v23  ;;  %v4399_v20 = vld [vmem:[%s6041_s0 + $0x240] ss:$16 sps:$4 sm:$0xff]   ;;  %v3373_v22 = vcombine.high %v3282_v18, %v3282_v18  ;;  %v3375_v23 = vcombine.high %v3283_v19, %v3283_v19  ;;  %v3372_v24 = vcombine.low %v3282_v18, %v3282_v18 }
  0x85   :  { %1206 = vmatprep.mubr.bf16.mxu1 %v3225_v25  ;;  %v3374_v25 = vcombine.low %v3283_v19, %v3283_v19 }
  0x8b   :  { %1119 = vmatmul.mubr.bf16.gmra.mxu0 %v3222_v28  ;;  %v4413_v28 = vld [vmem:[%s6041_s0 + $0x270] ss:$16 sps:$4 sm:$0xff]  }
  0x8c   :  { %1207 = vmatmul.mubr.bf16.gmra.mxu1 %v3224_v29  ;;  %1664 = vmatprep.mubr.bf16.mxu0 %v4343_v30  ;;  %v4416_v29 = vld [vmem:[%s6041_s0 + $0x278] ss:$16 sps:$4 sm:$0xff]   ;;  %v4419_v30 = vld [vmem:[%s6041_s0 + $0x294] ss:$16 sps:$4 sm:$0xff]  }
  0x8d   :  { %1752 = vmatprep.mubr.bf16.mxu1 %v4346_v31  ;;  %v4421_v31 = vld [vmem:[%s6041_s0 + $0x29c] ss:$16 sps:$4 sm:$0xff]  }
  0x93   :  { %1665 = vmatmul.mubr.bf16.vlgmr.msra.gmra.mxu0 %v4341_v32  ;;  %v4423_v32 = vld [vmem:[%s6041_s0 + $0x290] ss:$16 sps:$4 sm:$0xff]  }
  0x94   :  { %1753 = vmatmul.mubr.bf16.vlgmr.msra.gmra.mxu1 %v4344_v33  ;;  %4050 = vmatpush3.bf16.msra.mxu0 %v4348_v34  ;;  %v4424_v33 = vld [vmem:[%s6041_s0 + $0x298] ss:$16 sps:$4 sm:$0xff]   ;;  %v4425_v34 = vld [vmem:[%s6041_s0 + $0x2b4] ss:$16 sps:$4 sm:$0xff]  }
  0x95   :  { %4108 = vmatpush3.bf16.msra.mxu1 %v4350_v35  ;;  %1672 = vmatprep.mubr.bf16.mxu0 %v4351_v36  ;;  %v4427_v35 = vld [vmem:[%s6041_s0 + $0x2bc] ss:$16 sps:$4 sm:$0xff]   ;;  %v4429_v36 = vld [vmem:[%s6041_s0 + $0x2b0] ss:$16 sps:$4 sm:$0xff]  }
  0x96   :  { %1760 = vmatprep.mubr.bf16.mxu1 %v4353_v37  ;;  %4051 = vmatprep.subr.bf16.mxu0 %v4355_v38  ;;  %v4430_v37 = vld [vmem:[%s6041_s0 + $0x2b8] ss:$16 sps:$4 sm:$0xff]   ;;  %v4431_v38 = vld [vmem:[%s6041_s0 + $0x2d4] ss:$16 sps:$4 sm:$0xff]  }
  0x97   :  { %4109 = vmatprep.subr.bf16.mxu1 %v4359_v40  ;;  %v4435_v40 = vld [vmem:[%s6041_s0 + $0x2d0] ss:$16 sps:$4 sm:$0xff]  }
  0x98   :  { %4052 = vmatpush3.bf16.msra.mxu0 %v4358_v39  ;;  %v4433_v39 = vld [vmem:[%s6041_s0 + $0x2dc] ss:$16 sps:$4 sm:$0xff]  }
  0x99   :  { %4110 = vmatpush3.bf16.msra.mxu1 %v4360_v41  ;;  %4053 = vmatprep.subr.bf16.mxu0 %v4361_v43  ;;  %v4436_v41 = vld [vmem:[%s6041_s0 + $0x2d8] ss:$16 sps:$4 sm:$0xff]   ;;  %v4439_v43 = vld [vmem:[%s6041_s0 + $0x2fc] ss:$16 sps:$4 sm:$0xff]  }
  0x9a   :  { %4111 = vmatprep.subr.bf16.mxu1 %v4369_v44 }
  0x9b   :  { %1673 = vmatmul.mubr.bf16.gmra.mxu0 %v4356_v42  ;;  %v4437_v42 = vld [vmem:[%s6041_s0 + $0x2f4] ss:$16 sps:$4 sm:$0xff]  }
  0x9c   :  { %1761 = vmatmul.mubr.bf16.gmra.mxu1 %v4357_v45  ;;  %1680 = vmatprep.mubr.bf16.mxu0 %v4362_v46  ;;  %v5161_v46 = vld [vmem:[%s6042_s2] ss:$0 sm:$0xff] }
  0x9d   :  { %1768 = vmatprep.mubr.bf16.mxu1 %v4364_v47  ;;  %4054 = vmatpush3.bf16.msra.mxu0 %v4366_v48 }
  0x9e   :  { %4112 = vmatpush3.bf16.msra.mxu1 %v4370_v49  ;;  %4055 = vmatprep.subr.bf16.mxu0 %v4371_v50 }
  0x9f   :  { %4113 = vmatprep.subr.bf16.mxu1 %v4377_v51 }
  0xa1   :  { %4056 = vmatpush3.bf16.msra.mxu0 %v4372_v52  ;;  %v4441_v52 = vld [vmem:[%s6041_s0 + $0x2f0] ss:$16 sps:$4 sm:$0xff]  }
  0xa2   :  { %4114 = vmatpush3.bf16.msra.mxu1 %v4380_v54  ;;  %4057 = vmatprep.subr.bf16.mxu0 %v4381_v57 }
  0xa3   :  { %1681 = vmatmul.mubr.bf16.gmra.mxu0 %v4367_v53  ;;  %4115 = vmatprep.subr.bf16.mxu1 %v4383_v58  ;;  %v4445_v58 = vld [vmem:[%s6041_s0 + $0x31c] ss:$16 sps:$4 sm:$0xff]  }
  0xa4   :  { %1769 = vmatmul.mubr.bf16.gmra.mxu1 %v4368_v55  ;;  %1688 = vmatprep.mubr.bf16.mxu0 %v4373_v56  ;;  %v4442_v55 = vld [vmem:[%s6041_s0 + $0x2f8] ss:$16 sps:$4 sm:$0xff]   ;;  %v4443_v56 = vld [vmem:[%s6041_s0 + $0x314] ss:$16 sps:$4 sm:$0xff]  }
  0xa5   :  { %1776 = vmatprep.mubr.bf16.mxu1 %v4375_v59  ;;  %4058 = vmatpush3.bf16.msra.mxu0 %v4382_v60 }
  0xa6   :  { %4116 = vmatpush3.bf16.msra.mxu1 %v4388_v61  ;;  %4059 = vmatprep.subr.bf16.mxu0 %v4391_v62 }
  0xa7   :  { %4117 = vmatprep.subr.bf16.mxu1 %v4393_v63 }
  0xa9   :  { %4060 = vmatpush3.bf16.msra.mxu0 %v4392_v1 }
  0xaa   :  { %4118 = vmatpush3.bf16.msra.mxu1 %v4394_v2  ;;  %4061 = vmatprep.subr.bf16.mxu0 %v4401_v6 }
  0xab   :  { %1689 = vmatmul.mubr.bf16.gmra.mxu0 %v4378_v0  ;;  %4119 = vmatprep.subr.bf16.mxu1 %v4403_v8 }
  0xac   :  { %1777 = vmatmul.mubr.bf16.gmra.mxu1 %v4379_v3  ;;  %1696 = vmatprep.mubr.bf16.mxu0 %v4384_v4  ;;  %v3432_v3 = vld [vmem:[%s6041_s0 + $0x330] sm:$0x11] }
  0xad   :  { %1784 = vmatprep.mubr.bf16.mxu1 %v4386_v5  ;;  %4062 = vmatpush3.bf16.msra.mxu0 %v4402_v7  ;;  %v3433_v7 = vld [vmem:[%s6041_s0 + $0x338] sm:$0x11] }
  0xae   :  { %4120 = vmatpush3.bf16.msra.mxu1 %v4404_v9  ;;  %4063 = vmatprep.subr.bf16.mxu0 %v4409_v11 }
  0xaf   :  { %4121 = vmatprep.subr.bf16.mxu1 %v4411_v15 }
  0xb1   :  { %4064 = vmatpush3.bf16.msra.mxu0 %v4410_v14  ;;  %v3523_v14 = vcombine.high %v3432_v3, %v3432_v3 }
  0xb2   :  { %4122 = vmatpush3.bf16.msra.mxu1 %v4412_v16  ;;  %v3525_v16 = vcombine.high %v3433_v7, %v3433_v7 }
  0xb3   :  { %1697 = vmatmul.mubr.bf16.gmra.mxu0 %v4389_v10  ;;  %v4447_v10 = vld [vmem:[%s6041_s0 + $0x310] ss:$16 sps:$4 sm:$0xff]  }
  0xb4   :  { %1785 = vmatmul.mubr.bf16.gmra.mxu1 %v4390_v12  ;;  %1704 = vmatprep.mubr.bf16.mxu0 %v4395_v13  ;;  %v4448_v13 = vld [vmem:[%s6041_s0 + $0x318] ss:$16 sps:$4 sm:$0xff]  }
  0xb5   :  { %1792 = vmatprep.mubr.bf16.mxu1 %v4397_v17 }
  0xbb   :  { %1705 = vmatmul.mubr.bf16.gmra.mxu0 %v4399_v20 }
  0xbc   :  { %1793 = vmatmul.mubr.bf16.gmra.mxu1 %v4400_v21  ;;  %1712 = vmatprep.mubr.bf16.mxu0 %v3373_v22 }
  0xbd   :  { %1800 = vmatprep.mubr.bf16.mxu1 %v3375_v23 }
  0xc3   :  { %1713 = vmatmul.mubr.bf16.gmra.mxu0 %v3372_v24 }
  0xc4   :  { %1801 = vmatmul.mubr.bf16.gmra.mxu1 %v3374_v25  ;;  %2258 = vmatprep.mubr.bf16.mxu0 %v4415_v26 }
  0xc5   :  { %2346 = vmatprep.mubr.bf16.mxu1 %v4418_v27 }
  0xcb   :  { %2259 = vmatmul.mubr.bf16.vlgmr.msra.gmra.mxu0 %v4413_v28 }
  0xcc   :  { %2347 = vmatmul.mubr.bf16.vlgmr.msra.gmra.mxu1 %v4416_v29  ;;  %2266 = vmatprep.mubr.bf16.mxu0 %v4419_v30  ;;  %v3522_v30 = vcombine.low %v3432_v3, %v3432_v3 }
  0xcd   :  { %2354 = vmatprep.mubr.bf16.mxu1 %v4421_v31 }
  0xd3   :  { %2267 = vmatmul.mubr.bf16.gmra.mxu0 %v4423_v32 }
  0xd4   :  { %2355 = vmatmul.mubr.bf16.gmra.mxu1 %v4424_v33  ;;  %2274 = vmatprep.mubr.bf16.mxu0 %v4425_v34  ;;  %v3524_v33 = vcombine.low %v3433_v7, %v3433_v7 }
  0xd5   :  { %2362 = vmatprep.mubr.bf16.mxu1 %v4427_v35 }
  0xdb   :  { %2275 = vmatmul.mubr.bf16.gmra.mxu0 %v4429_v36 }
  0xdc   :  { %2363 = vmatmul.mubr.bf16.gmra.mxu1 %v4430_v37  ;;  %2282 = vmatprep.mubr.bf16.mxu0 %v4431_v38 }
  0xdd   :  { %2370 = vmatprep.mubr.bf16.mxu1 %v4433_v39 }
  0xe3   :  { %v3717_v44 = vpop.f32.mrf.mxu0  ;;  %2283 = vmatmul.mubr.bf16.gmra.mxu0 %v4435_v40 }
  0xe4   :  { %v3775_v45 = vpop.f32.mrf.mxu1  ;;  %2371 = vmatmul.mubr.bf16.gmra.mxu1 %v4436_v41  ;;  %2290 = vmatprep.mubr.bf16.mxu0 %v4437_v42 }
  0xe5   :  { %v3718_v47 = vpop.f32.mrf.mxu0  ;;  %2378 = vmatprep.mubr.bf16.mxu1 %v4439_v43 }
  0xe6   :  { %v3719_v48 = vadd.f32 %v3718_v47, %v3717_v44  ;;  %v3776_v49 = vpop.f32.mrf.mxu1 }
  0xe7   :  { %v3777_v50 = vadd.f32 %v3776_v49, %v3775_v45  ;;  %v3720_v51 = vpop.f32.mrf.mxu0 }
  0xe8   :  { %v479_v53 = vadd.f32 %v3719_v48, %v5161_v46  ;;  %v3778_v54 = vpop.f32.mrf.mxu1 }
  0xe9   :  { %v3721_v57 = vpop.f32.mrf.mxu0 }
  0xea   :  { %v5176_v59 = vadd.f32 %v3777_v50, %v479_v53  ;;  %v3722_v60 = vadd.f32 %v3721_v57, %v3720_v51  ;;  %v3779_v61 = vpop.f32.mrf.mxu1 }
  0xeb   :  { %v3780_v62 = vadd.f32 %v3779_v61, %v3778_v54  ;;  %v3723_v63 = vpop.f32.mrf.mxu0  ;;  %2291 = vmatmul.mubr.bf16.gmra.mxu0 %v4441_v52 }
  0xec   :  { %v482_v0 = vadd.f32 %v3722_v60, %v5161_v46  ;;  %v3781_v1 = vpop.f32.mrf.mxu1  ;;  %2379 = vmatmul.mubr.bf16.gmra.mxu1 %v4442_v55  ;;  %2298 = vmatprep.mubr.bf16.mxu0 %v4443_v56 }
  0xed   :  { %v3724_v2 = vpop.f32.mrf.mxu0  ;;  %2386 = vmatprep.mubr.bf16.mxu1 %v4445_v58 }
  0xee   :  { %v5182_v4 = vadd.f32 %v3780_v62, %v482_v0  ;;  %v3725_v5 = vadd.f32 %v3724_v2, %v3723_v63  ;;  %v3782_v6 = vpop.f32.mrf.mxu1 }
  0xef   :  { %v3783_v8 = vadd.f32 %v3782_v6, %v3781_v1  ;;  %v3726_v9 = vpop.f32.mrf.mxu0 }
  0xf0   :  { %6074 = vst [vmem:[#allocation2_spill] sm:$0xff] %v5182_v4  ;;  %v487_v11 = vadd.f32 %v3725_v5, %v5161_v46  ;;  %v3784_v12 = vpop.f32.mrf.mxu1 }
  0xf1   :  { %v3727_v15 = vpop.f32.mrf.mxu0 }
  0xf2   :  { %v5194_v17 = vadd.f32 %v3783_v8, %v487_v11  ;;  %v3728_v18 = vadd.f32 %v3727_v15, %v3726_v9  ;;  %v3785_v19 = vpop.f32.mrf.mxu1 }
  0xf3   :  { %v3786_v20 = vadd.f32 %v3785_v19, %v3784_v12  ;;  %v3729_v21 = vpop.f32.mrf.mxu0  ;;  %2299 = vmatmul.mubr.bf16.gmra.mxu0 %v4447_v10 }
  0xf4   :  { %v490_v22 = vadd.f32 %v3728_v18, %v5161_v46  ;;  %v3787_v23 = vpop.f32.mrf.mxu1  ;;  %2387 = vmatmul.mubr.bf16.gmra.mxu1 %v4448_v13  ;;  %2306 = vmatprep.mubr.bf16.mxu0 %v3523_v14 }
  0xf5   :  { %v3730_v24 = vpop.f32.mrf.mxu0  ;;  %2394 = vmatprep.mubr.bf16.mxu1 %v3525_v16 }
  0xf6   :  { %v5197_v25 = vadd.f32 %v3786_v20, %v490_v22  ;;  %v3731_v26 = vadd.f32 %v3730_v24, %v3729_v21  ;;  %v3788_v27 = vpop.f32.mrf.mxu1 }
  0xf7   :  { %v3789_v28 = vadd.f32 %v3788_v27, %v3787_v23  ;;  %v3732_v29 = vpop.f32.mrf.mxu0 }
  0xf8   :  { %v495_v31 = vadd.f32 %v3731_v26, %v5161_v46  ;;  %v3790_v32 = vpop.f32.mrf.mxu1 }
  0xf9   :  { %v3733_v34 = vpop.f32.mrf.mxu0 }
  0xfa   :  { %v5200_v35 = vadd.f32 %v3789_v28, %v495_v31  ;;  %v3734_v36 = vadd.f32 %v3733_v34, %v3732_v29  ;;  %v3791_v37 = vpop.f32.mrf.mxu1 }
  0xfb   :  { %v3792_v38 = vadd.f32 %v3791_v37, %v3790_v32  ;;  %v3735_v39 = vpop.f32.mrf.mxu0  ;;  %2307 = vmatmul.mubr.bf16.gmra.mxu0 %v3522_v30 }
  0xfc   :  { %6075 = vst [vmem:[#allocation3_spill] sm:$0xff] %v5200_v35  ;;  %v498_v40 = vadd.f32 %v3734_v36, %v5161_v46  ;;  %v3793_v41 = vpop.f32.mrf.mxu1  ;;  %2395 = vmatmul.mubr.bf16.gmra.mxu1 %v3524_v33 }
  0xfd   :  { %v3736_v42 = vpop.f32.mrf.mxu0 }
  0xfe   :  { %v5203_v43 = vadd.f32 %v3792_v38, %v498_v40  ;;  %v3737_v44 = vadd.f32 %v3736_v42, %v3735_v39  ;;  %v3794_v45 = vpop.f32.mrf.mxu1 }
  0xff   :  { %v3795_v47 = vadd.f32 %v3794_v45, %v3793_v41  ;;  %v3738_v48 = vpop.f32.mrf.mxu0 }
 0x100   :  { %6076 = vst [vmem:[#allocation4_spill] sm:$0xff] %v5203_v43  ;;  %v503_v49 = vadd.f32 %v3737_v44, %v5161_v46  ;;  %v3796_v50 = vpop.f32.mrf.mxu1 }
 0x101   :  { %v3739_v51 = vpop.f32.mrf.mxu0 }
 0x102   :  { %v5206_v52 = vadd.f32 %v3795_v47, %v503_v49  ;;  %v3740_v53 = vadd.f32 %v3739_v51, %v3738_v48  ;;  %v3797_v54 = vpop.f32.mrf.mxu1 }
 0x103   :  { %v3798_v55 = vadd.f32 %v3797_v54, %v3796_v50  ;;  %v3741_v56 = vpop.f32.mrf.mxu0 }
 0x104   :  { %6077 = vst [vmem:[#allocation5_spill] sm:$0xff] %v5206_v52  ;;  %v506_v57 = vadd.f32 %v3740_v53, %v5161_v46  ;;  %v3799_v58 = vpop.f32.mrf.mxu1 }
 0x105   :  { %v3742_v60 = vpop.f32.mrf.mxu0 }
 0x106   :  { %v5209_v61 = vadd.f32 %v3798_v55, %v506_v57  ;;  %v3743_v62 = vadd.f32 %v3742_v60, %v3741_v56  ;;  %v3800_v63 = vpop.f32.mrf.mxu1 }
 0x107   :  { %v3801_v0 = vadd.f32 %v3800_v63, %v3799_v58  ;;  %v3744_v1 = vpop.f32.mrf.mxu0 }
 0x108   :  { %v511_v2 = vadd.f32 %v3743_v62, %v5161_v46  ;;  %v3802_v3 = vpop.f32.mrf.mxu1 }
 0x109   :  { %v3745_v5 = vpop.f32.mrf.mxu0 }
 0x10a   :  { %v5212_v6 = vadd.f32 %v3801_v0, %v511_v2  ;;  %v3746_v7 = vadd.f32 %v3745_v5, %v3744_v1  ;;  %v3803_v8 = vpop.f32.mrf.mxu1 }
 0x10b   :  { %v3804_v9 = vadd.f32 %v3803_v8, %v3802_v3  ;;  %v3747_v10 = vpop.f32.mrf.mxu0 }
 0x10c   :  { %v514_v11 = vadd.f32 %v3746_v7, %v5161_v46  ;;  %v3805_v12 = vpop.f32.mrf.mxu1 }
 0x10d   :  { %v3748_v13 = vpop.f32.mrf.mxu0 }
 0x10e   :  { %v5215_v14 = vadd.f32 %v3804_v9, %v514_v11  ;;  %v3749_v15 = vadd.f32 %v3748_v13, %v3747_v10  ;;  %v3806_v16 = vpop.f32.mrf.mxu1 }
 0x10f   :  { %v3807_v18 = vadd.f32 %v3806_v16, %v3805_v12  ;;  %v3750_v19 = vpop.f32.mrf.mxu0 }
 0x110   :  { %6078 = vst [vmem:[#allocation6_spill] sm:$0xff] %v5215_v14  ;;  %v519_v20 = vadd.f32 %v3749_v15, %v5161_v46  ;;  %v3808_v21 = vpop.f32.mrf.mxu1 }
 0x111   :  { %v3751_v22 = vpop.f32.mrf.mxu0 }
 0x112   :  { %v5218_v23 = vadd.f32 %v3807_v18, %v519_v20  ;;  %v3752_v24 = vadd.f32 %v3751_v22, %v3750_v19  ;;  %v3809_v26 = vpop.f32.mrf.mxu1 }
 0x113   :  { %v3810_v27 = vadd.f32 %v3809_v26, %v3808_v21  ;;  %v3753_v28 = vpop.f32.mrf.mxu0 }
 0x114   :  { %6079 = vst [vmem:[#allocation7_spill] sm:$0xff] %v5218_v23  ;;  %v522_v29 = vadd.f32 %v3752_v24, %v5161_v46  ;;  %v3811_v30 = vpop.f32.mrf.mxu1 }
 0x115   :  { %v3754_v31 = vpop.f32.mrf.mxu0 }
 0x116   :  { %v5221_v32 = vadd.f32 %v3810_v27, %v522_v29  ;;  %v3755_v33 = vadd.f32 %v3754_v31, %v3753_v28  ;;  %v3812_v34 = vpop.f32.mrf.mxu1 }
 0x117   :  { %v3813_v36 = vadd.f32 %v3812_v34, %v3811_v30  ;;  %v3756_v37 = vpop.f32.mrf.mxu0 }
 0x118   :  { %6080 = vst [vmem:[#allocation8_spill] sm:$0xff] %v5221_v32  ;;  %v527_v38 = vadd.f32 %v3755_v33, %v5161_v46  ;;  %v3814_v39 = vpop.f32.mrf.mxu1 }
 0x119   :  { %v3757_v40 = vpop.f32.mrf.mxu0 }
 0x11a   :  { %v5224_v41 = vadd.f32 %v3813_v36, %v527_v38  ;;  %v3815_v42 = vpop.f32.mrf.mxu1 }
 0x11b   :  { %v3833_v44 = vpop.f32.mrf.mxu0 }
 0x11c   :  { %6081 = vst [vmem:[#allocation9_spill] sm:$0xff] %v5224_v41  ;;  %v3891_v45 = vpop.f32.mrf.mxu1 }
 0x11d   :  { %v3834_v47 = vpop.f32.mrf.mxu0 }
 0x11e   :  { %v3835_v48 = vadd.f32 %v3834_v47, %v3833_v44  ;;  %v3892_v49 = vpop.f32.mrf.mxu1 }
 0x11f   :  { %v3893_v50 = vadd.f32 %v3892_v49, %v3891_v45  ;;  %v3836_v51 = vpop.f32.mrf.mxu0 }
 0x120   :  { %v1073_v53 = vadd.f32 %v3835_v48, %v5161_v46  ;;  %v3894_v54 = vpop.f32.mrf.mxu1 }
 0x121   :  { %v3837_v55 = vpop.f32.mrf.mxu0 }
 0x122   :  { %v5227_v56 = vadd.f32 %v3893_v50, %v1073_v53  ;;  %v3838_v57 = vadd.f32 %v3837_v55, %v3836_v51  ;;  %v3895_v58 = vpop.f32.mrf.mxu1 }
 0x123   :  { %v3896_v60 = vadd.f32 %v3895_v58, %v3894_v54  ;;  %v3839_v62 = vpop.f32.mrf.mxu0 }
 0x124   :  { %6082 = vst [vmem:[#allocation10_spill] sm:$0xff] %v5227_v56  ;;  %v1076_v63 = vadd.f32 %v3838_v57, %v5161_v46  ;;  %v3897_v0 = vpop.f32.mrf.mxu1 }
 0x125   :  { %v3840_v1 = vpop.f32.mrf.mxu0 }
 0x126   :  { %v5230_v2 = vadd.f32 %v3896_v60, %v1076_v63  ;;  %v3841_v3 = vadd.f32 %v3840_v1, %v3839_v62  ;;  %v3898_v5 = vpop.f32.mrf.mxu1 }
 0x127   :  { %v3899_v7 = vadd.f32 %v3898_v5, %v3897_v0  ;;  %v3842_v8 = vpop.f32.mrf.mxu0 }
 0x128   :  { %6083 = vst [vmem:[#allocation11_spill] sm:$0xff] %v5230_v2  ;;  %v1081_v9 = vadd.f32 %v3841_v3, %v5161_v46  ;;  %v3900_v10 = vpop.f32.mrf.mxu1 }
 0x129   :  { %v3843_v11 = vpop.f32.mrf.mxu0 }
 0x12a   :  { %v5233_v12 = vadd.f32 %v3899_v7, %v1081_v9  ;;  %v3844_v13 = vadd.f32 %v3843_v11, %v3842_v8  ;;  %v3901_v15 = vpop.f32.mrf.mxu1 }
 0x12b   :  { %v3902_v16 = vadd.f32 %v3901_v15, %v3900_v10  ;;  %v3845_v18 = vpop.f32.mrf.mxu0 }
 0x12c   :  { %6084 = vst [vmem:[#allocation12_spill] sm:$0xff] %v5233_v12  ;;  %v1084_v19 = vadd.f32 %v3844_v13, %v5161_v46  ;;  %v3903_v20 = vpop.f32.mrf.mxu1 }
 0x12d   :  { %v3846_v21 = vpop.f32.mrf.mxu0 }
 0x12e   :  { %v5236_v22 = vadd.f32 %v3902_v16, %v1084_v19  ;;  %v3847_v24 = vadd.f32 %v3846_v21, %v3845_v18  ;;  %v3904_v26 = vpop.f32.mrf.mxu1 }
 0x12f   :  { %v3905_v27 = vadd.f32 %v3904_v26, %v3903_v20  ;;  %v3848_v28 = vpop.f32.mrf.mxu0 }
 0x130   :  { %6085 = vst [vmem:[#allocation13_spill] sm:$0xff] %v5236_v22  ;;  %v1089_v29 = vadd.f32 %v3847_v24, %v5161_v46  ;;  %v3906_v30 = vpop.f32.mrf.mxu1 }
 0x131   :  { %v3849_v31 = vpop.f32.mrf.mxu0 }
 0x132   :  { %v5239_v33 = vadd.f32 %v3905_v27, %v1089_v29  ;;  %v3850_v34 = vadd.f32 %v3849_v31, %v3848_v28  ;;  %v3907_v36 = vpop.f32.mrf.mxu1 }
 0x133   :  { %v3908_v37 = vadd.f32 %v3907_v36, %v3906_v30  ;;  %v3851_v38 = vpop.f32.mrf.mxu0 }
 0x134   :  { %6086 = vst [vmem:[#allocation14_spill] sm:$0xff] %v5239_v33  ;;  %v1092_v39 = vadd.f32 %v3850_v34, %v5161_v46  ;;  %v3909_v40 = vpop.f32.mrf.mxu1 }
 0x135   :  { %v3852_v42 = vpop.f32.mrf.mxu0 }
 0x136   :  { %v5242_v44 = vadd.f32 %v3908_v37, %v1092_v39  ;;  %v3853_v45 = vadd.f32 %v3852_v42, %v3851_v38  ;;  %v3910_v47 = vpop.f32.mrf.mxu1 }
 0x137   :  { %v3911_v48 = vadd.f32 %v3910_v47, %v3909_v40  ;;  %v3854_v49 = vpop.f32.mrf.mxu0 }
 0x138   :  { %6087 = vst [vmem:[#allocation15_spill] sm:$0xff] %v5242_v44  ;;  %v1097_v50 = vadd.f32 %v3853_v45, %v5161_v46  ;;  %v3912_v51 = vpop.f32.mrf.mxu1 }
 0x139   :  { %v3855_v53 = vpop.f32.mrf.mxu0 }
 0x13a   :  { %v5245_v54 = vadd.f32 %v3911_v48, %v1097_v50  ;;  %v3856_v55 = vadd.f32 %v3855_v53, %v3854_v49  ;;  %v3913_v57 = vpop.f32.mrf.mxu1 }
 0x13b   :  { %v3914_v58 = vadd.f32 %v3913_v57, %v3912_v51  ;;  %v3857_v60 = vpop.f32.mrf.mxu0 }
 0x13c   :  { %6088 = vst [vmem:[#allocation16_spill] sm:$0xff] %v5245_v54  ;;  %v1100_v62 = vadd.f32 %v3856_v55, %v5161_v46  ;;  %v3915_v63 = vpop.f32.mrf.mxu1 }
 0x13d   :  { %v3858_v0 = vpop.f32.mrf.mxu0 }
 0x13e   :  { %v5248_v1 = vadd.f32 %v3914_v58, %v1100_v62  ;;  %v3859_v3 = vadd.f32 %v3858_v0, %v3857_v60  ;;  %v3916_v5 = vpop.f32.mrf.mxu1 }
 0x13f   :  { %v3917_v7 = vadd.f32 %v3916_v5, %v3915_v63  ;;  %v3860_v8 = vpop.f32.mrf.mxu0 }
 0x140   :  { %6089 = vst [vmem:[#allocation17_spill] sm:$0xff] %v5248_v1  ;;  %v1105_v9 = vadd.f32 %v3859_v3, %v5161_v46  ;;  %v3918_v10 = vpop.f32.mrf.mxu1 }
 0x141   :  { %v3861_v11 = vpop.f32.mrf.mxu0 }
 0x142   :  { %v5251_v13 = vadd.f32 %v3917_v7, %v1105_v9  ;;  %v3862_v15 = vadd.f32 %v3861_v11, %v3860_v8  ;;  %v3919_v16 = vpop.f32.mrf.mxu1 }
 0x143   :  { %v3920_v18 = vadd.f32 %v3919_v16, %v3918_v10  ;;  %v3863_v19 = vpop.f32.mrf.mxu0 }
 0x144   :  { %6090 = vst [vmem:[#allocation18_spill] sm:$0xff] %v5251_v13  ;;  %v1108_v20 = vadd.f32 %v3862_v15, %v5161_v46  ;;  %v3921_v21 = vpop.f32.mrf.mxu1 }
 0x145   :  { %v3864_v24 = vpop.f32.mrf.mxu0 }
 0x146   :  { %v5254_v26 = vadd.f32 %v3920_v18, %v1108_v20  ;;  %v3865_v27 = vadd.f32 %v3864_v24, %v3863_v19  ;;  %v3922_v28 = vpop.f32.mrf.mxu1 }
 0x147   :  { %v3923_v29 = vadd.f32 %v3922_v28, %v3921_v21  ;;  %v3866_v30 = vpop.f32.mrf.mxu0 }
 0x148   :  { %6091 = vst [vmem:[#allocation19_spill] sm:$0xff] %v5254_v26  ;;  %v1113_v31 = vadd.f32 %v3865_v27, %v5161_v46  ;;  %v3924_v34 = vpop.f32.mrf.mxu1 }
 0x149   :  { %v3867_v36 = vpop.f32.mrf.mxu0 }
 0x14a   :  { %v5257_v37 = vadd.f32 %v3923_v29, %v1113_v31  ;;  %v3868_v38 = vadd.f32 %v3867_v36, %v3866_v30  ;;  %v3925_v39 = vpop.f32.mrf.mxu1 }
 0x14b   :  { %v3926_v40 = vadd.f32 %v3925_v39, %v3924_v34  ;;  %v3869_v42 = vpop.f32.mrf.mxu0 }
 0x14c   :  { %6092 = vst [vmem:[#allocation20_spill] sm:$0xff] %v5257_v37  ;;  %v1116_v45 = vadd.f32 %v3868_v38, %v5161_v46  ;;  %v3927_v47 = vpop.f32.mrf.mxu1 }
 0x14d   :  { %v3870_v48 = vpop.f32.mrf.mxu0 }
 0x14e   :  { %v5260_v49 = vadd.f32 %v3926_v40, %v1116_v45  ;;  %v3871_v50 = vadd.f32 %v3870_v48, %v3869_v42  ;;  %v3928_v51 = vpop.f32.mrf.mxu1 }
 0x14f   :  { %v3929_v53 = vadd.f32 %v3928_v51, %v3927_v47  ;;  %v3872_v55 = vpop.f32.mrf.mxu0 }
 0x150   :  { %6093 = vst [vmem:[#allocation21_spill] sm:$0xff] %v5260_v49  ;;  %v1121_v57 = vadd.f32 %v3871_v50, %v5161_v46  ;;  %v3930_v58 = vpop.f32.mrf.mxu1 }
 0x151   :  { %v3873_v60 = vpop.f32.mrf.mxu0 }
 0x152   :  { %v5263_v62 = vadd.f32 %v3929_v53, %v1121_v57  ;;  %v3931_v63 = vpop.f32.mrf.mxu1 }
 0x153   :  { %v3949_v0 = vpop.f32.mrf.mxu0 }
 0x154   :  { %6094 = vst [vmem:[#allocation22_spill] sm:$0xff] %v5263_v62  ;;  %v4007_v3 = vpop.f32.mrf.mxu1  ;;  %v2457_v62 = vmul.f32 %v5236_v22, %v5236_v22 }
 0x155   :  { %v3950_v5 = vpop.f32.mrf.mxu0 }
 0x156   :  { %v3951_v7 = vadd.f32 %v3950_v5, %v3949_v0  ;;  %v4008_v8 = vpop.f32.mrf.mxu1 }
 0x157   :  { %v4009_v9 = vadd.f32 %v4008_v8, %v4007_v3  ;;  %v3952_v10 = vpop.f32.mrf.mxu0 }
 0x158   :  { %v1667_v11 = vadd.f32 %v3951_v7, %v5161_v46  ;;  %v4010_v15 = vpop.f32.mrf.mxu1 }
 0x159   :  { %v3953_v16 = vpop.f32.mrf.mxu0 }
 0x15a   :  { %v5266_v18 = vadd.f32 %v4009_v9, %v1667_v11  ;;  %v3954_v19 = vadd.f32 %v3953_v16, %v3952_v10  ;;  %v4011_v20 = vpop.f32.mrf.mxu1 }
 0x15b   :  { %v4012_v21 = vadd.f32 %v4011_v20, %v4010_v15  ;;  %v3955_v24 = vpop.f32.mrf.mxu0 }
 0x15c   :  { %v1670_v27 = vadd.f32 %v3954_v19, %v5161_v46  ;;  %v4013_v28 = vpop.f32.mrf.mxu1 }
 0x15d   :  { %v3956_v29 = vpop.f32.mrf.mxu0 }
 0x15e   :  { %v5269_v30 = vadd.f32 %v4012_v21, %v1670_v27  ;;  %v3957_v31 = vadd.f32 %v3956_v29, %v3955_v24  ;;  %v4014_v34 = vpop.f32.mrf.mxu1 }
 0x15f   :  { %v4015_v36 = vadd.f32 %v4014_v34, %v4013_v28  ;;  %v3958_v38 = vpop.f32.mrf.mxu0 }
 0x160   :  { %v1675_v39 = vadd.f32 %v3957_v31, %v5161_v46  ;;  %v4016_v40 = vpop.f32.mrf.mxu1 }
 0x161   :  { %v3959_v42 = vpop.f32.mrf.mxu0 }
 0x162   :  { %v5272_v45 = vadd.f32 %v4015_v36, %v1675_v39  ;;  %v3960_v47 = vadd.f32 %v3959_v42, %v3958_v38  ;;  %v4017_v48 = vpop.f32.mrf.mxu1 }
 0x163   :  { %v4018_v50 = vadd.f32 %v4017_v48, %v4016_v40  ;;  %v3961_v51 = vpop.f32.mrf.mxu0 }
 0x164   :  { %v1678_v53 = vadd.f32 %v3960_v47, %v5161_v46  ;;  %v4019_v55 = vpop.f32.mrf.mxu1 }
 0x165   :  { %v3962_v57 = vpop.f32.mrf.mxu0 }
 0x166   :  { %v5275_v58 = vadd.f32 %v4018_v50, %v1678_v53  ;;  %v3963_v60 = vadd.f32 %v3962_v57, %v3961_v51  ;;  %v4020_v63 = vpop.f32.mrf.mxu1 }
 0x167   :  { %v4021_v0 = vadd.f32 %v4020_v63, %v4019_v55  ;;  %v3964_v3 = vpop.f32.mrf.mxu0 }
 0x168   :  { %v1683_v5 = vadd.f32 %v3963_v60, %v5161_v46  ;;  %v4022_v7 = vpop.f32.mrf.mxu1 }
 0x169   :  { %v3965_v8 = vpop.f32.mrf.mxu0 }
 0x16a   :  { %v5278_v9 = vadd.f32 %v4021_v0, %v1683_v5  ;;  %v3966_v10 = vadd.f32 %v3965_v8, %v3964_v3  ;;  %v4023_v11 = vpop.f32.mrf.mxu1 }
 0x16b   :  { %v4024_v15 = vadd.f32 %v4023_v11, %v4022_v7  ;;  %v3967_v16 = vpop.f32.mrf.mxu0 }
 0x16c   :  { %v1686_v19 = vadd.f32 %v3966_v10, %v5161_v46  ;;  %v4025_v20 = vpop.f32.mrf.mxu1 }
 0x16d   :  { %v3968_v21 = vpop.f32.mrf.mxu0 }
 0x16e   :  { %v5281_v24 = vadd.f32 %v4024_v15, %v1686_v19  ;;  %v3969_v27 = vadd.f32 %v3968_v21, %v3967_v16  ;;  %v4026_v28 = vpop.f32.mrf.mxu1 }
 0x16f   :  { %v4027_v29 = vadd.f32 %v4026_v28, %v4025_v20  ;;  %v3970_v31 = vpop.f32.mrf.mxu0 }
 0x170   :  { %v1691_v34 = vadd.f32 %v3969_v27, %v5161_v46  ;;  %v4028_v36 = vpop.f32.mrf.mxu1 }
 0x171   :  { %v3971_v38 = vpop.f32.mrf.mxu0 }
 0x172   :  { %v5284_v39 = vadd.f32 %v4027_v29, %v1691_v34  ;;  %v3972_v40 = vadd.f32 %v3971_v38, %v3970_v31  ;;  %v4029_v42 = vpop.f32.mrf.mxu1 }
 0x173   :  { %v4030_v47 = vadd.f32 %v4029_v42, %v4028_v36  ;;  %v3973_v48 = vpop.f32.mrf.mxu0 }
 0x174   :  { %v1694_v50 = vadd.f32 %v3972_v40, %v5161_v46  ;;  %v4031_v51 = vpop.f32.mrf.mxu1 }
 0x175   :  { %v3974_v53 = vpop.f32.mrf.mxu0 }
 0x176   :  { %v5287_v55 = vadd.f32 %v4030_v47, %v1694_v50  ;;  %v3975_v57 = vadd.f32 %v3974_v53, %v3973_v48  ;;  %v4032_v60 = vpop.f32.mrf.mxu1  ;;  %v2441_v50 = vmul.f32 %v5176_v59, %v5176_v59  ;;  %v2443_v53 = vmul.f32 %v5194_v17, %v5194_v17 }
 0x177   :  { %v4033_v63 = vadd.f32 %v4032_v60, %v4031_v51  ;;  %v3976_v0 = vpop.f32.mrf.mxu0  ;;  %v2442_v51 = vmul.f32 %v5182_v4, %v5182_v4  ;;  %v2444_v60 = vmul.f32 %v5197_v25, %v5197_v25 }
 0x178   :  { %6095 = vst [vmem:[#allocation23_spill] sm:$0xff] %v5287_v55  ;;  %v1699_v3 = vadd.f32 %v3975_v57, %v5161_v46  ;;  %v4034_v5 = vpop.f32.mrf.mxu1 }
 0x179   :  { %v3977_v7 = vpop.f32.mrf.mxu0 }
 0x17a   :  { %v5290_v8 = vadd.f32 %v4033_v63, %v1699_v3  ;;  %v3978_v10 = vadd.f32 %v3977_v7, %v3976_v0  ;;  %v4035_v11 = vpop.f32.mrf.mxu1  ;;  %v2445_v63 = vmul.f32 %v5200_v35, %v5200_v35  ;;  %v2446_v0 = vmul.f32 %v5203_v43, %v5203_v43 }
 0x17b   :  { %v4036_v15 = vadd.f32 %v4035_v11, %v4034_v5  ;;  %v5292_v16 = vpop.f32.mrf.mxu0  ;;  %v2454_v3 = vmul.f32 %v5227_v56, %v5227_v56  ;;  %v2447_v7 = vmul.f32 %v5206_v52, %v5206_v52  ;;  %v2455_v11 = vmul.f32 %v5230_v2, %v5230_v2 }
 0x17c   :  { %6096 = vst [vmem:[#allocation24_spill] sm:$0xff] %v5290_v8  ;;  %v1702_v19 = vadd.f32 %v3978_v10, %v5161_v46  ;;  %v5295_v20 = vpop.f32.mrf.mxu1  ;;  %v2448_v10 = vmul.f32 %v5209_v61, %v5209_v61  ;;  %v2461_v8 = vmul.f32 %v5248_v1, %v5248_v1 }
 0x17d   :  { %6097 = vst [vmem:[#allocation25_spill] sm:$0xff] %v5295_v20  ;;  %v5297_v21 = vpop.f32.mrf.mxu0  ;;  %v2404_v20 = vadd.f32 %v5233_v12, %v5194_v17 }
 0x17e   :  { %6098 = vst [vmem:[#allocation26_spill] sm:$0xff] %v5297_v21  ;;  %v5299_v27 = vadd.f32 %v4036_v15, %v1702_v19  ;;  %v5301_v28 = vpop.f32.mrf.mxu1  ;;  %v2456_v15 = vmul.f32 %v5233_v12, %v5233_v12 }
 0x17f   :  { %6100 = vst [vmem:[#allocation28_spill] sm:$0xff] %v5301_v28  ;;  %v5303_v29 = vpop.f32.mrf.mxu0  ;;  %v2460_v28 = vmul.f32 %v5245_v54, %v5245_v54 }
 0x180   :  { %6099 = vst [vmem:[#allocation27_spill] sm:$0xff] %v5299_v27  ;;  %6101 = vst [vmem:[#allocation29_spill] sm:$0xff] %v5303_v29  ;;  %v5305_v31 = vpop.f32.mrf.mxu1  ;;  %v2403_v29 = vadd.f32 %v5230_v2, %v5182_v4  ;;  %v2469_v27 = vadd.f32 %v2456_v15, %v2443_v53  ;;  %v2462_v2 = vmul.f32 %v5251_v13, %v5251_v13 }
 0x181   :  { %6102 = vst [vmem:[#allocation30_spill] sm:$0xff] %v5305_v31  ;;  %v5307_v34 = vpop.f32.mrf.mxu0  ;;  %v2402_v31 = vadd.f32 %v5227_v56, %v5176_v59  ;;  %v2405_v56 = vadd.f32 %v5236_v22, %v5197_v25  ;;  %v2463_v15 = vmul.f32 %v5254_v26, %v5254_v26  ;;  %v2408_v22 = vadd.f32 %v5245_v54, %v5206_v52 }
 0x182   :  { %6103 = vst [vmem:[#allocation31_spill] sm:$0xff] %v5307_v34  ;;  %v5309_v36 = vpop.f32.mrf.mxu1  ;;  %v2467_v34 = vadd.f32 %v2454_v3, %v2441_v50  ;;  %v2470_v50 = vadd.f32 %v2457_v62, %v2444_v60  ;;  %v2406_v3 = vadd.f32 %v5239_v33, %v5200_v35  ;;  %v5383_v62 = vadd.f32 %v2460_v28, %v2447_v7 }
 0x183   :  { %6104 = vst [vmem:[#allocation32_spill] sm:$0xff] %v5309_v36  ;;  %v5311_v38 = vpop.f32.mrf.mxu0  ;;  %v2464_v60 = vmul.f32 %v5257_v37, %v5257_v37  ;;  %v5397_v28 = vadd.f32 %v5251_v13, %v5212_v6  ;;  %v2481_v54 = vmul.f32 %v5269_v30, %v5269_v30 }
 0x184   :  { %6105 = vst [vmem:[#allocation33_spill] sm:$0xff] %v5311_v38  ;;  %v5313_v40 = vpop.f32.mrf.mxu1  ;;  %v2459_v38 = vmul.f32 %v5242_v44, %v5242_v44 }
 0x185   :  { %6106 = vst [vmem:[#allocation34_spill] sm:$0xff] %v5313_v40  ;;  %v5315_v42 = vpop.f32.mrf.mxu0  ;;  %v2452_v40 = vmul.f32 %v5221_v32, %v5221_v32 }
 0x186   :  { %6107 = vst [vmem:[#allocation35_spill] sm:$0xff] %v5315_v42  ;;  %v5317_v47 = vpop.f32.mrf.mxu1  ;;  %v5353_v42 = vmul.f32 %v5224_v41, %v5224_v41  ;;  %v2472_v53 = vadd.f32 %v2459_v38, %v2446_v0  ;;  %v5391_v38 = vadd.f32 %v2461_v8, %v2448_v10  ;;  %v2480_v0 = vmul.f32 %v5266_v18, %v5266_v18 }
 0x187   :  { %6108 = vst [vmem:[#allocation36_spill] sm:$0xff] %v5317_v47  ;;  %v3988_v48 = vpop.f32.mrf.mxu0  ;;  %v5405_v8 = vadd.f32 %v5254_v26, %v5215_v14  ;;  %v5426_v26 = vadd.f32 %v2402_v31, %v5266_v18  ;;  %v2485_v31 = vmul.f32 %v5281_v24, %v5281_v24 }
 0x188   :  { %v4046_v57 = vpop.f32.mrf.mxu1  ;;  %v2449_v48 = vmul.f32 %v5212_v6, %v5212_v6  ;;  %6109 = vst [vmem:[#allocation37_spill] sm:$0xff] %v5353_v42  ;;  %v2468_v42 = vadd.f32 %v2455_v11, %v2442_v51  ;;  %v2407_v11 = vadd.f32 %v5242_v44, %v5203_v43 }
 0x189   :  { %v3989_v5 = vpop.f32.mrf.mxu0  ;;  %v2450_v57 = vmul.f32 %v5215_v14, %v5215_v14 }
 0x18a   :  { %v4047_v19 = vpop.f32.mrf.mxu1  ;;  %v2451_v5 = vmul.f32 %v5218_v23, %v5218_v23  ;;  %v5399_v7 = vadd.f32 %v2462_v2, %v2449_v48 }
 0x18b   :  { %v4065_v47 = vpop.f32.mrf.mxu0  ;;  %v2458_v19 = vmul.f32 %v5239_v33, %v5239_v33  ;;  %v2465_v33 = vmul.f32 %v5260_v49, %v5260_v49  ;;  %v5407_v10 = vadd.f32 %v2463_v15, %v2450_v57  ;;  %v2483_v57 = vmul.f32 %v5275_v58, %v5275_v58 }
 0x18c   :  { %v5359_v36 = vpop.f32.mrf.mxu1  ;;  %v5415_v48 = vadd.f32 %v2464_v60, %v2451_v5  ;;  %v2416_v60 = vadd.f32 %v2403_v29, %v5269_v30 }
 0x18d   :  { %v4066_v41 = vpop.f32.mrf.mxu0  ;;  %v2471_v51 = vadd.f32 %v2458_v19, %v2445_v63  ;;  %v2409_v19 = vadd.f32 %v5248_v1, %v5209_v61  ;;  %v5443_v29 = vadd.f32 %v2483_v57, %v2470_v50  ;;  %v6111_v57 = vld [vmem:[#allocation26_spill] sm:$0xff] }
 0x18e   :  { %v4124_v21 = vpop.f32.mrf.mxu1  ;;  %v4067_v52 = vadd.f32 %v4066_v41, %v4065_v47  ;;  %v5419_v41 = vadd.f32 %v5260_v49, %v5221_v32  ;;  %v5421_v47 = vadd.f32 %v2465_v33, %v2452_v40  ;;  %v2484_v33 = vmul.f32 %v5278_v9, %v5278_v9 }
 0x18f   :  { %v4068_v4 = vpop.f32.mrf.mxu0  ;;  %v2417_v32 = vadd.f32 %v2404_v20, %v5272_v45  ;;  %v2486_v20 = vmul.f32 %v5284_v39, %v5284_v39 }
 0x190   :  { %v4126_v12 = vpop.f32.mrf.mxu1  ;;  %v2261_v40 = vadd.f32 %v4067_v52, %v5161_v46 }
 0x191   :  { %v4069_v63 = vpop.f32.mrf.mxu0 }
 0x192   :  { %v4070_v44 = vadd.f32 %v4069_v63, %v4068_v4  ;;  %v4127_v43 = vpop.f32.mrf.mxu1  ;;  %v5411_v4 = vadd.f32 %v5257_v37, %v5218_v23  ;;  %v2482_v63 = vmul.f32 %v5272_v45, %v5272_v45  ;;  %v5428_v37 = vadd.f32 %v2480_v0, %v2467_v34 }
 0x193   :  { %v4071_v35 = vpop.f32.mrf.mxu0  ;;  %v2494_v23 = vadd.f32 %v2481_v54, %v2468_v42  ;;  %v4128_v34 = vadd.f32 %v4127_v43, %v4126_v12  ;;  %v4125_v54 = vadd.f32 %v4124_v21, %v5359_v36  ;;  %v5448_v0 = vadd.f32 %v2406_v3, %v5278_v9 }
 0x194   :  { %v4129_v2 = vpop.f32.mrf.mxu1  ;;  %v2264_v13 = vadd.f32 %v4070_v44, %v5161_v46  ;;  %v5436_v14 = vadd.f32 %v2482_v63, %v2469_v27  ;;  %v5454_v63 = vadd.f32 %v2484_v33, %v2471_v51  ;;  %v5461_v36 = vadd.f32 %v2407_v11, %v5281_v24  ;;  %v6112_v33 = vld [vmem:[#allocation24_spill] sm:$0xff] }
 0x195   :  { %v4072_v15 = vpop.f32.mrf.mxu0  ;;  %v5458_v50 = vadd.f32 %v4125_v54, %v2261_v40  ;;  %v5463_v3 = vadd.f32 %v2485_v31, %v2472_v53  ;;  %v2488_v40 = vmul.f32 %v6112_v33, %v6112_v33  ;;  %v5476_v53 = vadd.f32 %v2486_v20, %v5383_v62 }
 0x196   :  { %v4073_v1 = vadd.f32 %v4072_v15, %v4071_v35  ;;  %v4130_v5 = vpop.f32.mrf.mxu1  ;;  %v5441_v35 = vadd.f32 %v2405_v56, %v5275_v58  ;;  %v5452_v27 = vadd.f32 %v4128_v34, %v2264_v13  ;;  %v2487_v56 = vmul.f32 %v5287_v55, %v5287_v55 }
 0x197   :  { %v4074_v49 = vpop.f32.mrf.mxu0  ;;  %v4131_v21 = vadd.f32 %v4130_v5, %v4129_v2  ;;  %v3981_v13 = vadd.f32 %v6111_v57, %v5292_v16  ;;  %v5469_v15 = vadd.f32 %v2408_v22, %v5284_v39  ;;  %v5479_v31 = vadd.f32 %v2409_v19, %v5287_v55  ;;  %v6116_v57 = vld [vmem:[#allocation28_spill] sm:$0xff] }
 0x198   :  { %v4132_v44 = vpop.f32.mrf.mxu1  ;;  %v2269_v42 = vadd.f32 %v4073_v1, %v5161_v46  ;;  %6110 = vst [vmem:[#allocation38_spill] sm:$0xff] %v5452_v27  ;;  %v2507_v16 = vmul.f32 %v5452_v27, %v5452_v27  ;;  %v5484_v22 = vadd.f32 %v2487_v56, %v5391_v38  ;;  %v5494_v19 = vadd.f32 %v5397_v28, %v6112_v33 }
 0x199   :  { %v4075_v52 = vpop.f32.mrf.mxu0  ;;  %v1707_v20 = vadd.f32 %v3981_v13, %v5161_v46  ;;  %v5499_v56 = vadd.f32 %v2488_v40, %v5399_v7  ;;  %v2428_v40 = vadd.f32 %v5426_v26, %v5458_v50 }
 0x19a   :  { %v4076_v43 = vadd.f32 %v4075_v52, %v4074_v49  ;;  %v4133_v12 = vpop.f32.mrf.mxu1  ;;  %v5473_v2 = vadd.f32 %v4131_v21, %v2269_v42  ;;  %v6113_v52 = vld [vmem:[#allocation27_spill] sm:$0xff]  ;;  %v2520_v13 = vadd.f32 %v2507_v16, %v2494_v23 }
 0x19b   :  { %v4077_v1 = vpop.f32.mrf.mxu0  ;;  %v4134_v5 = vadd.f32 %v4133_v12, %v4132_v44  ;;  %v2489_v42 = vmul.f32 %v6113_v52, %v6113_v52  ;;  %v2506_v44 = vmul.f32 %v5458_v50, %v5458_v50  ;;  %v5508_v28 = vadd.f32 %v5405_v8, %v6113_v52 }
 0x19c   :  { %v2272_v49 = vadd.f32 %v4076_v43, %v5161_v46  ;;  %v4135_v51 = vpop.f32.mrf.mxu1  ;;  %v2430_v23 = vadd.f32 %v2417_v32, %v5473_v2 }
 0x19d   :  { %v4078_v11 = vpop.f32.mrf.mxu0  ;;  %v5513_v7 = vadd.f32 %v2489_v42, %v5407_v10  ;;  %v6119_v10 = vld [vmem:[#allocation31_spill] sm:$0xff] }
 0x19e   :  { %v4079_v34 = vadd.f32 %v4078_v11, %v4077_v1  ;;  %v4136_v54 = vpop.f32.mrf.mxu1  ;;  %v5490_v43 = vadd.f32 %v4134_v5, %v2272_v49  ;;  %v6115_v1 = vld [vmem:[#allocation25_spill] sm:$0xff]  ;;  %v2429_v49 = vadd.f32 %v2416_v60, %v5452_v27  ;;  %v2508_v5 = vmul.f32 %v5473_v2, %v5473_v2 }
 0x19f   :  { %v4080_v62 = vpop.f32.mrf.mxu0  ;;  %v4137_v21 = vadd.f32 %v4136_v54, %v4135_v51  ;;  %v4039_v11 = vadd.f32 %v6116_v57, %v6115_v1  ;;  %v2519_v60 = vadd.f32 %v2506_v44, %v5428_v37 }
 0x1a0   :  { %6114 = vst [vmem:[#allocation26_spill] sm:$0xff] %v5490_v43  ;;  %v2277_v12 = vadd.f32 %v4079_v34, %v5161_v46  ;;  %v4138_v38 = vpop.f32.mrf.mxu1  ;;  %v2509_v1 = vmul.f32 %v5490_v43, %v5490_v43  ;;  %v2521_v26 = vadd.f32 %v2508_v5, %v5436_v14  ;;  %v2431_v32 = vadd.f32 %v5441_v35, %v5490_v43 }
 0x1a1   :  { %v4081_v55 = vpop.f32.mrf.mxu0  ;;  %v5520_v27 = vadd.f32 %v4039_v11, %v1707_v20  ;;  %v2567_v20 = vsel %vm2532_vm0, %v2520_v13, 0.0 }
 0x1a2   :  { %v5510_v34 = vadd.f32 %v4137_v21, %v2277_v12  ;;  %v4082_v51 = vadd.f32 %v4081_v55, %v4080_v62  ;;  %v4139_v54 = vpop.f32.mrf.mxu1  ;;  %v6118_v62 = vld [vmem:[#allocation29_spill] sm:$0xff]  ;;  %v2534_v12 = vsel %vm2532_vm0, %v2429_v49, 0.0  ;;  %v2522_v49 = vadd.f32 %v2509_v1, %v5443_v29 }
 0x1a3   :  { %v4083_v57 = vpop.f32.mrf.mxu0  ;;  %v4140_v55 = vadd.f32 %v4139_v54, %v4138_v38  ;;  %v3984_v42 = vadd.f32 %v6119_v10, %v6118_v62  ;;  %v2566_v54 = vsel %vm2532_vm0, %v2519_v60, 0.0  ;;  %v2536_v62 = vsel %vm2532_vm0, %v2430_v23, 0.0 }
 0x1a4   :  { %6117 = vst [vmem:[#allocation24_spill] sm:$0xff] %v5510_v34  ;;  %v2280_v8 = vadd.f32 %v4082_v51, %v5161_v46  ;;  %v4141_v16 = vpop.f32.mrf.mxu1  ;;  %v2510_v37 = vmul.f32 %v5510_v34, %v5510_v34  ;;  %v2533_v51 = vsel %vm2532_vm0, %v2428_v40, 0.0  ;;  %v2432_v14 = vadd.f32 %v5448_v0, %v5510_v34 }
 0x1a5   :  { %v4084_v44 = vpop.f32.mrf.mxu0  ;;  %v2568_v10 = vadd.f32 %v2567_v20, %v2566_v54  ;;  %v2569_v40 = vsel %vm2532_vm0, %v2521_v26, 0.0  ;;  %v2538_v1 = vsel %vm2532_vm0, %v2431_v32, 0.0 }
 0x1a6   :  { %v5533_v21 = vadd.f32 %v4140_v55, %v2280_v8  ;;  %v4085_v38 = vadd.f32 %v4084_v44, %v4083_v57  ;;  %v4142_v11 = vpop.f32.mrf.mxu1  ;;  %v2535_v55 = vadd.f32 %v2534_v12, %v2533_v51  ;;  %v2523_v60 = vadd.f32 %v2510_v37, %v5454_v63  ;;  %v6121_v51 = vld [vmem:[#allocation32_spill] sm:$0xff] }
 0x1a7   :  { %v4086_v5 = vpop.f32.mrf.mxu0  ;;  %v4143_v8 = vadd.f32 %v4142_v11, %v4141_v16  ;;  %v2540_v16 = vsel %vm2532_vm0, %v2432_v14, 0.0  ;;  %v6120_v11 = vld [vmem:[#allocation30_spill] sm:$0xff] }
 0x1a8   :  { %v2511_v13 = vmul.f32 %v5533_v21, %v5533_v21  ;;  %v2285_v35 = vadd.f32 %v4085_v38, %v5161_v46  ;;  %v4144_v57 = vpop.f32.mrf.mxu1  ;;  %v2433_v0 = vadd.f32 %v5461_v36, %v5533_v21  ;;  %v2537_v43 = vadd.f32 %v2536_v62, %v2535_v55  ;;  %v5561_v36 = vld [vmem:[%s6042_s2] ss:$0 sm:$0xff] }
 0x1a9   :  { %v4087_v29 = vpop.f32.mrf.mxu0  ;;  %v2571_v46 = vsel %vm2532_vm0, %v2522_v49, 0.0  ;;  %v4042_v54 = vadd.f32 %v6121_v51, %v6120_v11  ;;  %v2573_v14 = vsel %vm2532_vm0, %v2523_v60, 0.0  ;;  %v6123_v11 = vld [vmem:[#allocation35_spill] sm:$0xff] }
 0x1aa   :  { %v5549_v23 = vadd.f32 %v4143_v8, %v2285_v35  ;;  %v4088_v44 = vadd.f32 %v4087_v29, %v4086_v5  ;;  %v4145_v34 = vpop.f32.mrf.mxu1  ;;  %v2524_v12 = vadd.f32 %v2511_v13, %v5463_v3  ;;  %v2570_v3 = vadd.f32 %v2569_v40, %v2568_v10 }
 0x1ab   :  { %v4089_v26 = vpop.f32.mrf.mxu0  ;;  %v4146_v32 = vadd.f32 %v4145_v34, %v4144_v57  ;;  %v2539_v49 = vadd.f32 %v2538_v1, %v2537_v43  ;;  %v2542_v5 = vsel %vm2532_vm0, %v2433_v0, 0.0  ;;  %v1710_v1 = vadd.f32 %v5561_v36, %v3984_v42 }
 0x1ac   :  { %v2434_v63 = vadd.f32 %v5469_v15, %v5549_v23  ;;  %v2512_v37 = vmul.f32 %v5549_v23, %v5549_v23  ;;  %v2288_v20 = vadd.f32 %v5561_v36, %v4088_v44  ;;  %v4147_v38 = vpop.f32.mrf.mxu1  ;;  %v2572_v55 = vadd.f32 %v2571_v46, %v2570_v3 }
 0x1ad   :  { %v4090_v15 = vpop.f32.mrf.mxu0  ;;  %v2541_v29 = vadd.f32 %v2540_v16, %v2539_v49  ;;  %v2575_v34 = vsel %vm2532_vm0, %v2524_v12, 0.0 }
 0x1ae   :  { %v2525_v62 = vadd.f32 %v2512_v37, %v5476_v53  ;;  %v5569_v13 = vadd.f32 %v4146_v32, %v2288_v20  ;;  %v4091_v35 = vadd.f32 %v4090_v15, %v4089_v26  ;;  %v4148_v8 = vpop.f32.mrf.mxu1  ;;  %v2544_v57 = vsel %vm2532_vm0, %v2434_v63, 0.0  ;;  %v6122_v32 = vld [vmem:[#allocation33_spill] sm:$0xff] }
 0x1af   :  { %v4092_v44 = vpop.f32.mrf.mxu0  ;;  %v4149_v53 = vadd.f32 %v4148_v8, %v4147_v38  ;;  %v2574_v0 = vadd.f32 %v2573_v14, %v2572_v55  ;;  %v2543_v46 = vadd.f32 %v2542_v5, %v2541_v29  ;;  %v3987_v51 = vadd.f32 %v6123_v11, %v6122_v32 }
 0x1b0   :  { %v2435_v43 = vadd.f32 %v5479_v31, %v5569_v13  ;;  %v2513_v10 = vmul.f32 %v5569_v13, %v5569_v13  ;;  %v2293_v40 = vadd.f32 %v5561_v36, %v4091_v35  ;;  %v4150_v60 = vpop.f32.mrf.mxu1  ;;  %v2577_v16 = vsel %vm2532_vm0, %v2525_v62, 0.0 }
 0x1b1   :  { %v4093_v12 = vpop.f32.mrf.mxu0  ;;  %v2576_v38 = vadd.f32 %v2575_v34, %v2574_v0  ;;  %v2545_v3 = vadd.f32 %v2544_v57, %v2543_v46  ;;  %v2490_v35 = vmul.f32 %v5520_v27, %v5520_v27  ;;  %v5594_v8 = vadd.f32 %v4042_v54, %v1710_v1 }
 0x1b2   :  { %v2526_v26 = vadd.f32 %v2513_v10, %v5484_v22  ;;  %v2546_v63 = vsel %vm2532_vm0, %v2435_v43, 0.0  ;;  %v5582_v37 = vadd.f32 %v4149_v53, %v2293_v40  ;;  %v4094_v31 = vadd.f32 %v4093_v12, %v4092_v44  ;;  %v4151_v20 = vpop.f32.mrf.mxu1 }
 0x1b3   :  { %v4152_v49 = vadd.f32 %v4151_v20, %v4150_v60  ;;  %v4095_v42 = vpop.f32.mrf.mxu0  ;;  %v2578_v55 = vadd.f32 %v2577_v16, %v2576_v38  ;;  %v2547_v29 = vadd.f32 %v2546_v63, %v2545_v3  ;;  %v1715_v40 = vadd.f32 %v5561_v36, %v3987_v51  ;;  %v6125_v20 = vld [vmem:[#allocation36_spill] sm:$0xff] }
 0x1b4   :  { %v2579_v14 = vsel %vm2532_vm0, %v2526_v26, 0.0  ;;  %v2436_v15 = vadd.f32 %v5494_v19, %v5582_v37  ;;  %v2514_v22 = vmul.f32 %v5582_v37, %v5582_v37  ;;  %v2296_v5 = vadd.f32 %v5561_v36, %v4094_v31  ;;  %v4153_v62 = vpop.f32.mrf.mxu1  ;;  %v6124_v31 = vld [vmem:[#allocation34_spill] sm:$0xff] }
 0x1b5   :  { %v4096_v34 = vpop.f32.mrf.mxu0  ;;  %v2580_v53 = vadd.f32 %v2579_v14, %v2578_v55  ;;  %v2425_v26 = vadd.f32 %v5411_v4, %v5520_v27  ;;  %v2503_v63 = vadd.f32 %v2490_v35, %v5415_v48  ;;  %v4045_v32 = vadd.f32 %v6125_v20, %v6124_v31 }
 0x1b6   :  { %v2527_v57 = vadd.f32 %v2514_v22, %v5499_v56  ;;  %v2548_v44 = vsel %vm2532_vm0, %v2436_v15, 0.0  ;;  %v5598_v43 = vadd.f32 %v4152_v49, %v2296_v5  ;;  %v4097_v19 = vadd.f32 %v4096_v34, %v4095_v42  ;;  %v4154_v10 = vpop.f32.mrf.mxu1  ;;  %v6127_v34 = vld [vmem:[#allocation22_spill] sm:$0xff] }
 0x1b7   :  { %v2549_v60 = vadd.f32 %v2548_v44, %v2547_v29  ;;  %v4155_v0 = vadd.f32 %v4154_v10, %v4153_v62  ;;  %v4098_v46 = vpop.f32.mrf.mxu0  ;;  %v2491_v14 = vmul.f32 %v5594_v8, %v5594_v8  ;;  %v5618_v15 = vadd.f32 %v4045_v32, %v1715_v40  ;;  %v6126_v29 = vld [vmem:[#allocation9_spill] sm:$0xff] }
 0x1b8   :  { %v2581_v54 = vsel %vm2532_vm0, %v2527_v57, 0.0  ;;  %v2437_v1 = vadd.f32 %v5508_v28, %v5598_v43  ;;  %v2515_v56 = vmul.f32 %v5598_v43, %v5598_v43  ;;  %v2301_v16 = vadd.f32 %v5561_v36, %v4097_v19  ;;  %v4156_v12 = vpop.f32.mrf.mxu1 }
 0x1b9   :  { %v2582_v11 = vadd.f32 %v2581_v54, %v2580_v53  ;;  %v4099_v51 = vpop.f32.mrf.mxu0  ;;  %v2414_v57 = vadd.f32 %v6127_v34, %v6126_v29  ;;  %v2466_v44 = vmul.f32 %v6127_v34, %v6127_v34  ;;  %v2426_v19 = vadd.f32 %v5419_v41, %v5594_v8 }
 0x1ba   :  { %v2528_v38 = vadd.f32 %v2515_v56, %v5513_v7  ;;  %v2550_v28 = vsel %vm2532_vm0, %v2437_v1, 0.0  ;;  %v5614_v3 = vadd.f32 %v4155_v0, %v2301_v16  ;;  %v4100_v49 = vadd.f32 %v4099_v51, %v4098_v46  ;;  %v4157_v42 = vpop.f32.mrf.mxu1 }
 0x1bb   :  { %v2551_v4 = vadd.f32 %v2550_v28, %v2549_v60  ;;  %v4158_v48 = vadd.f32 %v4157_v42, %v4156_v12  ;;  %v4101_v22 = vpop.f32.mrf.mxu0  ;;  %v2504_v1 = vadd.f32 %v2491_v14, %v5421_v47  ;;  %v2492_v56 = vmul.f32 %v5618_v15, %v5618_v15 }
 0x1bc   :  { %v2583_v5 = vsel %vm2532_vm0, %v2528_v38, 0.0  ;;  %v2438_v62 = vadd.f32 %v2425_v26, %v5614_v3  ;;  %v2516_v7 = vmul.f32 %v5614_v3, %v5614_v3  ;;  %v2304_v35 = vadd.f32 %v5561_v36, %v4100_v49  ;;  %v4159_v55 = vpop.f32.mrf.mxu1 }
 0x1bd   :  { %v2584_v10 = vadd.f32 %v2583_v5, %v2582_v11  ;;  %v4102_v40 = vpop.f32.mrf.mxu0  ;;  %v6128_v11 = vld [vmem:[#allocation37_spill] sm:$0xff]  ;;  %v2427_v28 = vadd.f32 %v2414_v57, %v5618_v15 }
 0x1be   :  { %v2529_v53 = vadd.f32 %v2516_v7, %v2503_v63  ;;  %v2552_v60 = vsel %vm2532_vm0, %v2438_v62, 0.0  ;;  %v5632_v0 = vadd.f32 %v4158_v48, %v2304_v35  ;;  %v4103_v46 = vadd.f32 %v4102_v40, %v4101_v22  ;;  %v4160_v54 = vpop.f32.mrf.mxu1 }
 0x1bf   :  { %v2553_v16 = vadd.f32 %v2552_v60, %v2551_v4  ;;  %v4161_v12 = vadd.f32 %v4160_v54, %v4159_v55  ;;  %v4104_v26 = vpop.f32.mrf.mxu0  ;;  %v2479_v51 = vadd.f32 %v2466_v44, %v6128_v11 }
 0x1c0   :  { %v2585_v31 = vsel %vm2532_vm0, %v2529_v53, 0.0  ;;  %v2439_v41 = vadd.f32 %v2426_v19, %v5632_v0  ;;  %v2517_v63 = vmul.f32 %v5632_v0, %v5632_v0  ;;  %v2309_v20 = vadd.f32 %v5561_v36, %v4103_v46  ;;  %v4162_v32 = vpop.f32.mrf.mxu1 }
 0x1c1   :  { %v2586_v38 = vadd.f32 %v2585_v31, %v2584_v10  ;;  %v4105_v47 = vpop.f32.mrf.mxu0  ;;  %v2505_v22 = vadd.f32 %v2492_v56, %v2479_v51 }
 0x1c2   :  { %v2530_v49 = vadd.f32 %v2517_v63, %v2504_v1  ;;  %v2554_v42 = vsel %vm2532_vm0, %v2439_v41, 0.0  ;;  %v5645_v14 = vadd.f32 %v4161_v12, %v2309_v20  ;;  %v4163_v4 = vpop.f32.mrf.mxu1 }
 0x1c3   :  { %v2555_v48 = vadd.f32 %v2554_v42, %v2553_v16 }
 0x1c4   :  { %v2587_v5 = vsel %vm2532_vm0, %v2530_v49, 0.0  ;;  %v2440_v36 = vadd.f32 %v2427_v28, %v5645_v14  ;;  %v2518_v62 = vmul.f32 %v5645_v14, %v5645_v14  ;;  %v2603_v28 = vld [vmem:[%s6043_s3] sm:$0x1] }
 0x1c5   :  { %v2588_v7 = vadd.f32 %v2587_v5, %v2586_v38  ;;  %v2608_v38 = vlaneseq }
 0x1c6   :  { %v2531_v35 = vadd.f32 %v2518_v62, %v2505_v22  ;;  %v2557_v55 = vsel %vm2556_vm1, %v2440_v36, 0.0 }
 0x1c7   :  { %v2558_v57 = vadd.f32 %v2557_v55, %v2555_v48  ;;  %v2609_v47 = vshrl.u32 %v2608_v38, 7  ;;  %v2605_v48 = vld [vmem:[%s6044_s4] sm:$0x1] }
 0x1c8   :  { %v2589_v44 = vsel %vm2556_vm1, %v2531_v35, 0.0 }
 0x1c9   :  { %v2559_v19 = vrot.slane %v2558_v57, 4  ;;  %v2590_v10 = vadd.f32 %v2589_v44, %v2588_v7  ;;  %v2610_v49 = vsub.s32 0, %v2609_v47  ;;  %v6129_v7 = vld [vmem:[#allocation2_spill] sm:$0xff]  ;;  %v6130_v44 = vld [vmem:[#allocation3_spill] sm:$0xff] }
 0x1cb   :  { %v2560_v40 = vadd.f32 %v2559_v19, %v2558_v57  ;;  %v2591_v53 = vrot.slane %v2590_v10, 4 }
 0x1cd   :  { %v2561_v60 = vrot.slane %v2560_v40, 2  ;;  %v2592_v46 = vadd.f32 %v2591_v53, %v2590_v10  ;;  %v6131_v10 = vld [vmem:[#allocation4_spill] sm:$0xff]  ;;  %v6132_v53 = vld [vmem:[#allocation5_spill] sm:$0xff] }
 0x1cf   :  { %v2562_v54 = vadd.f32 %v2561_v60, %v2560_v40  ;;  %v2593_v1 = vrot.slane %v2592_v46, 2 }
 0x1d1   :  { %v2563_v56 = vrot.slane %v2562_v54, 1  ;;  %v2594_v16 = vadd.f32 %v2593_v1, %v2592_v46  ;;  %v6134_v1 = vld [vmem:[#allocation7_spill] sm:$0xff] }
 0x1d3   :  { %v2564_v12 = vadd.f32 %v2563_v56, %v2562_v54  ;;  %v2595_v26 = vrot.slane %v2594_v16, 1  ;;  %v6133_v54 = vld [vmem:[#allocation6_spill] sm:$0xff]  ;;  %v6135_v56 = vld [vmem:[#allocation8_spill] sm:$0xff] }
 0x1d5   :  { %v2565_v31 = vmul.f32 0.0025510204, %v2564_v12  ;;  %v2596_v41 = vadd.f32 %v2595_v26, %v2594_v16 }
 0x1d7   :  { %v2597_v63 = vmul.f32 0.0025510204, %v2596_v41  ;;  %v2598_v20 = vmul.f32 %v2565_v31, %v2565_v31 }
 0x1d9   :  { %v2599_v32 = vsub.f32 %v2597_v63, %v2598_v20  ;;  %v6138_v63 = vld [vmem:[#allocation12_spill] sm:$0xff] }
 0x1db   :  { %v2600_v11 = vmax.f32 %v2599_v32, 0.0  ;;  %v6139_v32 = vld [vmem:[#allocation13_spill] sm:$0xff] }
 0x1dd   :  { %v2601_v51 = vadd.f32 1e-05, %v2600_v11 }
 0x1df   :  { %4453 = vrsqrt.f32 %v2601_v51  ;;  %v6140_v51 = vld [vmem:[#allocation14_spill] sm:$0xff] }
 0x1ec   :  { %v4454_v42 = vpop.eup %4453 }
 0x1ed   :  { %v2604_v4 = vmul.f32 %v4454_v42, %v2603_v28 }
 0x1ef   :  { %v2606_v22 = vmul.f32 %v2604_v4, %v2565_v31  ;;  %v5657_v5 = vrot.slane %v2604_v4, %v2610_v49  ;;  %v6136_v31 = vld [vmem:[#allocation10_spill] sm:$0xff] }
 0x1f1   :  { %v2607_v36 = vsub.f32 %v2605_v48, %v2606_v22  ;;  %v2612_v62 = vmul.f32 %v5657_v5, %v5176_v59  ;;  %v2613_v35 = vmul.f32 %v5657_v5, %v6129_v7  ;;  %v2614_v55 = vmul.f32 %v5657_v5, %v5194_v17 }
 0x1f2   :  { %v2615_v57 = vmul.f32 %v5657_v5, %v5197_v25  ;;  %v2616_v19 = vmul.f32 %v5657_v5, %v6130_v44  ;;  %v2617_v40 = vmul.f32 %v5657_v5, %v6131_v10  ;;  %v2618_v60 = vmul.f32 %v5657_v5, %v6132_v53 }
 0x1f3   :  { %v2619_v59 = vmul.f32 %v5657_v5, %v5209_v61  ;;  %v2620_v46 = vmul.f32 %v5657_v5, %v5212_v6  ;;  %v2621_v17 = vmul.f32 %v5657_v5, %v6133_v54  ;;  %v2622_v25 = vmul.f32 %v5657_v5, %v6134_v1  ;;  %v6137_v6 = vld [vmem:[#allocation11_spill] sm:$0xff] }
 0x1f4   :  { %v2623_v16 = vmul.f32 %v5657_v5, %v6135_v56  ;;  %v2624_v12 = vmul.f32 %v5657_v5, %v6126_v29  ;;  %v5685_v26 = vrot.slane %v2607_v36, %v2610_v49  ;;  %v5689_v61 = vmul.f32 %v5657_v5, %v6136_v31 }
 0x1f5   :  { %v5693_v41 = vmul.f32 %v5657_v5, %v6137_v6  ;;  %v5697_v20 = vmul.f32 %v5657_v5, %v6138_v63  ;;  %v5701_v11 = vmul.f32 %v5657_v5, %v6139_v32  ;;  %v5705_v29 = vmul.f32 %v5657_v5, %v6140_v51 }
 0x1f6   :  { %v2631_v38 = vadd.f32 %v5685_v26, %v2612_v62  ;;  %v2632_v47 = vadd.f32 %v5685_v26, %v2613_v35  ;;  %v2633_v28 = vadd.f32 %v5685_v26, %v2614_v55  ;;  %v2634_v49 = vadd.f32 %v5685_v26, %v2615_v57 }
 0x1f7   :  { %v2635_v42 = vadd.f32 %v5685_v26, %v2616_v19  ;;  %v2636_v4 = vadd.f32 %v5685_v26, %v2617_v40  ;;  %v2637_v48 = vadd.f32 %v5685_v26, %v2618_v60  ;;  %v2638_v22 = vadd.f32 %v5685_v26, %v2619_v59 }
 0x1f8   :  { %v2639_v36 = vadd.f32 %v5685_v26, %v2620_v46  ;;  %v2640_v7 = vadd.f32 %v5685_v26, %v2621_v17  ;;  %v2641_v62 = vadd.f32 %v5685_v26, %v2622_v25  ;;  %v2642_v35 = vadd.f32 %v5685_v26, %v2623_v16 }
 0x1f9   :  { %v2643_v55 = vadd.f32 %v5685_v26, %v2624_v12  ;;  %v2644_v57 = vmax.f32 %v2631_v38, 0.0  ;;  %v2645_v44 = vmax.f32 %v2632_v47, 0.0  ;;  %v2646_v10 = vmax.f32 %v2633_v28, 0.0 }
 0x1fa   :  { %v2647_v19 = vmax.f32 %v2634_v49, 0.0  ;;  %v2648_v53 = vmax.f32 %v2635_v42, 0.0  ;;  %v2649_v40 = vmax.f32 %v2636_v4, 0.0  ;;  %v2650_v54 = vmax.f32 %v2637_v48, 0.0  ;;  %v6141_v4 = vld [vmem:[#allocation15_spill] sm:$0xff] }
 0x1fb   :  { %v2651_v60 = vmax.f32 %v2638_v22, 0.0  ;;  %v2652_v1 = vmax.f32 %v2639_v36, 0.0  ;;  %v2653_v59 = vmax.f32 %v2640_v7, 0.0  ;;  %v2654_v56 = vmax.f32 %v2641_v62, 0.0  ;;  %v6142_v22 = vld [vmem:[#allocation16_spill] sm:$0xff]  ;;  %v6143_v7 = vld [vmem:[#allocation17_spill] sm:$0xff] }
 0x1fc   :  { %v2655_v46 = vmax.f32 %v2642_v35, 0.0  ;;  %v2656_v31 = vmax.f32 %v2643_v55, 0.0  ;;  %v3649_v17 = vpack.c.bf16 %v2644_v57, %v2644_v57  ;;  %v3650_v6 = vpack.c.bf16 %v2645_v44, %v2645_v44  ;;  %v6144_v35 = vld [vmem:[#allocation18_spill] sm:$0xff]  ;;  %v6145_v57 = vld [vmem:[#allocation19_spill] sm:$0xff] }
 0x1fd   :  { %v3651_v25 = vpack.c.bf16 %v2646_v10, %v2646_v10  ;;  %v3652_v63 = vpack.c.bf16 %v2647_v19, %v2647_v19  ;;  %v3653_v16 = vpack.c.bf16 %v2648_v53, %v2648_v53  ;;  %v3654_v32 = vpack.c.bf16 %v2649_v40, %v2649_v40  ;;  %v6146_v10 = vld [vmem:[#allocation20_spill] sm:$0xff]  ;;  %v6147_v53 = vld [vmem:[#allocation21_spill] sm:$0xff] }
 0x1fe   :  { %v3655_v12 = vpack.c.bf16 %v2650_v54, %v2650_v54  ;;  %v3656_v51 = vpack.c.bf16 %v2651_v60, %v2651_v60  ;;  %v3657_v38 = vpack.c.bf16 %v2652_v1, %v2652_v1  ;;  %v3658_v47 = vpack.c.bf16 %v2653_v59, %v2653_v59  ;;  %2711 = vst.msk [vmem:[%s6045_s5] sm:$0xf] %vm2710_vm2, %v3649_v17 }
 0x1ff   :  { %2712 = vst.msk [vmem:[%s6045_s5 + $0x4] sm:$0xf] %vm2710_vm2, %v3650_v6  ;;  %v3659_v28 = vpack.c.bf16 %v2654_v56, %v2654_v56  ;;  %v3660_v49 = vpack.c.bf16 %v2655_v46, %v2655_v46  ;;  %v3661_v42 = vpack.c.bf16 %v2656_v31, %v2656_v31  ;;  %2713 = vst.msk [vmem:[%s6045_s5 + $0x8] sm:$0xf] %vm2710_vm2, %v3651_v25 }
 0x200   :  { %2714 = vst.msk [vmem:[%s6045_s5 + $0xc] sm:$0xf] %vm2710_vm2, %v3652_v63  ;;  %2715 = vst.msk [vmem:[%s6045_s5 + $0x10] sm:$0xf] %vm2710_vm2, %v3653_v16  ;;  %v2730_v48 = vmul.f32 %v5657_v5, %v6141_v4  ;;  %v2731_v36 = vmul.f32 %v5657_v5, %v6142_v22  ;;  %v2732_v62 = vmul.f32 %v5657_v5, %v6143_v7 }
 0x201   :  { %2716 = vst.msk [vmem:[%s6045_s5 + $0x14] sm:$0xf] %vm2710_vm2, %v3654_v32  ;;  %2717 = vst.msk [vmem:[%s6045_s5 + $0x18] sm:$0xf] %vm2710_vm2, %v3655_v12  ;;  %v2733_v55 = vmul.f32 %v5657_v5, %v6144_v35  ;;  %v2734_v44 = vmul.f32 %v5657_v5, %v6145_v57  ;;  %v2735_v19 = vmul.f32 %v5657_v5, %v6146_v10 }
 0x202   :  { %2718 = vst.msk [vmem:[%s6045_s5 + $0x1c] sm:$0xf] %vm2710_vm2, %v3656_v51  ;;  %2719 = vst.msk [vmem:[%s6045_s5 + $0x20] sm:$0xf] %vm2710_vm2, %v3657_v38  ;;  %v2736_v40 = vmul.f32 %v5657_v5, %v6147_v53  ;;  %v2737_v54 = vmul.f32 %v5657_v5, %v6127_v34  ;;  %v2738_v60 = vadd.f32 %v5689_v61, %v5685_v26 }
 0x203   :  { %2720 = vst.msk [vmem:[%s6045_s5 + $0x24] sm:$0xf] %vm2710_vm2, %v3658_v47  ;;  %2721 = vst.msk [vmem:[%s6045_s5 + $0x28] sm:$0xf] %vm2710_vm2, %v3659_v28  ;;  %v2739_v1 = vadd.f32 %v5693_v41, %v5685_v26  ;;  %v2740_v59 = vadd.f32 %v5697_v20, %v5685_v26  ;;  %v2741_v56 = vadd.f32 %v5701_v11, %v5685_v26 }
 0x204   :  { %2722 = vst.msk [vmem:[%s6045_s5 + $0x2c] sm:$0xf] %vm2710_vm2, %v3660_v49  ;;  %v2742_v46 = vadd.f32 %v5705_v29, %v5685_v26  ;;  %v2743_v31 = vadd.f32 %v2730_v48, %v5685_v26  ;;  %v2744_v17 = vadd.f32 %v2731_v36, %v5685_v26  ;;  %v2745_v34 = vadd.f32 %v2732_v62, %v5685_v26 }
 0x205   :  { %2724 = vst.msk [vmem:[%s6045_s5 + $0x30] sm:$0x1] %vm2723_vm3, %v3661_v42  ;;  %v2746_v61 = vadd.f32 %v2733_v55, %v5685_v26  ;;  %v2747_v6 = vadd.f32 %v2734_v44, %v5685_v26  ;;  %v2748_v41 = vadd.f32 %v2735_v19, %v5685_v26  ;;  %v2749_v20 = vadd.f32 %v2736_v40, %v5685_v26 }
 0x206   :  { %v2750_v25 = vadd.f32 %v2737_v54, %v5685_v26  ;;  %v2751_v11 = vmax.f32 %v2738_v60, 0.0  ;;  %v2752_v63 = vmax.f32 %v2739_v1, 0.0  ;;  %v2753_v16 = vmax.f32 %v2740_v59, 0.0 }
 0x207   :  { %v2754_v29 = vmax.f32 %v2741_v56, 0.0  ;;  %v2755_v32 = vmax.f32 %v2742_v46, 0.0  ;;  %v2756_v12 = vmax.f32 %v2743_v31, 0.0  ;;  %v2757_v51 = vmax.f32 %v2744_v17, 0.0 }
 0x208   :  { %v2758_v38 = vmax.f32 %v2745_v34, 0.0  ;;  %v2759_v47 = vmax.f32 %v2746_v61, 0.0  ;;  %v2760_v28 = vmax.f32 %v2747_v6, 0.0  ;;  %v2761_v49 = vmax.f32 %v2748_v41, 0.0 }
 0x209   :  { %v2762_v42 = vmax.f32 %v2749_v20, 0.0  ;;  %v2763_v4 = vmax.f32 %v2750_v25, 0.0  ;;  %v3662_v48 = vpack.c.bf16 %v2751_v11, %v2751_v11  ;;  %v3663_v22 = vpack.c.bf16 %v2752_v63, %v2752_v63 }
 0x20a   :  { %v3664_v36 = vpack.c.bf16 %v2753_v16, %v2753_v16  ;;  %v3665_v7 = vpack.c.bf16 %v2754_v29, %v2754_v29  ;;  %v3666_v62 = vpack.c.bf16 %v2755_v32, %v2755_v32  ;;  %v3667_v35 = vpack.c.bf16 %v2756_v12, %v2756_v12 }
 0x20b   :  { %v3668_v55 = vpack.c.bf16 %v2757_v51, %v2757_v51  ;;  %v3669_v57 = vpack.c.bf16 %v2758_v38, %v2758_v38  ;;  %v3670_v44 = vpack.c.bf16 %v2759_v47, %v2759_v47  ;;  %v3671_v10 = vpack.c.bf16 %v2760_v28, %v2760_v28  ;;  %3584 = vst.msk [vmem:[%s6045_s5 + $0x34] sm:$0xf] %vm2710_vm2, %v3662_v48 }
 0x20c   :  { %v3672_v19 = vpack.c.bf16 %v2761_v49, %v2761_v49  ;;  %3585 = vst.msk [vmem:[%s6045_s5 + $0x38] sm:$0xf] %vm2710_vm2, %v3663_v22  ;;  %3586 = vst.msk [vmem:[%s6045_s5 + $0x3c] sm:$0xf] %vm2710_vm2, %v3664_v36  ;;  %v3673_v53 = vpack.c.bf16 %v2762_v42, %v2762_v42  ;;  %v3674_v40 = vpack.c.bf16 %v2763_v4, %v2763_v4 }
 0x20d   :  { %3587 = vst.msk [vmem:[%s6045_s5 + $0x40] sm:$0xf] %vm2710_vm2, %v3665_v7  ;;  %3588 = vst.msk [vmem:[%s6045_s5 + $0x44] sm:$0xf] %vm2710_vm2, %v3666_v62  ;;  %v2831_v54 = vmul.f32 %v5657_v5, %v5266_v18  ;;  %v2832_v60 = vmul.f32 %v5657_v5, %v5269_v30  ;;  %v2833_v18 = vmul.f32 %v5657_v5, %v5272_v45 }
 0x20e   :  { %3589 = vst.msk [vmem:[%s6045_s5 + $0x48] sm:$0xf] %vm2710_vm2, %v3667_v35  ;;  %3590 = vst.msk [vmem:[%s6045_s5 + $0x4c] sm:$0xf] %vm2710_vm2, %v3668_v55  ;;  %v2834_v30 = vmul.f32 %v5657_v5, %v5275_v58  ;;  %v2835_v1 = vmul.f32 %v5657_v5, %v5278_v9  ;;  %v2836_v59 = vmul.f32 %v5657_v5, %v5281_v24  ;;  %v6148_v58 = vld [vmem:[#allocation23_spill] sm:$0xff] }
 0x20f   :  { %3591 = vst.msk [vmem:[%s6045_s5 + $0x50] sm:$0xf] %vm2710_vm2, %v3669_v57  ;;  %3592 = vst.msk [vmem:[%s6045_s5 + $0x54] sm:$0xf] %vm2710_vm2, %v3670_v44  ;;  %v2837_v45 = vmul.f32 %v5657_v5, %v5284_v39  ;;  %v2838_v56 = vmul.f32 %v5657_v5, %v6148_v58  ;;  %v2839_v9 = vmul.f32 %v5657_v5, %v6112_v33 }
 0x210   :  { %3593 = vst.msk [vmem:[%s6045_s5 + $0x58] sm:$0xf] %vm2710_vm2, %v3671_v10  ;;  %3594 = vst.msk [vmem:[%s6045_s5 + $0x5c] sm:$0xf] %vm2710_vm2, %v3672_v19  ;;  %v2840_v24 = vmul.f32 %v5657_v5, %v6113_v52  ;;  %v2841_v46 = vmul.f32 %v5657_v5, %v5520_v27  ;;  %v2842_v31 = vmul.f32 %v5657_v5, %v5594_v8 }
 0x211   :  { %3595 = vst.msk [vmem:[%s6045_s5 + $0x60] sm:$0xf] %vm2710_vm2, %v3673_v53  ;;  %v2843_v17 = vmul.f32 %v5657_v5, %v5618_v15  ;;  %v2844_v39 = vadd.f32 %v2831_v54, %v5685_v26  ;;  %v2845_v34 = vadd.f32 %v2832_v60, %v5685_v26  ;;  %v2846_v61 = vadd.f32 %v2833_v18, %v5685_v26  ;;  %v6149_v18 = vld [vmem:[#allocation38_spill] sm:$0xff] }
 0x212   :  { %3596 = vst.msk [vmem:[%s6045_s5 + $0x64] sm:$0x1] %vm2723_vm3, %v3674_v40  ;;  %v2847_v33 = vadd.f32 %v2834_v30, %v5685_v26  ;;  %v2848_v6 = vadd.f32 %v2835_v1, %v5685_v26  ;;  %v2849_v52 = vadd.f32 %v2836_v59, %v5685_v26  ;;  %v2850_v27 = vadd.f32 %v2837_v45, %v5685_v26  ;;  %v6150_v1 = vld [vmem:[#allocation26_spill] sm:$0xff]  ;;  %v6151_v45 = vld [vmem:[#allocation24_spill] sm:$0xff] }
 0x213   :  { %v2851_v41 = vadd.f32 %v2838_v56, %v5685_v26  ;;  %v2852_v8 = vadd.f32 %v2839_v9, %v5685_v26  ;;  %v2853_v15 = vadd.f32 %v2840_v24, %v5685_v26  ;;  %v2854_v20 = vadd.f32 %v2841_v46, %v5685_v26 }
 0x214   :  { %v2855_v25 = vadd.f32 %v2842_v31, %v5685_v26  ;;  %v2856_v11 = vadd.f32 %v2843_v17, %v5685_v26  ;;  %v2857_v63 = vmax.f32 %v2844_v39, 0.0  ;;  %v2858_v16 = vmax.f32 %v2845_v34, 0.0 }
 0x215   :  { %v2859_v29 = vmax.f32 %v2846_v61, 0.0  ;;  %v2860_v32 = vmax.f32 %v2847_v33, 0.0  ;;  %v2861_v12 = vmax.f32 %v2848_v6, 0.0  ;;  %v2862_v51 = vmax.f32 %v2849_v52, 0.0 }
 0x216   :  { %v2863_v38 = vmax.f32 %v2850_v27, 0.0  ;;  %v2864_v47 = vmax.f32 %v2851_v41, 0.0  ;;  %v2865_v28 = vmax.f32 %v2852_v8, 0.0  ;;  %v2866_v49 = vmax.f32 %v2853_v15, 0.0 }
 0x217   :  { %v2867_v42 = vmax.f32 %v2854_v20, 0.0  ;;  %v2868_v4 = vmax.f32 %v2855_v25, 0.0  ;;  %v2869_v48 = vmax.f32 %v2856_v11, 0.0  ;;  %v3675_v22 = vpack.c.bf16 %v2857_v63, %v2857_v63 }
 0x218   :  { %v3676_v36 = vpack.c.bf16 %v2858_v16, %v2858_v16  ;;  %v3677_v7 = vpack.c.bf16 %v2859_v29, %v2859_v29  ;;  %v3678_v62 = vpack.c.bf16 %v2860_v32, %v2860_v32  ;;  %v3679_v35 = vpack.c.bf16 %v2861_v12, %v2861_v12 }
 0x219   :  { %v3680_v55 = vpack.c.bf16 %v2862_v51, %v2862_v51  ;;  %v3681_v57 = vpack.c.bf16 %v2863_v38, %v2863_v38  ;;  %v3682_v44 = vpack.c.bf16 %v2864_v47, %v2864_v47  ;;  %v3683_v10 = vpack.c.bf16 %v2865_v28, %v2865_v28  ;;  %3610 = vst.msk [vmem:[%s6045_s5 + $0x68] sm:$0xf] %vm2710_vm2, %v3675_v22 }
 0x21a   :  { %v3684_v19 = vpack.c.bf16 %v2866_v49, %v2866_v49  ;;  %v3685_v53 = vpack.c.bf16 %v2867_v42, %v2867_v42  ;;  %3611 = vst.msk [vmem:[%s6045_s5 + $0x6c] sm:$0xf] %vm2710_vm2, %v3676_v36  ;;  %3612 = vst.msk [vmem:[%s6045_s5 + $0x70] sm:$0xf] %vm2710_vm2, %v3677_v7  ;;  %v3686_v40 = vpack.c.bf16 %v2868_v4, %v2868_v4 }
 0x21b   :  { %v3687_v54 = vpack.c.bf16 %v2869_v48, %v2869_v48  ;;  %3613 = vst.msk [vmem:[%s6045_s5 + $0x74] sm:$0xf] %vm2710_vm2, %v3678_v62  ;;  %3614 = vst.msk [vmem:[%s6045_s5 + $0x78] sm:$0xf] %vm2710_vm2, %v3679_v35  ;;  %v2937_v60 = vmul.f32 %v5657_v5, %v5458_v50  ;;  %v2938_v30 = vmul.f32 %v5657_v5, %v6149_v18 }
 0x21c   :  { %3615 = vst.msk [vmem:[%s6045_s5 + $0x7c] sm:$0xf] %vm2710_vm2, %v3680_v55  ;;  %3616 = vst.msk [vmem:[%s6045_s5 + $0x80] sm:$0xf] %vm2710_vm2, %v3681_v57  ;;  %v2939_v50 = vmul.f32 %v5657_v5, %v5473_v2  ;;  %v2940_v59 = vmul.f32 %v5657_v5, %v6150_v1  ;;  %v2941_v58 = vmul.f32 %v5657_v5, %v6151_v45 }
 0x21d   :  { %3617 = vst.msk [vmem:[%s6045_s5 + $0x84] sm:$0xf] %vm2710_vm2, %v3682_v44  ;;  %3618 = vst.msk [vmem:[%s6045_s5 + $0x88] sm:$0xf] %vm2710_vm2, %v3683_v10  ;;  %v2942_v56 = vmul.f32 %v5657_v5, %v5533_v21  ;;  %v2943_v2 = vmul.f32 %v5657_v5, %v5549_v23  ;;  %v2944_v9 = vmul.f32 %v5657_v5, %v5569_v13 }
 0x21e   :  { %3619 = vst.msk [vmem:[%s6045_s5 + $0x8c] sm:$0xf] %vm2710_vm2, %v3684_v19  ;;  %3620 = vst.msk [vmem:[%s6045_s5 + $0x90] sm:$0xf] %vm2710_vm2, %v3685_v53  ;;  %v2945_v24 = vmul.f32 %v5657_v5, %v5582_v37  ;;  %v2946_v21 = vmul.f32 %v5657_v5, %v5598_v43  ;;  %v2947_v46 = vmul.f32 %v5657_v5, %v5614_v3 }
 0x21f   :  { %3621 = vst.msk [vmem:[%s6045_s5 + $0x94] sm:$0xf] %vm2710_vm2, %v3686_v40  ;;  %v2948_v31 = vmul.f32 %v5657_v5, %v5632_v0  ;;  %v2949_v17 = vmul.f32 %v5657_v5, %v5645_v14  ;;  %v2950_v23 = vadd.f32 %v2937_v60, %v5685_v26  ;;  %v2951_v39 = vadd.f32 %v2938_v30, %v5685_v26 }
 0x220   :  { %3622 = vst.msk [vmem:[%s6045_s5 + $0x98] sm:$0x1] %vm2723_vm3, %v3687_v54  ;;  %v2952_v13 = vadd.f32 %v2939_v50, %v5685_v26  ;;  %v2953_v37 = vadd.f32 %v2940_v59, %v5685_v26  ;;  %v2954_v34 = vadd.f32 %v2941_v58, %v5685_v26  ;;  %v2955_v43 = vadd.f32 %v2942_v56, %v5685_v26 }
 0x221   :  { %v2956_v3 = vadd.f32 %v2943_v2, %v5685_v26  ;;  %v2957_v61 = vadd.f32 %v2944_v9, %v5685_v26  ;;  %v2958_v0 = vadd.f32 %v2945_v24, %v5685_v26  ;;  %v2959_v14 = vadd.f32 %v2946_v21, %v5685_v26 }
 0x222   :  { %v2960_v5 = vadd.f32 %v2947_v46, %v5685_v26  ;;  %v2961_v33 = vadd.f32 %v2948_v31, %v5685_v26  ;;  %v2962_v6 = vadd.f32 %v2949_v17, %v5685_v26  ;;  %v2963_v52 = vmax.f32 %v2950_v23, 0.0 }
 0x223   :  { %v2964_v27 = vmax.f32 %v2951_v39, 0.0  ;;  %v2965_v41 = vmax.f32 %v2952_v13, 0.0  ;;  %v2966_v8 = vmax.f32 %v2953_v37, 0.0  ;;  %v2967_v15 = vmax.f32 %v2954_v34, 0.0 }
 0x224   :  { %v2968_v20 = vmax.f32 %v2955_v43, 0.0  ;;  %v2969_v25 = vmax.f32 %v2956_v3, 0.0  ;;  %v2970_v11 = vmax.f32 %v2957_v61, 0.0  ;;  %v2971_v63 = vmax.f32 %v2958_v0, 0.0 }
 0x225   :  { %v2972_v16 = vmax.f32 %v2959_v14, 0.0  ;;  %v2973_v29 = vmax.f32 %v2960_v5, 0.0  ;;  %v2974_v32 = vmax.f32 %v2961_v33, 0.0  ;;  %v2975_v12 = vmax.f32 %v2962_v6, 0.0 }
 0x226   :  { %v3688_v51 = vpack.c.bf16 %v2963_v52, %v2963_v52  ;;  %v3689_v38 = vpack.c.bf16 %v2964_v27, %v2964_v27  ;;  %v3690_v47 = vpack.c.bf16 %v2965_v41, %v2965_v41  ;;  %v3691_v28 = vpack.c.bf16 %v2966_v8, %v2966_v8 }
 0x227   :  { %v3692_v49 = vpack.c.bf16 %v2967_v15, %v2967_v15  ;;  %v3693_v42 = vpack.c.bf16 %v2968_v20, %v2968_v20  ;;  %v3694_v26 = vpack.c.bf16 %v2969_v25, %v2969_v25  ;;  %v3695_v4 = vpack.c.bf16 %v2970_v11, %v2970_v11 }
 0x228   :  { %v3696_v48 = vpack.c.bf16 %v2971_v63, %v2971_v63  ;;  %v3697_v22 = vpack.c.bf16 %v2972_v16, %v2972_v16  ;;  %v3698_v36 = vpack.c.bf16 %v2973_v29, %v2973_v29  ;;  %3636 = vst.msk [vmem:[%s6045_s5 + $0x9c] sm:$0xf] %vm2710_vm2, %v3688_v51  ;;  %3637 = vst.msk [vmem:[%s6045_s5 + $0xa0] sm:$0xf] %vm2710_vm2, %v3689_v38 }
 0x229   :  { %3638 = vst.msk [vmem:[%s6045_s5 + $0xa4] sm:$0xf] %vm2710_vm2, %v3690_v47  ;;  %v3699_v7 = vpack.c.bf16 %v2974_v32, %v2974_v32  ;;  %v3700_v62 = vpack.c.bf16 %v2975_v12, %v2975_v12  ;;  %3639 = vst.msk [vmem:[%s6045_s5 + $0xa8] sm:$0xf] %vm2710_vm2, %v3691_v28 }
 0x22a   :  { %3640 = vst.msk [vmem:[%s6045_s5 + $0xac] sm:$0xf] %vm2710_vm2, %v3692_v49  ;;  %3641 = vst.msk [vmem:[%s6045_s5 + $0xb0] sm:$0xf] %vm2710_vm2, %v3693_v42 }
 0x22b   :  { %3642 = vst.msk [vmem:[%s6045_s5 + $0xb4] sm:$0xf] %vm2710_vm2, %v3694_v26  ;;  %3643 = vst.msk [vmem:[%s6045_s5 + $0xb8] sm:$0xf] %vm2710_vm2, %v3695_v4 }
 0x22c   :  { %3644 = vst.msk [vmem:[%s6045_s5 + $0xbc] sm:$0xf] %vm2710_vm2, %v3696_v48  ;;  %3645 = vst.msk [vmem:[%s6045_s5 + $0xc0] sm:$0xf] %vm2710_vm2, %v3697_v22 }
 0x22d   :  { %3646 = vst.msk [vmem:[%s6045_s5 + $0xc4] sm:$0xf] %vm2710_vm2, %v3698_v36  ;;  %3647 = vst.msk [vmem:[%s6045_s5 + $0xc8] sm:$0xf] %vm2710_vm2, %v3699_v7 }
 0x22e   :  { %3648 = vst.msk [vmem:[%s6045_s5 + $0xcc] sm:$0x1] %vm2723_vm3, %v3700_v62 }

// kernel: generator_forward.5
= control target key start
LH: loop header
LB: loop body
LE: loop exit
PB: predicated region body
PF: predicated region fallthrough
CT: control target
= control target key end

     0   :  { %v2643_v10 = vmov 0   ;;  %v2644_v38 = vmov 1983009808   ;;  %v290_v40 = vlaneseq  ;;  %vm1969_vm0 = vcmask 1043456   ;;  %s3488_s1 = inlined_call_operand.vmem [shape: bf16[1024,392], index: 1, kind: input, shape index: {}]   ;;  %s3489_s2 = inlined_call_operand.<no memory space> [shape: f32[1,1], index: 2, kind: input, shape index: {}]   ;;  %s3490_s0 = inlined_call_operand.vmem [shape: bf16[4,1024], index: 0, kind: input, shape index: {}]   ;;  %s3491_s3 = inlined_call_operand.vmem [shape: f32[4,392], index: 3, kind: output, shape index: {}]  }
   0x1   :  { %v2241_v0 = vld [vmem:[%s3488_s1 + $0xe4] ss:$16 sps:$4 sm:$0xff]   ;;  %v8_v1 = vstv %s3489_s2  ;;  %v2245_v3 = vld [vmem:[%s3488_s1 + $0xe0] ss:$16 sps:$4 sm:$0xff]   ;;  %2240 = vset.pattern.permute.xlu0 %v2643_v10  ;;  %v288_v39 = vunpack.c.l.s4 %v2644_v38  ;;  %vm1970_vm1 = vcmask 64516  }
   0x2   :  { %v2243_v2 = vld [vmem:[%s3488_s1 + $0x2e4] ss:$16 sps:$4 sm:$0xff]   ;;  %9 = vst [vmem:[#allocation2] sm:$0x1] %v8_v1  ;;  %1608 = vmatprep.subr.bf16.mxu0 %v2241_v0  ;;  %v2246_v4 = vld [vmem:[%s3488_s1 + $0x2e0] ss:$16 sps:$4 sm:$0xff]   ;;  %vm1971_vm2 = vmor %vm1970_vm1, %vm1969_vm0 }
   0x3   :  { %1649 = vmatprep.subr.bf16.mxu1 %v2243_v2  ;;  %v2247_v5 = vld [vmem:[%s3488_s1 + $0xc4] ss:$16 sps:$4 sm:$0xff]   ;;  %1609 = vmatpush1.bf16.msra.mxu0 %v2245_v3  ;;  %v2251_v7 = vld [vmem:[%s3488_s1 + $0xc0] ss:$16 sps:$4 sm:$0xff]   ;;  %v289_v44 = vunpack.c.0.s8 %v288_v39  ;;  %v291_v45 = vshrl.u32 %v290_v40, 7 }
   0x4   :  { %1650 = vmatpush1.bf16.msra.mxu1 %v2246_v4  ;;  %v2249_v6 = vld [vmem:[%s3488_s1 + $0x2c4] ss:$16 sps:$4 sm:$0xff]   ;;  %1610 = vmatprep.subr.bf16.mxu0 %v2247_v5  ;;  %v2252_v8 = vld [vmem:[%s3488_s1 + $0x2c0] ss:$16 sps:$4 sm:$0xff]  }
   0x5   :  { %1651 = vmatprep.subr.bf16.mxu1 %v2249_v6  ;;  %v2253_v9 = vld [vmem:[%s3488_s1 + $0xa4] ss:$16 sps:$4 sm:$0xff]   ;;  %v2257_v12 = vld [vmem:[%s3488_s1 + $0xa0] ss:$16 sps:$4 sm:$0xff]   ;;  %v292_v51 = vsub.s32 %v289_v44, %v291_v45 }
   0x6   :  { %v2255_v11 = vld [vmem:[%s3488_s1 + $0x2a4] ss:$16 sps:$4 sm:$0xff]   ;;  %v2258_v13 = vld [vmem:[%s3488_s1 + $0x2a0] ss:$16 sps:$4 sm:$0xff]  }
   0x7   :  { %1611 = vmatpush1.bf16.msra.mxu0 %v2251_v7  ;;  %v2259_v14 = vld [vmem:[%s3488_s1 + $0x84] ss:$16 sps:$4 sm:$0xff]   ;;  %v2263_v16 = vld [vmem:[%s3488_s1 + $0x80] ss:$16 sps:$4 sm:$0xff]  }
   0x8   :  { %1652 = vmatpush1.bf16.msra.mxu1 %v2252_v8  ;;  %1612 = vmatprep.subr.bf16.mxu0 %v2253_v9  ;;  %v2261_v15 = vld [vmem:[%s3488_s1 + $0x284] ss:$16 sps:$4 sm:$0xff]   ;;  %v2264_v17 = vld [vmem:[%s3488_s1 + $0x280] ss:$16 sps:$4 sm:$0xff]   ;;  %v17_v8 = vld [vmem:[%s3490_s0 + $0x8] sm:$0xff] }
   0x9   :  { %1653 = vmatprep.subr.bf16.mxu1 %v2255_v11  ;;  %v2265_v18 = vld [vmem:[%s3488_s1 + $0x64] ss:$16 sps:$4 sm:$0xff]   ;;  %v2269_v20 = vld [vmem:[%s3488_s1 + $0x60] ss:$16 sps:$4 sm:$0xff]  }
   0xa   :  { %v2267_v19 = vld [vmem:[%s3488_s1 + $0x264] ss:$16 sps:$4 sm:$0xff]   ;;  %v2270_v21 = vld [vmem:[%s3488_s1 + $0x260] ss:$16 sps:$4 sm:$0xff]  }
   0xb   :  { %1613 = vmatpush1.bf16.msra.mxu0 %v2257_v12  ;;  %v2271_v22 = vld [vmem:[%s3488_s1 + $0x44] ss:$16 sps:$4 sm:$0xff]   ;;  %v2275_v24 = vld [vmem:[%s3488_s1 + $0x40] ss:$16 sps:$4 sm:$0xff]  }
   0xc   :  { %1654 = vmatpush1.bf16.msra.mxu1 %v2258_v13  ;;  %1614 = vmatprep.subr.bf16.mxu0 %v2259_v14  ;;  %v2273_v23 = vld [vmem:[%s3488_s1 + $0x244] ss:$16 sps:$4 sm:$0xff]   ;;  %v2276_v25 = vld [vmem:[%s3488_s1 + $0x240] ss:$16 sps:$4 sm:$0xff]   ;;  %v303_v13 = vcombine.high %v17_v8, %v17_v8 }
   0xd   :  { %1655 = vmatprep.subr.bf16.mxu1 %v2261_v15  ;;  %v2277_v26 = vld [vmem:[%s3488_s1 + $0x24] ss:$16 sps:$4 sm:$0xff]   ;;  %v2281_v28 = vld [vmem:[%s3488_s1 + $0x20] ss:$16 sps:$4 sm:$0xff]  }
   0xe   :  { %v2279_v27 = vld [vmem:[%s3488_s1 + $0x224] ss:$16 sps:$4 sm:$0xff]   ;;  %v2282_v29 = vld [vmem:[%s3488_s1 + $0x220] ss:$16 sps:$4 sm:$0xff]  }
   0xf   :  { %1615 = vmatpush1.bf16.msra.mxu0 %v2263_v16  ;;  %v2283_v30 = vld [vmem:[%s3488_s1 + $0x4] ss:$16 sps:$4 sm:$0xff]   ;;  %v2287_v32 = vld [vmem:[%s3488_s1] ss:$16 sps:$4 sm:$0xff]  }
  0x10   :  { %1656 = vmatpush1.bf16.msra.mxu1 %v2264_v17  ;;  %1616 = vmatprep.subr.bf16.mxu0 %v2265_v18  ;;  %v2285_v31 = vld [vmem:[%s3488_s1 + $0x204] ss:$16 sps:$4 sm:$0xff]   ;;  %v2288_v33 = vld [vmem:[%s3488_s1 + $0x200] ss:$16 sps:$4 sm:$0xff]   ;;  %v2886_v18 = vrot.slane %v17_v8, %v292_v51 }
  0x11   :  { %1657 = vmatprep.subr.bf16.mxu1 %v2267_v19  ;;  %v2289_v34 = vld [vmem:[%s3488_s1 + $0x1e4] ss:$16 sps:$4 sm:$0xff]   ;;  %v2293_v36 = vld [vmem:[%s3488_s1 + $0x1e0] ss:$16 sps:$4 sm:$0xff]   ;;  %v2888_v19 = vrot.slane %v303_v13, %v292_v51 }
  0x12   :  { %v2291_v35 = vld [vmem:[%s3488_s1 + $0x3e4] ss:$16 sps:$4 sm:$0xff]   ;;  %v2294_v37 = vld [vmem:[%s3488_s1 + $0x3e0] ss:$16 sps:$4 sm:$0xff]  }
  0x13   :  { %1617 = vmatpush1.bf16.msra.mxu0 %v2269_v20  ;;  %v2295_v41 = vld [vmem:[%s3488_s1 + $0x1c4] ss:$16 sps:$4 sm:$0xff]   ;;  %v2299_v43 = vld [vmem:[%s3488_s1 + $0x1c0] ss:$16 sps:$4 sm:$0xff]  }
  0x14   :  { %1658 = vmatpush1.bf16.msra.mxu1 %v2270_v21  ;;  %1618 = vmatprep.subr.bf16.mxu0 %v2271_v22  ;;  %v2297_v42 = vld [vmem:[%s3488_s1 + $0x3c4] ss:$16 sps:$4 sm:$0xff]   ;;  %v2300_v46 = vld [vmem:[%s3488_s1 + $0x3c0] ss:$16 sps:$4 sm:$0xff]  }
  0x15   :  { %1659 = vmatprep.subr.bf16.mxu1 %v2273_v23  ;;  %v2301_v47 = vld [vmem:[%s3488_s1 + $0x1a4] ss:$16 sps:$4 sm:$0xff]   ;;  %v2305_v49 = vld [vmem:[%s3488_s1 + $0x1a0] ss:$16 sps:$4 sm:$0xff]  }
  0x16   :  { %v2303_v48 = vld [vmem:[%s3488_s1 + $0x3a4] ss:$16 sps:$4 sm:$0xff]   ;;  %v2306_v50 = vld [vmem:[%s3488_s1 + $0x3a0] ss:$16 sps:$4 sm:$0xff]  }
  0x17   :  { %1619 = vmatpush1.bf16.msra.mxu0 %v2275_v24  ;;  %v2307_v52 = vld [vmem:[%s3488_s1 + $0x184] ss:$16 sps:$4 sm:$0xff]   ;;  %v2311_v57 = vld [vmem:[%s3488_s1 + $0x180] ss:$16 sps:$4 sm:$0xff]   ;;  %v2904_v24 = vcombine.high %v2886_v18, %v2886_v18 }
  0x18   :  { %1660 = vmatpush1.bf16.msra.mxu1 %v2276_v25  ;;  %1620 = vmatprep.subr.bf16.mxu0 %v2277_v26  ;;  %v2309_v53 = vld [vmem:[%s3488_s1 + $0x384] ss:$16 sps:$4 sm:$0xff]   ;;  %v2312_v58 = vld [vmem:[%s3488_s1 + $0x380] ss:$16 sps:$4 sm:$0xff]   ;;  %v2908_v25 = vcombine.high %v2888_v19, %v2888_v19 }
  0x19   :  { %1661 = vmatprep.subr.bf16.mxu1 %v2279_v27  ;;  %v16_v54 = vld [vmem:[%s3490_s0] sm:$0xff] }
  0x1a   :  { %v2809_v55 = vrot.slane %v16_v54, %v292_v51  ;;  %v286_v56 = vcombine.high %v16_v54, %v16_v54  ;;  %v2313_v59 = vld [vmem:[%s3488_s1 + $0x164] ss:$16 sps:$4 sm:$0xff]   ;;  %v2317_v0 = vld [vmem:[%s3488_s1 + $0x160] ss:$16 sps:$4 sm:$0xff]  }
  0x1b   :  { %1621 = vmatpush1.bf16.msra.mxu0 %v2281_v28  ;;  %v2315_v60 = vld [vmem:[%s3488_s1 + $0x364] ss:$16 sps:$4 sm:$0xff]   ;;  %v2318_v1 = vld [vmem:[%s3488_s1 + $0x360] ss:$16 sps:$4 sm:$0xff]  }
  0x1c   :  { %1662 = vmatpush1.bf16.msra.mxu1 %v2282_v29  ;;  %1622 = vmatprep.subr.bf16.mxu0 %v2283_v30  ;;  %v2825_v61 = vcombine.high %v2809_v55, %v2809_v55  ;;  %v2827_v62 = vrot.slane %v286_v56, %v292_v51  ;;  %v2319_v2 = vld [vmem:[%s3488_s1 + $0x144] ss:$16 sps:$4 sm:$0xff]   ;;  %v2323_v4 = vld [vmem:[%s3488_s1 + $0x140] ss:$16 sps:$4 sm:$0xff]  }
  0x1d   :  { %1663 = vmatprep.subr.bf16.mxu1 %v2285_v31  ;;  %v2321_v3 = vld [vmem:[%s3488_s1 + $0x344] ss:$16 sps:$4 sm:$0xff]   ;;  %v2324_v5 = vld [vmem:[%s3488_s1 + $0x340] ss:$16 sps:$4 sm:$0xff]  }
  0x1e   :  { %1640 = vmatprep.mubr.bf16.mxu0 %v2825_v61  ;;  %v2832_v63 = vcombine.high %v2827_v62, %v2827_v62  ;;  %v2325_v6 = vld [vmem:[%s3488_s1 + $0x124] ss:$16 sps:$4 sm:$0xff]   ;;  %v2329_v9 = vld [vmem:[%s3488_s1 + $0x120] ss:$16 sps:$4 sm:$0xff]  }
  0x1f   :  { %1623 = vmatpush1.bf16.msra.mxu0 %v2287_v32  ;;  %v2327_v7 = vld [vmem:[%s3488_s1 + $0x324] ss:$16 sps:$4 sm:$0xff]   ;;  %v2330_v10 = vld [vmem:[%s3488_s1 + $0x320] ss:$16 sps:$4 sm:$0xff]  }
  0x20   :  { %1664 = vmatpush1.bf16.msra.mxu1 %v2288_v33  ;;  %1624 = vmatprep.subr.bf16.mxu0 %v2289_v34  ;;  %v2331_v11 = vld [vmem:[%s3488_s1 + $0x104] ss:$16 sps:$4 sm:$0xff]   ;;  %v2335_v14 = vld [vmem:[%s3488_s1 + $0x100] ss:$16 sps:$4 sm:$0xff]  }
  0x21   :  { %1665 = vmatprep.subr.bf16.mxu1 %v2291_v35  ;;  %1681 = vmatprep.mubr.bf16.mxu1 %v2832_v63  ;;  %v2333_v12 = vld [vmem:[%s3488_s1 + $0x304] ss:$16 sps:$4 sm:$0xff]   ;;  %v2336_v15 = vld [vmem:[%s3488_s1 + $0x300] ss:$16 sps:$4 sm:$0xff]  }
  0x22   :  { %v2341_v16 = vld [vmem:[%s3488_s1 + $0x4e4] ss:$16 sps:$4 sm:$0xff]   ;;  %v2339_v20 = vld [vmem:[%s3488_s1 + $0x4e0] ss:$16 sps:$4 sm:$0xff]  }
  0x23   :  { %1625 = vmatpush2.bf16.msra.mxu0 %v2293_v36  ;;  %v2344_v17 = vld [vmem:[%s3488_s1 + $0x6e4] ss:$16 sps:$4 sm:$0xff]   ;;  %v2342_v21 = vld [vmem:[%s3488_s1 + $0x6e0] ss:$16 sps:$4 sm:$0xff]  }
  0x24   :  { %1666 = vmatpush2.bf16.msra.mxu1 %v2294_v37  ;;  %1626 = vmatprep.subr.bf16.mxu0 %v2295_v41  ;;  %v2347_v22 = vld [vmem:[%s3488_s1 + $0x4c4] ss:$16 sps:$4 sm:$0xff]   ;;  %v2345_v26 = vld [vmem:[%s3488_s1 + $0x4c0] ss:$16 sps:$4 sm:$0xff]  }
  0x25   :  { %1667 = vmatprep.subr.bf16.mxu1 %v2297_v42  ;;  %v2350_v23 = vld [vmem:[%s3488_s1 + $0x6c4] ss:$16 sps:$4 sm:$0xff]   ;;  %v2348_v27 = vld [vmem:[%s3488_s1 + $0x6c0] ss:$16 sps:$4 sm:$0xff]  }
  0x26   :  { %v2353_v28 = vld [vmem:[%s3488_s1 + $0x4a4] ss:$16 sps:$4 sm:$0xff]   ;;  %v2351_v30 = vld [vmem:[%s3488_s1 + $0x4a0] ss:$16 sps:$4 sm:$0xff]  }
  0x27   :  { %1627 = vmatpush2.bf16.msra.mxu0 %v2299_v43  ;;  %v2356_v29 = vld [vmem:[%s3488_s1 + $0x6a4] ss:$16 sps:$4 sm:$0xff]   ;;  %v2354_v31 = vld [vmem:[%s3488_s1 + $0x6a0] ss:$16 sps:$4 sm:$0xff]  }
  0x28   :  { %1668 = vmatpush2.bf16.msra.mxu1 %v2300_v46  ;;  %1628 = vmatprep.subr.bf16.mxu0 %v2301_v47  ;;  %v2359_v32 = vld [vmem:[%s3488_s1 + $0x484] ss:$16 sps:$4 sm:$0xff]   ;;  %v2357_v34 = vld [vmem:[%s3488_s1 + $0x480] ss:$16 sps:$4 sm:$0xff]  }
  0x29   :  { %1669 = vmatprep.subr.bf16.mxu1 %v2303_v48  ;;  %v2362_v33 = vld [vmem:[%s3488_s1 + $0x684] ss:$16 sps:$4 sm:$0xff]   ;;  %v2360_v35 = vld [vmem:[%s3488_s1 + $0x680] ss:$16 sps:$4 sm:$0xff]  }
  0x2a   :  { %v2365_v36 = vld [vmem:[%s3488_s1 + $0x464] ss:$16 sps:$4 sm:$0xff]   ;;  %v2363_v38 = vld [vmem:[%s3488_s1 + $0x460] ss:$16 sps:$4 sm:$0xff]  }
  0x2b   :  { %1629 = vmatpush2.bf16.msra.mxu0 %v2305_v49  ;;  %v2368_v37 = vld [vmem:[%s3488_s1 + $0x664] ss:$16 sps:$4 sm:$0xff]   ;;  %v2366_v39 = vld [vmem:[%s3488_s1 + $0x660] ss:$16 sps:$4 sm:$0xff]  }
  0x2c   :  { %1670 = vmatpush2.bf16.msra.mxu1 %v2306_v50  ;;  %1630 = vmatprep.subr.bf16.mxu0 %v2307_v52  ;;  %v2371_v40 = vld [vmem:[%s3488_s1 + $0x444] ss:$16 sps:$4 sm:$0xff]   ;;  %v2369_v42 = vld [vmem:[%s3488_s1 + $0x440] ss:$16 sps:$4 sm:$0xff]  }
  0x2d   :  { %1671 = vmatprep.subr.bf16.mxu1 %v2309_v53  ;;  %v2374_v41 = vld [vmem:[%s3488_s1 + $0x644] ss:$16 sps:$4 sm:$0xff]   ;;  %v2372_v43 = vld [vmem:[%s3488_s1 + $0x640] ss:$16 sps:$4 sm:$0xff]  }
  0x2e   :  { %v2377_v44 = vld [vmem:[%s3488_s1 + $0x424] ss:$16 sps:$4 sm:$0xff]   ;;  %v2375_v46 = vld [vmem:[%s3488_s1 + $0x420] ss:$16 sps:$4 sm:$0xff]  }
  0x2f   :  { %1631 = vmatpush2.bf16.msra.mxu0 %v2311_v57  ;;  %v2380_v45 = vld [vmem:[%s3488_s1 + $0x624] ss:$16 sps:$4 sm:$0xff]   ;;  %v2378_v47 = vld [vmem:[%s3488_s1 + $0x620] ss:$16 sps:$4 sm:$0xff]  }
  0x30   :  { %1672 = vmatpush2.bf16.msra.mxu1 %v2312_v58  ;;  %1632 = vmatprep.subr.bf16.mxu0 %v2313_v59  ;;  %v2383_v48 = vld [vmem:[%s3488_s1 + $0x404] ss:$16 sps:$4 sm:$0xff]   ;;  %v2381_v50 = vld [vmem:[%s3488_s1 + $0x400] ss:$16 sps:$4 sm:$0xff]  }
  0x31   :  { %1673 = vmatprep.subr.bf16.mxu1 %v2315_v60  ;;  %v2386_v49 = vld [vmem:[%s3488_s1 + $0x604] ss:$16 sps:$4 sm:$0xff]   ;;  %v1977_v51 = vld [vmem:[#allocation2] ss:$0 sm:$0xff] }
  0x32   :  { %v2384_v52 = vld [vmem:[%s3488_s1 + $0x600] ss:$16 sps:$4 sm:$0xff]   ;;  %v2389_v53 = vld [vmem:[%s3488_s1 + $0x5e4] ss:$16 sps:$4 sm:$0xff]   ;;  %281 = vperm.xlu0 %2240, %v1977_v51   ;;  %v2473_v51 = vld [vmem:[%s3488_s1 + $0x2c] ss:$16 sps:$4 sm:$0xff]  }
  0x33   :  { %1633 = vmatpush2.bf16.msra.mxu0 %v2317_v0  ;;  %v2392_v54 = vld [vmem:[%s3488_s1 + $0x7e4] ss:$16 sps:$4 sm:$0xff]   ;;  %v2387_v56 = vld [vmem:[%s3488_s1 + $0x5e0] ss:$16 sps:$4 sm:$0xff]  }
  0x34   :  { %1674 = vmatpush2.bf16.msra.mxu1 %v2318_v1  ;;  %1634 = vmatprep.subr.bf16.mxu0 %v2319_v2  ;;  %v2390_v57 = vld [vmem:[%s3488_s1 + $0x7e0] ss:$16 sps:$4 sm:$0xff]   ;;  %v2395_v58 = vld [vmem:[%s3488_s1 + $0x5c4] ss:$16 sps:$4 sm:$0xff]  }
  0x35   :  { %1675 = vmatprep.subr.bf16.mxu1 %v2321_v3  ;;  %v2398_v59 = vld [vmem:[%s3488_s1 + $0x7c4] ss:$16 sps:$4 sm:$0xff]   ;;  %v2393_v60 = vld [vmem:[%s3488_s1 + $0x5c0] ss:$16 sps:$4 sm:$0xff]  }
  0x36   :  { %v2396_v0 = vld [vmem:[%s3488_s1 + $0x7c0] ss:$16 sps:$4 sm:$0xff]   ;;  %v2401_v1 = vld [vmem:[%s3488_s1 + $0x5a4] ss:$16 sps:$4 sm:$0xff]  }
  0x37   :  { %1635 = vmatpush2.bf16.msra.mxu0 %v2323_v4  ;;  %v2404_v2 = vld [vmem:[%s3488_s1 + $0x7a4] ss:$16 sps:$4 sm:$0xff]   ;;  %v2399_v3 = vld [vmem:[%s3488_s1 + $0x5a0] ss:$16 sps:$4 sm:$0xff]  }
  0x38   :  { %1676 = vmatpush2.bf16.msra.mxu1 %v2324_v5  ;;  %1636 = vmatprep.subr.bf16.mxu0 %v2325_v6  ;;  %v2402_v4 = vld [vmem:[%s3488_s1 + $0x7a0] ss:$16 sps:$4 sm:$0xff]   ;;  %v2407_v5 = vld [vmem:[%s3488_s1 + $0x584] ss:$16 sps:$4 sm:$0xff]  }
  0x39   :  { %1677 = vmatprep.subr.bf16.mxu1 %v2327_v7  ;;  %v2410_v6 = vld [vmem:[%s3488_s1 + $0x784] ss:$16 sps:$4 sm:$0xff]   ;;  %v2405_v7 = vld [vmem:[%s3488_s1 + $0x580] ss:$16 sps:$4 sm:$0xff]  }
  0x3a   :  { %v2408_v8 = vld [vmem:[%s3488_s1 + $0x780] ss:$16 sps:$4 sm:$0xff]   ;;  %v2419_v13 = vld [vmem:[%s3488_s1 + $0x544] ss:$16 sps:$4 sm:$0xff]  }
  0x3b   :  { %1637 = vmatpush2.bf16.msra.mxu0 %v2329_v9  ;;  %v2413_v9 = vld [vmem:[%s3488_s1 + $0x564] ss:$16 sps:$4 sm:$0xff]  }
  0x3c   :  { %1678 = vmatpush2.bf16.msra.mxu1 %v2330_v10  ;;  %1638 = vmatprep.subr.bf16.mxu0 %v2331_v11  ;;  %v2416_v10 = vld [vmem:[%s3488_s1 + $0x764] ss:$16 sps:$4 sm:$0xff]   ;;  %v2411_v11 = vld [vmem:[%s3488_s1 + $0x560] ss:$16 sps:$4 sm:$0xff]  }
  0x3d   :  { %1679 = vmatprep.subr.bf16.mxu1 %v2333_v12  ;;  %v2414_v12 = vld [vmem:[%s3488_s1 + $0x760] ss:$16 sps:$4 sm:$0xff]  }
  0x3f   :  { %1639 = vmatpush2.bf16.msra.mxu0 %v2335_v14  ;;  %v2422_v14 = vld [vmem:[%s3488_s1 + $0x744] ss:$16 sps:$4 sm:$0xff]  }
  0x40   :  { %1680 = vmatpush2.bf16.msra.mxu1 %v2336_v15  ;;  %1690 = vmatprep.subr.bf16.mxu0 %v2341_v16  ;;  %v2417_v15 = vld [vmem:[%s3488_s1 + $0x540] ss:$16 sps:$4 sm:$0xff]  }
  0x41   :  { %1731 = vmatprep.subr.bf16.mxu1 %v2344_v17  ;;  %v2420_v16 = vld [vmem:[%s3488_s1 + $0x740] ss:$16 sps:$4 sm:$0xff]   ;;  %v2425_v17 = vld [vmem:[%s3488_s1 + $0x524] ss:$16 sps:$4 sm:$0xff]  }
  0x42   :  { %1641 = vmatmul.mubr.bf16.vlgmr.msra.gmra.mxu0 %v2809_v55 }
  0x43   :  { %1682 = vmatmul.mubr.bf16.vlgmr.msra.gmra.mxu1 %v2827_v62  ;;  %1691 = vmatpush1.bf16.msra.mxu0 %v2339_v20  ;;  %v2428_v20 = vld [vmem:[%s3488_s1 + $0x724] ss:$16 sps:$4 sm:$0xff]  }
  0x44   :  { %1732 = vmatpush1.bf16.msra.mxu1 %v2342_v21  ;;  %1692 = vmatprep.subr.bf16.mxu0 %v2347_v22  ;;  %v2423_v21 = vld [vmem:[%s3488_s1 + $0x520] ss:$16 sps:$4 sm:$0xff]  }
  0x45   :  { %1733 = vmatprep.subr.bf16.mxu1 %v2350_v23  ;;  %1722 = vmatprep.mubr.bf16.mxu0 %v2904_v24  ;;  %v2426_v22 = vld [vmem:[%s3488_s1 + $0x720] ss:$16 sps:$4 sm:$0xff]   ;;  %v2431_v23 = vld [vmem:[%s3488_s1 + $0x504] ss:$16 sps:$4 sm:$0xff]  }
  0x46   :  { %1763 = vmatprep.mubr.bf16.mxu1 %v2908_v25 }
  0x47   :  { %1693 = vmatpush1.bf16.msra.mxu0 %v2345_v26  ;;  %v2434_v26 = vld [vmem:[%s3488_s1 + $0x704] ss:$16 sps:$4 sm:$0xff]  }
  0x48   :  { %1734 = vmatpush1.bf16.msra.mxu1 %v2348_v27  ;;  %1694 = vmatprep.subr.bf16.mxu0 %v2353_v28  ;;  %v2429_v27 = vld [vmem:[%s3488_s1 + $0x500] ss:$16 sps:$4 sm:$0xff]  }
  0x49   :  { %1735 = vmatprep.subr.bf16.mxu1 %v2356_v29  ;;  %v2432_v28 = vld [vmem:[%s3488_s1 + $0x700] ss:$16 sps:$4 sm:$0xff]   ;;  %v2437_v29 = vld [vmem:[%s3488_s1 + $0xec] ss:$16 sps:$4 sm:$0xff]  }
  0x4b   :  { %1695 = vmatpush1.bf16.msra.mxu0 %v2351_v30  ;;  %v2440_v30 = vld [vmem:[%s3488_s1 + $0x2ec] ss:$16 sps:$4 sm:$0xff]  }
  0x4c   :  { %1736 = vmatpush1.bf16.msra.mxu1 %v2354_v31  ;;  %1696 = vmatprep.subr.bf16.mxu0 %v2359_v32  ;;  %v2435_v31 = vld [vmem:[%s3488_s1 + $0xe8] ss:$16 sps:$4 sm:$0xff]  }
  0x4d   :  { %1737 = vmatprep.subr.bf16.mxu1 %v2362_v33  ;;  %v2438_v32 = vld [vmem:[%s3488_s1 + $0x2e8] ss:$16 sps:$4 sm:$0xff]   ;;  %v2443_v33 = vld [vmem:[%s3488_s1 + $0xcc] ss:$16 sps:$4 sm:$0xff]  }
  0x4f   :  { %1697 = vmatpush1.bf16.msra.mxu0 %v2357_v34  ;;  %v2446_v34 = vld [vmem:[%s3488_s1 + $0x2cc] ss:$16 sps:$4 sm:$0xff]  }
  0x50   :  { %1738 = vmatpush1.bf16.msra.mxu1 %v2360_v35  ;;  %1698 = vmatprep.subr.bf16.mxu0 %v2365_v36  ;;  %v2441_v35 = vld [vmem:[%s3488_s1 + $0xc8] ss:$16 sps:$4 sm:$0xff]  }
  0x51   :  { %1739 = vmatprep.subr.bf16.mxu1 %v2368_v37  ;;  %v2444_v36 = vld [vmem:[%s3488_s1 + $0x2c8] ss:$16 sps:$4 sm:$0xff]   ;;  %v2449_v37 = vld [vmem:[%s3488_s1 + $0xac] ss:$16 sps:$4 sm:$0xff]  }
  0x53   :  { %1699 = vmatpush1.bf16.msra.mxu0 %v2363_v38  ;;  %v2452_v38 = vld [vmem:[%s3488_s1 + $0x2ac] ss:$16 sps:$4 sm:$0xff]  }
  0x54   :  { %1740 = vmatpush1.bf16.msra.mxu1 %v2366_v39  ;;  %1700 = vmatprep.subr.bf16.mxu0 %v2371_v40  ;;  %v2447_v39 = vld [vmem:[%s3488_s1 + $0xa8] ss:$16 sps:$4 sm:$0xff]  }
  0x55   :  { %1741 = vmatprep.subr.bf16.mxu1 %v2374_v41  ;;  %v2450_v40 = vld [vmem:[%s3488_s1 + $0x2a8] ss:$16 sps:$4 sm:$0xff]   ;;  %v2455_v41 = vld [vmem:[%s3488_s1 + $0x8c] ss:$16 sps:$4 sm:$0xff]  }
  0x57   :  { %1701 = vmatpush1.bf16.msra.mxu0 %v2369_v42  ;;  %v2456_v42 = vld [vmem:[%s3488_s1 + $0x288] ss:$16 sps:$4 sm:$0xff]  }
  0x58   :  { %1742 = vmatpush1.bf16.msra.mxu1 %v2372_v43  ;;  %1702 = vmatprep.subr.bf16.mxu0 %v2377_v44  ;;  %v2461_v43 = vld [vmem:[%s3488_s1 + $0x6c] ss:$16 sps:$4 sm:$0xff]  }
  0x59   :  { %1743 = vmatprep.subr.bf16.mxu1 %v2380_v45  ;;  %v2464_v44 = vld [vmem:[%s3488_s1 + $0x26c] ss:$16 sps:$4 sm:$0xff]   ;;  %v2459_v45 = vld [vmem:[%s3488_s1 + $0x68] ss:$16 sps:$4 sm:$0xff]  }
  0x5b   :  { %1703 = vmatpush1.bf16.msra.mxu0 %v2375_v46  ;;  %v2462_v46 = vld [vmem:[%s3488_s1 + $0x268] ss:$16 sps:$4 sm:$0xff]  }
  0x5c   :  { %1744 = vmatpush1.bf16.msra.mxu1 %v2378_v47  ;;  %1704 = vmatprep.subr.bf16.mxu0 %v2383_v48  ;;  %v2467_v47 = vld [vmem:[%s3488_s1 + $0x4c] ss:$16 sps:$4 sm:$0xff]  }
  0x5d   :  { %1745 = vmatprep.subr.bf16.mxu1 %v2386_v49  ;;  %v2470_v48 = vld [vmem:[%s3488_s1 + $0x24c] ss:$16 sps:$4 sm:$0xff]   ;;  %v2465_v49 = vld [vmem:[%s3488_s1 + $0x48] ss:$16 sps:$4 sm:$0xff]  }
  0x5f   :  { %1705 = vmatpush1.bf16.msra.mxu0 %v2381_v50  ;;  %v2468_v50 = vld [vmem:[%s3488_s1 + $0x248] ss:$16 sps:$4 sm:$0xff]  }
  0x60   :  { %1746 = vmatpush1.bf16.msra.mxu1 %v2384_v52  ;;  %1706 = vmatprep.subr.bf16.mxu0 %v2389_v53  ;;  %v2476_v52 = vld [vmem:[%s3488_s1 + $0x22c] ss:$16 sps:$4 sm:$0xff]   ;;  %v2471_v53 = vld [vmem:[%s3488_s1 + $0x28] ss:$16 sps:$4 sm:$0xff]  }
  0x61   :  { %1747 = vmatprep.subr.bf16.mxu1 %v2392_v54  ;;  %v2474_v54 = vld [vmem:[%s3488_s1 + $0x228] ss:$16 sps:$4 sm:$0xff]  }
  0x63   :  { %1707 = vmatpush2.bf16.msra.mxu0 %v2387_v56  ;;  %v2479_v56 = vld [vmem:[%s3488_s1 + $0xc] ss:$16 sps:$4 sm:$0xff]  }
  0x64   :  { %1748 = vmatpush2.bf16.msra.mxu1 %v2390_v57  ;;  %1708 = vmatprep.subr.bf16.mxu0 %v2395_v58  ;;  %v2482_v57 = vld [vmem:[%s3488_s1 + $0x20c] ss:$16 sps:$4 sm:$0xff]   ;;  %v2477_v58 = vld [vmem:[%s3488_s1 + $0x8] ss:$16 sps:$4 sm:$0xff]  }
  0x65   :  { %1749 = vmatprep.subr.bf16.mxu1 %v2398_v59  ;;  %v2480_v59 = vld [vmem:[%s3488_s1 + $0x208] ss:$16 sps:$4 sm:$0xff]  }
  0x67   :  { %1709 = vmatpush2.bf16.msra.mxu0 %v2393_v60  ;;  %v2485_v60 = vld [vmem:[%s3488_s1 + $0x1ec] ss:$16 sps:$4 sm:$0xff]  }
  0x68   :  { %1750 = vmatpush2.bf16.msra.mxu1 %v2396_v0  ;;  %1710 = vmatprep.subr.bf16.mxu0 %v2401_v1  ;;  %v2488_v0 = vld [vmem:[%s3488_s1 + $0x3ec] ss:$16 sps:$4 sm:$0xff]   ;;  %v2483_v1 = vld [vmem:[%s3488_s1 + $0x1e8] ss:$16 sps:$4 sm:$0xff]  }
  0x69   :  { %1751 = vmatprep.subr.bf16.mxu1 %v2404_v2  ;;  %v2486_v2 = vld [vmem:[%s3488_s1 + $0x3e8] ss:$16 sps:$4 sm:$0xff]  }
  0x6b   :  { %1711 = vmatpush2.bf16.msra.mxu0 %v2399_v3  ;;  %v2491_v3 = vld [vmem:[%s3488_s1 + $0x1cc] ss:$16 sps:$4 sm:$0xff]  }
  0x6c   :  { %1752 = vmatpush2.bf16.msra.mxu1 %v2402_v4  ;;  %1712 = vmatprep.subr.bf16.mxu0 %v2407_v5  ;;  %v2494_v4 = vld [vmem:[%s3488_s1 + $0x3cc] ss:$16 sps:$4 sm:$0xff]   ;;  %v2489_v5 = vld [vmem:[%s3488_s1 + $0x1c8] ss:$16 sps:$4 sm:$0xff]  }
  0x6d   :  { %1753 = vmatprep.subr.bf16.mxu1 %v2410_v6  ;;  %v2492_v6 = vld [vmem:[%s3488_s1 + $0x3c8] ss:$16 sps:$4 sm:$0xff]  }
  0x6f   :  { %1713 = vmatpush2.bf16.msra.mxu0 %v2405_v7  ;;  %v2497_v7 = vld [vmem:[%s3488_s1 + $0x1ac] ss:$16 sps:$4 sm:$0xff]  }
  0x70   :  { %1754 = vmatpush2.bf16.msra.mxu1 %v2408_v8  ;;  %1714 = vmatprep.subr.bf16.mxu0 %v2413_v9  ;;  %v2500_v8 = vld [vmem:[%s3488_s1 + $0x3ac] ss:$16 sps:$4 sm:$0xff]   ;;  %v2495_v9 = vld [vmem:[%s3488_s1 + $0x1a8] ss:$16 sps:$4 sm:$0xff]  }
  0x71   :  { %1755 = vmatprep.subr.bf16.mxu1 %v2416_v10  ;;  %v2498_v10 = vld [vmem:[%s3488_s1 + $0x3a8] ss:$16 sps:$4 sm:$0xff]  }
  0x73   :  { %1715 = vmatpush2.bf16.msra.mxu0 %v2411_v11  ;;  %v2503_v11 = vld [vmem:[%s3488_s1 + $0x18c] ss:$16 sps:$4 sm:$0xff]  }
  0x74   :  { %1756 = vmatpush2.bf16.msra.mxu1 %v2414_v12  ;;  %1716 = vmatprep.subr.bf16.mxu0 %v2419_v13  ;;  %v2506_v12 = vld [vmem:[%s3488_s1 + $0x38c] ss:$16 sps:$4 sm:$0xff]   ;;  %v2501_v13 = vld [vmem:[%s3488_s1 + $0x188] ss:$16 sps:$4 sm:$0xff]  }
  0x75   :  { %1757 = vmatprep.subr.bf16.mxu1 %v2422_v14  ;;  %v2504_v14 = vld [vmem:[%s3488_s1 + $0x388] ss:$16 sps:$4 sm:$0xff]  }
  0x77   :  { %1717 = vmatpush2.bf16.msra.mxu0 %v2417_v15  ;;  %v2509_v15 = vld [vmem:[%s3488_s1 + $0x16c] ss:$16 sps:$4 sm:$0xff]  }
  0x78   :  { %1758 = vmatpush2.bf16.msra.mxu1 %v2420_v16  ;;  %1718 = vmatprep.subr.bf16.mxu0 %v2425_v17  ;;  %v2512_v16 = vld [vmem:[%s3488_s1 + $0x36c] ss:$16 sps:$4 sm:$0xff]   ;;  %v2507_v17 = vld [vmem:[%s3488_s1 + $0x168] ss:$16 sps:$4 sm:$0xff]  }
  0x79   :  { %1759 = vmatprep.subr.bf16.mxu1 %v2428_v20  ;;  %v2510_v20 = vld [vmem:[%s3488_s1 + $0x368] ss:$16 sps:$4 sm:$0xff]  }
  0x7b   :  { %1719 = vmatpush2.bf16.msra.mxu0 %v2423_v21  ;;  %v2515_v21 = vld [vmem:[%s3488_s1 + $0x14c] ss:$16 sps:$4 sm:$0xff]  }
  0x7c   :  { %1760 = vmatpush2.bf16.msra.mxu1 %v2426_v22  ;;  %1720 = vmatprep.subr.bf16.mxu0 %v2431_v23  ;;  %v2518_v22 = vld [vmem:[%s3488_s1 + $0x34c] ss:$16 sps:$4 sm:$0xff]   ;;  %v2513_v23 = vld [vmem:[%s3488_s1 + $0x148] ss:$16 sps:$4 sm:$0xff]  }
  0x7d   :  { %1761 = vmatprep.subr.bf16.mxu1 %v2434_v26  ;;  %v2516_v26 = vld [vmem:[%s3488_s1 + $0x348] ss:$16 sps:$4 sm:$0xff]  }
  0x7f   :  { %1721 = vmatpush2.bf16.msra.mxu0 %v2429_v27  ;;  %v2521_v27 = vld [vmem:[%s3488_s1 + $0x12c] ss:$16 sps:$4 sm:$0xff]  }
  0x80   :  { %1762 = vmatpush2.bf16.msra.mxu1 %v2432_v28  ;;  %1772 = vmatprep.subr.bf16.mxu0 %v2437_v29  ;;  %v2524_v28 = vld [vmem:[%s3488_s1 + $0x32c] ss:$16 sps:$4 sm:$0xff]   ;;  %v2519_v29 = vld [vmem:[%s3488_s1 + $0x128] ss:$16 sps:$4 sm:$0xff]  }
  0x81   :  { %1813 = vmatprep.subr.bf16.mxu1 %v2440_v30  ;;  %v2522_v30 = vld [vmem:[%s3488_s1 + $0x328] ss:$16 sps:$4 sm:$0xff]  }
  0x82   :  { %1723 = vmatmul.mubr.bf16.vlgmr.msra.gmra.mxu0 %v2886_v18 }
  0x83   :  { %1764 = vmatmul.mubr.bf16.vlgmr.msra.gmra.mxu1 %v2888_v19  ;;  %1773 = vmatpush1.bf16.msra.mxu0 %v2435_v31  ;;  %v2527_v31 = vld [vmem:[%s3488_s1 + $0x10c] ss:$16 sps:$4 sm:$0xff]  }
  0x84   :  { %1814 = vmatpush1.bf16.msra.mxu1 %v2438_v32  ;;  %1774 = vmatprep.subr.bf16.mxu0 %v2443_v33  ;;  %v2530_v32 = vld [vmem:[%s3488_s1 + $0x30c] ss:$16 sps:$4 sm:$0xff]   ;;  %v2525_v33 = vld [vmem:[%s3488_s1 + $0x108] ss:$16 sps:$4 sm:$0xff]  }
  0x85   :  { %1815 = vmatprep.subr.bf16.mxu1 %v2446_v34  ;;  %1804 = vmatprep.mubr.bf16.mxu0 %v2825_v61  ;;  %v2458_v61 = vld [vmem:[%s3488_s1 + $0x28c] ss:$16 sps:$4 sm:$0xff]   ;;  %v2528_v34 = vld [vmem:[%s3488_s1 + $0x308] ss:$16 sps:$4 sm:$0xff]  }
  0x86   :  { %1845 = vmatprep.mubr.bf16.mxu1 %v2832_v63  ;;  %v2453_v63 = vld [vmem:[%s3488_s1 + $0x88] ss:$16 sps:$4 sm:$0xff]  }
  0x87   :  { %1775 = vmatpush1.bf16.msra.mxu0 %v2441_v35  ;;  %v2533_v35 = vld [vmem:[%s3488_s1 + $0x4ec] ss:$16 sps:$4 sm:$0xff]  }
  0x88   :  { %1816 = vmatpush1.bf16.msra.mxu1 %v2444_v36  ;;  %1776 = vmatprep.subr.bf16.mxu0 %v2449_v37  ;;  %v2536_v36 = vld [vmem:[%s3488_s1 + $0x6ec] ss:$16 sps:$4 sm:$0xff]   ;;  %v2531_v37 = vld [vmem:[%s3488_s1 + $0x4e8] ss:$16 sps:$4 sm:$0xff]  }
  0x89   :  { %1817 = vmatprep.subr.bf16.mxu1 %v2452_v38  ;;  %v2534_v38 = vld [vmem:[%s3488_s1 + $0x6e8] ss:$16 sps:$4 sm:$0xff]  }
  0x8b   :  { %1777 = vmatpush1.bf16.msra.mxu0 %v2447_v39  ;;  %v2539_v39 = vld [vmem:[%s3488_s1 + $0x4cc] ss:$16 sps:$4 sm:$0xff]  }
  0x8c   :  { %1818 = vmatpush1.bf16.msra.mxu1 %v2450_v40  ;;  %1778 = vmatprep.subr.bf16.mxu0 %v2455_v41  ;;  %v2542_v40 = vld [vmem:[%s3488_s1 + $0x6cc] ss:$16 sps:$4 sm:$0xff]   ;;  %v2537_v41 = vld [vmem:[%s3488_s1 + $0x4c8] ss:$16 sps:$4 sm:$0xff]  }
  0x8d   :  { %1819 = vmatprep.subr.bf16.mxu1 %v2458_v61  ;;  %v2540_v61 = vld [vmem:[%s3488_s1 + $0x6c8] ss:$16 sps:$4 sm:$0xff]  }
  0x8f   :  { %1779 = vmatpush1.bf16.msra.mxu0 %v2453_v63  ;;  %v2545_v63 = vld [vmem:[%s3488_s1 + $0x4ac] ss:$16 sps:$4 sm:$0xff]  }
  0x90   :  { %1820 = vmatpush1.bf16.msra.mxu1 %v2456_v42  ;;  %1780 = vmatprep.subr.bf16.mxu0 %v2461_v43  ;;  %v2546_v42 = vld [vmem:[%s3488_s1 + $0x6a8] ss:$16 sps:$4 sm:$0xff]   ;;  %v2551_v43 = vld [vmem:[%s3488_s1 + $0x48c] ss:$16 sps:$4 sm:$0xff]  }
  0x91   :  { %1821 = vmatprep.subr.bf16.mxu1 %v2464_v44  ;;  %v2552_v44 = vld [vmem:[%s3488_s1 + $0x688] ss:$16 sps:$4 sm:$0xff]  }
  0x93   :  { %1781 = vmatpush1.bf16.msra.mxu0 %v2459_v45  ;;  %v2557_v45 = vld [vmem:[%s3488_s1 + $0x46c] ss:$16 sps:$4 sm:$0xff]  }
  0x94   :  { %1822 = vmatpush1.bf16.msra.mxu1 %v2462_v46  ;;  %1782 = vmatprep.subr.bf16.mxu0 %v2467_v47  ;;  %v2560_v46 = vld [vmem:[%s3488_s1 + $0x66c] ss:$16 sps:$4 sm:$0xff]   ;;  %v2555_v47 = vld [vmem:[%s3488_s1 + $0x468] ss:$16 sps:$4 sm:$0xff]  }
  0x95   :  { %1823 = vmatprep.subr.bf16.mxu1 %v2470_v48  ;;  %v2558_v48 = vld [vmem:[%s3488_s1 + $0x668] ss:$16 sps:$4 sm:$0xff]  }
  0x97   :  { %1783 = vmatpush1.bf16.msra.mxu0 %v2465_v49  ;;  %v2563_v49 = vld [vmem:[%s3488_s1 + $0x44c] ss:$16 sps:$4 sm:$0xff]  }
  0x98   :  { %1824 = vmatpush1.bf16.msra.mxu1 %v2468_v50  ;;  %1784 = vmatprep.subr.bf16.mxu0 %v2473_v51  ;;  %v2566_v50 = vld [vmem:[%s3488_s1 + $0x64c] ss:$16 sps:$4 sm:$0xff]   ;;  %v2561_v51 = vld [vmem:[%s3488_s1 + $0x448] ss:$16 sps:$4 sm:$0xff]  }
  0x99   :  { %1825 = vmatprep.subr.bf16.mxu1 %v2476_v52  ;;  %v2564_v52 = vld [vmem:[%s3488_s1 + $0x648] ss:$16 sps:$4 sm:$0xff]  }
  0x9b   :  { %1785 = vmatpush1.bf16.msra.mxu0 %v2471_v53  ;;  %v2569_v53 = vld [vmem:[%s3488_s1 + $0x42c] ss:$16 sps:$4 sm:$0xff]  }
  0x9c   :  { %1826 = vmatpush1.bf16.msra.mxu1 %v2474_v54  ;;  %1786 = vmatprep.subr.bf16.mxu0 %v2479_v56  ;;  %v2572_v54 = vld [vmem:[%s3488_s1 + $0x62c] ss:$16 sps:$4 sm:$0xff]   ;;  %v2567_v56 = vld [vmem:[%s3488_s1 + $0x428] ss:$16 sps:$4 sm:$0xff]  }
  0x9d   :  { %1827 = vmatprep.subr.bf16.mxu1 %v2482_v57  ;;  %v2570_v57 = vld [vmem:[%s3488_s1 + $0x628] ss:$16 sps:$4 sm:$0xff]  }
  0x9f   :  { %1787 = vmatpush1.bf16.msra.mxu0 %v2477_v58  ;;  %v2575_v58 = vld [vmem:[%s3488_s1 + $0x40c] ss:$16 sps:$4 sm:$0xff]  }
  0xa0   :  { %1828 = vmatpush1.bf16.msra.mxu1 %v2480_v59  ;;  %1788 = vmatprep.subr.bf16.mxu0 %v2485_v60  ;;  %v2578_v59 = vld [vmem:[%s3488_s1 + $0x60c] ss:$16 sps:$4 sm:$0xff]   ;;  %v2573_v60 = vld [vmem:[%s3488_s1 + $0x408] ss:$16 sps:$4 sm:$0xff]  }
  0xa1   :  { %1829 = vmatprep.subr.bf16.mxu1 %v2488_v0  ;;  %v2576_v0 = vld [vmem:[%s3488_s1 + $0x608] ss:$16 sps:$4 sm:$0xff]  }
  0xa3   :  { %1789 = vmatpush2.bf16.msra.mxu0 %v2483_v1  ;;  %v2581_v1 = vld [vmem:[%s3488_s1 + $0x5ec] ss:$16 sps:$4 sm:$0xff]  }
  0xa4   :  { %1830 = vmatpush2.bf16.msra.mxu1 %v2486_v2  ;;  %1790 = vmatprep.subr.bf16.mxu0 %v2491_v3  ;;  %v2584_v2 = vld [vmem:[%s3488_s1 + $0x7ec] ss:$16 sps:$4 sm:$0xff]   ;;  %v2579_v3 = vld [vmem:[%s3488_s1 + $0x5e8] ss:$16 sps:$4 sm:$0xff]  }
  0xa5   :  { %1831 = vmatprep.subr.bf16.mxu1 %v2494_v4  ;;  %v2582_v4 = vld [vmem:[%s3488_s1 + $0x7e8] ss:$16 sps:$4 sm:$0xff]  }
  0xa7   :  { %1791 = vmatpush2.bf16.msra.mxu0 %v2489_v5  ;;  %v2587_v5 = vld [vmem:[%s3488_s1 + $0x5cc] ss:$16 sps:$4 sm:$0xff]  }
  0xa8   :  { %1832 = vmatpush2.bf16.msra.mxu1 %v2492_v6  ;;  %1792 = vmatprep.subr.bf16.mxu0 %v2497_v7  ;;  %v2590_v6 = vld [vmem:[%s3488_s1 + $0x7cc] ss:$16 sps:$4 sm:$0xff]   ;;  %v2585_v7 = vld [vmem:[%s3488_s1 + $0x5c8] ss:$16 sps:$4 sm:$0xff]  }
  0xa9   :  { %1833 = vmatprep.subr.bf16.mxu1 %v2500_v8  ;;  %v2588_v8 = vld [vmem:[%s3488_s1 + $0x7c8] ss:$16 sps:$4 sm:$0xff]  }
  0xab   :  { %1793 = vmatpush2.bf16.msra.mxu0 %v2495_v9  ;;  %v2593_v9 = vld [vmem:[%s3488_s1 + $0x5ac] ss:$16 sps:$4 sm:$0xff]  }
  0xac   :  { %1834 = vmatpush2.bf16.msra.mxu1 %v2498_v10  ;;  %1794 = vmatprep.subr.bf16.mxu0 %v2503_v11  ;;  %v2596_v10 = vld [vmem:[%s3488_s1 + $0x7ac] ss:$16 sps:$4 sm:$0xff]   ;;  %v2591_v11 = vld [vmem:[%s3488_s1 + $0x5a8] ss:$16 sps:$4 sm:$0xff]  }
  0xad   :  { %1835 = vmatprep.subr.bf16.mxu1 %v2506_v12  ;;  %v2594_v12 = vld [vmem:[%s3488_s1 + $0x7a8] ss:$16 sps:$4 sm:$0xff]  }
  0xaf   :  { %1795 = vmatpush2.bf16.msra.mxu0 %v2501_v13  ;;  %v2599_v13 = vld [vmem:[%s3488_s1 + $0x58c] ss:$16 sps:$4 sm:$0xff]  }
  0xb0   :  { %1836 = vmatpush2.bf16.msra.mxu1 %v2504_v14  ;;  %1796 = vmatprep.subr.bf16.mxu0 %v2509_v15  ;;  %v2602_v14 = vld [vmem:[%s3488_s1 + $0x78c] ss:$16 sps:$4 sm:$0xff]   ;;  %v2597_v15 = vld [vmem:[%s3488_s1 + $0x588] ss:$16 sps:$4 sm:$0xff]  }
  0xb1   :  { %1837 = vmatprep.subr.bf16.mxu1 %v2512_v16  ;;  %v2600_v16 = vld [vmem:[%s3488_s1 + $0x788] ss:$16 sps:$4 sm:$0xff]  }
  0xb3   :  { %1797 = vmatpush2.bf16.msra.mxu0 %v2507_v17  ;;  %v2605_v17 = vld [vmem:[%s3488_s1 + $0x56c] ss:$16 sps:$4 sm:$0xff]  }
  0xb4   :  { %1838 = vmatpush2.bf16.msra.mxu1 %v2510_v20  ;;  %1798 = vmatprep.subr.bf16.mxu0 %v2515_v21  ;;  %v2608_v20 = vld [vmem:[%s3488_s1 + $0x76c] ss:$16 sps:$4 sm:$0xff]   ;;  %v2603_v21 = vld [vmem:[%s3488_s1 + $0x568] ss:$16 sps:$4 sm:$0xff]  }
  0xb5   :  { %1839 = vmatprep.subr.bf16.mxu1 %v2518_v22  ;;  %v2606_v22 = vld [vmem:[%s3488_s1 + $0x768] ss:$16 sps:$4 sm:$0xff]  }
  0xb7   :  { %1799 = vmatpush2.bf16.msra.mxu0 %v2513_v23  ;;  %v2611_v23 = vld [vmem:[%s3488_s1 + $0x54c] ss:$16 sps:$4 sm:$0xff]  }
  0xb8   :  { %1840 = vmatpush2.bf16.msra.mxu1 %v2516_v26  ;;  %1800 = vmatprep.subr.bf16.mxu0 %v2521_v27  ;;  %v2614_v26 = vld [vmem:[%s3488_s1 + $0x74c] ss:$16 sps:$4 sm:$0xff]   ;;  %v2609_v27 = vld [vmem:[%s3488_s1 + $0x548] ss:$16 sps:$4 sm:$0xff]  }
  0xb9   :  { %1841 = vmatprep.subr.bf16.mxu1 %v2524_v28  ;;  %v2612_v28 = vld [vmem:[%s3488_s1 + $0x748] ss:$16 sps:$4 sm:$0xff]  }
  0xbb   :  { %1801 = vmatpush2.bf16.msra.mxu0 %v2519_v29  ;;  %v2617_v29 = vld [vmem:[%s3488_s1 + $0x52c] ss:$16 sps:$4 sm:$0xff]  }
  0xbc   :  { %1842 = vmatpush2.bf16.msra.mxu1 %v2522_v30  ;;  %1802 = vmatprep.subr.bf16.mxu0 %v2527_v31  ;;  %v2620_v30 = vld [vmem:[%s3488_s1 + $0x72c] ss:$16 sps:$4 sm:$0xff]   ;;  %v2615_v31 = vld [vmem:[%s3488_s1 + $0x528] ss:$16 sps:$4 sm:$0xff]  }
  0xbd   :  { %1843 = vmatprep.subr.bf16.mxu1 %v2530_v32  ;;  %v2618_v32 = vld [vmem:[%s3488_s1 + $0x728] ss:$16 sps:$4 sm:$0xff]  }
  0xbf   :  { %1803 = vmatpush2.bf16.msra.mxu0 %v2525_v33  ;;  %v2623_v33 = vld [vmem:[%s3488_s1 + $0x50c] ss:$16 sps:$4 sm:$0xff]  }
  0xc0   :  { %1844 = vmatpush2.bf16.msra.mxu1 %v2528_v34  ;;  %1854 = vmatprep.subr.bf16.mxu0 %v2533_v35  ;;  %v2626_v34 = vld [vmem:[%s3488_s1 + $0x70c] ss:$16 sps:$4 sm:$0xff]   ;;  %v2621_v35 = vld [vmem:[%s3488_s1 + $0x508] ss:$16 sps:$4 sm:$0xff]  }
  0xc1   :  { %1895 = vmatprep.subr.bf16.mxu1 %v2536_v36  ;;  %v2624_v36 = vld [vmem:[%s3488_s1 + $0x708] ss:$16 sps:$4 sm:$0xff]  }
  0xc2   :  { %1805 = vmatmul.mubr.bf16.vlgmr.msra.gmra.mxu0 %v2809_v55  ;;  %v2548_v55 = vld [vmem:[%s3488_s1 + $0x6ac] ss:$16 sps:$4 sm:$0xff]  }
  0xc3   :  { %1846 = vmatmul.mubr.bf16.vlgmr.msra.gmra.mxu1 %v2827_v62  ;;  %1855 = vmatpush1.bf16.msra.mxu0 %v2531_v37  ;;  %v2543_v62 = vld [vmem:[%s3488_s1 + $0x4a8] ss:$16 sps:$4 sm:$0xff]  }
  0xc4   :  { %1896 = vmatpush1.bf16.msra.mxu1 %v2534_v38  ;;  %1856 = vmatprep.subr.bf16.mxu0 %v2539_v39 }
  0xc5   :  { %1897 = vmatprep.subr.bf16.mxu1 %v2542_v40  ;;  %1886 = vmatprep.mubr.bf16.mxu0 %v2904_v24  ;;  %v2554_v24 = vld [vmem:[%s3488_s1 + $0x68c] ss:$16 sps:$4 sm:$0xff]  }
  0xc6   :  { %1927 = vmatprep.mubr.bf16.mxu1 %v2908_v25  ;;  %v2549_v25 = vld [vmem:[%s3488_s1 + $0x488] ss:$16 sps:$4 sm:$0xff]  }
  0xc7   :  { %1857 = vmatpush1.bf16.msra.mxu0 %v2537_v41 }
  0xc8   :  { %1898 = vmatpush1.bf16.msra.mxu1 %v2540_v61  ;;  %1858 = vmatprep.subr.bf16.mxu0 %v2545_v63 }
  0xc9   :  { %1899 = vmatprep.subr.bf16.mxu1 %v2548_v55 }
  0xcb   :  { %1859 = vmatpush1.bf16.msra.mxu0 %v2543_v62  ;;  %v282_v62 = vpop.permute.xlu0 %281 }
  0xcc   :  { %1900 = vmatpush1.bf16.msra.mxu1 %v2546_v42  ;;  %1860 = vmatprep.subr.bf16.mxu0 %v2551_v43 }
  0xcd   :  { %1901 = vmatprep.subr.bf16.mxu1 %v2554_v24 }
  0xcf   :  { %1861 = vmatpush1.bf16.msra.mxu0 %v2549_v25 }
  0xd0   :  { %1902 = vmatpush1.bf16.msra.mxu1 %v2552_v44  ;;  %1862 = vmatprep.subr.bf16.mxu0 %v2557_v45 }
  0xd1   :  { %1903 = vmatprep.subr.bf16.mxu1 %v2560_v46 }
  0xd3   :  { %1863 = vmatpush1.bf16.msra.mxu0 %v2555_v47 }
  0xd4   :  { %1904 = vmatpush1.bf16.msra.mxu1 %v2558_v48  ;;  %1864 = vmatprep.subr.bf16.mxu0 %v2563_v49 }
  0xd5   :  { %1905 = vmatprep.subr.bf16.mxu1 %v2566_v50 }
  0xd7   :  { %1865 = vmatpush1.bf16.msra.mxu0 %v2561_v51 }
  0xd8   :  { %1906 = vmatpush1.bf16.msra.mxu1 %v2564_v52  ;;  %1866 = vmatprep.subr.bf16.mxu0 %v2569_v53 }
  0xd9   :  { %1907 = vmatprep.subr.bf16.mxu1 %v2572_v54 }
  0xdb   :  { %1867 = vmatpush1.bf16.msra.mxu0 %v2567_v56 }
  0xdc   :  { %1908 = vmatpush1.bf16.msra.mxu1 %v2570_v57  ;;  %1868 = vmatprep.subr.bf16.mxu0 %v2575_v58 }
  0xdd   :  { %1909 = vmatprep.subr.bf16.mxu1 %v2578_v59 }
  0xdf   :  { %1869 = vmatpush1.bf16.msra.mxu0 %v2573_v60 }
  0xe0   :  { %1910 = vmatpush1.bf16.msra.mxu1 %v2576_v0  ;;  %1870 = vmatprep.subr.bf16.mxu0 %v2581_v1 }
  0xe1   :  { %1911 = vmatprep.subr.bf16.mxu1 %v2584_v2 }
  0xe3   :  { %1871 = vmatpush2.bf16.msra.mxu0 %v2579_v3 }
  0xe4   :  { %1912 = vmatpush2.bf16.msra.mxu1 %v2582_v4  ;;  %1872 = vmatprep.subr.bf16.mxu0 %v2587_v5 }
  0xe5   :  { %1913 = vmatprep.subr.bf16.mxu1 %v2590_v6 }
  0xe7   :  { %1873 = vmatpush2.bf16.msra.mxu0 %v2585_v7 }
  0xe8   :  { %1914 = vmatpush2.bf16.msra.mxu1 %v2588_v8  ;;  %1874 = vmatprep.subr.bf16.mxu0 %v2593_v9 }
  0xe9   :  { %1915 = vmatprep.subr.bf16.mxu1 %v2596_v10 }
  0xeb   :  { %1875 = vmatpush2.bf16.msra.mxu0 %v2591_v11 }
  0xec   :  { %1916 = vmatpush2.bf16.msra.mxu1 %v2594_v12  ;;  %1876 = vmatprep.subr.bf16.mxu0 %v2599_v13 }
  0xed   :  { %1917 = vmatprep.subr.bf16.mxu1 %v2602_v14 }
  0xef   :  { %1877 = vmatpush2.bf16.msra.mxu0 %v2597_v15 }
  0xf0   :  { %1918 = vmatpush2.bf16.msra.mxu1 %v2600_v16  ;;  %1878 = vmatprep.subr.bf16.mxu0 %v2605_v17 }
  0xf1   :  { %1919 = vmatprep.subr.bf16.mxu1 %v2608_v20 }
  0xf3   :  { %1879 = vmatpush2.bf16.msra.mxu0 %v2603_v21 }
  0xf4   :  { %1920 = vmatpush2.bf16.msra.mxu1 %v2606_v22  ;;  %1880 = vmatprep.subr.bf16.mxu0 %v2611_v23 }
  0xf5   :  { %1921 = vmatprep.subr.bf16.mxu1 %v2614_v26 }
  0xf7   :  { %1881 = vmatpush2.bf16.msra.mxu0 %v2609_v27 }
  0xf8   :  { %1922 = vmatpush2.bf16.msra.mxu1 %v2612_v28  ;;  %1882 = vmatprep.subr.bf16.mxu0 %v2617_v29 }
  0xf9   :  { %1923 = vmatprep.subr.bf16.mxu1 %v2620_v30 }
  0xfb   :  { %1883 = vmatpush2.bf16.msra.mxu0 %v2615_v31 }
  0xfc   :  { %1924 = vmatpush2.bf16.msra.mxu1 %v2618_v32  ;;  %1884 = vmatprep.subr.bf16.mxu0 %v2623_v33 }
  0xfd   :  { %1925 = vmatprep.subr.bf16.mxu1 %v2626_v34 }
  0xff   :  { %1885 = vmatpush2.bf16.msra.mxu0 %v2621_v35 }
 0x100   :  { %1926 = vmatpush2.bf16.msra.mxu1 %v2624_v36 }
 0x102   :  { %v1642_v37 = vpop.f32.mrf.mxu0  ;;  %1887 = vmatmul.mubr.bf16.vlgmr.msra.gmra.mxu0 %v2886_v18 }
 0x103   :  { %v1683_v38 = vpop.f32.mrf.mxu1  ;;  %1928 = vmatmul.mubr.bf16.vlgmr.msra.gmra.mxu1 %v2888_v19  ;;  %v1643_v42 = vadd.f32 %v1642_v37, %v282_v62 }
 0x104   :  { %v1644_v39 = vpop.f32.mrf.mxu0 }
 0x105   :  { %v1685_v40 = vpop.f32.mrf.mxu1  ;;  %v1645_v43 = vadd.f32 %v1644_v39, %v282_v62  ;;  %v1684_v24 = vadd.f32 %v1683_v38, %v1643_v42 }
 0x106   :  { %v1646_v41 = vpop.f32.mrf.mxu0 }
 0x107   :  { %v1687_v61 = vpop.f32.mrf.mxu1  ;;  %v1686_v45 = vadd.f32 %v1685_v40, %v1645_v43 }
 0x108   :  { %v1647_v63 = vpop.f32.mrf.mxu0 }
 0x109   :  { %v1688_v55 = vpop.f32.mrf.mxu1 }
 0x142   :  { %v1724_v25 = vpop.f32.mrf.mxu0 }
 0x143   :  { %v1765_v44 = vpop.f32.mrf.mxu1  ;;  %v1725_v46 = vadd.f32 %v1724_v25, %v1684_v24 }
 0x144   :  { %v1726_v47 = vpop.f32.mrf.mxu0 }
 0x145   :  { %v1767_v48 = vpop.f32.mrf.mxu1  ;;  %v1766_v49 = vadd.f32 %v1765_v44, %v1725_v46  ;;  %v1727_v18 = vadd.f32 %v1726_v47, %v1686_v45 }
 0x146   :  { %v1728_v50 = vpop.f32.mrf.mxu0 }
 0x147   :  { %v1769_v19 = vpop.f32.mrf.mxu1  ;;  %v2234_v51 = vmul.f32 -1.442695, %v1766_v49  ;;  %v1768_v52 = vadd.f32 %v1767_v48, %v1727_v18 }
 0x148   :  { %v1729_v53 = vpop.f32.mrf.mxu0 }
 0x149   :  { %v1770_v54 = vpop.f32.mrf.mxu1  ;;  %2627 = vpow2.f32 %v2234_v51  ;;  %v2235_v56 = vmul.f32 -1.442695, %v1768_v52 }
 0x14b   :  { %2629 = vpow2.f32 %v2235_v56 }
 0x156   :  { %v2628_v57 = vpop.eup %2627 }
 0x157   :  { %v1948_v58 = vadd.f32 1.0, %v2628_v57 }
 0x158   :  { %v2630_v59 = vpop.eup %2629 }
 0x159   :  { %v1949_v60 = vadd.f32 1.0, %v2630_v59  ;;  %2631 = vrcp.f32 %v1948_v58 }
 0x15b   :  { %2633 = vrcp.f32 %v1949_v60 }
 0x166   :  { %v2632_v0 = vpop.eup %2631 }
 0x168   :  { %v2634_v1 = vpop.eup %2633 }
 0x169   :  { %v1964_v2 = vcombine.low %v2632_v0, %v2634_v1 }
 0x16b   :  { %1968 = vst [vmem:[%s3491_s3] sm:$0xff] %v1964_v2 }
 0x182   :  { %v1806_v3 = vpop.f32.mrf.mxu0 }
 0x183   :  { %v1847_v4 = vpop.f32.mrf.mxu1  ;;  %v1807_v11 = vadd.f32 %v1806_v3, %v282_v62 }
 0x184   :  { %v1808_v5 = vpop.f32.mrf.mxu0 }
 0x185   :  { %v1849_v6 = vpop.f32.mrf.mxu1  ;;  %v1809_v12 = vadd.f32 %v1808_v5, %v282_v62  ;;  %v1848_v13 = vadd.f32 %v1847_v4, %v1807_v11 }
 0x186   :  { %v1810_v7 = vpop.f32.mrf.mxu0 }
 0x187   :  { %v1851_v8 = vpop.f32.mrf.mxu1  ;;  %v1850_v16 = vadd.f32 %v1849_v6, %v1809_v12 }
 0x188   :  { %v1811_v9 = vpop.f32.mrf.mxu0 }
 0x189   :  { %v1852_v10 = vpop.f32.mrf.mxu1 }
 0x1c2   :  { %v1888_v14 = vpop.f32.mrf.mxu0 }
 0x1c3   :  { %v1929_v15 = vpop.f32.mrf.mxu1  ;;  %v1889_v17 = vadd.f32 %v1888_v14, %v1848_v13 }
 0x1c4   :  { %v1890_v20 = vpop.f32.mrf.mxu0 }
 0x1c5   :  { %v1931_v21 = vpop.f32.mrf.mxu1  ;;  %v1930_v22 = vadd.f32 %v1929_v15, %v1889_v17  ;;  %v1891_v23 = vadd.f32 %v1890_v20, %v1850_v16 }
 0x1c6   :  { %v1892_v26 = vpop.f32.mrf.mxu0 }
 0x1c7   :  { %v1933_v27 = vpop.f32.mrf.mxu1  ;;  %v2236_v28 = vmul.f32 -1.442695, %v1930_v22  ;;  %v1932_v29 = vadd.f32 %v1931_v21, %v1891_v23 }
 0x1c8   :  { %v1893_v30 = vpop.f32.mrf.mxu0 }
 0x1c9   :  { %v1934_v31 = vpop.f32.mrf.mxu1  ;;  %2635 = vpow2.f32 %v2236_v28  ;;  %v2237_v32 = vmul.f32 -1.442695, %v1932_v29 }
 0x1cb   :  { %2637 = vpow2.f32 %v2237_v32 }
 0x1d6   :  { %v2636_v33 = vpop.eup %2635 }
 0x1d7   :  { %v1950_v34 = vadd.f32 1.0, %v2636_v33 }
 0x1d8   :  { %v2638_v35 = vpop.eup %2637 }
 0x1d9   :  { %v1951_v36 = vadd.f32 1.0, %v2638_v35  ;;  %2639 = vrcp.f32 %v1950_v34 }
 0x1db   :  { %2641 = vrcp.f32 %v1951_v36 }
 0x1e6   :  { %v2640_v37 = vpop.eup %2639 }
 0x1e8   :  { %v2642_v38 = vpop.eup %2641 }
 0x1e9   :  { %v1965_v39 = vcombine.low %v2640_v37, %v2642_v38 }
 0x1eb   :  { %1972 = vst.msk [vmem:[%s3491_s3 + $0x8] sm:$0xff] %vm1971_vm2, %v1965_v39 }

</bundles_post_ra>
